<compile_context>
chip_gen: v6e
topology: v6e:2x2x1
jax: 0.10.0
libtpu: 0.0.40
codegen_flags: <defaults>
</compile_context>

<pallas_src>
import functools

import jax
import jax.numpy as jnp
from jax.experimental import pallas as pl
from jax.experimental.pallas import tpu as pltpu


def _round_up(x, m):
    return (x + m - 1) // m * m


# ----------------------------------------------------------------------------
# Pallas kernel 1: fused bf16 matmul + per-channel f32 scale/bias (+ ReLU)
# ----------------------------------------------------------------------------
def _matmul_bn_act_kernel(x_ref, w_ref, s_ref, b_ref, o_ref, *, apply_relu):
    acc = jnp.dot(x_ref[...], w_ref[...], preferred_element_type=jnp.float32)
    y = acc * s_ref[...] + b_ref[...]            # f32 epilogue (v5e-friendly)
    if apply_relu:
        y = jnp.maximum(y, 0.0)
    o_ref[...] = y.astype(o_ref.dtype)


def matmul_bn_act(x, w, scale, bias, apply_relu):
    """relu((x @ w) * scale + bias); bf16 MXU inputs, f32 accumulate/epilogue."""
    M, K = x.shape
    Kw, N = w.shape
    assert K == Kw
    Kp = _round_up(K, 128)                       # lane-aligned contraction dim
    Np = _round_up(N, 128)
    TN = 256 if Np % 256 == 0 else 128
    num_n = Np // TN
    num_m = 2 if M >= 64 else 1                  # >=2 parallel tiles for v7x
    Mp = _round_up(M, 8 * num_m)
    TM = Mp // num_m

    x_p = jnp.pad(x.astype(jnp.bfloat16), ((0, Mp - M), (0, Kp - K)))
    w_p = jnp.pad(w.astype(jnp.bfloat16), ((0, Kp - K), (0, Np - N)))
    s_p = jnp.pad(scale.astype(jnp.float32), (0, Np - N)).reshape(1, Np)
    b_p = jnp.pad(bias.astype(jnp.float32), (0, Np - N)).reshape(1, Np)

    out = pl.pallas_call(
        functools.partial(_matmul_bn_act_kernel, apply_relu=apply_relu),
        out_shape=jax.ShapeDtypeStruct((Mp, Np), jnp.bfloat16),
        grid_spec=pltpu.PrefetchScalarGridSpec(
            num_scalar_prefetch=0,
            grid=(num_m, num_n),
            in_specs=[
                pl.BlockSpec((TM, Kp), lambda i, j: (i, 0)),
                pl.BlockSpec((Kp, TN), lambda i, j: (0, j)),
                pl.BlockSpec((1, TN), lambda i, j: (0, j)),
                pl.BlockSpec((1, TN), lambda i, j: (0, j)),
            ],
            out_specs=pl.BlockSpec((TM, TN), lambda i, j: (i, j)),
        ),
        compiler_params=pltpu.CompilerParams(
            dimension_semantics=("parallel", "parallel")),
    )(x_p, w_p, s_p, b_p)
    return out[:M, :N]


# ----------------------------------------------------------------------------
# Pallas kernel 2: window pooling over static shifted slices (no k*k stack)
# ----------------------------------------------------------------------------
def _pool_kernel(x_ref, o_ref, *, k, op, inv_k):
    _, H1, W1, _ = o_ref.shape
    acc = x_ref[:, 0:H1, 0:W1, :].astype(jnp.float32)
    for di in range(k):
        for dj in range(k):
            if di == 0 and dj == 0:
                continue
            v = x_ref[:, di:di + H1, dj:dj + W1, :].astype(jnp.float32)
            acc = jnp.maximum(acc, v) if op == "max" else acc + v
    if op == "avg":
        acc = acc * inv_k
    o_ref[...] = acc.astype(o_ref.dtype)


def pool2d(x, k, stride, pad, op):
    """MaxPool2d / AvgPool2d on NHWC bf16 input.

    Computes the stride-1 pooled tensor inside one Pallas call (padded input
    held as a single VMEM block, window handled via static shifted slices),
    then decimates in glue when stride > 1."""
    N, H, W, C = x.shape
    pad_val = float("-inf") if op == "max" else 0.0
    xp = x if pad == 0 else jnp.pad(
        x, ((0, 0), (pad, pad), (pad, pad), (0, 0)), constant_values=pad_val)
    Hp, Wp = H + 2 * pad, W + 2 * pad
    H1, W1 = Hp - k + 1, Wp - k + 1
    y = pl.pallas_call(
        functools.partial(_pool_kernel, k=k, op=op, inv_k=1.0 / (k * k)),
        out_shape=jax.ShapeDtypeStruct((N, H1, W1, C), x.dtype),
        grid_spec=pltpu.PrefetchScalarGridSpec(
            num_scalar_prefetch=0,
            grid=(1,),
            in_specs=[pl.BlockSpec((N, Hp, Wp, C), lambda i: (0, 0, 0, 0))],
            out_specs=pl.BlockSpec((N, H1, W1, C), lambda i: (0, 0, 0, 0)),
        ),
        compiler_params=pltpu.CompilerParams(
            dimension_semantics=("arbitrary",)),
    )(xp)
    if stride > 1:
        y = y[:, ::stride, ::stride, :]
    return y


# ----------------------------------------------------------------------------
# Pallas kernel 3: fused global avg-pool + flatten + Linear (network tail)
# ----------------------------------------------------------------------------
def _avgpool_fc_kernel(x_ref, w_ref, b_ref, o_ref):
    Nb, H, W, C = x_ref.shape
    xm = jnp.zeros((Nb, C), jnp.float32)
    for i in range(H):
        for j in range(W):
            xm = xm + x_ref[:, i, j, :].astype(jnp.float32)
    xm = xm * (1.0 / (H * W))
    acc = jnp.dot(xm.astype(jnp.bfloat16), w_ref[...],
                  preferred_element_type=jnp.float32)
    o_ref[...] = acc + b_ref[...]


def avgpool_fc(x, fc_w, fc_b):
    """F.avg_pool2d(x, full_spatial) + flatten + Linear in one pallas_call."""
    N, H, W, C = x.shape
    Nout = fc_w.shape[1]
    Np = _round_up(Nout, 128)
    Nb = _round_up(N, 8)
    x_p = jnp.pad(x, ((0, Nb - N), (0, 0), (0, 0), (0, 0)))
    w_p = jnp.pad(fc_w.astype(jnp.bfloat16), ((0, 0), (0, Np - Nout)))
    b_p = jnp.pad(fc_b.astype(jnp.float32), (0, Np - Nout)).reshape(1, Np)
    out = pl.pallas_call(
        _avgpool_fc_kernel,
        out_shape=jax.ShapeDtypeStruct((Nb, Np), jnp.float32),
        grid_spec=pltpu.PrefetchScalarGridSpec(
            num_scalar_prefetch=0,
            grid=(1,),
            in_specs=[
                pl.BlockSpec((Nb, H, W, C), lambda i: (0, 0, 0, 0)),
                pl.BlockSpec((C, Np), lambda i: (0, 0)),
                pl.BlockSpec((1, Np), lambda i: (0, 0)),
            ],
            out_specs=pl.BlockSpec((Nb, Np), lambda i: (0, 0)),
        ),
        compiler_params=pltpu.CompilerParams(
            dimension_semantics=("arbitrary",)),
    )(x_p, w_p, b_p)
    return out[:N, :Nout]


# ----------------------------------------------------------------------------
# ConvBNRelu = im2col glue (no stack copy) + fused Pallas GEMM kernel
# ----------------------------------------------------------------------------
def conv_bn_relu(x, p, k, stride, pad, apply_relu=True):
    N, H, W, C = x.shape
    Ho = (H + 2 * pad - k) // stride + 1
    Wo = (W + 2 * pad - k) // stride + 1
    if k == 1 and stride == 1 and pad == 0:
        patches = x.reshape(N * H * W, C)        # 1x1 conv: no im2col blowup
    else:
        xp = jnp.pad(x, ((0, 0), (pad, pad), (pad, pad), (0, 0)))
        cols = [xp[:, di:di + stride * Ho:stride, dj:dj + stride * Wo:stride, :]
                for di in range(k) for dj in range(k)]
        patches = jnp.concatenate(cols, axis=-1).reshape(N * Ho * Wo, k * k * C)
    out = matmul_bn_act(patches, p["w"], p["scale"], p["bias"], apply_relu)
    return out.reshape(N, Ho, Wo, -1)


# ----------------------------------------------------------------------------
# Parameter initialization (eval-mode BN folded into scale/bias, bf16 weights)
# ----------------------------------------------------------------------------
def init_convbn(key, cin, cout, k):
    k1, k2, k3, k4, k5, k6 = jax.random.split(key, 6)
    w = jax.random.normal(k1, (cout, cin, k, k), jnp.float32) / jnp.sqrt(
        float(cin * k * k))
    b = 0.1 * jax.random.normal(k2, (cout,), jnp.float32)
    gamma = 1.0 + 0.1 * jax.random.normal(k3, (cout,), jnp.float32)
    beta = 0.1 * jax.random.normal(k4, (cout,), jnp.float32)
    mean = 0.1 * jax.random.normal(k5, (cout,), jnp.float32)
    var = 1.0 + 0.1 * jnp.abs(jax.random.normal(k6, (cout,), jnp.float32))
    scale = gamma / jnp.sqrt(var + 1e-5)
    bias = (b - mean) * scale + beta
    # PyTorch weight (Cout, Cin, kh, kw) -> (kh*kw*Cin, Cout), matching the
    # (di, dj, c) patch column order used in conv_bn_relu.
    w_mat = jnp.transpose(w, (2, 3, 1, 0)).reshape(k * k * cin, cout)
    return {"w": w_mat.astype(jnp.bfloat16), "scale": scale, "bias": bias}


def _merge_convbn(ps):
    return {
        "w": jnp.concatenate([p["w"] for p in ps], axis=1),
        "scale": jnp.concatenate([p["scale"] for p in ps]),
        "bias": jnp.concatenate([p["bias"] for p in ps]),
    }


def init_inception(key, cin, oc, rc):
    ks = jax.random.split(key, 6)
    b1 = init_convbn(ks[0], cin, oc[0], 1)
    b2a = init_convbn(ks[1], cin, rc[0], 1)
    b3a = init_convbn(ks[3], cin, rc[1], 1)
    return {
        "b1x": _merge_convbn([b1, b2a, b3a]),    # merged 1x1 branch GEMM
        "b2b": init_convbn(ks[2], rc[0], oc[1], 3),
        "b3b": init_convbn(ks[4], rc[1], oc[2], 5),
        "b4": init_convbn(ks[5], cin, oc[3], 3),
    }


def init_params(key):
    ks = jax.random.split(key, 6)
    fc_w = jax.random.normal(ks[4], (10, 96 * 4), jnp.float32) / jnp.sqrt(384.0)
    fc_b = 0.1 * jax.random.normal(ks[5], (10,), jnp.float32)
    return {
        "block1": init_convbn(ks[0], 3, 64, 7),
        "block2": init_convbn(ks[1], 64, 128, 3),
        "inc3": init_inception(ks[2], 128, [64, 64, 64, 64], [16, 16]),
        "inc4": init_inception(ks[3], 256, [96, 96, 96, 96], [32, 32]),
        "fc_w": jnp.transpose(fc_w).astype(jnp.bfloat16),   # (384, 10)
        "fc_b": fc_b,
    }


# ----------------------------------------------------------------------------
# Network forward
# ----------------------------------------------------------------------------
def base_inception(x, p, oc0, rc0, rc1):
    m = conv_bn_relu(x, p["b1x"], 1, 1, 0)       # b1 + b2a + b3a in one GEMM
    o1 = m[..., :oc0]
    o2 = conv_bn_relu(m[..., oc0:oc0 + rc0], p["b2b"], 3, 1, 1)
    o3 = conv_bn_relu(m[..., oc0 + rc0:], p["b3b"], 5, 1, 2)
    o4 = pool2d(x, 3, 1, 1, "max")
    o4 = conv_bn_relu(o4, p["b4"], 3, 1, 1)
    return jnp.concatenate([o1, o2, o3, o4], axis=-1)


def inception_net_forward(params, x_nchw):
    x = jnp.transpose(x_nchw, (0, 2, 3, 1)).astype(jnp.bfloat16)  # NCHW->NHWC
    x = conv_bn_relu(x, params["block1"], 7, 2, 1)                # block1
    x = conv_bn_relu(x, params["block2"], 3, 2, 1)                # block2
    x = base_inception(x, params["inc3"], 64, 16, 16)             # block3
    x = pool2d(x, 3, 2, 1, "max")
    x = base_inception(x, params["inc4"], 96, 32, 32)             # block4
    x = pool2d(x, 3, 2, 1, "max")
    logits = avgpool_fc(x, params["fc_w"], params["fc_b"])        # avgpool+fc
    return logits


if __name__ == "__main__":
    key = jax.random.PRNGKey(0)
    pkey, xkey = jax.random.split(key)
    params = init_params(pkey)
    # Spatial size 32 is required so the flatten matches nn.Linear(96*4, 10).
    x = jax.random.normal(xkey, (2, 3, 32, 32), jnp.float32)
    fwd = jax.jit(inception_net_forward)
    out = jax.block_until_ready(fwd(params, x))
    assert out.shape == (2, 10), out.shape
    assert bool(jnp.all(jnp.isfinite(out)))
    print("KERNEL_OK")
</pallas_src>

<mosaic_0001>
module attributes {stable_mosaic.version = 11 : i64} {
  func.func @_matmul_bn_act_kernel(%arg0: i32, %arg1: i32, %arg2: memref<200x256xbf16, #tpu.memory_space<vmem>>, %arg3: memref<256x128xbf16, #tpu.memory_space<vmem>>, %arg4: memref<1x128xf32, #tpu.memory_space<vmem>>, %arg5: memref<1x128xf32, #tpu.memory_space<vmem>>, %arg6: memref<200x128xbf16, #tpu.memory_space<vmem>>) attributes {dimension_semantics = [#tpu.dimension_semantics<parallel>, #tpu.dimension_semantics<parallel>], iteration_bounds = array<i64: 2, 1>, scalar_prefetch = 0 : i64, scratch_operands = 0 : i64, tpu.core_type = #tpu.core_type<tc>, window_params = [{transform_indices = @transform_0, window_bounds = array<i64: 200, 256>}, {transform_indices = @transform_1, window_bounds = array<i64: 256, 128>}, {transform_indices = @transform_2, window_bounds = array<i64: 1, 128>}, {transform_indices = @transform_3, window_bounds = array<i64: 1, 128>}, {transform_indices = @transform_4, window_bounds = array<i64: 200, 128>}]} {
    %c0 = arith.constant 0 : index
    %c0_0 = arith.constant 0 : index
    %0 = vector.load %arg2[%c0, %c0_0] : memref<200x256xbf16, #tpu.memory_space<vmem>>, vector<200x256xbf16>
    %c0_1 = arith.constant 0 : index
    %c0_2 = arith.constant 0 : index
    %1 = vector.load %arg3[%c0_1, %c0_2] : memref<256x128xbf16, #tpu.memory_space<vmem>>, vector<256x128xbf16>
    %cst = arith.constant dense<0.000000e+00> : vector<200x128xf32>
    %2 = tpu.matmul %0, %1, %cst {dimension_numbers = #tpu.dot_dimension_numbers<[1], [0], [0], [1], [0, 0, 1, 1], [], []>} : vector<200x256xbf16>, vector<256x128xbf16>, vector<200x128xf32> -> vector<200x128xf32>
    %c0_3 = arith.constant 0 : index
    %c0_4 = arith.constant 0 : index
    %3 = vector.load %arg4[%c0_3, %c0_4] : memref<1x128xf32, #tpu.memory_space<vmem>>, vector<1x128xf32>
    %4 = vector.broadcast %3 : vector<1x128xf32> to vector<200x128xf32>
    %5 = arith.mulf %2, %4 : vector<200x128xf32>
    %c0_5 = arith.constant 0 : index
    %c0_6 = arith.constant 0 : index
    %6 = vector.load %arg5[%c0_5, %c0_6] : memref<1x128xf32, #tpu.memory_space<vmem>>, vector<1x128xf32>
    %7 = vector.broadcast %6 : vector<1x128xf32> to vector<200x128xf32>
    %8 = arith.addf %5, %7 : vector<200x128xf32>
    %cst_7 = arith.constant 0.000000e+00 : f32
    %9 = vector.broadcast %cst_7 : f32 to vector<200x128xf32>
    %10 = arith.maximumf %8, %9 : vector<200x128xf32>
    %11 = arith.truncf %10 : vector<200x128xf32> to vector<200x128xbf16>
    %c0_8 = arith.constant 0 : index
    %c0_9 = arith.constant 0 : index
    %12 = vector.load %arg6[%c0_8, %c0_9] : memref<200x128xbf16, #tpu.memory_space<vmem>>, vector<200x128xbf16>
    tpu.vector_store %arg6[%c0_8, %c0_9], %11 {strides = array<i32>} : memref<200x128xbf16, #tpu.memory_space<vmem>>, vector<200x128xbf16>,
    return
  }
  func.func @transform_0(%arg0: i32, %arg1: i32) -> (i32, i32) {
    %c0_i32 = arith.constant 0 : i32
    %c0_i32_0 = arith.constant 0 : i32
    return %arg0, %c0_i32 : i32, i32
  }
  func.func @transform_1(%arg0: i32, %arg1: i32) -> (i32, i32) {
    %c0_i32 = arith.constant 0 : i32
    %c0_i32_0 = arith.constant 0 : i32
    return %c0_i32, %arg1 : i32, i32
  }
  func.func @transform_2(%arg0: i32, %arg1: i32) -> (i32, i32) {
    %c0_i32 = arith.constant 0 : i32
    %c0_i32_0 = arith.constant 0 : i32
    return %c0_i32, %arg1 : i32, i32
  }
  func.func @transform_3(%arg0: i32, %arg1: i32) -> (i32, i32) {
    %c0_i32 = arith.constant 0 : i32
    %c0_i32_0 = arith.constant 0 : i32
    return %c0_i32, %arg1 : i32, i32
  }
  func.func @transform_4(%arg0: i32, %arg1: i32) -> (i32, i32) {
    %c0_i32 = arith.constant 0 : i32
    return %arg0, %arg1 : i32, i32
  }
}

module attributes {stable_mosaic.version = 11 : i64} {
  func.func @_matmul_bn_act_kernel(%arg0: i32, %arg1: i32, %arg2: memref<56x640xbf16, #tpu.memory_space<vmem>>, %arg3: memref<640x128xbf16, #tpu.memory_space<vmem>>, %arg4: memref<1x128xf32, #tpu.memory_space<vmem>>, %arg5: memref<1x128xf32, #tpu.memory_space<vmem>>, %arg6: memref<56x128xbf16, #tpu.memory_space<vmem>>) attributes {dimension_semantics = [#tpu.dimension_semantics<parallel>, #tpu.dimension_semantics<parallel>], iteration_bounds = array<i64: 2, 1>, scalar_prefetch = 0 : i64, scratch_operands = 0 : i64, tpu.core_type = #tpu.core_type<tc>, window_params = [{transform_indices = @transform_0, window_bounds = array<i64: 56, 640>}, {transform_indices = @transform_1, window_bounds = array<i64: 640, 128>}, {transform_indices = @transform_2, window_bounds = array<i64: 1, 128>}, {transform_indices = @transform_3, window_bounds = array<i64: 1, 128>}, {transform_indices = @transform_4, window_bounds = array<i64: 56, 128>}]} {
    %c0 = arith.constant 0 : index
    %c0_0 = arith.constant 0 : index
    %0 = vector.load %arg2[%c0, %c0_0] : memref<56x640xbf16, #tpu.memory_space<vmem>>, vector<56x640xbf16>
    %c0_1 = arith.constant 0 : index
    %c0_2 = arith.constant 0 : index
    %1 = vector.load %arg3[%c0_1, %c0_2] : memref<640x128xbf16, #tpu.memory_space<vmem>>, vector<640x128xbf16>
    %cst = arith.constant dense<0.000000e+00> : vector<56x128xf32>
    %2 = tpu.matmul %0, %1, %cst {dimension_numbers = #tpu.dot_dimension_numbers<[1], [0], [0], [1], [0, 0, 1, 1], [], []>} : vector<56x640xbf16>, vector<640x128xbf16>, vector<56x128xf32> -> vector<56x128xf32>
    %c0_3 = arith.constant 0 : index
    %c0_4 = arith.constant 0 : index
    %3 = vector.load %arg4[%c0_3, %c0_4] : memref<1x128xf32, #tpu.memory_space<vmem>>, vector<1x128xf32>
    %4 = vector.broadcast %3 : vector<1x128xf32> to vector<56x128xf32>
    %5 = arith.mulf %2, %4 : vector<56x128xf32>
    %c0_5 = arith.constant 0 : index
    %c0_6 = arith.constant 0 : index
    %6 = vector.load %arg5[%c0_5, %c0_6] : memref<1x128xf32, #tpu.memory_space<vmem>>, vector<1x128xf32>
    %7 = vector.broadcast %6 : vector<1x128xf32> to vector<56x128xf32>
    %8 = arith.addf %5, %7 : vector<56x128xf32>
    %cst_7 = arith.constant 0.000000e+00 : f32
    %9 = vector.broadcast %cst_7 : f32 to vector<56x128xf32>
    %10 = arith.maximumf %8, %9 : vector<56x128xf32>
    %11 = arith.truncf %10 : vector<56x128xf32> to vector<56x128xbf16>
    %c0_8 = arith.constant 0 : index
    %c0_9 = arith.constant 0 : index
    %12 = vector.load %arg6[%c0_8, %c0_9] : memref<56x128xbf16, #tpu.memory_space<vmem>>, vector<56x128xbf16>
    tpu.vector_store %arg6[%c0_8, %c0_9], %11 {strides = array<i32>} : memref<56x128xbf16, #tpu.memory_space<vmem>>, vector<56x128xbf16>,
    return
  }
  func.func @transform_0(%arg0: i32, %arg1: i32) -> (i32, i32) {
    %c0_i32 = arith.constant 0 : i32
    %c0_i32_0 = arith.constant 0 : i32
    return %arg0, %c0_i32 : i32, i32
  }
  func.func @transform_1(%arg0: i32, %arg1: i32) -> (i32, i32) {
    %c0_i32 = arith.constant 0 : i32
    %c0_i32_0 = arith.constant 0 : i32
    return %c0_i32, %arg1 : i32, i32
  }
  func.func @transform_2(%arg0: i32, %arg1: i32) -> (i32, i32) {
    %c0_i32 = arith.constant 0 : i32
    %c0_i32_0 = arith.constant 0 : i32
    return %c0_i32, %arg1 : i32, i32
  }
  func.func @transform_3(%arg0: i32, %arg1: i32) -> (i32, i32) {
    %c0_i32 = arith.constant 0 : i32
    %c0_i32_0 = arith.constant 0 : i32
    return %c0_i32, %arg1 : i32, i32
  }
  func.func @transform_4(%arg0: i32, %arg1: i32) -> (i32, i32) {
    %c0_i32 = arith.constant 0 : i32
    return %arg0, %arg1 : i32, i32
  }
}

module attributes {stable_mosaic.version = 11 : i64} {
  func.func @_matmul_bn_act_kernel(%arg0: i32, %arg1: i32, %arg2: memref<56x128xbf16, #tpu.memory_space<vmem>>, %arg3: memref<128x128xbf16, #tpu.memory_space<vmem>>, %arg4: memref<1x128xf32, #tpu.memory_space<vmem>>, %arg5: memref<1x128xf32, #tpu.memory_space<vmem>>, %arg6: memref<56x128xbf16, #tpu.memory_space<vmem>>) attributes {dimension_semantics = [#tpu.dimension_semantics<parallel>, #tpu.dimension_semantics<parallel>], iteration_bounds = array<i64: 2, 1>, scalar_prefetch = 0 : i64, scratch_operands = 0 : i64, tpu.core_type = #tpu.core_type<tc>, window_params = [{transform_indices = @transform_0, window_bounds = array<i64: 56, 128>}, {transform_indices = @transform_1, window_bounds = array<i64: 128, 128>}, {transform_indices = @transform_2, window_bounds = array<i64: 1, 128>}, {transform_indices = @transform_3, window_bounds = array<i64: 1, 128>}, {transform_indices = @transform_4, window_bounds = array<i64: 56, 128>}]} {
    %c0 = arith.constant 0 : index
    %c0_0 = arith.constant 0 : index
    %0 = vector.load %arg2[%c0, %c0_0] : memref<56x128xbf16, #tpu.memory_space<vmem>>, vector<56x128xbf16>
    %c0_1 = arith.constant 0 : index
    %c0_2 = arith.constant 0 : index
    %1 = vector.load %arg3[%c0_1, %c0_2] : memref<128x128xbf16, #tpu.memory_space<vmem>>, vector<128x128xbf16>
    %cst = arith.constant dense<0.000000e+00> : vector<56x128xf32>
    %2 = tpu.matmul %0, %1, %cst {dimension_numbers = #tpu.dot_dimension_numbers<[1], [0], [0], [1], [0, 0, 1, 1], [], []>} : vector<56x128xbf16>, vector<128x128xbf16>, vector<56x128xf32> -> vector<56x128xf32>
    %c0_3 = arith.constant 0 : index
    %c0_4 = arith.constant 0 : index
    %3 = vector.load %arg4[%c0_3, %c0_4] : memref<1x128xf32, #tpu.memory_space<vmem>>, vector<1x128xf32>
    %4 = vector.broadcast %3 : vector<1x128xf32> to vector<56x128xf32>
    %5 = arith.mulf %2, %4 : vector<56x128xf32>
    %c0_5 = arith.constant 0 : index
    %c0_6 = arith.constant 0 : index
    %6 = vector.load %arg5[%c0_5, %c0_6] : memref<1x128xf32, #tpu.memory_space<vmem>>, vector<1x128xf32>
    %7 = vector.broadcast %6 : vector<1x128xf32> to vector<56x128xf32>
    %8 = arith.addf %5, %7 : vector<56x128xf32>
    %cst_7 = arith.constant 0.000000e+00 : f32
    %9 = vector.broadcast %cst_7 : f32 to vector<56x128xf32>
    %10 = arith.maximumf %8, %9 : vector<56x128xf32>
    %11 = arith.truncf %10 : vector<56x128xf32> to vector<56x128xbf16>
    %c0_8 = arith.constant 0 : index
    %c0_9 = arith.constant 0 : index
    %12 = vector.load %arg6[%c0_8, %c0_9] : memref<56x128xbf16, #tpu.memory_space<vmem>>, vector<56x128xbf16>
    tpu.vector_store %arg6[%c0_8, %c0_9], %11 {strides = array<i32>} : memref<56x128xbf16, #tpu.memory_space<vmem>>, vector<56x128xbf16>,
    return
  }
  func.func @transform_0(%arg0: i32, %arg1: i32) -> (i32, i32) {
    %c0_i32 = arith.constant 0 : i32
    %c0_i32_0 = arith.constant 0 : i32
    return %arg0, %c0_i32 : i32, i32
  }
  func.func @transform_1(%arg0: i32, %arg1: i32) -> (i32, i32) {
    %c0_i32 = arith.constant 0 : i32
    %c0_i32_0 = arith.constant 0 : i32
    return %c0_i32, %arg1 : i32, i32
  }
  func.func @transform_2(%arg0: i32, %arg1: i32) -> (i32, i32) {
    %c0_i32 = arith.constant 0 : i32
    %c0_i32_0 = arith.constant 0 : i32
    return %c0_i32, %arg1 : i32, i32
  }
  func.func @transform_3(%arg0: i32, %arg1: i32) -> (i32, i32) {
    %c0_i32 = arith.constant 0 : i32
    %c0_i32_0 = arith.constant 0 : i32
    return %c0_i32, %arg1 : i32, i32
  }
  func.func @transform_4(%arg0: i32, %arg1: i32) -> (i32, i32) {
    %c0_i32 = arith.constant 0 : i32
    return %arg0, %arg1 : i32, i32
  }
}

module attributes {stable_mosaic.version = 11 : i64} {
  func.func @_matmul_bn_act_kernel(%arg0: i32, %arg1: i32, %arg2: memref<56x256xbf16, #tpu.memory_space<vmem>>, %arg3: memref<256x128xbf16, #tpu.memory_space<vmem>>, %arg4: memref<1x128xf32, #tpu.memory_space<vmem>>, %arg5: memref<1x128xf32, #tpu.memory_space<vmem>>, %arg6: memref<56x128xbf16, #tpu.memory_space<vmem>>) attributes {dimension_semantics = [#tpu.dimension_semantics<parallel>, #tpu.dimension_semantics<parallel>], iteration_bounds = array<i64: 2, 1>, scalar_prefetch = 0 : i64, scratch_operands = 0 : i64, tpu.core_type = #tpu.core_type<tc>, window_params = [{transform_indices = @transform_0, window_bounds = array<i64: 56, 256>}, {transform_indices = @transform_1, window_bounds = array<i64: 256, 128>}, {transform_indices = @transform_2, window_bounds = array<i64: 1, 128>}, {transform_indices = @transform_3, window_bounds = array<i64: 1, 128>}, {transform_indices = @transform_4, window_bounds = array<i64: 56, 128>}]} {
    %c0 = arith.constant 0 : index
    %c0_0 = arith.constant 0 : index
    %0 = vector.load %arg2[%c0, %c0_0] : memref<56x256xbf16, #tpu.memory_space<vmem>>, vector<56x256xbf16>
    %c0_1 = arith.constant 0 : index
    %c0_2 = arith.constant 0 : index
    %1 = vector.load %arg3[%c0_1, %c0_2] : memref<256x128xbf16, #tpu.memory_space<vmem>>, vector<256x128xbf16>
    %cst = arith.constant dense<0.000000e+00> : vector<56x128xf32>
    %2 = tpu.matmul %0, %1, %cst {dimension_numbers = #tpu.dot_dimension_numbers<[1], [0], [0], [1], [0, 0, 1, 1], [], []>} : vector<56x256xbf16>, vector<256x128xbf16>, vector<56x128xf32> -> vector<56x128xf32>
    %c0_3 = arith.constant 0 : index
    %c0_4 = arith.constant 0 : index
    %3 = vector.load %arg4[%c0_3, %c0_4] : memref<1x128xf32, #tpu.memory_space<vmem>>, vector<1x128xf32>
    %4 = vector.broadcast %3 : vector<1x128xf32> to vector<56x128xf32>
    %5 = arith.mulf %2, %4 : vector<56x128xf32>
    %c0_5 = arith.constant 0 : index
    %c0_6 = arith.constant 0 : index
    %6 = vector.load %arg5[%c0_5, %c0_6] : memref<1x128xf32, #tpu.memory_space<vmem>>, vector<1x128xf32>
    %7 = vector.broadcast %6 : vector<1x128xf32> to vector<56x128xf32>
    %8 = arith.addf %5, %7 : vector<56x128xf32>
    %cst_7 = arith.constant 0.000000e+00 : f32
    %9 = vector.broadcast %cst_7 : f32 to vector<56x128xf32>
    %10 = arith.maximumf %8, %9 : vector<56x128xf32>
    %11 = arith.truncf %10 : vector<56x128xf32> to vector<56x128xbf16>
    %c0_8 = arith.constant 0 : index
    %c0_9 = arith.constant 0 : index
    %12 = vector.load %arg6[%c0_8, %c0_9] : memref<56x128xbf16, #tpu.memory_space<vmem>>, vector<56x128xbf16>
    tpu.vector_store %arg6[%c0_8, %c0_9], %11 {strides = array<i32>} : memref<56x128xbf16, #tpu.memory_space<vmem>>, vector<56x128xbf16>,
    return
  }
  func.func @transform_0(%arg0: i32, %arg1: i32) -> (i32, i32) {
    %c0_i32 = arith.constant 0 : i32
    %c0_i32_0 = arith.constant 0 : i32
    return %arg0, %c0_i32 : i32, i32
  }
  func.func @transform_1(%arg0: i32, %arg1: i32) -> (i32, i32) {
    %c0_i32 = arith.constant 0 : i32
    %c0_i32_0 = arith.constant 0 : i32
    return %c0_i32, %arg1 : i32, i32
  }
  func.func @transform_2(%arg0: i32, %arg1: i32) -> (i32, i32) {
    %c0_i32 = arith.constant 0 : i32
    %c0_i32_0 = arith.constant 0 : i32
    return %c0_i32, %arg1 : i32, i32
  }
  func.func @transform_3(%arg0: i32, %arg1: i32) -> (i32, i32) {
    %c0_i32 = arith.constant 0 : i32
    %c0_i32_0 = arith.constant 0 : i32
    return %c0_i32, %arg1 : i32, i32
  }
  func.func @transform_4(%arg0: i32, %arg1: i32) -> (i32, i32) {
    %c0_i32 = arith.constant 0 : i32
    return %arg0, %arg1 : i32, i32
  }
}

module attributes {stable_mosaic.version = 11 : i64} {
  func.func @_matmul_bn_act_kernel(%arg0: i32, %arg1: i32, %arg2: memref<56x512xbf16, #tpu.memory_space<vmem>>, %arg3: memref<512x128xbf16, #tpu.memory_space<vmem>>, %arg4: memref<1x128xf32, #tpu.memory_space<vmem>>, %arg5: memref<1x128xf32, #tpu.memory_space<vmem>>, %arg6: memref<56x128xbf16, #tpu.memory_space<vmem>>) attributes {dimension_semantics = [#tpu.dimension_semantics<parallel>, #tpu.dimension_semantics<parallel>], iteration_bounds = array<i64: 2, 1>, scalar_prefetch = 0 : i64, scratch_operands = 0 : i64, tpu.core_type = #tpu.core_type<tc>, window_params = [{transform_indices = @transform_0, window_bounds = array<i64: 56, 512>}, {transform_indices = @transform_1, window_bounds = array<i64: 512, 128>}, {transform_indices = @transform_2, window_bounds = array<i64: 1, 128>}, {transform_indices = @transform_3, window_bounds = array<i64: 1, 128>}, {transform_indices = @transform_4, window_bounds = array<i64: 56, 128>}]} {
    %c0 = arith.constant 0 : index
    %c0_0 = arith.constant 0 : index
    %0 = vector.load %arg2[%c0, %c0_0] : memref<56x512xbf16, #tpu.memory_space<vmem>>, vector<56x512xbf16>
    %c0_1 = arith.constant 0 : index
    %c0_2 = arith.constant 0 : index
    %1 = vector.load %arg3[%c0_1, %c0_2] : memref<512x128xbf16, #tpu.memory_space<vmem>>, vector<512x128xbf16>
    %cst = arith.constant dense<0.000000e+00> : vector<56x128xf32>
    %2 = tpu.matmul %0, %1, %cst {dimension_numbers = #tpu.dot_dimension_numbers<[1], [0], [0], [1], [0, 0, 1, 1], [], []>} : vector<56x512xbf16>, vector<512x128xbf16>, vector<56x128xf32> -> vector<56x128xf32>
    %c0_3 = arith.constant 0 : index
    %c0_4 = arith.constant 0 : index
    %3 = vector.load %arg4[%c0_3, %c0_4] : memref<1x128xf32, #tpu.memory_space<vmem>>, vector<1x128xf32>
    %4 = vector.broadcast %3 : vector<1x128xf32> to vector<56x128xf32>
    %5 = arith.mulf %2, %4 : vector<56x128xf32>
    %c0_5 = arith.constant 0 : index
    %c0_6 = arith.constant 0 : index
    %6 = vector.load %arg5[%c0_5, %c0_6] : memref<1x128xf32, #tpu.memory_space<vmem>>, vector<1x128xf32>
    %7 = vector.broadcast %6 : vector<1x128xf32> to vector<56x128xf32>
    %8 = arith.addf %5, %7 : vector<56x128xf32>
    %cst_7 = arith.constant 0.000000e+00 : f32
    %9 = vector.broadcast %cst_7 : f32 to vector<56x128xf32>
    %10 = arith.maximumf %8, %9 : vector<56x128xf32>
    %11 = arith.truncf %10 : vector<56x128xf32> to vector<56x128xbf16>
    %c0_8 = arith.constant 0 : index
    %c0_9 = arith.constant 0 : index
    %12 = vector.load %arg6[%c0_8, %c0_9] : memref<56x128xbf16, #tpu.memory_space<vmem>>, vector<56x128xbf16>
    tpu.vector_store %arg6[%c0_8, %c0_9], %11 {strides = array<i32>} : memref<56x128xbf16, #tpu.memory_space<vmem>>, vector<56x128xbf16>,
    return
  }
  func.func @transform_0(%arg0: i32, %arg1: i32) -> (i32, i32) {
    %c0_i32 = arith.constant 0 : i32
    %c0_i32_0 = arith.constant 0 : i32
    return %arg0, %c0_i32 : i32, i32
  }
  func.func @transform_1(%arg0: i32, %arg1: i32) -> (i32, i32) {
    %c0_i32 = arith.constant 0 : i32
    %c0_i32_0 = arith.constant 0 : i32
    return %c0_i32, %arg1 : i32, i32
  }
  func.func @transform_2(%arg0: i32, %arg1: i32) -> (i32, i32) {
    %c0_i32 = arith.constant 0 : i32
    %c0_i32_0 = arith.constant 0 : i32
    return %c0_i32, %arg1 : i32, i32
  }
  func.func @transform_3(%arg0: i32, %arg1: i32) -> (i32, i32) {
    %c0_i32 = arith.constant 0 : i32
    %c0_i32_0 = arith.constant 0 : i32
    return %c0_i32, %arg1 : i32, i32
  }
  func.func @transform_4(%arg0: i32, %arg1: i32) -> (i32, i32) {
    %c0_i32 = arith.constant 0 : i32
    return %arg0, %arg1 : i32, i32
  }
}

module attributes {stable_mosaic.version = 11 : i64} {
  func.func @_pool_kernel(%arg0: i32, %arg1: memref<2x9x9x128xbf16, #tpu.memory_space<vmem>>, %arg2: memref<2x7x7x128xbf16, #tpu.memory_space<vmem>>) attributes {dimension_semantics = [#tpu.dimension_semantics<arbitrary>], iteration_bounds = array<i64: 1>, scalar_prefetch = 0 : i64, scratch_operands = 0 : i64, tpu.core_type = #tpu.core_type<tc>, window_params = [{pipeline_mode = #tpu.pipeline_mode<synchronous>, transform_indices = @transform_0, window_bounds = array<i64: 2, 9, 9, 128>}, {pipeline_mode = #tpu.pipeline_mode<synchronous>, transform_indices = @transform_1, window_bounds = array<i64: 2, 7, 7, 128>}]} {
    %c0 = arith.constant 0 : index
    %c0_0 = arith.constant 0 : index
    %c0_1 = arith.constant 0 : index
    %c0_2 = arith.constant 0 : index
    %0 = vector.load %arg1[%c0, %c0_0, %c0_1, %c0_2] : memref<2x9x9x128xbf16, #tpu.memory_space<vmem>>, vector<2x7x7x128xbf16>
    %1 = arith.extf %0 : vector<2x7x7x128xbf16> to vector<2x7x7x128xf32>
    %c0_3 = arith.constant 0 : index
    %c0_4 = arith.constant 0 : index
    %c1 = arith.constant 1 : index
    %c0_5 = arith.constant 0 : index
    %2 = vector.load %arg1[%c0_3, %c0_4, %c1, %c0_5] : memref<2x9x9x128xbf16, #tpu.memory_space<vmem>>, vector<2x7x7x128xbf16>
    %3 = arith.extf %2 : vector<2x7x7x128xbf16> to vector<2x7x7x128xf32>
    %4 = arith.maximumf %1, %3 : vector<2x7x7x128xf32>
    %c0_6 = arith.constant 0 : index
    %c0_7 = arith.constant 0 : index
    %c2 = arith.constant 2 : index
    %c0_8 = arith.constant 0 : index
    %5 = vector.load %arg1[%c0_6, %c0_7, %c2, %c0_8] : memref<2x9x9x128xbf16, #tpu.memory_space<vmem>>, vector<2x7x7x128xbf16>
    %6 = arith.extf %5 : vector<2x7x7x128xbf16> to vector<2x7x7x128xf32>
    %7 = arith.maximumf %4, %6 : vector<2x7x7x128xf32>
    %c0_9 = arith.constant 0 : index
    %c1_10 = arith.constant 1 : index
    %c0_11 = arith.constant 0 : index
    %c0_12 = arith.constant 0 : index
    %8 = vector.load %arg1[%c0_9, %c1_10, %c0_11, %c0_12] : memref<2x9x9x128xbf16, #tpu.memory_space<vmem>>, vector<2x7x7x128xbf16>
    %9 = arith.extf %8 : vector<2x7x7x128xbf16> to vector<2x7x7x128xf32>
    %10 = arith.maximumf %7, %9 : vector<2x7x7x128xf32>
    %c0_13 = arith.constant 0 : index
    %c1_14 = arith.constant 1 : index
    %c1_15 = arith.constant 1 : index
    %c0_16 = arith.constant 0 : index
    %11 = vector.load %arg1[%c0_13, %c1_14, %c1_15, %c0_16] : memref<2x9x9x128xbf16, #tpu.memory_space<vmem>>, vector<2x7x7x128xbf16>
    %12 = arith.extf %11 : vector<2x7x7x128xbf16> to vector<2x7x7x128xf32>
    %13 = arith.maximumf %10, %12 : vector<2x7x7x128xf32>
    %c0_17 = arith.constant 0 : index
    %c1_18 = arith.constant 1 : index
    %c2_19 = arith.constant 2 : index
    %c0_20 = arith.constant 0 : index
    %14 = vector.load %arg1[%c0_17, %c1_18, %c2_19, %c0_20] : memref<2x9x9x128xbf16, #tpu.memory_space<vmem>>, vector<2x7x7x128xbf16>
    %15 = arith.extf %14 : vector<2x7x7x128xbf16> to vector<2x7x7x128xf32>
    %16 = arith.maximumf %13, %15 : vector<2x7x7x128xf32>
    %c0_21 = arith.constant 0 : index
    %c2_22 = arith.constant 2 : index
    %c0_23 = arith.constant 0 : index
    %c0_24 = arith.constant 0 : index
    %17 = vector.load %arg1[%c0_21, %c2_22, %c0_23, %c0_24] : memref<2x9x9x128xbf16, #tpu.memory_space<vmem>>, vector<2x7x7x128xbf16>
    %18 = arith.extf %17 : vector<2x7x7x128xbf16> to vector<2x7x7x128xf32>
    %19 = arith.maximumf %16, %18 : vector<2x7x7x128xf32>
    %c0_25 = arith.constant 0 : index
    %c2_26 = arith.constant 2 : index
    %c1_27 = arith.constant 1 : index
    %c0_28 = arith.constant 0 : index
    %20 = vector.load %arg1[%c0_25, %c2_26, %c1_27, %c0_28] : memref<2x9x9x128xbf16, #tpu.memory_space<vmem>>, vector<2x7x7x128xbf16>
    %21 = arith.extf %20 : vector<2x7x7x128xbf16> to vector<2x7x7x128xf32>
    %22 = arith.maximumf %19, %21 : vector<2x7x7x128xf32>
    %c0_29 = arith.constant 0 : index
    %c2_30 = arith.constant 2 : index
    %c2_31 = arith.constant 2 : index
    %c0_32 = arith.constant 0 : index
    %23 = vector.load %arg1[%c0_29, %c2_30, %c2_31, %c0_32] : memref<2x9x9x128xbf16, #tpu.memory_space<vmem>>, vector<2x7x7x128xbf16>
    %24 = arith.extf %23 : vector<2x7x7x128xbf16> to vector<2x7x7x128xf32>
    %25 = arith.maximumf %22, %24 : vector<2x7x7x128xf32>
    %26 = arith.truncf %25 : vector<2x7x7x128xf32> to vector<2x7x7x128xbf16>
    %c0_33 = arith.constant 0 : index
    %c0_34 = arith.constant 0 : index
    %c0_35 = arith.constant 0 : index
    %c0_36 = arith.constant 0 : index
    %27 = vector.load %arg2[%c0_33, %c0_34, %c0_35, %c0_36] : memref<2x7x7x128xbf16, #tpu.memory_space<vmem>>, vector<2x7x7x128xbf16>
    tpu.vector_store %arg2[%c0_33, %c0_34, %c0_35, %c0_36], %26 {strides = array<i32>} : memref<2x7x7x128xbf16, #tpu.memory_space<vmem>>, vector<2x7x7x128xbf16>,
    return
  }
  func.func @transform_0(%arg0: i32) -> (i32, i32, i32, i32) {
    %c0_i32 = arith.constant 0 : i32
    %c0_i32_0 = arith.constant 0 : i32
    %c0_i32_1 = arith.constant 0 : i32
    %c0_i32_2 = arith.constant 0 : i32
    %c0_i32_3 = arith.constant 0 : i32
    return %c0_i32, %c0_i32_0, %c0_i32_1, %c0_i32_2 : i32, i32, i32, i32
  }
  func.func @transform_1(%arg0: i32) -> (i32, i32, i32, i32) {
    %c0_i32 = arith.constant 0 : i32
    %c0_i32_0 = arith.constant 0 : i32
    %c0_i32_1 = arith.constant 0 : i32
    %c0_i32_2 = arith.constant 0 : i32
    %c0_i32_3 = arith.constant 0 : i32
    return %c0_i32, %c0_i32_0, %c0_i32_1, %c0_i32_2 : i32, i32, i32, i32
  }
}

module attributes {stable_mosaic.version = 11 : i64} {
  func.func @_matmul_bn_act_kernel(%arg0: i32, %arg1: i32, %arg2: memref<56x1152xbf16, #tpu.memory_space<vmem>>, %arg3: memref<1152x128xbf16, #tpu.memory_space<vmem>>, %arg4: memref<1x128xf32, #tpu.memory_space<vmem>>, %arg5: memref<1x128xf32, #tpu.memory_space<vmem>>, %arg6: memref<56x128xbf16, #tpu.memory_space<vmem>>) attributes {dimension_semantics = [#tpu.dimension_semantics<parallel>, #tpu.dimension_semantics<parallel>], iteration_bounds = array<i64: 2, 1>, scalar_prefetch = 0 : i64, scratch_operands = 0 : i64, tpu.core_type = #tpu.core_type<tc>, window_params = [{transform_indices = @transform_0, window_bounds = array<i64: 56, 1152>}, {transform_indices = @transform_1, window_bounds = array<i64: 1152, 128>}, {transform_indices = @transform_2, window_bounds = array<i64: 1, 128>}, {transform_indices = @transform_3, window_bounds = array<i64: 1, 128>}, {transform_indices = @transform_4, window_bounds = array<i64: 56, 128>}]} {
    %c0 = arith.constant 0 : index
    %c0_0 = arith.constant 0 : index
    %0 = vector.load %arg2[%c0, %c0_0] : memref<56x1152xbf16, #tpu.memory_space<vmem>>, vector<56x1152xbf16>
    %c0_1 = arith.constant 0 : index
    %c0_2 = arith.constant 0 : index
    %1 = vector.load %arg3[%c0_1, %c0_2] : memref<1152x128xbf16, #tpu.memory_space<vmem>>, vector<1152x128xbf16>
    %cst = arith.constant dense<0.000000e+00> : vector<56x128xf32>
    %2 = tpu.matmul %0, %1, %cst {dimension_numbers = #tpu.dot_dimension_numbers<[1], [0], [0], [1], [0, 0, 1, 1], [], []>} : vector<56x1152xbf16>, vector<1152x128xbf16>, vector<56x128xf32> -> vector<56x128xf32>
    %c0_3 = arith.constant 0 : index
    %c0_4 = arith.constant 0 : index
    %3 = vector.load %arg4[%c0_3, %c0_4] : memref<1x128xf32, #tpu.memory_space<vmem>>, vector<1x128xf32>
    %4 = vector.broadcast %3 : vector<1x128xf32> to vector<56x128xf32>
    %5 = arith.mulf %2, %4 : vector<56x128xf32>
    %c0_5 = arith.constant 0 : index
    %c0_6 = arith.constant 0 : index
    %6 = vector.load %arg5[%c0_5, %c0_6] : memref<1x128xf32, #tpu.memory_space<vmem>>, vector<1x128xf32>
    %7 = vector.broadcast %6 : vector<1x128xf32> to vector<56x128xf32>
    %8 = arith.addf %5, %7 : vector<56x128xf32>
    %cst_7 = arith.constant 0.000000e+00 : f32
    %9 = vector.broadcast %cst_7 : f32 to vector<56x128xf32>
    %10 = arith.maximumf %8, %9 : vector<56x128xf32>
    %11 = arith.truncf %10 : vector<56x128xf32> to vector<56x128xbf16>
    %c0_8 = arith.constant 0 : index
    %c0_9 = arith.constant 0 : index
    %12 = vector.load %arg6[%c0_8, %c0_9] : memref<56x128xbf16, #tpu.memory_space<vmem>>, vector<56x128xbf16>
    tpu.vector_store %arg6[%c0_8, %c0_9], %11 {strides = array<i32>} : memref<56x128xbf16, #tpu.memory_space<vmem>>, vector<56x128xbf16>,
    return
  }
  func.func @transform_0(%arg0: i32, %arg1: i32) -> (i32, i32) {
    %c0_i32 = arith.constant 0 : i32
    %c0_i32_0 = arith.constant 0 : i32
    return %arg0, %c0_i32 : i32, i32
  }
  func.func @transform_1(%arg0: i32, %arg1: i32) -> (i32, i32) {
    %c0_i32 = arith.constant 0 : i32
    %c0_i32_0 = arith.constant 0 : i32
    return %c0_i32, %arg1 : i32, i32
  }
  func.func @transform_2(%arg0: i32, %arg1: i32) -> (i32, i32) {
    %c0_i32 = arith.constant 0 : i32
    %c0_i32_0 = arith.constant 0 : i32
    return %c0_i32, %arg1 : i32, i32
  }
  func.func @transform_3(%arg0: i32, %arg1: i32) -> (i32, i32) {
    %c0_i32 = arith.constant 0 : i32
    %c0_i32_0 = arith.constant 0 : i32
    return %c0_i32, %arg1 : i32, i32
  }
  func.func @transform_4(%arg0: i32, %arg1: i32) -> (i32, i32) {
    %c0_i32 = arith.constant 0 : i32
    return %arg0, %arg1 : i32, i32
  }
}

module attributes {stable_mosaic.version = 11 : i64} {
  func.func @_pool_kernel(%arg0: i32, %arg1: memref<2x9x9x256xbf16, #tpu.memory_space<vmem>>, %arg2: memref<2x7x7x256xbf16, #tpu.memory_space<vmem>>) attributes {dimension_semantics = [#tpu.dimension_semantics<arbitrary>], iteration_bounds = array<i64: 1>, scalar_prefetch = 0 : i64, scratch_operands = 0 : i64, tpu.core_type = #tpu.core_type<tc>, window_params = [{pipeline_mode = #tpu.pipeline_mode<synchronous>, transform_indices = @transform_0, window_bounds = array<i64: 2, 9, 9, 256>}, {pipeline_mode = #tpu.pipeline_mode<synchronous>, transform_indices = @transform_1, window_bounds = array<i64: 2, 7, 7, 256>}]} {
    %c0 = arith.constant 0 : index
    %c0_0 = arith.constant 0 : index
    %c0_1 = arith.constant 0 : index
    %c0_2 = arith.constant 0 : index
    %0 = vector.load %arg1[%c0, %c0_0, %c0_1, %c0_2] : memref<2x9x9x256xbf16, #tpu.memory_space<vmem>>, vector<2x7x7x256xbf16>
    %1 = arith.extf %0 : vector<2x7x7x256xbf16> to vector<2x7x7x256xf32>
    %c0_3 = arith.constant 0 : index
    %c0_4 = arith.constant 0 : index
    %c1 = arith.constant 1 : index
    %c0_5 = arith.constant 0 : index
    %2 = vector.load %arg1[%c0_3, %c0_4, %c1, %c0_5] : memref<2x9x9x256xbf16, #tpu.memory_space<vmem>>, vector<2x7x7x256xbf16>
    %3 = arith.extf %2 : vector<2x7x7x256xbf16> to vector<2x7x7x256xf32>
    %4 = arith.maximumf %1, %3 : vector<2x7x7x256xf32>
    %c0_6 = arith.constant 0 : index
    %c0_7 = arith.constant 0 : index
    %c2 = arith.constant 2 : index
    %c0_8 = arith.constant 0 : index
    %5 = vector.load %arg1[%c0_6, %c0_7, %c2, %c0_8] : memref<2x9x9x256xbf16, #tpu.memory_space<vmem>>, vector<2x7x7x256xbf16>
    %6 = arith.extf %5 : vector<2x7x7x256xbf16> to vector<2x7x7x256xf32>
    %7 = arith.maximumf %4, %6 : vector<2x7x7x256xf32>
    %c0_9 = arith.constant 0 : index
    %c1_10 = arith.constant 1 : index
    %c0_11 = arith.constant 0 : index
    %c0_12 = arith.constant 0 : index
    %8 = vector.load %arg1[%c0_9, %c1_10, %c0_11, %c0_12] : memref<2x9x9x256xbf16, #tpu.memory_space<vmem>>, vector<2x7x7x256xbf16>
    %9 = arith.extf %8 : vector<2x7x7x256xbf16> to vector<2x7x7x256xf32>
    %10 = arith.maximumf %7, %9 : vector<2x7x7x256xf32>
    %c0_13 = arith.constant 0 : index
    %c1_14 = arith.constant 1 : index
    %c1_15 = arith.constant 1 : index
    %c0_16 = arith.constant 0 : index
    %11 = vector.load %arg1[%c0_13, %c1_14, %c1_15, %c0_16] : memref<2x9x9x256xbf16, #tpu.memory_space<vmem>>, vector<2x7x7x256xbf16>
    %12 = arith.extf %11 : vector<2x7x7x256xbf16> to vector<2x7x7x256xf32>
    %13 = arith.maximumf %10, %12 : vector<2x7x7x256xf32>
    %c0_17 = arith.constant 0 : index
    %c1_18 = arith.constant 1 : index
    %c2_19 = arith.constant 2 : index
    %c0_20 = arith.constant 0 : index
    %14 = vector.load %arg1[%c0_17, %c1_18, %c2_19, %c0_20] : memref<2x9x9x256xbf16, #tpu.memory_space<vmem>>, vector<2x7x7x256xbf16>
    %15 = arith.extf %14 : vector<2x7x7x256xbf16> to vector<2x7x7x256xf32>
    %16 = arith.maximumf %13, %15 : vector<2x7x7x256xf32>
    %c0_21 = arith.constant 0 : index
    %c2_22 = arith.constant 2 : index
    %c0_23 = arith.constant 0 : index
    %c0_24 = arith.constant 0 : index
    %17 = vector.load %arg1[%c0_21, %c2_22, %c0_23, %c0_24] : memref<2x9x9x256xbf16, #tpu.memory_space<vmem>>, vector<2x7x7x256xbf16>
    %18 = arith.extf %17 : vector<2x7x7x256xbf16> to vector<2x7x7x256xf32>
    %19 = arith.maximumf %16, %18 : vector<2x7x7x256xf32>
    %c0_25 = arith.constant 0 : index
    %c2_26 = arith.constant 2 : index
    %c1_27 = arith.constant 1 : index
    %c0_28 = arith.constant 0 : index
    %20 = vector.load %arg1[%c0_25, %c2_26, %c1_27, %c0_28] : memref<2x9x9x256xbf16, #tpu.memory_space<vmem>>, vector<2x7x7x256xbf16>
    %21 = arith.extf %20 : vector<2x7x7x256xbf16> to vector<2x7x7x256xf32>
    %22 = arith.maximumf %19, %21 : vector<2x7x7x256xf32>
    %c0_29 = arith.constant 0 : index
    %c2_30 = arith.constant 2 : index
    %c2_31 = arith.constant 2 : index
    %c0_32 = arith.constant 0 : index
    %23 = vector.load %arg1[%c0_29, %c2_30, %c2_31, %c0_32] : memref<2x9x9x256xbf16, #tpu.memory_space<vmem>>, vector<2x7x7x256xbf16>
    %24 = arith.extf %23 : vector<2x7x7x256xbf16> to vector<2x7x7x256xf32>
    %25 = arith.maximumf %22, %24 : vector<2x7x7x256xf32>
    %26 = arith.truncf %25 : vector<2x7x7x256xf32> to vector<2x7x7x256xbf16>
    %c0_33 = arith.constant 0 : index
    %c0_34 = arith.constant 0 : index
    %c0_35 = arith.constant 0 : index
    %c0_36 = arith.constant 0 : index
    %27 = vector.load %arg2[%c0_33, %c0_34, %c0_35, %c0_36] : memref<2x7x7x256xbf16, #tpu.memory_space<vmem>>, vector<2x7x7x256xbf16>
    tpu.vector_store %arg2[%c0_33, %c0_34, %c0_35, %c0_36], %26 {strides = array<i32>} : memref<2x7x7x256xbf16, #tpu.memory_space<vmem>>, vector<2x7x7x256xbf16>,
    return
  }
  func.func @transform_0(%arg0: i32) -> (i32, i32, i32, i32) {
    %c0_i32 = arith.constant 0 : i32
    %c0_i32_0 = arith.constant 0 : i32
    %c0_i32_1 = arith.constant 0 : i32
    %c0_i32_2 = arith.constant 0 : i32
    %c0_i32_3 = arith.constant 0 : i32
    return %c0_i32, %c0_i32_0, %c0_i32_1, %c0_i32_2 : i32, i32, i32, i32
  }
  func.func @transform_1(%arg0: i32) -> (i32, i32, i32, i32) {
    %c0_i32 = arith.constant 0 : i32
    %c0_i32_0 = arith.constant 0 : i32
    %c0_i32_1 = arith.constant 0 : i32
    %c0_i32_2 = arith.constant 0 : i32
    %c0_i32_3 = arith.constant 0 : i32
    return %c0_i32, %c0_i32_0, %c0_i32_1, %c0_i32_2 : i32, i32, i32, i32
  }
}

module attributes {stable_mosaic.version = 11 : i64} {
  func.func @_matmul_bn_act_kernel(%arg0: i32, %arg1: i32, %arg2: memref<32x256xbf16, #tpu.memory_space<vmem>>, %arg3: memref<256x256xbf16, #tpu.memory_space<vmem>>, %arg4: memref<1x256xf32, #tpu.memory_space<vmem>>, %arg5: memref<1x256xf32, #tpu.memory_space<vmem>>, %arg6: memref<32x256xbf16, #tpu.memory_space<vmem>>) attributes {dimension_semantics = [#tpu.dimension_semantics<parallel>, #tpu.dimension_semantics<parallel>], iteration_bounds = array<i64: 1, 1>, scalar_prefetch = 0 : i64, scratch_operands = 0 : i64, tpu.core_type = #tpu.core_type<tc>, window_params = [{transform_indices = @transform_0, window_bounds = array<i64: 32, 256>}, {transform_indices = @transform_1, window_bounds = array<i64: 256, 256>}, {transform_indices = @transform_2, window_bounds = array<i64: 1, 256>}, {transform_indices = @transform_3, window_bounds = array<i64: 1, 256>}, {transform_indices = @transform_4, window_bounds = array<i64: 32, 256>}]} {
    %c0 = arith.constant 0 : index
    %c0_0 = arith.constant 0 : index
    %0 = vector.load %arg2[%c0, %c0_0] : memref<32x256xbf16, #tpu.memory_space<vmem>>, vector<32x256xbf16>
    %c0_1 = arith.constant 0 : index
    %c0_2 = arith.constant 0 : index
    %1 = vector.load %arg3[%c0_1, %c0_2] : memref<256x256xbf16, #tpu.memory_space<vmem>>, vector<256x256xbf16>
    %cst = arith.constant dense<0.000000e+00> : vector<32x256xf32>
    %2 = tpu.matmul %0, %1, %cst {dimension_numbers = #tpu.dot_dimension_numbers<[1], [0], [0], [1], [0, 0, 1, 1], [], []>} : vector<32x256xbf16>, vector<256x256xbf16>, vector<32x256xf32> -> vector<32x256xf32>
    %c0_3 = arith.constant 0 : index
    %c0_4 = arith.constant 0 : index
    %3 = vector.load %arg4[%c0_3, %c0_4] : memref<1x256xf32, #tpu.memory_space<vmem>>, vector<1x256xf32>
    %4 = vector.broadcast %3 : vector<1x256xf32> to vector<32x256xf32>
    %5 = arith.mulf %2, %4 : vector<32x256xf32>
    %c0_5 = arith.constant 0 : index
    %c0_6 = arith.constant 0 : index
    %6 = vector.load %arg5[%c0_5, %c0_6] : memref<1x256xf32, #tpu.memory_space<vmem>>, vector<1x256xf32>
    %7 = vector.broadcast %6 : vector<1x256xf32> to vector<32x256xf32>
    %8 = arith.addf %5, %7 : vector<32x256xf32>
    %cst_7 = arith.constant 0.000000e+00 : f32
    %9 = vector.broadcast %cst_7 : f32 to vector<32x256xf32>
    %10 = arith.maximumf %8, %9 : vector<32x256xf32>
    %11 = arith.truncf %10 : vector<32x256xf32> to vector<32x256xbf16>
    %c0_8 = arith.constant 0 : index
    %c0_9 = arith.constant 0 : index
    %12 = vector.load %arg6[%c0_8, %c0_9] : memref<32x256xbf16, #tpu.memory_space<vmem>>, vector<32x256xbf16>
    tpu.vector_store %arg6[%c0_8, %c0_9], %11 {strides = array<i32>} : memref<32x256xbf16, #tpu.memory_space<vmem>>, vector<32x256xbf16>,
    return
  }
  func.func @transform_0(%arg0: i32, %arg1: i32) -> (i32, i32) {
    %c0_i32 = arith.constant 0 : i32
    %c0_i32_0 = arith.constant 0 : i32
    return %arg0, %c0_i32 : i32, i32
  }
  func.func @transform_1(%arg0: i32, %arg1: i32) -> (i32, i32) {
    %c0_i32 = arith.constant 0 : i32
    %c0_i32_0 = arith.constant 0 : i32
    return %c0_i32, %arg1 : i32, i32
  }
  func.func @transform_2(%arg0: i32, %arg1: i32) -> (i32, i32) {
    %c0_i32 = arith.constant 0 : i32
    %c0_i32_0 = arith.constant 0 : i32
    return %c0_i32, %arg1 : i32, i32
  }
  func.func @transform_3(%arg0: i32, %arg1: i32) -> (i32, i32) {
    %c0_i32 = arith.constant 0 : i32
    %c0_i32_0 = arith.constant 0 : i32
    return %c0_i32, %arg1 : i32, i32
  }
  func.func @transform_4(%arg0: i32, %arg1: i32) -> (i32, i32) {
    %c0_i32 = arith.constant 0 : i32
    return %arg0, %arg1 : i32, i32
  }
}

module attributes {stable_mosaic.version = 11 : i64} {
  func.func @_matmul_bn_act_kernel(%arg0: i32, %arg1: i32, %arg2: memref<32x384xbf16, #tpu.memory_space<vmem>>, %arg3: memref<384x128xbf16, #tpu.memory_space<vmem>>, %arg4: memref<1x128xf32, #tpu.memory_space<vmem>>, %arg5: memref<1x128xf32, #tpu.memory_space<vmem>>, %arg6: memref<32x128xbf16, #tpu.memory_space<vmem>>) attributes {dimension_semantics = [#tpu.dimension_semantics<parallel>, #tpu.dimension_semantics<parallel>], iteration_bounds = array<i64: 1, 1>, scalar_prefetch = 0 : i64, scratch_operands = 0 : i64, tpu.core_type = #tpu.core_type<tc>, window_params = [{transform_indices = @transform_0, window_bounds = array<i64: 32, 384>}, {transform_indices = @transform_1, window_bounds = array<i64: 384, 128>}, {transform_indices = @transform_2, window_bounds = array<i64: 1, 128>}, {transform_indices = @transform_3, window_bounds = array<i64: 1, 128>}, {transform_indices = @transform_4, window_bounds = array<i64: 32, 128>}]} {
    %c0 = arith.constant 0 : index
    %c0_0 = arith.constant 0 : index
    %0 = vector.load %arg2[%c0, %c0_0] : memref<32x384xbf16, #tpu.memory_space<vmem>>, vector<32x384xbf16>
    %c0_1 = arith.constant 0 : index
    %c0_2 = arith.constant 0 : index
    %1 = vector.load %arg3[%c0_1, %c0_2] : memref<384x128xbf16, #tpu.memory_space<vmem>>, vector<384x128xbf16>
    %cst = arith.constant dense<0.000000e+00> : vector<32x128xf32>
    %2 = tpu.matmul %0, %1, %cst {dimension_numbers = #tpu.dot_dimension_numbers<[1], [0], [0], [1], [0, 0, 1, 1], [], []>} : vector<32x384xbf16>, vector<384x128xbf16>, vector<32x128xf32> -> vector<32x128xf32>
    %c0_3 = arith.constant 0 : index
    %c0_4 = arith.constant 0 : index
    %3 = vector.load %arg4[%c0_3, %c0_4] : memref<1x128xf32, #tpu.memory_space<vmem>>, vector<1x128xf32>
    %4 = vector.broadcast %3 : vector<1x128xf32> to vector<32x128xf32>
    %5 = arith.mulf %2, %4 : vector<32x128xf32>
    %c0_5 = arith.constant 0 : index
    %c0_6 = arith.constant 0 : index
    %6 = vector.load %arg5[%c0_5, %c0_6] : memref<1x128xf32, #tpu.memory_space<vmem>>, vector<1x128xf32>
    %7 = vector.broadcast %6 : vector<1x128xf32> to vector<32x128xf32>
    %8 = arith.addf %5, %7 : vector<32x128xf32>
    %cst_7 = arith.constant 0.000000e+00 : f32
    %9 = vector.broadcast %cst_7 : f32 to vector<32x128xf32>
    %10 = arith.maximumf %8, %9 : vector<32x128xf32>
    %11 = arith.truncf %10 : vector<32x128xf32> to vector<32x128xbf16>
    %c0_8 = arith.constant 0 : index
    %c0_9 = arith.constant 0 : index
    %12 = vector.load %arg6[%c0_8, %c0_9] : memref<32x128xbf16, #tpu.memory_space<vmem>>, vector<32x128xbf16>
    tpu.vector_store %arg6[%c0_8, %c0_9], %11 {strides = array<i32>} : memref<32x128xbf16, #tpu.memory_space<vmem>>, vector<32x128xbf16>,
    return
  }
  func.func @transform_0(%arg0: i32, %arg1: i32) -> (i32, i32) {
    %c0_i32 = arith.constant 0 : i32
    %c0_i32_0 = arith.constant 0 : i32
    return %arg0, %c0_i32 : i32, i32
  }
  func.func @transform_1(%arg0: i32, %arg1: i32) -> (i32, i32) {
    %c0_i32 = arith.constant 0 : i32
    %c0_i32_0 = arith.constant 0 : i32
    return %c0_i32, %arg1 : i32, i32
  }
  func.func @transform_2(%arg0: i32, %arg1: i32) -> (i32, i32) {
    %c0_i32 = arith.constant 0 : i32
    %c0_i32_0 = arith.constant 0 : i32
    return %c0_i32, %arg1 : i32, i32
  }
  func.func @transform_3(%arg0: i32, %arg1: i32) -> (i32, i32) {
    %c0_i32 = arith.constant 0 : i32
    %c0_i32_0 = arith.constant 0 : i32
    return %c0_i32, %arg1 : i32, i32
  }
  func.func @transform_4(%arg0: i32, %arg1: i32) -> (i32, i32) {
    %c0_i32 = arith.constant 0 : i32
    return %arg0, %arg1 : i32, i32
  }
}

module attributes {stable_mosaic.version = 11 : i64} {
  func.func @_matmul_bn_act_kernel(%arg0: i32, %arg1: i32, %arg2: memref<32x896xbf16, #tpu.memory_space<vmem>>, %arg3: memref<896x128xbf16, #tpu.memory_space<vmem>>, %arg4: memref<1x128xf32, #tpu.memory_space<vmem>>, %arg5: memref<1x128xf32, #tpu.memory_space<vmem>>, %arg6: memref<32x128xbf16, #tpu.memory_space<vmem>>) attributes {dimension_semantics = [#tpu.dimension_semantics<parallel>, #tpu.dimension_semantics<parallel>], iteration_bounds = array<i64: 1, 1>, scalar_prefetch = 0 : i64, scratch_operands = 0 : i64, tpu.core_type = #tpu.core_type<tc>, window_params = [{transform_indices = @transform_0, window_bounds = array<i64: 32, 896>}, {transform_indices = @transform_1, window_bounds = array<i64: 896, 128>}, {transform_indices = @transform_2, window_bounds = array<i64: 1, 128>}, {transform_indices = @transform_3, window_bounds = array<i64: 1, 128>}, {transform_indices = @transform_4, window_bounds = array<i64: 32, 128>}]} {
    %c0 = arith.constant 0 : index
    %c0_0 = arith.constant 0 : index
    %0 = vector.load %arg2[%c0, %c0_0] : memref<32x896xbf16, #tpu.memory_space<vmem>>, vector<32x896xbf16>
    %c0_1 = arith.constant 0 : index
    %c0_2 = arith.constant 0 : index
    %1 = vector.load %arg3[%c0_1, %c0_2] : memref<896x128xbf16, #tpu.memory_space<vmem>>, vector<896x128xbf16>
    %cst = arith.constant dense<0.000000e+00> : vector<32x128xf32>
    %2 = tpu.matmul %0, %1, %cst {dimension_numbers = #tpu.dot_dimension_numbers<[1], [0], [0], [1], [0, 0, 1, 1], [], []>} : vector<32x896xbf16>, vector<896x128xbf16>, vector<32x128xf32> -> vector<32x128xf32>
    %c0_3 = arith.constant 0 : index
    %c0_4 = arith.constant 0 : index
    %3 = vector.load %arg4[%c0_3, %c0_4] : memref<1x128xf32, #tpu.memory_space<vmem>>, vector<1x128xf32>
    %4 = vector.broadcast %3 : vector<1x128xf32> to vector<32x128xf32>
    %5 = arith.mulf %2, %4 : vector<32x128xf32>
    %c0_5 = arith.constant 0 : index
    %c0_6 = arith.constant 0 : index
    %6 = vector.load %arg5[%c0_5, %c0_6] : memref<1x128xf32, #tpu.memory_space<vmem>>, vector<1x128xf32>
    %7 = vector.broadcast %6 : vector<1x128xf32> to vector<32x128xf32>
    %8 = arith.addf %5, %7 : vector<32x128xf32>
    %cst_7 = arith.constant 0.000000e+00 : f32
    %9 = vector.broadcast %cst_7 : f32 to vector<32x128xf32>
    %10 = arith.maximumf %8, %9 : vector<32x128xf32>
    %11 = arith.truncf %10 : vector<32x128xf32> to vector<32x128xbf16>
    %c0_8 = arith.constant 0 : index
    %c0_9 = arith.constant 0 : index
    %12 = vector.load %arg6[%c0_8, %c0_9] : memref<32x128xbf16, #tpu.memory_space<vmem>>, vector<32x128xbf16>
    tpu.vector_store %arg6[%c0_8, %c0_9], %11 {strides = array<i32>} : memref<32x128xbf16, #tpu.memory_space<vmem>>, vector<32x128xbf16>,
    return
  }
  func.func @transform_0(%arg0: i32, %arg1: i32) -> (i32, i32) {
    %c0_i32 = arith.constant 0 : i32
    %c0_i32_0 = arith.constant 0 : i32
    return %arg0, %c0_i32 : i32, i32
  }
  func.func @transform_1(%arg0: i32, %arg1: i32) -> (i32, i32) {
    %c0_i32 = arith.constant 0 : i32
    %c0_i32_0 = arith.constant 0 : i32
    return %c0_i32, %arg1 : i32, i32
  }
  func.func @transform_2(%arg0: i32, %arg1: i32) -> (i32, i32) {
    %c0_i32 = arith.constant 0 : i32
    %c0_i32_0 = arith.constant 0 : i32
    return %c0_i32, %arg1 : i32, i32
  }
  func.func @transform_3(%arg0: i32, %arg1: i32) -> (i32, i32) {
    %c0_i32 = arith.constant 0 : i32
    %c0_i32_0 = arith.constant 0 : i32
    return %c0_i32, %arg1 : i32, i32
  }
  func.func @transform_4(%arg0: i32, %arg1: i32) -> (i32, i32) {
    %c0_i32 = arith.constant 0 : i32
    return %arg0, %arg1 : i32, i32
  }
}

module attributes {stable_mosaic.version = 11 : i64} {
  func.func @_pool_kernel(%arg0: i32, %arg1: memref<2x6x6x256xbf16, #tpu.memory_space<vmem>>, %arg2: memref<2x4x4x256xbf16, #tpu.memory_space<vmem>>) attributes {dimension_semantics = [#tpu.dimension_semantics<arbitrary>], iteration_bounds = array<i64: 1>, scalar_prefetch = 0 : i64, scratch_operands = 0 : i64, tpu.core_type = #tpu.core_type<tc>, window_params = [{pipeline_mode = #tpu.pipeline_mode<synchronous>, transform_indices = @transform_0, window_bounds = array<i64: 2, 6, 6, 256>}, {pipeline_mode = #tpu.pipeline_mode<synchronous>, transform_indices = @transform_1, window_bounds = array<i64: 2, 4, 4, 256>}]} {
    %c0 = arith.constant 0 : index
    %c0_0 = arith.constant 0 : index
    %c0_1 = arith.constant 0 : index
    %c0_2 = arith.constant 0 : index
    %0 = vector.load %arg1[%c0, %c0_0, %c0_1, %c0_2] : memref<2x6x6x256xbf16, #tpu.memory_space<vmem>>, vector<2x4x4x256xbf16>
    %1 = arith.extf %0 : vector<2x4x4x256xbf16> to vector<2x4x4x256xf32>
    %c0_3 = arith.constant 0 : index
    %c0_4 = arith.constant 0 : index
    %c1 = arith.constant 1 : index
    %c0_5 = arith.constant 0 : index
    %2 = vector.load %arg1[%c0_3, %c0_4, %c1, %c0_5] : memref<2x6x6x256xbf16, #tpu.memory_space<vmem>>, vector<2x4x4x256xbf16>
    %3 = arith.extf %2 : vector<2x4x4x256xbf16> to vector<2x4x4x256xf32>
    %4 = arith.maximumf %1, %3 : vector<2x4x4x256xf32>
    %c0_6 = arith.constant 0 : index
    %c0_7 = arith.constant 0 : index
    %c2 = arith.constant 2 : index
    %c0_8 = arith.constant 0 : index
    %5 = vector.load %arg1[%c0_6, %c0_7, %c2, %c0_8] : memref<2x6x6x256xbf16, #tpu.memory_space<vmem>>, vector<2x4x4x256xbf16>
    %6 = arith.extf %5 : vector<2x4x4x256xbf16> to vector<2x4x4x256xf32>
    %7 = arith.maximumf %4, %6 : vector<2x4x4x256xf32>
    %c0_9 = arith.constant 0 : index
    %c1_10 = arith.constant 1 : index
    %c0_11 = arith.constant 0 : index
    %c0_12 = arith.constant 0 : index
    %8 = vector.load %arg1[%c0_9, %c1_10, %c0_11, %c0_12] : memref<2x6x6x256xbf16, #tpu.memory_space<vmem>>, vector<2x4x4x256xbf16>
    %9 = arith.extf %8 : vector<2x4x4x256xbf16> to vector<2x4x4x256xf32>
    %10 = arith.maximumf %7, %9 : vector<2x4x4x256xf32>
    %c0_13 = arith.constant 0 : index
    %c1_14 = arith.constant 1 : index
    %c1_15 = arith.constant 1 : index
    %c0_16 = arith.constant 0 : index
    %11 = vector.load %arg1[%c0_13, %c1_14, %c1_15, %c0_16] : memref<2x6x6x256xbf16, #tpu.memory_space<vmem>>, vector<2x4x4x256xbf16>
    %12 = arith.extf %11 : vector<2x4x4x256xbf16> to vector<2x4x4x256xf32>
    %13 = arith.maximumf %10, %12 : vector<2x4x4x256xf32>
    %c0_17 = arith.constant 0 : index
    %c1_18 = arith.constant 1 : index
    %c2_19 = arith.constant 2 : index
    %c0_20 = arith.constant 0 : index
    %14 = vector.load %arg1[%c0_17, %c1_18, %c2_19, %c0_20] : memref<2x6x6x256xbf16, #tpu.memory_space<vmem>>, vector<2x4x4x256xbf16>
    %15 = arith.extf %14 : vector<2x4x4x256xbf16> to vector<2x4x4x256xf32>
    %16 = arith.maximumf %13, %15 : vector<2x4x4x256xf32>
    %c0_21 = arith.constant 0 : index
    %c2_22 = arith.constant 2 : index
    %c0_23 = arith.constant 0 : index
    %c0_24 = arith.constant 0 : index
    %17 = vector.load %arg1[%c0_21, %c2_22, %c0_23, %c0_24] : memref<2x6x6x256xbf16, #tpu.memory_space<vmem>>, vector<2x4x4x256xbf16>
    %18 = arith.extf %17 : vector<2x4x4x256xbf16> to vector<2x4x4x256xf32>
    %19 = arith.maximumf %16, %18 : vector<2x4x4x256xf32>
    %c0_25 = arith.constant 0 : index
    %c2_26 = arith.constant 2 : index
    %c1_27 = arith.constant 1 : index
    %c0_28 = arith.constant 0 : index
    %20 = vector.load %arg1[%c0_25, %c2_26, %c1_27, %c0_28] : memref<2x6x6x256xbf16, #tpu.memory_space<vmem>>, vector<2x4x4x256xbf16>
    %21 = arith.extf %20 : vector<2x4x4x256xbf16> to vector<2x4x4x256xf32>
    %22 = arith.maximumf %19, %21 : vector<2x4x4x256xf32>
    %c0_29 = arith.constant 0 : index
    %c2_30 = arith.constant 2 : index
    %c2_31 = arith.constant 2 : index
    %c0_32 = arith.constant 0 : index
    %23 = vector.load %arg1[%c0_29, %c2_30, %c2_31, %c0_32] : memref<2x6x6x256xbf16, #tpu.memory_space<vmem>>, vector<2x4x4x256xbf16>
    %24 = arith.extf %23 : vector<2x4x4x256xbf16> to vector<2x4x4x256xf32>
    %25 = arith.maximumf %22, %24 : vector<2x4x4x256xf32>
    %26 = arith.truncf %25 : vector<2x4x4x256xf32> to vector<2x4x4x256xbf16>
    %c0_33 = arith.constant 0 : index
    %c0_34 = arith.constant 0 : index
    %c0_35 = arith.constant 0 : index
    %c0_36 = arith.constant 0 : index
    %27 = vector.load %arg2[%c0_33, %c0_34, %c0_35, %c0_36] : memref<2x4x4x256xbf16, #tpu.memory_space<vmem>>, vector<2x4x4x256xbf16>
    tpu.vector_store %arg2[%c0_33, %c0_34, %c0_35, %c0_36], %26 {strides = array<i32>} : memref<2x4x4x256xbf16, #tpu.memory_space<vmem>>, vector<2x4x4x256xbf16>,
    return
  }
  func.func @transform_0(%arg0: i32) -> (i32, i32, i32, i32) {
    %c0_i32 = arith.constant 0 : i32
    %c0_i32_0 = arith.constant 0 : i32
    %c0_i32_1 = arith.constant 0 : i32
    %c0_i32_2 = arith.constant 0 : i32
    %c0_i32_3 = arith.constant 0 : i32
    return %c0_i32, %c0_i32_0, %c0_i32_1, %c0_i32_2 : i32, i32, i32, i32
  }
  func.func @transform_1(%arg0: i32) -> (i32, i32, i32, i32) {
    %c0_i32 = arith.constant 0 : i32
    %c0_i32_0 = arith.constant 0 : i32
    %c0_i32_1 = arith.constant 0 : i32
    %c0_i32_2 = arith.constant 0 : i32
    %c0_i32_3 = arith.constant 0 : i32
    return %c0_i32, %c0_i32_0, %c0_i32_1, %c0_i32_2 : i32, i32, i32, i32
  }
}

module attributes {stable_mosaic.version = 11 : i64} {
  func.func @_matmul_bn_act_kernel(%arg0: i32, %arg1: i32, %arg2: memref<32x2304xbf16, #tpu.memory_space<vmem>>, %arg3: memref<2304x128xbf16, #tpu.memory_space<vmem>>, %arg4: memref<1x128xf32, #tpu.memory_space<vmem>>, %arg5: memref<1x128xf32, #tpu.memory_space<vmem>>, %arg6: memref<32x128xbf16, #tpu.memory_space<vmem>>) attributes {dimension_semantics = [#tpu.dimension_semantics<parallel>, #tpu.dimension_semantics<parallel>], iteration_bounds = array<i64: 1, 1>, scalar_prefetch = 0 : i64, scratch_operands = 0 : i64, tpu.core_type = #tpu.core_type<tc>, window_params = [{transform_indices = @transform_0, window_bounds = array<i64: 32, 2304>}, {transform_indices = @transform_1, window_bounds = array<i64: 2304, 128>}, {transform_indices = @transform_2, window_bounds = array<i64: 1, 128>}, {transform_indices = @transform_3, window_bounds = array<i64: 1, 128>}, {transform_indices = @transform_4, window_bounds = array<i64: 32, 128>}]} {
    %c0 = arith.constant 0 : index
    %c0_0 = arith.constant 0 : index
    %0 = vector.load %arg2[%c0, %c0_0] : memref<32x2304xbf16, #tpu.memory_space<vmem>>, vector<32x2304xbf16>
    %c0_1 = arith.constant 0 : index
    %c0_2 = arith.constant 0 : index
    %1 = vector.load %arg3[%c0_1, %c0_2] : memref<2304x128xbf16, #tpu.memory_space<vmem>>, vector<2304x128xbf16>
    %cst = arith.constant dense<0.000000e+00> : vector<32x128xf32>
    %2 = tpu.matmul %0, %1, %cst {dimension_numbers = #tpu.dot_dimension_numbers<[1], [0], [0], [1], [0, 0, 1, 1], [], []>} : vector<32x2304xbf16>, vector<2304x128xbf16>, vector<32x128xf32> -> vector<32x128xf32>
    %c0_3 = arith.constant 0 : index
    %c0_4 = arith.constant 0 : index
    %3 = vector.load %arg4[%c0_3, %c0_4] : memref<1x128xf32, #tpu.memory_space<vmem>>, vector<1x128xf32>
    %4 = vector.broadcast %3 : vector<1x128xf32> to vector<32x128xf32>
    %5 = arith.mulf %2, %4 : vector<32x128xf32>
    %c0_5 = arith.constant 0 : index
    %c0_6 = arith.constant 0 : index
    %6 = vector.load %arg5[%c0_5, %c0_6] : memref<1x128xf32, #tpu.memory_space<vmem>>, vector<1x128xf32>
    %7 = vector.broadcast %6 : vector<1x128xf32> to vector<32x128xf32>
    %8 = arith.addf %5, %7 : vector<32x128xf32>
    %cst_7 = arith.constant 0.000000e+00 : f32
    %9 = vector.broadcast %cst_7 : f32 to vector<32x128xf32>
    %10 = arith.maximumf %8, %9 : vector<32x128xf32>
    %11 = arith.truncf %10 : vector<32x128xf32> to vector<32x128xbf16>
    %c0_8 = arith.constant 0 : index
    %c0_9 = arith.constant 0 : index
    %12 = vector.load %arg6[%c0_8, %c0_9] : memref<32x128xbf16, #tpu.memory_space<vmem>>, vector<32x128xbf16>
    tpu.vector_store %arg6[%c0_8, %c0_9], %11 {strides = array<i32>} : memref<32x128xbf16, #tpu.memory_space<vmem>>, vector<32x128xbf16>,
    return
  }
  func.func @transform_0(%arg0: i32, %arg1: i32) -> (i32, i32) {
    %c0_i32 = arith.constant 0 : i32
    %c0_i32_0 = arith.constant 0 : i32
    return %arg0, %c0_i32 : i32, i32
  }
  func.func @transform_1(%arg0: i32, %arg1: i32) -> (i32, i32) {
    %c0_i32 = arith.constant 0 : i32
    %c0_i32_0 = arith.constant 0 : i32
    return %c0_i32, %arg1 : i32, i32
  }
  func.func @transform_2(%arg0: i32, %arg1: i32) -> (i32, i32) {
    %c0_i32 = arith.constant 0 : i32
    %c0_i32_0 = arith.constant 0 : i32
    return %c0_i32, %arg1 : i32, i32
  }
  func.func @transform_3(%arg0: i32, %arg1: i32) -> (i32, i32) {
    %c0_i32 = arith.constant 0 : i32
    %c0_i32_0 = arith.constant 0 : i32
    return %c0_i32, %arg1 : i32, i32
  }
  func.func @transform_4(%arg0: i32, %arg1: i32) -> (i32, i32) {
    %c0_i32 = arith.constant 0 : i32
    return %arg0, %arg1 : i32, i32
  }
}

module attributes {stable_mosaic.version = 11 : i64} {
  func.func @_pool_kernel(%arg0: i32, %arg1: memref<2x6x6x384xbf16, #tpu.memory_space<vmem>>, %arg2: memref<2x4x4x384xbf16, #tpu.memory_space<vmem>>) attributes {dimension_semantics = [#tpu.dimension_semantics<arbitrary>], iteration_bounds = array<i64: 1>, scalar_prefetch = 0 : i64, scratch_operands = 0 : i64, tpu.core_type = #tpu.core_type<tc>, window_params = [{pipeline_mode = #tpu.pipeline_mode<synchronous>, transform_indices = @transform_0, window_bounds = array<i64: 2, 6, 6, 384>}, {pipeline_mode = #tpu.pipeline_mode<synchronous>, transform_indices = @transform_1, window_bounds = array<i64: 2, 4, 4, 384>}]} {
    %c0 = arith.constant 0 : index
    %c0_0 = arith.constant 0 : index
    %c0_1 = arith.constant 0 : index
    %c0_2 = arith.constant 0 : index
    %0 = vector.load %arg1[%c0, %c0_0, %c0_1, %c0_2] : memref<2x6x6x384xbf16, #tpu.memory_space<vmem>>, vector<2x4x4x384xbf16>
    %1 = arith.extf %0 : vector<2x4x4x384xbf16> to vector<2x4x4x384xf32>
    %c0_3 = arith.constant 0 : index
    %c0_4 = arith.constant 0 : index
    %c1 = arith.constant 1 : index
    %c0_5 = arith.constant 0 : index
    %2 = vector.load %arg1[%c0_3, %c0_4, %c1, %c0_5] : memref<2x6x6x384xbf16, #tpu.memory_space<vmem>>, vector<2x4x4x384xbf16>
    %3 = arith.extf %2 : vector<2x4x4x384xbf16> to vector<2x4x4x384xf32>
    %4 = arith.maximumf %1, %3 : vector<2x4x4x384xf32>
    %c0_6 = arith.constant 0 : index
    %c0_7 = arith.constant 0 : index
    %c2 = arith.constant 2 : index
    %c0_8 = arith.constant 0 : index
    %5 = vector.load %arg1[%c0_6, %c0_7, %c2, %c0_8] : memref<2x6x6x384xbf16, #tpu.memory_space<vmem>>, vector<2x4x4x384xbf16>
    %6 = arith.extf %5 : vector<2x4x4x384xbf16> to vector<2x4x4x384xf32>
    %7 = arith.maximumf %4, %6 : vector<2x4x4x384xf32>
    %c0_9 = arith.constant 0 : index
    %c1_10 = arith.constant 1 : index
    %c0_11 = arith.constant 0 : index
    %c0_12 = arith.constant 0 : index
    %8 = vector.load %arg1[%c0_9, %c1_10, %c0_11, %c0_12] : memref<2x6x6x384xbf16, #tpu.memory_space<vmem>>, vector<2x4x4x384xbf16>
    %9 = arith.extf %8 : vector<2x4x4x384xbf16> to vector<2x4x4x384xf32>
    %10 = arith.maximumf %7, %9 : vector<2x4x4x384xf32>
    %c0_13 = arith.constant 0 : index
    %c1_14 = arith.constant 1 : index
    %c1_15 = arith.constant 1 : index
    %c0_16 = arith.constant 0 : index
    %11 = vector.load %arg1[%c0_13, %c1_14, %c1_15, %c0_16] : memref<2x6x6x384xbf16, #tpu.memory_space<vmem>>, vector<2x4x4x384xbf16>
    %12 = arith.extf %11 : vector<2x4x4x384xbf16> to vector<2x4x4x384xf32>
    %13 = arith.maximumf %10, %12 : vector<2x4x4x384xf32>
    %c0_17 = arith.constant 0 : index
    %c1_18 = arith.constant 1 : index
    %c2_19 = arith.constant 2 : index
    %c0_20 = arith.constant 0 : index
    %14 = vector.load %arg1[%c0_17, %c1_18, %c2_19, %c0_20] : memref<2x6x6x384xbf16, #tpu.memory_space<vmem>>, vector<2x4x4x384xbf16>
    %15 = arith.extf %14 : vector<2x4x4x384xbf16> to vector<2x4x4x384xf32>
    %16 = arith.maximumf %13, %15 : vector<2x4x4x384xf32>
    %c0_21 = arith.constant 0 : index
    %c2_22 = arith.constant 2 : index
    %c0_23 = arith.constant 0 : index
    %c0_24 = arith.constant 0 : index
    %17 = vector.load %arg1[%c0_21, %c2_22, %c0_23, %c0_24] : memref<2x6x6x384xbf16, #tpu.memory_space<vmem>>, vector<2x4x4x384xbf16>
    %18 = arith.extf %17 : vector<2x4x4x384xbf16> to vector<2x4x4x384xf32>
    %19 = arith.maximumf %16, %18 : vector<2x4x4x384xf32>
    %c0_25 = arith.constant 0 : index
    %c2_26 = arith.constant 2 : index
    %c1_27 = arith.constant 1 : index
    %c0_28 = arith.constant 0 : index
    %20 = vector.load %arg1[%c0_25, %c2_26, %c1_27, %c0_28] : memref<2x6x6x384xbf16, #tpu.memory_space<vmem>>, vector<2x4x4x384xbf16>
    %21 = arith.extf %20 : vector<2x4x4x384xbf16> to vector<2x4x4x384xf32>
    %22 = arith.maximumf %19, %21 : vector<2x4x4x384xf32>
    %c0_29 = arith.constant 0 : index
    %c2_30 = arith.constant 2 : index
    %c2_31 = arith.constant 2 : index
    %c0_32 = arith.constant 0 : index
    %23 = vector.load %arg1[%c0_29, %c2_30, %c2_31, %c0_32] : memref<2x6x6x384xbf16, #tpu.memory_space<vmem>>, vector<2x4x4x384xbf16>
    %24 = arith.extf %23 : vector<2x4x4x384xbf16> to vector<2x4x4x384xf32>
    %25 = arith.maximumf %22, %24 : vector<2x4x4x384xf32>
    %26 = arith.truncf %25 : vector<2x4x4x384xf32> to vector<2x4x4x384xbf16>
    %c0_33 = arith.constant 0 : index
    %c0_34 = arith.constant 0 : index
    %c0_35 = arith.constant 0 : index
    %c0_36 = arith.constant 0 : index
    %27 = vector.load %arg2[%c0_33, %c0_34, %c0_35, %c0_36] : memref<2x4x4x384xbf16, #tpu.memory_space<vmem>>, vector<2x4x4x384xbf16>
    tpu.vector_store %arg2[%c0_33, %c0_34, %c0_35, %c0_36], %26 {strides = array<i32>} : memref<2x4x4x384xbf16, #tpu.memory_space<vmem>>, vector<2x4x4x384xbf16>,
    return
  }
  func.func @transform_0(%arg0: i32) -> (i32, i32, i32, i32) {
    %c0_i32 = arith.constant 0 : i32
    %c0_i32_0 = arith.constant 0 : i32
    %c0_i32_1 = arith.constant 0 : i32
    %c0_i32_2 = arith.constant 0 : i32
    %c0_i32_3 = arith.constant 0 : i32
    return %c0_i32, %c0_i32_0, %c0_i32_1, %c0_i32_2 : i32, i32, i32, i32
  }
  func.func @transform_1(%arg0: i32) -> (i32, i32, i32, i32) {
    %c0_i32 = arith.constant 0 : i32
    %c0_i32_0 = arith.constant 0 : i32
    %c0_i32_1 = arith.constant 0 : i32
    %c0_i32_2 = arith.constant 0 : i32
    %c0_i32_3 = arith.constant 0 : i32
    return %c0_i32, %c0_i32_0, %c0_i32_1, %c0_i32_2 : i32, i32, i32, i32
  }
}

module attributes {stable_mosaic.version = 11 : i64} {
  func.func @_avgpool_fc_kernel(%arg0: i32, %arg1: memref<8x2x2x384xbf16, #tpu.memory_space<vmem>>, %arg2: memref<384x128xbf16, #tpu.memory_space<vmem>>, %arg3: memref<1x128xf32, #tpu.memory_space<vmem>>, %arg4: memref<8x128xf32, #tpu.memory_space<vmem>>) attributes {dimension_semantics = [#tpu.dimension_semantics<arbitrary>], iteration_bounds = array<i64: 1>, scalar_prefetch = 0 : i64, scratch_operands = 0 : i64, tpu.core_type = #tpu.core_type<tc>, window_params = [{pipeline_mode = #tpu.pipeline_mode<synchronous>, transform_indices = @transform_0, window_bounds = array<i64: 8, 2, 2, 384>}, {pipeline_mode = #tpu.pipeline_mode<synchronous>, transform_indices = @transform_1, window_bounds = array<i64: 384, 128>}, {pipeline_mode = #tpu.pipeline_mode<synchronous>, transform_indices = @transform_2, window_bounds = array<i64: 1, 128>}, {pipeline_mode = #tpu.pipeline_mode<synchronous>, transform_indices = @transform_3, window_bounds = array<i64: 8, 128>}]} {
    %cst = arith.constant 0.000000e+00 : f32
    %0 = vector.broadcast %cst : f32 to vector<8x384xf32>
    %c0 = arith.constant 0 : index
    %c0_0 = arith.constant 0 : index
    %c0_1 = arith.constant 0 : index
    %c0_2 = arith.constant 0 : index
    %1 = vector.load %arg1[%c0, %c0_0, %c0_1, %c0_2] : memref<8x2x2x384xbf16, #tpu.memory_space<vmem>>, vector<8x1x1x384xbf16>
    %2 = vector.shape_cast %1 : vector<8x1x1x384xbf16> to vector<8x384xbf16>
    %3 = arith.extf %2 : vector<8x384xbf16> to vector<8x384xf32>
    %4 = arith.addf %0, %3 : vector<8x384xf32>
    %c0_3 = arith.constant 0 : index
    %c0_4 = arith.constant 0 : index
    %c1 = arith.constant 1 : index
    %c0_5 = arith.constant 0 : index
    %5 = vector.load %arg1[%c0_3, %c0_4, %c1, %c0_5] : memref<8x2x2x384xbf16, #tpu.memory_space<vmem>>, vector<8x1x1x384xbf16>
    %6 = vector.shape_cast %5 : vector<8x1x1x384xbf16> to vector<8x384xbf16>
    %7 = arith.extf %6 : vector<8x384xbf16> to vector<8x384xf32>
    %8 = arith.addf %4, %7 : vector<8x384xf32>
    %c0_6 = arith.constant 0 : index
    %c1_7 = arith.constant 1 : index
    %c0_8 = arith.constant 0 : index
    %c0_9 = arith.constant 0 : index
    %9 = vector.load %arg1[%c0_6, %c1_7, %c0_8, %c0_9] : memref<8x2x2x384xbf16, #tpu.memory_space<vmem>>, vector<8x1x1x384xbf16>
    %10 = vector.shape_cast %9 : vector<8x1x1x384xbf16> to vector<8x384xbf16>
    %11 = arith.extf %10 : vector<8x384xbf16> to vector<8x384xf32>
    %12 = arith.addf %8, %11 : vector<8x384xf32>
    %c0_10 = arith.constant 0 : index
    %c1_11 = arith.constant 1 : index
    %c1_12 = arith.constant 1 : index
    %c0_13 = arith.constant 0 : index
    %13 = vector.load %arg1[%c0_10, %c1_11, %c1_12, %c0_13] : memref<8x2x2x384xbf16, #tpu.memory_space<vmem>>, vector<8x1x1x384xbf16>
    %14 = vector.shape_cast %13 : vector<8x1x1x384xbf16> to vector<8x384xbf16>
    %15 = arith.extf %14 : vector<8x384xbf16> to vector<8x384xf32>
    %16 = arith.addf %12, %15 : vector<8x384xf32>
    %cst_14 = arith.constant 2.500000e-01 : f32
    %17 = vector.broadcast %cst_14 : f32 to vector<8x384xf32>
    %18 = arith.mulf %16, %17 : vector<8x384xf32>
    %19 = arith.truncf %18 : vector<8x384xf32> to vector<8x384xbf16>
    %c0_15 = arith.constant 0 : index
    %c0_16 = arith.constant 0 : index
    %20 = vector.load %arg2[%c0_15, %c0_16] : memref<384x128xbf16, #tpu.memory_space<vmem>>, vector<384x128xbf16>
    %cst_17 = arith.constant dense<0.000000e+00> : vector<8x128xf32>
    %21 = tpu.matmul %19, %20, %cst_17 {dimension_numbers = #tpu.dot_dimension_numbers<[1], [0], [0], [1], [0, 0, 1, 1], [], []>} : vector<8x384xbf16>, vector<384x128xbf16>, vector<8x128xf32> -> vector<8x128xf32>
    %c0_18 = arith.constant 0 : index
    %c0_19 = arith.constant 0 : index
    %22 = vector.load %arg3[%c0_18, %c0_19] : memref<1x128xf32, #tpu.memory_space<vmem>>, vector<1x128xf32>
    %23 = vector.broadcast %22 : vector<1x128xf32> to vector<8x128xf32>
    %24 = arith.addf %21, %23 : vector<8x128xf32>
    %c0_20 = arith.constant 0 : index
    %c0_21 = arith.constant 0 : index
    %25 = vector.load %arg4[%c0_20, %c0_21] : memref<8x128xf32, #tpu.memory_space<vmem>>, vector<8x128xf32>
    tpu.vector_store %arg4[%c0_20, %c0_21], %24 {strides = array<i32>} : memref<8x128xf32, #tpu.memory_space<vmem>>, vector<8x128xf32>,
    return
  }
  func.func @transform_0(%arg0: i32) -> (i32, i32, i32, i32) {
    %c0_i32 = arith.constant 0 : i32
    %c0_i32_0 = arith.constant 0 : i32
    %c0_i32_1 = arith.constant 0 : i32
    %c0_i32_2 = arith.constant 0 : i32
    %c0_i32_3 = arith.constant 0 : i32
    return %c0_i32, %c0_i32_0, %c0_i32_1, %c0_i32_2 : i32, i32, i32, i32
  }
  func.func @transform_1(%arg0: i32) -> (i32, i32) {
    %c0_i32 = arith.constant 0 : i32
    %c0_i32_0 = arith.constant 0 : i32
    %c0_i32_1 = arith.constant 0 : i32
    return %c0_i32, %c0_i32_0 : i32, i32
  }
  func.func @transform_2(%arg0: i32) -> (i32, i32) {
    %c0_i32 = arith.constant 0 : i32
    %c0_i32_0 = arith.constant 0 : i32
    %c0_i32_1 = arith.constant 0 : i32
    return %c0_i32, %c0_i32_0 : i32, i32
  }
  func.func @transform_3(%arg0: i32) -> (i32, i32) {
    %c0_i32 = arith.constant 0 : i32
    %c0_i32_0 = arith.constant 0 : i32
    %c0_i32_1 = arith.constant 0 : i32
    return %c0_i32, %c0_i32_0 : i32, i32
  }
}

</mosaic_0001>

<bundles_post_ra>
// kernel: inception_net_forward.15
= control target key start
LH: loop header
LB: loop body
LE: loop exit
PB: predicated region body
PF: predicated region fallthrough
CT: control target
= control target key end

     0   :  { %s1431_s15 = smov 0   ;;  %s1433_s16 = smov 0   ;;  %s1618_s0 = inlined_call_operand.vmem [shape: bf16[400,256], index: 0, kind: input, shape index: {}]   ;;  %s1619_s1 = inlined_call_operand.vmem [shape: bf16[256,128], index: 1, kind: input, shape index: {}]   ;;  %s1620_s2 = inlined_call_operand.vmem [shape: f32[1,128], index: 2, kind: input, shape index: {}]   ;;  %s1621_s3 = inlined_call_operand.vmem [shape: f32[1,128], index: 3, kind: input, shape index: {}]   ;;  %s1622_s4 = inlined_call_operand.vmem [shape: bf16[400,128], index: 4, kind: output, shape index: {}]  }
   0x1   :  { %s1435_s17 = smov 0  }
   0x2 LB: > { %s26_s18 = sadd.s32 1, %s1400_s16  ;;  %p1022_p0 = scmp.ge.s32.totalorder %s1404_s17, 1  ;;  %s1404_s17 = sphi %s1435_s17, %s14_s17   ;;  %s1400_s16 = sphi %s1433_s16, %s1624_s16   ;;  %s1396_s15 = sphi %s1431_s15, %s1623_s15  }
   0x3   : > { %p28_p1 = scmp.ge.s32.totalorder %s26_s18, 2  ;;  %p203_p2 = scmp.lt.s32.totalorder %s1404_s17, 3 }
   0x5   : > { %s1626_s18 = smov (%p28_p1, %s26_s18), 0  ;;  %p204_p3 = pnand %p1022_p0, %p203_p2 }
   0x6   : > { %s243_s21 = smul.u32 (!%p204_p3), 25, %s1396_s15 }
   0x7   : > { %207 = sbr.rel (%p204_p3) target bundleno = 303 (0x12f), region = 36 }
   0x8   : > { %p244_p4 = scmp.lt.s32.totalorder (!%p204_p3), %s243_s21, 49 }
   0xc   : > { %v1328_v0 = vld [vmem:[%s1619_s1 + $0x78] sm:$0xff]   ;;  %v1330_v2 = vld [vmem:[%s1619_s1 + $0x70] sm:$0xff]   ;;  %v1332_v4 = vld [vmem:[%s1619_s1 + $0x68] sm:$0xff]   ;;  %s1628_s21 = smov (!%p244_p4, %s243_s21), 49 }
   0xd   : > { %v1329_v1 = vld [vmem:[%s1619_s1 + $0x38] sm:$0xff]   ;;  %1194 = vmatprep.subr.bf16.mxu0 %v1328_v0  ;;  %1288 = vmatprep.subr.bf16.mxu1 %v1328_v0  ;;  %v1331_v3 = vld [vmem:[%s1619_s1 + $0x30] sm:$0xff]   ;;  %v1333_v5 = vld [vmem:[%s1619_s1 + $0x28] sm:$0xff]   ;;  %s1097_s10 = sshll.u32 %s1628_s21, 3  ;;  %s1025_s12 = sshll.u32 %s1628_s21, 2 }
   0xe   : > { %1195 = vmatpush3.bf16.msra.mxu0 %v1329_v1  ;;  %1296 = vmatpush3.bf16.msra.mxu1 %v1329_v1  ;;  %v1334_v6 = vld [vmem:[%s1619_s1 + $0x60] sm:$0xff]   ;;  %v1336_v8 = vld [vmem:[%s1619_s1 + $0x58] sm:$0xff]   ;;  %s1482_s15 = scalar_lea.vmem %s1618_s0, %s1097_s10  ;;  %v1338_v10 = vld [vmem:[%s1619_s1 + $0x50] sm:$0xff]  }
   0xf   : > { %1196 = vmatprep.subr.bf16.mxu0 %v1330_v2  ;;  %1289 = vmatprep.subr.bf16.mxu1 %v1330_v2  ;;  %v1335_v7 = vld [vmem:[%s1619_s1 + $0x20] sm:$0xff]   ;;  %v1337_v9 = vld [vmem:[%s1619_s1 + $0x18] sm:$0xff]   ;;  %v1339_v13 = vld [vmem:[%s1619_s1 + $0x10] sm:$0xff]  }
  0x10   : > { %v1346_v11 = vld [vmem:[%s1482_s15 + $0x4] ss:$8 sps:$4 sm:$0xff]   ;;  %v1349_v12 = vld [vmem:[%s1482_s15 + $0x74] ss:$8 sps:$4 sm:$0xff]   ;;  %v1344_v18 = vld [vmem:[%s1482_s15] ss:$8 sps:$4 sm:$0xff]  }
  0x11   : > { %v1340_v14 = vld [vmem:[%s1619_s1 + $0x48] sm:$0xff]   ;;  %582 = vmatprep.mubr.bf16.mxu0 %v1346_v11  ;;  %638 = vmatprep.mubr.bf16.mxu1 %v1349_v12  ;;  %v1342_v16 = vld [vmem:[%s1619_s1 + $0x40] sm:$0xff]   ;;  %v1347_v19 = vld [vmem:[%s1482_s15 + $0x70] ss:$8 sps:$4 sm:$0xff]  }
  0x12   : > { %1197 = vmatpush3.bf16.msra.mxu0 %v1331_v3  ;;  %1297 = vmatpush3.bf16.msra.mxu1 %v1331_v3  ;;  %v1341_v15 = vld [vmem:[%s1619_s1 + $0x8] sm:$0xff]   ;;  %v1343_v17 = vld [vmem:[%s1619_s1] sm:$0xff]   ;;  %v1350_v20 = vld [vmem:[%s1482_s15 + $0x14] ss:$8 sps:$4 sm:$0xff]  }
  0x13   : > { %1198 = vmatprep.subr.bf16.mxu0 %v1332_v4  ;;  %1290 = vmatprep.subr.bf16.mxu1 %v1332_v4  ;;  %v1353_v21 = vld [vmem:[%s1482_s15 + $0x84] ss:$8 sps:$4 sm:$0xff]   ;;  %v1352_v22 = vld [vmem:[%s1482_s15 + $0x10] ss:$8 sps:$4 sm:$0xff]   ;;  %v1355_v23 = vld [vmem:[%s1482_s15 + $0x80] ss:$8 sps:$4 sm:$0xff]  }
  0x14   : > { %v1356_v24 = vld [vmem:[%s1482_s15 + $0x24] ss:$8 sps:$4 sm:$0xff]   ;;  %v1359_v25 = vld [vmem:[%s1482_s15 + $0x94] ss:$8 sps:$4 sm:$0xff]   ;;  %v1358_v26 = vld [vmem:[%s1482_s15 + $0x20] ss:$8 sps:$4 sm:$0xff]  }
  0x15   : > { %v1361_v27 = vld [vmem:[%s1482_s15 + $0x90] ss:$8 sps:$4 sm:$0xff]   ;;  %v1362_v28 = vld [vmem:[%s1482_s15 + $0x34] ss:$8 sps:$4 sm:$0xff]   ;;  %v1365_v29 = vld [vmem:[%s1482_s15 + $0xa4] ss:$8 sps:$4 sm:$0xff]  }
  0x16   : > { %1199 = vmatpush3.bf16.msra.mxu0 %v1333_v5  ;;  %1298 = vmatpush3.bf16.msra.mxu1 %v1333_v5  ;;  %v1364_v30 = vld [vmem:[%s1482_s15 + $0x30] ss:$8 sps:$4 sm:$0xff]   ;;  %v1367_v31 = vld [vmem:[%s1482_s15 + $0xa0] ss:$8 sps:$4 sm:$0xff]   ;;  %v1368_v32 = vld [vmem:[%s1482_s15 + $0x44] ss:$8 sps:$4 sm:$0xff]  }
  0x17   : > { %1200 = vmatprep.subr.bf16.mxu0 %v1334_v6  ;;  %1291 = vmatprep.subr.bf16.mxu1 %v1334_v6  ;;  %v1371_v33 = vld [vmem:[%s1482_s15 + $0xb4] ss:$8 sps:$4 sm:$0xff]   ;;  %v294_v34 = vld [vmem:[%s1482_s15 + $0xc0] sm:$0xff]  ;;  %v1373_v36 = vld [vmem:[%s1482_s15 + $0xb0] ss:$8 sps:$4 sm:$0xff]  }
  0x18   : > { %v1370_v35 = vld [vmem:[%s1482_s15 + $0x40] ss:$8 sps:$4 sm:$0xff]   ;;  %v1374_v37 = vld [vmem:[%s1482_s15 + $0x54] ss:$8 sps:$4 sm:$0xff]   ;;  %v1051_v38 = vcombine.high %v294_v34, %v294_v34  ;;  %v1376_v39 = vld [vmem:[%s1482_s15 + $0x50] ss:$8 sps:$4 sm:$0xff]   ;;  %v1050_v40 = vcombine.low %v294_v34, %v294_v34 }
  0x19   : > { %v1379_v41 = vld [vmem:[%s1482_s15 + $0x64] ss:$8 sps:$4 sm:$0xff]   ;;  %v1381_v42 = vld [vmem:[%s1482_s15 + $0x60] ss:$8 sps:$4 sm:$0xff]   ;;  %s1554_s15 = scalar_lea.vmem %s1622_s4, %s1025_s12 }
  0x1a   : > { %1201 = vmatpush3.bf16.msra.mxu0 %v1335_v7  ;;  %1299 = vmatpush3.bf16.msra.mxu1 %v1335_v7  ;;  %v1533_v46 = vld [vmem:[%s1620_s2] ss:$0 sm:$0xff] }
  0x1b   : > { %1202 = vmatprep.subr.bf16.mxu0 %v1336_v8  ;;  %1292 = vmatprep.subr.bf16.mxu1 %v1336_v8  ;;  %v1539_v53 = vld [vmem:[%s1621_s3] ss:$0 sm:$0xff] }
  0x1e   : > { %1203 = vmatpush3.bf16.msra.mxu0 %v1337_v9  ;;  %1300 = vmatpush3.bf16.msra.mxu1 %v1337_v9 }
  0x1f   : > { %1204 = vmatprep.subr.bf16.mxu0 %v1338_v10  ;;  %1293 = vmatprep.subr.bf16.mxu1 %v1338_v10 }
  0x22   : > { %1205 = vmatpush3.bf16.msra.mxu0 %v1339_v13  ;;  %1301 = vmatpush3.bf16.msra.mxu1 %v1339_v13 }
  0x23   : > { %1206 = vmatprep.subr.bf16.mxu0 %v1340_v14  ;;  %1294 = vmatprep.subr.bf16.mxu1 %v1340_v14 }
  0x26   : > { %1207 = vmatpush3.bf16.msra.mxu0 %v1341_v15  ;;  %1302 = vmatpush3.bf16.msra.mxu1 %v1341_v15 }
  0x27   : > { %1208 = vmatprep.subr.bf16.mxu0 %v1342_v16  ;;  %1295 = vmatprep.subr.bf16.mxu1 %v1342_v16 }
  0x2a   : > { %1209 = vmatpush3.bf16.msra.mxu0 %v1343_v17  ;;  %1303 = vmatpush3.bf16.msra.mxu1 %v1343_v17 }
  0x2d   : > { %583 = vmatmul.mubr.bf16.vlgmr.msra.gmra.mxu0 %v1344_v18  ;;  %639 = vmatmul.mubr.bf16.vlgmr.msra.gmra.mxu1 %v1347_v19 }
  0x2e   : > { %590 = vmatprep.mubr.bf16.mxu0 %v1350_v20  ;;  %646 = vmatprep.mubr.bf16.mxu1 %v1353_v21 }
  0x35   : > { %591 = vmatmul.mubr.bf16.gmra.mxu0 %v1352_v22  ;;  %647 = vmatmul.mubr.bf16.gmra.mxu1 %v1355_v23 }
  0x36   : > { %598 = vmatprep.mubr.bf16.mxu0 %v1356_v24  ;;  %654 = vmatprep.mubr.bf16.mxu1 %v1359_v25 }
  0x3d   : > { %599 = vmatmul.mubr.bf16.gmra.mxu0 %v1358_v26  ;;  %655 = vmatmul.mubr.bf16.gmra.mxu1 %v1361_v27 }
  0x3e   : > { %606 = vmatprep.mubr.bf16.mxu0 %v1362_v28  ;;  %662 = vmatprep.mubr.bf16.mxu1 %v1365_v29 }
  0x45   : > { %607 = vmatmul.mubr.bf16.gmra.mxu0 %v1364_v30  ;;  %663 = vmatmul.mubr.bf16.gmra.mxu1 %v1367_v31 }
  0x46   : > { %614 = vmatprep.mubr.bf16.mxu0 %v1368_v32  ;;  %670 = vmatprep.mubr.bf16.mxu1 %v1371_v33 }
  0x4d   : > { %615 = vmatmul.mubr.bf16.gmra.mxu0 %v1370_v35  ;;  %671 = vmatmul.mubr.bf16.gmra.mxu1 %v1373_v36 }
  0x4e   : > { %622 = vmatprep.mubr.bf16.mxu0 %v1374_v37  ;;  %678 = vmatprep.mubr.bf16.mxu1 %v1051_v38 }
  0x55   : > { %623 = vmatmul.mubr.bf16.gmra.mxu0 %v1376_v39  ;;  %679 = vmatmul.mubr.bf16.gmra.mxu1 %v1050_v40 }
  0x56   : > { %630 = vmatprep.mubr.bf16.mxu0 %v1379_v41 }
  0x5d   : > { %631 = vmatmul.mubr.bf16.gmra.mxu0 %v1381_v42 }
  0xed   : > { %v1210_v43 = vpop.f32.mrf.mxu0  ;;  %v1252_v44 = vpop.f32.mrf.mxu1 }
  0xef   : > { %v1211_v45 = vpop.f32.mrf.mxu0  ;;  %v1253_v47 = vpop.f32.mrf.mxu1 }
  0xf0   : > { %v1212_v48 = vadd.f32 %v1211_v45, %v1210_v43  ;;  %v1254_v49 = vadd.f32 %v1253_v47, %v1252_v44 }
  0xf1   : > { %v1213_v50 = vpop.f32.mrf.mxu0  ;;  %v1255_v51 = vpop.f32.mrf.mxu1 }
  0xf2   : > { %v693_v52 = vmul.f32 %v1212_v48, %v1533_v46  ;;  %v707_v54 = vmul.f32 %v1254_v49, %v1533_v46 }
  0xf3   : > { %v1214_v55 = vpop.f32.mrf.mxu0  ;;  %v1256_v56 = vpop.f32.mrf.mxu1 }
  0xf4   : > { %v1215_v57 = vadd.f32 %v1214_v55, %v1213_v50  ;;  %v739_v58 = vadd.f32 %v1539_v53, %v707_v54  ;;  %v1257_v59 = vadd.f32 %v1256_v56, %v1255_v51  ;;  %v725_v60 = vadd.f32 %v1539_v53, %v693_v52 }
  0xf5   : > { %v1216_v61 = vpop.f32.mrf.mxu0  ;;  %v1258_v62 = vpop.f32.mrf.mxu1 }
  0xf6   : > { %v694_v63 = vmul.f32 %v1215_v57, %v1533_v46  ;;  %v708_v0 = vmul.f32 %v1257_v59, %v1533_v46  ;;  %v764_v1 = vmax.f32 %v739_v58, 0.0  ;;  %v750_v8 = vmax.f32 %v725_v60, 0.0 }
  0xf7   : > { %v1217_v2 = vpop.f32.mrf.mxu0  ;;  %v1259_v3 = vpop.f32.mrf.mxu1 }
  0xf8   : > { %v726_v4 = vadd.f32 %v1539_v53, %v694_v63  ;;  %v1218_v5 = vadd.f32 %v1217_v2, %v1216_v61  ;;  %v740_v6 = vadd.f32 %v1539_v53, %v708_v0  ;;  %v1260_v7 = vadd.f32 %v1259_v3, %v1258_v62 }
  0xf9   : > { %v1219_v9 = vpop.f32.mrf.mxu0  ;;  %v1261_v10 = vpop.f32.mrf.mxu1 }
  0xfa   : > { %v751_v11 = vmax.f32 %v726_v4, 0.0  ;;  %v695_v12 = vmul.f32 %v1218_v5, %v1533_v46  ;;  %v765_v13 = vmax.f32 %v740_v6, 0.0  ;;  %v709_v14 = vmul.f32 %v1260_v7, %v1533_v46 }
  0xfb   : > { %v1220_v15 = vpop.f32.mrf.mxu0  ;;  %v1262_v16 = vpop.f32.mrf.mxu1 }
  0xfc   : > { %v1126_v17 = vpack.c.bf16 %v751_v11, %v750_v8  ;;  %v1161_v18 = vpack.c.bf16 %v765_v13, %v764_v1  ;;  %v1221_v19 = vadd.f32 %v1220_v15, %v1219_v9  ;;  %v741_v21 = vadd.f32 %v1539_v53, %v709_v14 }
  0xfd   : > { %v1222_v20 = vpop.f32.mrf.mxu0  ;;  %v1263_v22 = vadd.f32 %v1262_v16, %v1261_v10  ;;  %v1264_v23 = vpop.f32.mrf.mxu1  ;;  %v727_v24 = vadd.f32 %v1539_v53, %v695_v12 }
  0xfe   : > { %1127 = vst [vmem:[%s1554_s15] sm:$0xff] %v1126_v17   ;;  %1189 = vst [vmem:[%s1554_s15 + $0x38] sm:$0xff] %v1161_v18   ;;  %v696_v25 = vmul.f32 %v1221_v19, %v1533_v46  ;;  %v766_v32 = vmax.f32 %v741_v21, 0.0 }
  0xff   : > { %v1223_v26 = vpop.f32.mrf.mxu0  ;;  %v710_v27 = vmul.f32 %v1263_v22, %v1533_v46  ;;  %v1265_v28 = vpop.f32.mrf.mxu1  ;;  %v752_v36 = vmax.f32 %v727_v24, 0.0 }
 0x100   : > { %v728_v29 = vadd.f32 %v1539_v53, %v696_v25  ;;  %v1224_v30 = vadd.f32 %v1223_v26, %v1222_v20  ;;  %v1266_v31 = vadd.f32 %v1265_v28, %v1264_v23 }
 0x101   : > { %v1225_v33 = vpop.f32.mrf.mxu0  ;;  %v742_v34 = vadd.f32 %v1539_v53, %v710_v27  ;;  %v1267_v35 = vpop.f32.mrf.mxu1 }
 0x102   : > { %v753_v37 = vmax.f32 %v728_v29, 0.0  ;;  %v697_v38 = vmul.f32 %v1224_v30, %v1533_v46  ;;  %v711_v39 = vmul.f32 %v1266_v31, %v1533_v46 }
 0x103   : > { %v767_v40 = vmax.f32 %v742_v34, 0.0  ;;  %v1226_v41 = vpop.f32.mrf.mxu0  ;;  %v1268_v42 = vpop.f32.mrf.mxu1 }
 0x104   : > { %v1131_v43 = vpack.c.bf16 %v753_v37, %v752_v36  ;;  %v1227_v44 = vadd.f32 %v1226_v41, %v1225_v33  ;;  %v743_v48 = vadd.f32 %v1539_v53, %v711_v39  ;;  %v1269_v49 = vadd.f32 %v1268_v42, %v1267_v35 }
 0x105   : > { %v1166_v45 = vpack.c.bf16 %v767_v40, %v766_v32  ;;  %v1228_v47 = vpop.f32.mrf.mxu0  ;;  %v1270_v50 = vpop.f32.mrf.mxu1  ;;  %v729_v51 = vadd.f32 %v1539_v53, %v697_v38 }
 0x106   : > { %1183 = vst [vmem:[%s1554_s15 + $0x8] sm:$0xff] %v1131_v43   ;;  %v698_v52 = vmul.f32 %v1227_v44, %v1533_v46  ;;  %v712_v55 = vmul.f32 %v1269_v49, %v1533_v46  ;;  %v768_v60 = vmax.f32 %v743_v48, 0.0 }
 0x107   : > { %1190 = vst [vmem:[%s1554_s15 + $0x40] sm:$0xff] %v1166_v45   ;;  %v1229_v54 = vpop.f32.mrf.mxu0  ;;  %v1271_v56 = vpop.f32.mrf.mxu1  ;;  %v754_v0 = vmax.f32 %v729_v51, 0.0 }
 0x108   : > { %v730_v57 = vadd.f32 %v1539_v53, %v698_v52  ;;  %v1230_v58 = vadd.f32 %v1229_v54, %v1228_v47  ;;  %v1272_v59 = vadd.f32 %v1271_v56, %v1270_v50  ;;  %v744_v62 = vadd.f32 %v1539_v53, %v712_v55 }
 0x109   : > { %v1231_v61 = vpop.f32.mrf.mxu0  ;;  %v1273_v63 = vpop.f32.mrf.mxu1 }
 0x10a   : > { %v755_v1 = vmax.f32 %v730_v57, 0.0  ;;  %v699_v2 = vmul.f32 %v1230_v58, %v1533_v46  ;;  %v713_v3 = vmul.f32 %v1272_v59, %v1533_v46  ;;  %v769_v4 = vmax.f32 %v744_v62, 0.0 }
 0x10b   : > { %v1232_v5 = vpop.f32.mrf.mxu0  ;;  %v1274_v6 = vpop.f32.mrf.mxu1 }
 0x10c   : > { %v1136_v7 = vpack.c.bf16 %v755_v1, %v754_v0  ;;  %v1233_v8 = vadd.f32 %v1232_v5, %v1231_v61  ;;  %v1171_v9 = vpack.c.bf16 %v769_v4, %v768_v60  ;;  %v745_v11 = vadd.f32 %v1539_v53, %v713_v3 }
 0x10d   : > { %v1234_v10 = vpop.f32.mrf.mxu0  ;;  %v1275_v12 = vadd.f32 %v1274_v6, %v1273_v63  ;;  %v1276_v13 = vpop.f32.mrf.mxu1  ;;  %v731_v14 = vadd.f32 %v1539_v53, %v699_v2 }
 0x10e   : > { %1184 = vst [vmem:[%s1554_s15 + $0x10] sm:$0xff] %v1136_v7   ;;  %v700_v15 = vmul.f32 %v1233_v8, %v1533_v46  ;;  %1191 = vst [vmem:[%s1554_s15 + $0x48] sm:$0xff] %v1171_v9   ;;  %v770_v22 = vmax.f32 %v745_v11, 0.0 }
 0x10f   : > { %v1235_v16 = vpop.f32.mrf.mxu0  ;;  %v714_v17 = vmul.f32 %v1275_v12, %v1533_v46  ;;  %v1277_v18 = vpop.f32.mrf.mxu1  ;;  %v756_v26 = vmax.f32 %v731_v14, 0.0 }
 0x110   : > { %v732_v19 = vadd.f32 %v1539_v53, %v700_v15  ;;  %v1236_v20 = vadd.f32 %v1235_v16, %v1234_v10  ;;  %v1278_v21 = vadd.f32 %v1277_v18, %v1276_v13 }
 0x111   : > { %v1237_v23 = vpop.f32.mrf.mxu0  ;;  %v746_v24 = vadd.f32 %v1539_v53, %v714_v17  ;;  %v1279_v25 = vpop.f32.mrf.mxu1 }
 0x112   : > { %v757_v27 = vmax.f32 %v732_v19, 0.0  ;;  %v701_v28 = vmul.f32 %v1236_v20, %v1533_v46  ;;  %v715_v29 = vmul.f32 %v1278_v21, %v1533_v46 }
 0x113   : > { %v771_v30 = vmax.f32 %v746_v24, 0.0  ;;  %v1238_v31 = vpop.f32.mrf.mxu0  ;;  %v1280_v32 = vpop.f32.mrf.mxu1 }
 0x114   : > { %v1141_v33 = vpack.c.bf16 %v757_v27, %v756_v26  ;;  %v1239_v34 = vadd.f32 %v1238_v31, %v1237_v23  ;;  %v747_v37 = vadd.f32 %v1539_v53, %v715_v29  ;;  %v1281_v38 = vadd.f32 %v1280_v32, %v1279_v25 }
 0x115   : > { %v1176_v35 = vpack.c.bf16 %v771_v30, %v770_v22  ;;  %v1240_v36 = vpop.f32.mrf.mxu0  ;;  %v1282_v39 = vpop.f32.mrf.mxu1  ;;  %v733_v40 = vadd.f32 %v1539_v53, %v701_v28 }
 0x116   : > { %1185 = vst [vmem:[%s1554_s15 + $0x18] sm:$0xff] %v1141_v33   ;;  %v702_v41 = vmul.f32 %v1239_v34, %v1533_v46  ;;  %v716_v43 = vmul.f32 %v1281_v38, %v1533_v46  ;;  %v772_v49 = vmax.f32 %v747_v37, 0.0 }
 0x117   : > { %1192 = vst [vmem:[%s1554_s15 + $0x50] sm:$0xff] %v1176_v35   ;;  %v1241_v42 = vpop.f32.mrf.mxu0  ;;  %v1283_v44 = vpop.f32.mrf.mxu1  ;;  %v758_v54 = vmax.f32 %v733_v40, 0.0 }
 0x118   : > { %v734_v45 = vadd.f32 %v1539_v53, %v702_v41  ;;  %v1242_v47 = vadd.f32 %v1241_v42, %v1240_v36  ;;  %v1284_v48 = vadd.f32 %v1283_v44, %v1282_v39  ;;  %v748_v51 = vadd.f32 %v1539_v53, %v716_v43 }
 0x119   : > { %v1243_v50 = vpop.f32.mrf.mxu0  ;;  %v1285_v52 = vpop.f32.mrf.mxu1 }
 0x11a   : > { %v759_v55 = vmax.f32 %v734_v45, 0.0  ;;  %v703_v56 = vmul.f32 %v1242_v47, %v1533_v46  ;;  %v717_v57 = vmul.f32 %v1284_v48, %v1533_v46  ;;  %v773_v58 = vmax.f32 %v748_v51, 0.0 }
 0x11b   : > { %v1244_v59 = vpop.f32.mrf.mxu0  ;;  %v1286_v60 = vpop.f32.mrf.mxu1 }
 0x11c   : > { %v1146_v61 = vpack.c.bf16 %v759_v55, %v758_v54  ;;  %v1245_v62 = vadd.f32 %v1244_v59, %v1243_v50  ;;  %v749_v63 = vadd.f32 %v1539_v53, %v717_v57  ;;  %v1181_v0 = vpack.c.bf16 %v773_v58, %v772_v49 }
 0x11d   : > { %v1246_v1 = vpop.f32.mrf.mxu0  ;;  %v735_v2 = vadd.f32 %v1539_v53, %v703_v56 }
 0x11e   : > { %1186 = vst [vmem:[%s1554_s15 + $0x20] sm:$0xff] %v1146_v61   ;;  %v704_v3 = vmul.f32 %v1245_v62, %v1533_v46  ;;  %v774_v4 = vmax.f32 %v749_v63, 0.0  ;;  %1193 = vst [vmem:[%s1554_s15 + $0x58] sm:$0xff] %v1181_v0  }
 0x11f   : > { %v1247_v5 = vpop.f32.mrf.mxu0  ;;  %v760_v10 = vmax.f32 %v735_v2, 0.0 }
 0x120   : > { %v736_v6 = vadd.f32 %v1539_v53, %v704_v3  ;;  %v1122_v7 = vpack.c.bf16 %v774_v4, %v774_v4  ;;  %v1248_v8 = vadd.f32 %v1247_v5, %v1246_v1 }
 0x121   : > { %v1249_v9 = vpop.f32.mrf.mxu0 }
 0x122   : > { %v761_v11 = vmax.f32 %v736_v6, 0.0  ;;  %900 = vst [vmem:[%s1554_s15 + $0x60] sm:$0xf] %v1122_v7  ;;  %v705_v12 = vmul.f32 %v1248_v8, %v1533_v46 }
 0x123   : > { %v1250_v13 = vpop.f32.mrf.mxu0 }
 0x124   : > { %v1151_v14 = vpack.c.bf16 %v761_v11, %v760_v10  ;;  %v1251_v15 = vadd.f32 %v1250_v13, %v1249_v9  ;;  %v737_v16 = vadd.f32 %v1539_v53, %v705_v12 }
 0x126   : > { %1187 = vst [vmem:[%s1554_s15 + $0x28] sm:$0xff] %v1151_v14   ;;  %v706_v17 = vmul.f32 %v1251_v15, %v1533_v46  ;;  %v762_v19 = vmax.f32 %v737_v16, 0.0 }
 0x128   : > { %v738_v18 = vadd.f32 %v1539_v53, %v706_v17 }
 0x12a   : > { %v763_v20 = vmax.f32 %v738_v18, 0.0 }
 0x12c   : > { %v1156_v21 = vpack.c.bf16 %v763_v20, %v762_v19 }
 0x12e   : > { %1188 = vst [vmem:[%s1554_s15 + $0x30] sm:$0xff] %v1156_v21  }
 0x12f PF: > { %s14_s17 = sadd.s32 1, %s1404_s17   ;;  %s1623_s15 = smov %s1400_s16 }
 0x130   : > { %p11_p5 = scmp.ge.s32.totalorder %s14_s17, 4   ;;  %s1624_s16 = smov %s1626_s18 }
 0x132   :  { %13 = sbr.rel (!%p11_p5) target bundleno = 2 (0x2), region = 75 }

// kernel: inception_net_forward.17
= control target key start
LH: loop header
LB: loop body
LE: loop exit
PB: predicated region body
PF: predicated region fallthrough
CT: control target
= control target key end

     0   :  { %s803_s15 = smov 0   ;;  %s805_s16 = smov 0   ;;  %s879_s0 = inlined_call_operand.vmem [shape: bf16[112,128], index: 0, kind: input, shape index: {}]   ;;  %s880_s1 = inlined_call_operand.vmem [shape: bf16[128,128], index: 1, kind: input, shape index: {}]   ;;  %s881_s2 = inlined_call_operand.vmem [shape: f32[1,128], index: 2, kind: input, shape index: {}]   ;;  %s882_s3 = inlined_call_operand.vmem [shape: f32[1,128], index: 3, kind: input, shape index: {}]   ;;  %s883_s4 = inlined_call_operand.vmem [shape: bf16[112,128], index: 4, kind: output, shape index: {}]  }
   0x1   :  { %s807_s17 = smov 0  }
   0x2 LB: > { %s26_s18 = sadd.s32 1, %s772_s16  ;;  %p616_p0 = scmp.ge.s32.totalorder %s776_s17, 1  ;;  %s776_s17 = sphi %s807_s17, %s14_s17   ;;  %s772_s16 = sphi %s805_s16, %s885_s16   ;;  %s768_s15 = sphi %s803_s15, %s884_s15  }
   0x3   : > { %p28_p1 = scmp.ge.s32.totalorder %s26_s18, 2  ;;  %p202_p2 = scmp.lt.s32.totalorder %s776_s17, 3 }
   0x5   : > { %s887_s18 = smov (%p28_p1, %s26_s18), 0  ;;  %p203_p3 = pnand %p616_p0, %p202_p2 }
   0x6   : > { %s241_s21 = smul.u32 (!%p203_p3), 7, %s768_s15 }
   0x7   : > { %206 = sbr.rel (%p203_p3) target bundleno = 253 (0xfd), region = 36 }
   0x8   : > { %p242_p4 = scmp.lt.s32.totalorder (!%p203_p3), %s241_s21, 13 }
   0xc   : > { %v742_v0 = vld [vmem:[%s880_s1 + $0x38] sm:$0xff]   ;;  %v743_v1 = vld [vmem:[%s880_s1 + $0x30] sm:$0xff]   ;;  %v744_v2 = vld [vmem:[%s880_s1 + $0x28] sm:$0xff]   ;;  %s889_s21 = smov (!%p242_p4, %s241_s21), 13 }
   0xd   : > { %678 = vmatprep.subr.bf16.mxu0 %v742_v0  ;;  %702 = vmatprep.subr.bf16.mxu1 %v742_v0  ;;  %s617_s26 = sshll.u32 %s889_s21, 2  ;;  %v745_v3 = vld [vmem:[%s880_s1 + $0x20] sm:$0xff]   ;;  %v746_v6 = vld [vmem:[%s880_s1 + $0x18] sm:$0xff]   ;;  %v747_v7 = vld [vmem:[%s880_s1 + $0x10] sm:$0xff]  }
   0xe   : > { %679 = vmatpush3.bf16.msra.mxu0 %v742_v0  ;;  %710 = vmatpush3.bf16.msra.mxu1 %v742_v0  ;;  %s841_s5 = scalar_lea.vmem %s879_s0, %s617_s26  ;;  %v748_v8 = vld [vmem:[%s880_s1 + $0x8] sm:$0xff]   ;;  %v749_v9 = vld [vmem:[%s880_s1] sm:$0xff]   ;;  %s264_s24 = scalar_lea.vmem %s883_s4, %s617_s26 }
   0xf   : > { %680 = vmatprep.subr.bf16.mxu0 %v743_v1  ;;  %703 = vmatprep.subr.bf16.mxu1 %v743_v1  ;;  %v750_v4 = vld [vmem:[%s841_s5] sm:$0xff]   ;;  %v751_v5 = vld [vmem:[%s841_s5 + $0x10] sm:$0xff]   ;;  %v752_v10 = vld [vmem:[%s841_s5 + $0x8] sm:$0xff]  }
  0x10   : > { %694 = vmatprep.mubr.bf16.mxu0 %v750_v4  ;;  %698 = vmatprep.mubr.bf16.mxu1 %v751_v5  ;;  %v753_v11 = vld [vmem:[%s841_s5 + $0x18] ss:$0 sps:$4 sm:$0xff]   ;;  %v631_v12 = vld [vmem:[%s881_s2] ss:$0 sm:$0xff] }
  0x11   : > { %v632_v14 = vld [vmem:[%s882_s3] ss:$0 sm:$0xff] }
  0x12   : > { %681 = vmatpush3.bf16.msra.mxu0 %v743_v1  ;;  %711 = vmatpush3.bf16.msra.mxu1 %v743_v1 }
  0x13   : > { %682 = vmatprep.subr.bf16.mxu0 %v744_v2  ;;  %704 = vmatprep.subr.bf16.mxu1 %v744_v2 }
  0x16   : > { %683 = vmatpush3.bf16.msra.mxu0 %v744_v2  ;;  %712 = vmatpush3.bf16.msra.mxu1 %v744_v2 }
  0x17   : > { %684 = vmatprep.subr.bf16.mxu0 %v745_v3  ;;  %705 = vmatprep.subr.bf16.mxu1 %v745_v3 }
  0x1a   : > { %685 = vmatpush3.bf16.msra.mxu0 %v745_v3  ;;  %713 = vmatpush3.bf16.msra.mxu1 %v745_v3 }
  0x1b   : > { %686 = vmatprep.subr.bf16.mxu0 %v746_v6  ;;  %706 = vmatprep.subr.bf16.mxu1 %v746_v6 }
  0x1e   : > { %687 = vmatpush3.bf16.msra.mxu0 %v746_v6  ;;  %714 = vmatpush3.bf16.msra.mxu1 %v746_v6 }
  0x1f   : > { %688 = vmatprep.subr.bf16.mxu0 %v747_v7  ;;  %707 = vmatprep.subr.bf16.mxu1 %v747_v7 }
  0x22   : > { %689 = vmatpush3.bf16.msra.mxu0 %v747_v7  ;;  %715 = vmatpush3.bf16.msra.mxu1 %v747_v7 }
  0x23   : > { %690 = vmatprep.subr.bf16.mxu0 %v748_v8  ;;  %708 = vmatprep.subr.bf16.mxu1 %v748_v8 }
  0x26   : > { %691 = vmatpush3.bf16.msra.mxu0 %v748_v8  ;;  %716 = vmatpush3.bf16.msra.mxu1 %v748_v8 }
  0x27   : > { %692 = vmatprep.subr.bf16.mxu0 %v749_v9  ;;  %709 = vmatprep.subr.bf16.mxu1 %v749_v9 }
  0x2a   : > { %693 = vmatpush3.bf16.msra.mxu0 %v749_v9  ;;  %717 = vmatpush3.bf16.msra.mxu1 %v749_v9 }
  0x2d   : > { %695 = vmatmul.mubr.bf16.vlgmr.msra.gmra.mxu0 %v752_v10  ;;  %699 = vmatmul.mubr.bf16.vlgmr.msra.gmra.mxu1 %v753_v11 }
  0xed   : > { %v696_v13 = vpop.f32.mrf.mxu0  ;;  %v700_v15 = vpop.f32.mrf.mxu1 }
  0xee   : > { %v437_v16 = vmul.f32 %v700_v15, %v631_v12  ;;  %v433_v17 = vmul.f32 %v696_v13, %v631_v12 }
  0xef   : > { %v394_v18 = vpop.f32.mrf.mxu0  ;;  %v410_v19 = vpop.f32.mrf.mxu1 }
  0xf0   : > { %v451_v20 = vadd.f32 %v632_v14, %v437_v16  ;;  %v431_v21 = vmul.f32 %v631_v12, %v394_v18  ;;  %v435_v22 = vmul.f32 %v631_v12, %v410_v19  ;;  %v447_v26 = vadd.f32 %v632_v14, %v433_v17 }
  0xf1   : > { %v697_v23 = vpop.f32.mrf.mxu0  ;;  %v701_v24 = vpop.f32.mrf.mxu1 }
  0xf2   : > { %v458_v25 = vmax.f32 %v451_v20, 0.0  ;;  %v434_v27 = vmul.f32 %v697_v23, %v631_v12  ;;  %v445_v31 = vadd.f32 %v632_v14, %v431_v21  ;;  %v449_v33 = vadd.f32 %v632_v14, %v435_v22 }
  0xf3   : > { %v397_v28 = vpop.f32.mrf.mxu0  ;;  %v413_v29 = vpop.f32.mrf.mxu1  ;;  %v454_v37 = vmax.f32 %v447_v26, 0.0 }
  0xf4   : > { %v648_v30 = vpack.c.bf16 %v458_v25, %v458_v25  ;;  %v432_v32 = vmul.f32 %v631_v12, %v397_v28  ;;  %v448_v34 = vadd.f32 %v632_v14, %v434_v27  ;;  %v436_v35 = vmul.f32 %v631_v12, %v413_v29 }
  0xf5   : > { %v452_v40 = vmax.f32 %v445_v31, 0.0  ;;  %v456_v42 = vmax.f32 %v449_v33, 0.0 }
  0xf6   : > { %494 = vst [vmem:[%s264_s24 + $0x18] sm:$0xf] %v648_v30  ;;  %v446_v36 = vadd.f32 %v632_v14, %v432_v32  ;;  %v455_v38 = vmax.f32 %v448_v34, 0.0  ;;  %v450_v39 = vadd.f32 %v632_v14, %v436_v35 }
  0xf8   : > { %v453_v41 = vmax.f32 %v446_v36, 0.0  ;;  %v657_v43 = vpack.c.bf16 %v455_v38, %v454_v37  ;;  %v457_v44 = vmax.f32 %v450_v39, 0.0 }
  0xfa   : > { %v652_v45 = vpack.c.bf16 %v453_v41, %v452_v40  ;;  %664 = vst [vmem:[%s264_s24 + $0x8] sm:$0xff] %v657_v43   ;;  %v662_v46 = vpack.c.bf16 %v457_v44, %v456_v42 }
  0xfc   : > { %653 = vst [vmem:[%s264_s24] sm:$0xff] %v652_v45   ;;  %665 = vst [vmem:[%s264_s24 + $0x10] sm:$0xff] %v662_v46  }
  0xfd PF: > { %s14_s17 = sadd.s32 1, %s776_s17   ;;  %s884_s15 = smov %s772_s16 }
  0xfe   : > { %p11_p5 = scmp.ge.s32.totalorder %s14_s17, 4   ;;  %s885_s16 = smov %s887_s18 }
 0x100   :  { %13 = sbr.rel (!%p11_p5) target bundleno = 2 (0x2), region = 75 }

// kernel: inception_net_forward.16
= control target key start
LH: loop header
LB: loop body
LE: loop exit
PB: predicated region body
PF: predicated region fallthrough
CT: control target
= control target key end

     0   :  { %s1461_s15 = smov 0   ;;  %s1463_s16 = smov 0   ;;  %s1647_s0 = inlined_call_operand.vmem [shape: bf16[112,640], index: 0, kind: input, shape index: {}]   ;;  %s1648_s1 = inlined_call_operand.vmem [shape: bf16[640,128], index: 1, kind: input, shape index: {}]   ;;  %s1649_s2 = inlined_call_operand.vmem [shape: f32[1,128], index: 2, kind: input, shape index: {}]   ;;  %s1650_s3 = inlined_call_operand.vmem [shape: f32[1,128], index: 3, kind: input, shape index: {}]   ;;  %s1651_s4 = inlined_call_operand.vmem [shape: bf16[112,128], index: 4, kind: output, shape index: {}]  }
   0x1   :  { %s1465_s17 = smov 0  }
   0x2 LB: > { %s26_s18 = sadd.s32 1, %s1430_s16  ;;  %p1091_p0 = scmp.ge.s32.totalorder %s1434_s17, 1  ;;  %s1434_s17 = sphi %s1465_s17, %s14_s17   ;;  %s1430_s16 = sphi %s1463_s16, %s1653_s16   ;;  %s1426_s15 = sphi %s1461_s15, %s1652_s15  }
   0x3   : > { %p28_p1 = scmp.ge.s32.totalorder %s26_s18, 2  ;;  %p203_p2 = scmp.lt.s32.totalorder %s1434_s17, 3 }
   0x5   : > { %s1655_s18 = smov (%p28_p1, %s26_s18), 0  ;;  %p204_p3 = pnand %p1091_p0, %p203_p2 }
   0x6   : > { %s243_s25 = smul.u32 (!%p204_p3), 7, %s1426_s15 }
   0x7   : > { %207 = sbr.rel (%p204_p3) target bundleno = 290 (0x122), region = 36 }
   0x8   : > { %p244_p4 = scmp.lt.s32.totalorder (!%p204_p3), %s243_s25, 13 }
   0xc   : > { %v1346_v0 = vld [vmem:[%s1648_s1 + $0x78] sm:$0xff]   ;;  %v1350_v4 = vld [vmem:[%s1648_s1 + $0x70] sm:$0xff]   ;;  %v1354_v8 = vld [vmem:[%s1648_s1 + $0x68] sm:$0xff]   ;;  %s1657_s25 = smov (!%p244_p4, %s243_s25), 13 }
   0xd   : > { %v1347_v1 = vld [vmem:[%s1648_s1 + $0xf8] sm:$0xff]   ;;  %1189 = vmatprep.subr.bf16.mxu0 %v1346_v0  ;;  %v1351_v5 = vld [vmem:[%s1648_s1 + $0xf0] sm:$0xff]   ;;  %v1355_v9 = vld [vmem:[%s1648_s1 + $0xe8] sm:$0xff]   ;;  %s1321_s28 = smul.u32 20, %s1657_s25  ;;  %s1093_s19 = sshll.u32 %s1657_s25, 2 }
   0xe   : > { %v1348_v2 = vld [vmem:[%s1648_s1 + $0x38] sm:$0xff]   ;;  %1229 = vmatprep.subr.bf16.mxu1 %v1347_v1  ;;  %v1352_v6 = vld [vmem:[%s1648_s1 + $0x30] sm:$0xff]   ;;  %v1356_v10 = vld [vmem:[%s1648_s1 + $0x28] sm:$0xff]   ;;  %s267_s22 = scalar_lea.vmem %s1651_s4, %s1093_s19 }
   0xf   : > { %v1349_v3 = vld [vmem:[%s1648_s1 + $0xb8] sm:$0xff]   ;;  %1190 = vmatpush3.bf16.msra.mxu0 %v1348_v2  ;;  %v1353_v7 = vld [vmem:[%s1648_s1 + $0xb0] sm:$0xff]   ;;  %v1357_v11 = vld [vmem:[%s1648_s1 + $0xa8] sm:$0xff]   ;;  %s1578_s12 = scalar_lea.vmem %s1647_s0, %s1321_s28 }
  0x10   : > { %1230 = vmatpush3.bf16.msra.mxu1 %v1349_v3  ;;  %1191 = vmatprep.subr.bf16.mxu0 %v1350_v4  ;;  %v1358_v12 = vld [vmem:[%s1648_s1 + $0x60] sm:$0xff]   ;;  %v1362_v16 = vld [vmem:[%s1648_s1 + $0x58] sm:$0xff]   ;;  %v1366_v20 = vld [vmem:[%s1648_s1 + $0x50] sm:$0xff]  }
  0x11   : > { %1231 = vmatprep.subr.bf16.mxu1 %v1351_v5  ;;  %v1359_v13 = vld [vmem:[%s1648_s1 + $0xe0] sm:$0xff]   ;;  %v1363_v17 = vld [vmem:[%s1648_s1 + $0xd8] sm:$0xff]   ;;  %v1367_v21 = vld [vmem:[%s1648_s1 + $0xd0] sm:$0xff]  }
  0x12   : > { %v1360_v14 = vld [vmem:[%s1648_s1 + $0x20] sm:$0xff]   ;;  %v1364_v18 = vld [vmem:[%s1648_s1 + $0x18] sm:$0xff]   ;;  %v1368_v22 = vld [vmem:[%s1648_s1 + $0x10] sm:$0xff]  }
  0x13   : > { %1192 = vmatpush3.bf16.msra.mxu0 %v1352_v6  ;;  %v1361_v15 = vld [vmem:[%s1648_s1 + $0xa0] sm:$0xff]   ;;  %v1365_v19 = vld [vmem:[%s1648_s1 + $0x98] sm:$0xff]   ;;  %v1369_v23 = vld [vmem:[%s1648_s1 + $0x90] sm:$0xff]  }
  0x14   : > { %1232 = vmatpush3.bf16.msra.mxu1 %v1353_v7  ;;  %1193 = vmatprep.subr.bf16.mxu0 %v1354_v8  ;;  %v1370_v24 = vld [vmem:[%s1648_s1 + $0x48] sm:$0xff]   ;;  %v1374_v28 = vld [vmem:[%s1648_s1 + $0x40] sm:$0xff]   ;;  %v1384_v36 = vld [vmem:[%s1648_s1 + $0x138] sm:$0xff]  }
  0x15   : > { %1233 = vmatprep.subr.bf16.mxu1 %v1355_v9  ;;  %v1371_v25 = vld [vmem:[%s1648_s1 + $0xc8] sm:$0xff]   ;;  %v1375_v29 = vld [vmem:[%s1648_s1 + $0xc0] sm:$0xff]   ;;  %v1385_v37 = vld [vmem:[%s1648_s1 + $0x130] sm:$0xff]  }
  0x16   : > { %v1372_v26 = vld [vmem:[%s1648_s1 + $0x8] sm:$0xff]   ;;  %v1376_v30 = vld [vmem:[%s1648_s1] sm:$0xff]   ;;  %v1396_v45 = vld [vmem:[%s1578_s12 + $0x5c] ss:$20 sps:$4 sm:$0xff]  }
  0x17   : > { %1194 = vmatpush3.bf16.msra.mxu0 %v1356_v10  ;;  %v1373_v27 = vld [vmem:[%s1648_s1 + $0x88] sm:$0xff]   ;;  %v1377_v31 = vld [vmem:[%s1648_s1 + $0x80] sm:$0xff]   ;;  %v1400_v46 = vld [vmem:[%s1648_s1 + $0x118] sm:$0xff]  }
  0x18   : > { %1234 = vmatpush3.bf16.msra.mxu1 %v1357_v11  ;;  %1195 = vmatprep.subr.bf16.mxu0 %v1358_v12  ;;  %v1378_v32 = vld [vmem:[%s1578_s12] ss:$20 sps:$4 sm:$0xff]   ;;  %v1380_v33 = vld [vmem:[%s1578_s12 + $0x4] ss:$20 sps:$4 sm:$0xff]   ;;  %v1381_v34 = vld [vmem:[%s1578_s12 + $0x8] ss:$20 sps:$4 sm:$0xff]  }
  0x19   : > { %1235 = vmatprep.subr.bf16.mxu1 %v1359_v13  ;;  %v1383_v35 = vld [vmem:[%s1578_s12 + $0xc] ss:$20 sps:$4 sm:$0xff]   ;;  %739 = vmatprep.mubr.bf16.mxu0 %v1380_v33  ;;  %v1388_v39 = vld [vmem:[%s1578_s12 + $0x34] ss:$20 sps:$4 sm:$0xff]   ;;  %v1391_v42 = vld [vmem:[%s1578_s12 + $0x30] ss:$20 sps:$4 sm:$0xff]  }
  0x1a   : > { %803 = vmatprep.mubr.bf16.mxu1 %v1383_v35  ;;  %v1386_v38 = vld [vmem:[%s1578_s12 + $0x2c] ss:$20 sps:$4 sm:$0xff]   ;;  %v1390_v40 = vld [vmem:[%s1578_s12 + $0x28] ss:$20 sps:$4 sm:$0xff]   ;;  %v1398_v49 = vld [vmem:[%s1578_s12 + $0x50] ss:$20 sps:$4 sm:$0xff]  }
  0x1b   : > { %1196 = vmatpush3.bf16.msra.mxu0 %v1360_v14  ;;  %v1392_v41 = vld [vmem:[%s1648_s1 + $0x128] sm:$0xff]   ;;  %v1393_v44 = vld [vmem:[%s1648_s1 + $0x120] sm:$0xff]   ;;  %v288_v47 = vld [vmem:[%s1578_s12 + $0x78] sm:$0xff] }
  0x1c   : > { %1236 = vmatpush3.bf16.msra.mxu1 %v1361_v15  ;;  %1197 = vmatprep.subr.bf16.mxu0 %v1362_v16  ;;  %v1394_v43 = vld [vmem:[%s1578_s12 + $0x54] ss:$20 sps:$4 sm:$0xff]   ;;  %v289_v48 = vld [vmem:[%s1578_s12 + $0x80] sm:$0xff]  ;;  %v1399_v50 = vld [vmem:[%s1578_s12 + $0x58] ss:$20 sps:$4 sm:$0xff]   ;;  %v1110_v51 = vcombine.high %v288_v47, %v288_v47  ;;  %v1109_v55 = vcombine.low %v288_v47, %v288_v47 }
  0x1d   : > { %1237 = vmatprep.subr.bf16.mxu1 %v1363_v17  ;;  %v1112_v52 = vcombine.high %v289_v48, %v289_v48  ;;  %v1401_v53 = vld [vmem:[%s1648_s1 + $0x110] sm:$0xff]   ;;  %v1406_v54 = vld [vmem:[%s1648_s1 + $0x108] sm:$0xff]   ;;  %v1111_v56 = vcombine.low %v289_v48, %v289_v48  ;;  %v1407_v59 = vld [vmem:[%s1648_s1 + $0x100] sm:$0xff]  }
  0x1e   : > { %v1408_v57 = vld [vmem:[%s1578_s12 + $0x10] ss:$20 sps:$4 sm:$0xff]   ;;  %v1409_v58 = vld [vmem:[%s1578_s12 + $0x60] ss:$20 sps:$4 sm:$0xff]   ;;  %v1410_v60 = vld [vmem:[%s1578_s12 + $0x38] ss:$20 sps:$4 sm:$0xff]  }
  0x1f   : > { %1198 = vmatpush3.bf16.msra.mxu0 %v1364_v18  ;;  %v1411_v61 = vld [vmem:[%s1578_s12 + $0x88] ss:$0 sps:$4 sm:$0xff]  }
  0x20   : > { %1238 = vmatpush3.bf16.msra.mxu1 %v1365_v19  ;;  %1199 = vmatprep.subr.bf16.mxu0 %v1366_v20 }
  0x21   : > { %1239 = vmatprep.subr.bf16.mxu1 %v1367_v21 }
  0x23   : > { %1200 = vmatpush3.bf16.msra.mxu0 %v1368_v22 }
  0x24   : > { %1240 = vmatpush3.bf16.msra.mxu1 %v1369_v23  ;;  %1201 = vmatprep.subr.bf16.mxu0 %v1370_v24 }
  0x25   : > { %1241 = vmatprep.subr.bf16.mxu1 %v1371_v25 }
  0x27   : > { %1202 = vmatpush3.bf16.msra.mxu0 %v1372_v26 }
  0x28   : > { %1242 = vmatpush3.bf16.msra.mxu1 %v1373_v27  ;;  %1203 = vmatprep.subr.bf16.mxu0 %v1374_v28 }
  0x29   : > { %1243 = vmatprep.subr.bf16.mxu1 %v1375_v29 }
  0x2b   : > { %1204 = vmatpush3.bf16.msra.mxu0 %v1376_v30 }
  0x2c   : > { %1244 = vmatpush3.bf16.msra.mxu1 %v1377_v31  ;;  %1281 = vmatprep.subr.bf16.mxu0 %v1384_v36 }
  0x2d   : > { %1305 = vmatprep.subr.bf16.mxu1 %v1384_v36 }
  0x2e   : > { %740 = vmatmul.mubr.bf16.vlgmr.msra.gmra.mxu0 %v1378_v32 }
  0x2f   : > { %804 = vmatmul.mubr.bf16.vlgmr.msra.gmra.mxu1 %v1381_v34  ;;  %1282 = vmatpush3.bf16.msra.mxu0 %v1384_v36 }
  0x30   : > { %1313 = vmatpush3.bf16.msra.mxu1 %v1384_v36  ;;  %1283 = vmatprep.subr.bf16.mxu0 %v1385_v37 }
  0x31   : > { %1306 = vmatprep.subr.bf16.mxu1 %v1385_v37  ;;  %747 = vmatprep.mubr.bf16.mxu0 %v1386_v38 }
  0x32   : > { %811 = vmatprep.mubr.bf16.mxu1 %v1388_v39 }
  0x33   : > { %1284 = vmatpush3.bf16.msra.mxu0 %v1385_v37 }
  0x34   : > { %1314 = vmatpush3.bf16.msra.mxu1 %v1385_v37  ;;  %1285 = vmatprep.subr.bf16.mxu0 %v1392_v41 }
  0x35   : > { %1307 = vmatprep.subr.bf16.mxu1 %v1392_v41 }
  0x36   : > { %748 = vmatmul.mubr.bf16.gmra.mxu0 %v1390_v40 }
  0x37   : > { %812 = vmatmul.mubr.bf16.gmra.mxu1 %v1391_v42  ;;  %755 = vmatprep.mubr.bf16.mxu0 %v1394_v43  ;;  %v1154_v42 = vld [vmem:[%s1649_s2] ss:$0 sm:$0xff] }
  0x38   : > { %1286 = vmatpush3.bf16.msra.mxu0 %v1392_v41  ;;  %819 = vmatprep.mubr.bf16.mxu1 %v1396_v45 }
  0x39   : > { %1315 = vmatpush3.bf16.msra.mxu1 %v1392_v41  ;;  %1287 = vmatprep.subr.bf16.mxu0 %v1393_v44 }
  0x3a   : > { %1308 = vmatprep.subr.bf16.mxu1 %v1393_v44 }
  0x3c   : > { %1288 = vmatpush3.bf16.msra.mxu0 %v1393_v44 }
  0x3d   : > { %1316 = vmatpush3.bf16.msra.mxu1 %v1393_v44  ;;  %1289 = vmatprep.subr.bf16.mxu0 %v1400_v46 }
  0x3e   : > { %756 = vmatmul.mubr.bf16.gmra.mxu0 %v1398_v49  ;;  %1309 = vmatprep.subr.bf16.mxu1 %v1400_v46 }
  0x3f   : > { %820 = vmatmul.mubr.bf16.gmra.mxu1 %v1399_v50  ;;  %763 = vmatprep.mubr.bf16.mxu0 %v1110_v51 }
  0x40   : > { %1290 = vmatpush3.bf16.msra.mxu0 %v1400_v46  ;;  %827 = vmatprep.mubr.bf16.mxu1 %v1112_v52 }
  0x41   : > { %1317 = vmatpush3.bf16.msra.mxu1 %v1400_v46  ;;  %1291 = vmatprep.subr.bf16.mxu0 %v1401_v53 }
  0x42   : > { %1310 = vmatprep.subr.bf16.mxu1 %v1401_v53 }
  0x44   : > { %1292 = vmatpush3.bf16.msra.mxu0 %v1401_v53 }
  0x45   : > { %1318 = vmatpush3.bf16.msra.mxu1 %v1401_v53  ;;  %1293 = vmatprep.subr.bf16.mxu0 %v1406_v54 }
  0x46   : > { %764 = vmatmul.mubr.bf16.gmra.mxu0 %v1109_v55  ;;  %1311 = vmatprep.subr.bf16.mxu1 %v1406_v54  ;;  %v1155_v55 = vld [vmem:[%s1650_s3] ss:$0 sm:$0xff] }
  0x47   : > { %828 = vmatmul.mubr.bf16.gmra.mxu1 %v1111_v56  ;;  %1297 = vmatprep.mubr.bf16.mxu0 %v1408_v57 }
  0x48   : > { %1294 = vmatpush3.bf16.msra.mxu0 %v1406_v54  ;;  %1301 = vmatprep.mubr.bf16.mxu1 %v1409_v58 }
  0x49   : > { %1319 = vmatpush3.bf16.msra.mxu1 %v1406_v54  ;;  %1295 = vmatprep.subr.bf16.mxu0 %v1407_v59 }
  0x4a   : > { %1312 = vmatprep.subr.bf16.mxu1 %v1407_v59 }
  0x4c   : > { %1296 = vmatpush3.bf16.msra.mxu0 %v1407_v59 }
  0x4d   : > { %1320 = vmatpush3.bf16.msra.mxu1 %v1407_v59 }
  0x4f   : > { %1298 = vmatmul.mubr.bf16.vlgmr.msra.gmra.mxu0 %v1410_v60 }
  0x50   : > { %1302 = vmatmul.mubr.bf16.vlgmr.msra.gmra.mxu1 %v1411_v61 }
  0xee   : > { %v1205_v62 = vpop.f32.mrf.mxu0 }
  0xef   : > { %v1245_v63 = vpop.f32.mrf.mxu1 }
  0xf0   : > { %v1206_v0 = vpop.f32.mrf.mxu0 }
  0xf1   : > { %v1246_v1 = vpop.f32.mrf.mxu1  ;;  %v1207_v32 = vadd.f32 %v1206_v0, %v1205_v62 }
  0xf2   : > { %v1208_v2 = vpop.f32.mrf.mxu0  ;;  %v1247_v33 = vadd.f32 %v1246_v1, %v1245_v63 }
  0xf3   : > { %v1248_v3 = vpop.f32.mrf.mxu1 }
  0xf4   : > { %v1209_v4 = vpop.f32.mrf.mxu0  ;;  %v806_v48 = vadd.f32 %v1247_v33, %v1207_v32 }
  0xf5   : > { %v1249_v5 = vpop.f32.mrf.mxu1  ;;  %v1210_v44 = vadd.f32 %v1209_v4, %v1208_v2 }
  0xf6   : > { %v1211_v6 = vpop.f32.mrf.mxu0  ;;  %v1250_v45 = vadd.f32 %v1249_v5, %v1248_v3 }
  0xf7   : > { %v1251_v7 = vpop.f32.mrf.mxu1 }
  0xf8   : > { %v1212_v8 = vpop.f32.mrf.mxu0  ;;  %v809_v1 = vadd.f32 %v1250_v45, %v1210_v44 }
  0xf9   : > { %v1252_v9 = vpop.f32.mrf.mxu1  ;;  %v1213_v26 = vadd.f32 %v1212_v8, %v1211_v6 }
  0xfa   : > { %v1214_v10 = vpop.f32.mrf.mxu0  ;;  %v1253_v27 = vadd.f32 %v1252_v9, %v1251_v7 }
  0xfb   : > { %v1254_v11 = vpop.f32.mrf.mxu1 }
  0xfc   : > { %v1215_v12 = vpop.f32.mrf.mxu0  ;;  %v814_v40 = vadd.f32 %v1253_v27, %v1213_v26 }
  0xfd   : > { %v1255_v13 = vpop.f32.mrf.mxu1  ;;  %v1216_v38 = vadd.f32 %v1215_v12, %v1214_v10 }
  0xfe   : > { %v1217_v14 = vpop.f32.mrf.mxu0  ;;  %v1256_v39 = vadd.f32 %v1255_v13, %v1254_v11 }
  0xff   : > { %v1257_v15 = vpop.f32.mrf.mxu1 }
 0x100   : > { %v1218_v16 = vpop.f32.mrf.mxu0  ;;  %v817_v58 = vadd.f32 %v1256_v39, %v1216_v38 }
 0x101   : > { %v1258_v17 = vpop.f32.mrf.mxu1  ;;  %v1219_v35 = vadd.f32 %v1218_v16, %v1217_v14 }
 0x102   : > { %v1220_v18 = vpop.f32.mrf.mxu0  ;;  %v1259_v36 = vadd.f32 %v1258_v17, %v1257_v15 }
 0x103   : > { %v1260_v19 = vpop.f32.mrf.mxu1 }
 0x104   : > { %v1221_v20 = vpop.f32.mrf.mxu0  ;;  %v822_v53 = vadd.f32 %v1259_v36, %v1219_v35 }
 0x105   : > { %v1261_v21 = vpop.f32.mrf.mxu1  ;;  %v1222_v49 = vadd.f32 %v1221_v20, %v1220_v18 }
 0x106   : > { %v1223_v22 = vpop.f32.mrf.mxu0  ;;  %v1262_v50 = vadd.f32 %v1261_v21, %v1260_v19 }
 0x107   : > { %v1263_v23 = vpop.f32.mrf.mxu1 }
 0x108   : > { %v1224_v24 = vpop.f32.mrf.mxu0  ;;  %v825_v5 = vadd.f32 %v1262_v50, %v1222_v49 }
 0x109   : > { %v1264_v25 = vpop.f32.mrf.mxu1  ;;  %v1225_v29 = vadd.f32 %v1224_v24, %v1223_v22 }
 0x10a   : > { %v1226_v28 = vpop.f32.mrf.mxu0  ;;  %v1265_v30 = vadd.f32 %v1264_v25, %v1263_v23 }
 0x10b   : > { %v1266_v31 = vpop.f32.mrf.mxu1 }
 0x10c   : > { %v1227_v34 = vpop.f32.mrf.mxu0  ;;  %v830_v43 = vadd.f32 %v1265_v30, %v1225_v29 }
 0x10d   : > { %v1267_v37 = vpop.f32.mrf.mxu1 }
 0x10f   : > { %v1299_v41 = vpop.f32.mrf.mxu0 }
 0x110   : > { %v878_v46 = vadd.f32 %v1299_v41, %v814_v40  ;;  %v1303_v47 = vpop.f32.mrf.mxu1 }
 0x111   : > { %v894_v51 = vadd.f32 %v1303_v47, %v830_v43  ;;  %v869_v52 = vpop.f32.mrf.mxu0 }
 0x112   : > { %v908_v54 = vmul.f32 %v1154_v42, %v878_v46  ;;  %v870_v56 = vadd.f32 %v869_v52, %v806_v48  ;;  %v885_v57 = vpop.f32.mrf.mxu1 }
 0x113   : > { %v912_v59 = vmul.f32 %v1154_v42, %v894_v51  ;;  %v886_v60 = vadd.f32 %v885_v57, %v822_v53  ;;  %v1300_v61 = vpop.f32.mrf.mxu0 }
 0x114   : > { %v906_v62 = vmul.f32 %v1154_v42, %v870_v56  ;;  %v881_v63 = vadd.f32 %v1300_v61, %v817_v58  ;;  %v1304_v0 = vpop.f32.mrf.mxu1  ;;  %v922_v6 = vadd.f32 %v1155_v55, %v908_v54 }
 0x115   : > { %v926_v2 = vadd.f32 %v1155_v55, %v912_v59  ;;  %v910_v3 = vmul.f32 %v1154_v42, %v886_v60  ;;  %v872_v4 = vpop.f32.mrf.mxu0 }
 0x116   : > { %v909_v7 = vmul.f32 %v1154_v42, %v881_v63  ;;  %v873_v8 = vadd.f32 %v872_v4, %v809_v1  ;;  %v888_v9 = vpop.f32.mrf.mxu1  ;;  %v920_v12 = vadd.f32 %v1155_v55, %v906_v62  ;;  %v929_v18 = vmax.f32 %v922_v6, 0.0 }
 0x117   : > { %v933_v10 = vmax.f32 %v926_v2, 0.0  ;;  %v889_v11 = vadd.f32 %v888_v9, %v825_v5  ;;  %v924_v16 = vadd.f32 %v1155_v55, %v910_v3 }
 0x118   : > { %v923_v13 = vadd.f32 %v1155_v55, %v909_v7  ;;  %v907_v14 = vmul.f32 %v1154_v42, %v873_v8  ;;  %v927_v22 = vmax.f32 %v920_v12, 0.0 }
 0x119   : > { %v1171_v15 = vpack.c.bf16 %v933_v10, %v933_v10  ;;  %v911_v17 = vmul.f32 %v1154_v42, %v889_v11  ;;  %v931_v25 = vmax.f32 %v924_v16, 0.0 }
 0x11a   : > { %v930_v19 = vmax.f32 %v923_v13, 0.0  ;;  %v921_v20 = vadd.f32 %v1155_v55, %v907_v14 }
 0x11b   : > { %969 = vst [vmem:[%s267_s22 + $0x18] sm:$0xf] %v1171_v15  ;;  %v925_v21 = vadd.f32 %v1155_v55, %v911_v17 }
 0x11c   : > { %v1180_v23 = vpack.c.bf16 %v930_v19, %v929_v18  ;;  %v928_v24 = vmax.f32 %v921_v20, 0.0 }
 0x11d   : > { %v932_v26 = vmax.f32 %v925_v21, 0.0 }
 0x11e   : > { %1187 = vst [vmem:[%s267_s22 + $0x8] sm:$0xff] %v1180_v23   ;;  %v1175_v27 = vpack.c.bf16 %v928_v24, %v927_v22 }
 0x11f   : > { %v1185_v28 = vpack.c.bf16 %v932_v26, %v931_v25 }
 0x120   : > { %1176 = vst [vmem:[%s267_s22] sm:$0xff] %v1175_v27  }
 0x121   : > { %1188 = vst [vmem:[%s267_s22 + $0x10] sm:$0xff] %v1185_v28  }
 0x122 PF: > { %s14_s17 = sadd.s32 1, %s1434_s17   ;;  %s1652_s15 = smov %s1430_s16 }
 0x123   : > { %p11_p5 = scmp.ge.s32.totalorder %s14_s17, 4   ;;  %s1653_s16 = smov %s1655_s18 }
 0x125   :  { %13 = sbr.rel (!%p11_p5) target bundleno = 2 (0x2), region = 75 }

// kernel: inception_net_forward.18
= control target key start
LH: loop header
LB: loop body
LE: loop exit
PB: predicated region body
PF: predicated region fallthrough
CT: control target
= control target key end

     0   :  { %s918_s15 = smov 0   ;;  %s920_s16 = smov 0   ;;  %s1018_s0 = inlined_call_operand.vmem [shape: bf16[112,256], index: 0, kind: input, shape index: {}]   ;;  %s1019_s1 = inlined_call_operand.vmem [shape: bf16[256,128], index: 1, kind: input, shape index: {}]   ;;  %s1020_s2 = inlined_call_operand.vmem [shape: f32[1,128], index: 2, kind: input, shape index: {}]   ;;  %s1021_s3 = inlined_call_operand.vmem [shape: f32[1,128], index: 3, kind: input, shape index: {}]   ;;  %s1022_s4 = inlined_call_operand.vmem [shape: bf16[112,128], index: 4, kind: output, shape index: {}]  }
   0x1   :  { %s922_s17 = smov 0  }
   0x2 LB: > { %s26_s18 = sadd.s32 1, %s887_s16  ;;  %p698_p0 = scmp.ge.s32.totalorder %s891_s17, 1  ;;  %s891_s17 = sphi %s922_s17, %s14_s17   ;;  %s887_s16 = sphi %s920_s16, %s1024_s16   ;;  %s883_s15 = sphi %s918_s15, %s1023_s15  }
   0x3   : > { %p28_p1 = scmp.ge.s32.totalorder %s26_s18, 2  ;;  %p203_p2 = scmp.lt.s32.totalorder %s891_s17, 3 }
   0x5   : > { %s1026_s18 = smov (%p28_p1, %s26_s18), 0  ;;  %p204_p3 = pnand %p698_p0, %p203_p2 }
   0x6   : > { %s243_s21 = smul.u32 (!%p204_p3), 7, %s883_s15 }
   0x7   : > { %207 = sbr.rel (%p204_p3) target bundleno = 263 (0x107), region = 36 }
   0x8   : > { %p244_p4 = scmp.lt.s32.totalorder (!%p204_p3), %s243_s21, 13 }
   0xc   : > { %v842_v0 = vld [vmem:[%s1019_s1 + $0x78] sm:$0xff]   ;;  %v844_v2 = vld [vmem:[%s1019_s1 + $0x70] sm:$0xff]   ;;  %v846_v4 = vld [vmem:[%s1019_s1 + $0x68] sm:$0xff]   ;;  %s1028_s21 = smov (!%p244_p4, %s243_s21), 13 }
   0xd   : > { %v843_v1 = vld [vmem:[%s1019_s1 + $0x38] sm:$0xff]   ;;  %762 = vmatprep.subr.bf16.mxu0 %v842_v0  ;;  %802 = vmatprep.subr.bf16.mxu1 %v842_v0  ;;  %v845_v3 = vld [vmem:[%s1019_s1 + $0x30] sm:$0xff]   ;;  %v847_v5 = vld [vmem:[%s1019_s1 + $0x28] sm:$0xff]   ;;  %s737_s10 = sshll.u32 %s1028_s21, 3  ;;  %s701_s12 = sshll.u32 %s1028_s21, 2 }
   0xe   : > { %763 = vmatpush3.bf16.msra.mxu0 %v843_v1  ;;  %810 = vmatpush3.bf16.msra.mxu1 %v843_v1  ;;  %v848_v6 = vld [vmem:[%s1019_s1 + $0x60] sm:$0xff]   ;;  %v850_v8 = vld [vmem:[%s1019_s1 + $0x58] sm:$0xff]   ;;  %s969_s15 = scalar_lea.vmem %s1018_s0, %s737_s10  ;;  %v852_v10 = vld [vmem:[%s1019_s1 + $0x50] sm:$0xff]  }
   0xf   : > { %764 = vmatprep.subr.bf16.mxu0 %v844_v2  ;;  %803 = vmatprep.subr.bf16.mxu1 %v844_v2  ;;  %v849_v7 = vld [vmem:[%s1019_s1 + $0x20] sm:$0xff]   ;;  %v851_v9 = vld [vmem:[%s1019_s1 + $0x18] sm:$0xff]   ;;  %v853_v13 = vld [vmem:[%s1019_s1 + $0x10] sm:$0xff]  }
  0x10   : > { %v860_v11 = vld [vmem:[%s969_s15 + $0x4] ss:$8 sps:$4 sm:$0xff]   ;;  %v276_v18 = vld [vmem:[%s969_s15 + $0x30] sm:$0xff]  ;;  %v858_v19 = vld [vmem:[%s969_s15] ss:$8 sps:$4 sm:$0xff]  }
  0x11   : > { %v863_v12 = vld [vmem:[%s969_s15 + $0x24] ss:$8 sps:$4 sm:$0xff]   ;;  %474 = vmatprep.mubr.bf16.mxu0 %v860_v11  ;;  %v861_v20 = vld [vmem:[%s969_s15 + $0x20] ss:$8 sps:$4 sm:$0xff]   ;;  %v864_v21 = vld [vmem:[%s969_s15 + $0x14] ss:$8 sps:$4 sm:$0xff]   ;;  %v709_v22 = vcombine.high %v276_v18, %v276_v18  ;;  %v708_v24 = vcombine.low %v276_v18, %v276_v18 }
  0x12   : > { %765 = vmatpush3.bf16.msra.mxu0 %v845_v3  ;;  %811 = vmatpush3.bf16.msra.mxu1 %v845_v3  ;;  %v854_v14 = vld [vmem:[%s1019_s1 + $0x48] sm:$0xff]   ;;  %v856_v16 = vld [vmem:[%s1019_s1 + $0x40] sm:$0xff]   ;;  %v867_v23 = vld [vmem:[%s969_s15 + $0x10] ss:$8 sps:$4 sm:$0xff]   ;;  %s267_s15 = scalar_lea.vmem %s1022_s4, %s701_s12 }
  0x13   : > { %766 = vmatprep.subr.bf16.mxu0 %v846_v4  ;;  %804 = vmatprep.subr.bf16.mxu1 %v846_v4  ;;  %v855_v15 = vld [vmem:[%s1019_s1 + $0x8] sm:$0xff]   ;;  %v857_v17 = vld [vmem:[%s1019_s1] sm:$0xff]  }
  0x14   : > { %490 = vmatprep.mubr.bf16.mxu1 %v863_v12  ;;  %v726_v28 = vld [vmem:[%s1020_s2] ss:$0 sm:$0xff] }
  0x15   : > { %v727_v35 = vld [vmem:[%s1021_s3] ss:$0 sm:$0xff] }
  0x16   : > { %767 = vmatpush3.bf16.msra.mxu0 %v847_v5  ;;  %812 = vmatpush3.bf16.msra.mxu1 %v847_v5 }
  0x17   : > { %768 = vmatprep.subr.bf16.mxu0 %v848_v6  ;;  %805 = vmatprep.subr.bf16.mxu1 %v848_v6 }
  0x1a   : > { %769 = vmatpush3.bf16.msra.mxu0 %v849_v7  ;;  %813 = vmatpush3.bf16.msra.mxu1 %v849_v7 }
  0x1b   : > { %770 = vmatprep.subr.bf16.mxu0 %v850_v8  ;;  %806 = vmatprep.subr.bf16.mxu1 %v850_v8 }
  0x1e   : > { %771 = vmatpush3.bf16.msra.mxu0 %v851_v9  ;;  %814 = vmatpush3.bf16.msra.mxu1 %v851_v9 }
  0x1f   : > { %772 = vmatprep.subr.bf16.mxu0 %v852_v10  ;;  %807 = vmatprep.subr.bf16.mxu1 %v852_v10 }
  0x22   : > { %773 = vmatpush3.bf16.msra.mxu0 %v853_v13  ;;  %815 = vmatpush3.bf16.msra.mxu1 %v853_v13 }
  0x23   : > { %774 = vmatprep.subr.bf16.mxu0 %v854_v14  ;;  %808 = vmatprep.subr.bf16.mxu1 %v854_v14 }
  0x26   : > { %775 = vmatpush3.bf16.msra.mxu0 %v855_v15  ;;  %816 = vmatpush3.bf16.msra.mxu1 %v855_v15 }
  0x27   : > { %776 = vmatprep.subr.bf16.mxu0 %v856_v16  ;;  %809 = vmatprep.subr.bf16.mxu1 %v856_v16 }
  0x2a   : > { %777 = vmatpush3.bf16.msra.mxu0 %v857_v17  ;;  %817 = vmatpush3.bf16.msra.mxu1 %v857_v17 }
  0x2d   : > { %475 = vmatmul.mubr.bf16.vlgmr.msra.gmra.mxu0 %v858_v19  ;;  %491 = vmatmul.mubr.bf16.vlgmr.msra.gmra.mxu1 %v861_v20 }
  0x2e   : > { %482 = vmatprep.mubr.bf16.mxu0 %v864_v21  ;;  %498 = vmatprep.mubr.bf16.mxu1 %v709_v22 }
  0x35   : > { %483 = vmatmul.mubr.bf16.gmra.mxu0 %v867_v23  ;;  %499 = vmatmul.mubr.bf16.gmra.mxu1 %v708_v24 }
  0xed   : > { %v778_v25 = vpop.f32.mrf.mxu0  ;;  %v790_v26 = vpop.f32.mrf.mxu1 }
  0xef   : > { %v779_v27 = vpop.f32.mrf.mxu0  ;;  %v791_v29 = vpop.f32.mrf.mxu1 }
  0xf0   : > { %v780_v30 = vadd.f32 %v779_v27, %v778_v25  ;;  %v792_v31 = vadd.f32 %v791_v29, %v790_v26 }
  0xf1   : > { %v781_v32 = vpop.f32.mrf.mxu0  ;;  %v793_v33 = vpop.f32.mrf.mxu1 }
  0xf2   : > { %v513_v34 = vmul.f32 %v780_v30, %v726_v28  ;;  %v517_v36 = vmul.f32 %v792_v31, %v726_v28 }
  0xf3   : > { %v782_v37 = vpop.f32.mrf.mxu0  ;;  %v794_v38 = vpop.f32.mrf.mxu1 }
  0xf4   : > { %v783_v39 = vadd.f32 %v782_v37, %v781_v32  ;;  %v795_v40 = vadd.f32 %v794_v38, %v793_v33  ;;  %v527_v41 = vadd.f32 %v727_v35, %v513_v34  ;;  %v531_v44 = vadd.f32 %v727_v35, %v517_v36 }
  0xf5   : > { %v784_v42 = vpop.f32.mrf.mxu0  ;;  %v796_v43 = vpop.f32.mrf.mxu1 }
  0xf6   : > { %v514_v45 = vmul.f32 %v783_v39, %v726_v28  ;;  %v518_v46 = vmul.f32 %v795_v40, %v726_v28  ;;  %v534_v53 = vmax.f32 %v527_v41, 0.0  ;;  %v538_v56 = vmax.f32 %v531_v44, 0.0 }
  0xf7   : > { %v785_v47 = vpop.f32.mrf.mxu0  ;;  %v797_v48 = vpop.f32.mrf.mxu1 }
  0xf8   : > { %v528_v49 = vadd.f32 %v727_v35, %v514_v45  ;;  %v532_v50 = vadd.f32 %v727_v35, %v518_v46  ;;  %v786_v51 = vadd.f32 %v785_v47, %v784_v42  ;;  %v798_v52 = vadd.f32 %v797_v48, %v796_v43 }
  0xf9   : > { %v787_v54 = vpop.f32.mrf.mxu0  ;;  %v799_v55 = vpop.f32.mrf.mxu1 }
  0xfa   : > { %v535_v57 = vmax.f32 %v528_v49, 0.0  ;;  %v539_v58 = vmax.f32 %v532_v50, 0.0  ;;  %v519_v59 = vmul.f32 %v798_v52, %v726_v28  ;;  %v515_v60 = vmul.f32 %v786_v51, %v726_v28 }
  0xfb   : > { %v788_v61 = vpop.f32.mrf.mxu0  ;;  %v800_v62 = vpop.f32.mrf.mxu1 }
  0xfc   : > { %v748_v63 = vpack.c.bf16 %v535_v57, %v534_v53  ;;  %v758_v0 = vpack.c.bf16 %v539_v58, %v538_v56  ;;  %v533_v1 = vadd.f32 %v727_v35, %v519_v59  ;;  %v789_v2 = vadd.f32 %v788_v61, %v787_v54 }
  0xfd   : > { %v529_v4 = vadd.f32 %v727_v35, %v515_v60 }
  0xfe   : > { %749 = vst [vmem:[%s267_s15] sm:$0xff] %v748_v63   ;;  %761 = vst [vmem:[%s267_s15 + $0x10] sm:$0xff] %v758_v0   ;;  %v540_v3 = vmax.f32 %v533_v1, 0.0  ;;  %v516_v5 = vmul.f32 %v789_v2, %v726_v28 }
  0xff   : > { %v536_v8 = vmax.f32 %v529_v4, 0.0 }
 0x100   : > { %v744_v6 = vpack.c.bf16 %v540_v3, %v540_v3  ;;  %v530_v7 = vadd.f32 %v727_v35, %v516_v5 }
 0x102   : > { %576 = vst [vmem:[%s267_s15 + $0x18] sm:$0xf] %v744_v6  ;;  %v537_v9 = vmax.f32 %v530_v7, 0.0 }
 0x104   : > { %v753_v10 = vpack.c.bf16 %v537_v9, %v536_v8 }
 0x106   : > { %760 = vst [vmem:[%s267_s15 + $0x8] sm:$0xff] %v753_v10  }
 0x107 PF: > { %s14_s17 = sadd.s32 1, %s891_s17   ;;  %s1023_s15 = smov %s887_s16 }
 0x108   : > { %p11_p5 = scmp.ge.s32.totalorder %s14_s17, 4   ;;  %s1024_s16 = smov %s1026_s18 }
 0x10a   :  { %13 = sbr.rel (!%p11_p5) target bundleno = 2 (0x2), region = 75 }

// kernel: inception_net_forward.19
= control target key start
LH: loop header
LB: loop body
LE: loop exit
PB: predicated region body
PF: predicated region fallthrough
CT: control target
= control target key end

     0   :  { %s1229_s15 = smov 0   ;;  %s1231_s16 = smov 0   ;;  %s1395_s0 = inlined_call_operand.vmem [shape: bf16[112,512], index: 0, kind: input, shape index: {}]   ;;  %s1396_s1 = inlined_call_operand.vmem [shape: bf16[512,128], index: 1, kind: input, shape index: {}]   ;;  %s1397_s2 = inlined_call_operand.vmem [shape: f32[1,128], index: 2, kind: input, shape index: {}]   ;;  %s1398_s3 = inlined_call_operand.vmem [shape: f32[1,128], index: 3, kind: input, shape index: {}]   ;;  %s1399_s4 = inlined_call_operand.vmem [shape: bf16[112,128], index: 4, kind: output, shape index: {}]  }
   0x1   :  { %s1233_s17 = smov 0  }
   0x2 LB: > { %s26_s18 = sadd.s32 1, %s1198_s16  ;;  %p934_p0 = scmp.ge.s32.totalorder %s1202_s17, 1  ;;  %s1202_s17 = sphi %s1233_s17, %s14_s17   ;;  %s1198_s16 = sphi %s1231_s16, %s1401_s16   ;;  %s1194_s15 = sphi %s1229_s15, %s1400_s15  }
   0x3   : > { %p28_p1 = scmp.ge.s32.totalorder %s26_s18, 2  ;;  %p203_p2 = scmp.lt.s32.totalorder %s1202_s17, 3 }
   0x5   : > { %s1403_s18 = smov (%p28_p1, %s26_s18), 0  ;;  %p204_p3 = pnand %p934_p0, %p203_p2 }
   0x6   : > { %s243_s27 = smul.u32 (!%p204_p3), 7, %s1194_s15 }
   0x7   : > { %207 = sbr.rel (%p204_p3) target bundleno = 279 (0x117), region = 36 }
   0x8   : > { %p244_p4 = scmp.lt.s32.totalorder (!%p204_p3), %s243_s27, 13 }
   0xc   : > { %v1126_v0 = vld [vmem:[%s1396_s1 + $0x78] sm:$0xff]   ;;  %v1130_v4 = vld [vmem:[%s1396_s1 + $0x70] sm:$0xff]   ;;  %v1134_v8 = vld [vmem:[%s1396_s1 + $0x68] sm:$0xff]   ;;  %s1405_s27 = smov (!%p244_p4, %s243_s27), 13 }
   0xd   : > { %v1127_v1 = vld [vmem:[%s1396_s1 + $0xf8] sm:$0xff]   ;;  %1022 = vmatprep.subr.bf16.mxu0 %v1126_v0  ;;  %v1131_v5 = vld [vmem:[%s1396_s1 + $0xf0] sm:$0xff]   ;;  %v1135_v9 = vld [vmem:[%s1396_s1 + $0xe8] sm:$0xff]   ;;  %s997_s30 = sshll.u32 %s1405_s27, 4  ;;  %s937_s25 = sshll.u32 %s1405_s27, 2 }
   0xe   : > { %v1128_v2 = vld [vmem:[%s1396_s1 + $0x38] sm:$0xff]   ;;  %1062 = vmatprep.subr.bf16.mxu1 %v1127_v1  ;;  %v1132_v6 = vld [vmem:[%s1396_s1 + $0x30] sm:$0xff]   ;;  %v1136_v10 = vld [vmem:[%s1396_s1 + $0x28] sm:$0xff]   ;;  %s248_s12 = scalar_lea.vmem %s1395_s0, %s997_s30  ;;  %s1371_s29 = scalar_lea.vmem %s1399_s4, %s937_s25 }
   0xf   : > { %v1129_v3 = vld [vmem:[%s1396_s1 + $0xb8] sm:$0xff]   ;;  %1023 = vmatpush3.bf16.msra.mxu0 %v1128_v2  ;;  %v1133_v7 = vld [vmem:[%s1396_s1 + $0xb0] sm:$0xff]   ;;  %v1137_v11 = vld [vmem:[%s1396_s1 + $0xa8] sm:$0xff]  }
  0x10   : > { %1063 = vmatpush3.bf16.msra.mxu1 %v1129_v3  ;;  %1024 = vmatprep.subr.bf16.mxu0 %v1130_v4  ;;  %v1138_v12 = vld [vmem:[%s1396_s1 + $0x60] sm:$0xff]   ;;  %v1142_v16 = vld [vmem:[%s1396_s1 + $0x58] sm:$0xff]   ;;  %v1146_v20 = vld [vmem:[%s1396_s1 + $0x50] sm:$0xff]  }
  0x11   : > { %1064 = vmatprep.subr.bf16.mxu1 %v1131_v5  ;;  %v1139_v13 = vld [vmem:[%s1396_s1 + $0xe0] sm:$0xff]   ;;  %v1143_v17 = vld [vmem:[%s1396_s1 + $0xd8] sm:$0xff]   ;;  %v1147_v21 = vld [vmem:[%s1396_s1 + $0xd0] sm:$0xff]  }
  0x12   : > { %v1140_v14 = vld [vmem:[%s1396_s1 + $0x20] sm:$0xff]   ;;  %v1144_v18 = vld [vmem:[%s1396_s1 + $0x18] sm:$0xff]   ;;  %v1148_v22 = vld [vmem:[%s1396_s1 + $0x10] sm:$0xff]  }
  0x13   : > { %1025 = vmatpush3.bf16.msra.mxu0 %v1132_v6  ;;  %v1141_v15 = vld [vmem:[%s1396_s1 + $0xa0] sm:$0xff]   ;;  %v1145_v19 = vld [vmem:[%s1396_s1 + $0x98] sm:$0xff]   ;;  %v1149_v23 = vld [vmem:[%s1396_s1 + $0x90] sm:$0xff]  }
  0x14   : > { %1065 = vmatpush3.bf16.msra.mxu1 %v1133_v7  ;;  %1026 = vmatprep.subr.bf16.mxu0 %v1134_v8  ;;  %v1150_v24 = vld [vmem:[%s1396_s1 + $0x48] sm:$0xff]   ;;  %v1154_v28 = vld [vmem:[%s1396_s1 + $0x40] sm:$0xff]  }
  0x15   : > { %1066 = vmatprep.subr.bf16.mxu1 %v1135_v9  ;;  %v1151_v25 = vld [vmem:[%s1396_s1 + $0xc8] sm:$0xff]   ;;  %v1155_v29 = vld [vmem:[%s1396_s1 + $0xc0] sm:$0xff]  }
  0x16   : > { %v1152_v26 = vld [vmem:[%s1396_s1 + $0x8] sm:$0xff]   ;;  %v1156_v30 = vld [vmem:[%s1396_s1] sm:$0xff]  }
  0x17   : > { %1027 = vmatpush3.bf16.msra.mxu0 %v1136_v10  ;;  %v1153_v27 = vld [vmem:[%s1396_s1 + $0x88] sm:$0xff]   ;;  %v1157_v31 = vld [vmem:[%s1396_s1 + $0x80] sm:$0xff]  }
  0x18   : > { %1067 = vmatpush3.bf16.msra.mxu1 %v1137_v11  ;;  %1028 = vmatprep.subr.bf16.mxu0 %v1138_v12  ;;  %v1158_v32 = vld [vmem:[%s248_s12] ss:$16 sps:$4 sm:$0xff]   ;;  %v1160_v33 = vld [vmem:[%s248_s12 + $0x4] ss:$16 sps:$4 sm:$0xff]   ;;  %v1161_v34 = vld [vmem:[%s248_s12 + $0x8] ss:$16 sps:$4 sm:$0xff]  }
  0x19   : > { %1068 = vmatprep.subr.bf16.mxu1 %v1139_v13  ;;  %v1163_v35 = vld [vmem:[%s248_s12 + $0xc] ss:$16 sps:$4 sm:$0xff]   ;;  %646 = vmatprep.mubr.bf16.mxu0 %v1160_v33  ;;  %v1164_v36 = vld [vmem:[%s248_s12 + $0x24] ss:$16 sps:$4 sm:$0xff]   ;;  %v1168_v38 = vld [vmem:[%s248_s12 + $0x20] ss:$16 sps:$4 sm:$0xff]  }
  0x1a   : > { %710 = vmatprep.mubr.bf16.mxu1 %v1163_v35  ;;  %v1166_v37 = vld [vmem:[%s248_s12 + $0x2c] ss:$16 sps:$4 sm:$0xff]   ;;  %v1169_v39 = vld [vmem:[%s248_s12 + $0x28] ss:$16 sps:$4 sm:$0xff]   ;;  %v1170_v40 = vld [vmem:[%s248_s12 + $0x44] ss:$16 sps:$4 sm:$0xff]  }
  0x1b   : > { %1029 = vmatpush3.bf16.msra.mxu0 %v1140_v14  ;;  %v1172_v41 = vld [vmem:[%s248_s12 + $0x4c] ss:$16 sps:$4 sm:$0xff]   ;;  %v282_v42 = vld [vmem:[%s248_s12 + $0x60] sm:$0xff]  ;;  %v1175_v45 = vld [vmem:[%s248_s12 + $0x48] ss:$16 sps:$4 sm:$0xff]  }
  0x1c   : > { %1069 = vmatpush3.bf16.msra.mxu1 %v1141_v15  ;;  %1030 = vmatprep.subr.bf16.mxu0 %v1142_v16  ;;  %v283_v43 = vld [vmem:[%s248_s12 + $0x68] sm:$0xff]  ;;  %v1174_v44 = vld [vmem:[%s248_s12 + $0x40] ss:$16 sps:$4 sm:$0xff]   ;;  %v951_v46 = vcombine.high %v282_v42, %v282_v42  ;;  %v950_v48 = vcombine.low %v282_v42, %v282_v42 }
  0x1d   : > { %1070 = vmatprep.subr.bf16.mxu1 %v1143_v17  ;;  %v953_v47 = vcombine.high %v283_v43, %v283_v43  ;;  %v952_v49 = vcombine.low %v283_v43, %v283_v43  ;;  %v1355_v57 = vld [vmem:[%s1397_s2] ss:$0 sm:$0xff] }
  0x1e   : > { %v1361_v2 = vld [vmem:[%s1398_s3] ss:$0 sm:$0xff] }
  0x1f   : > { %1031 = vmatpush3.bf16.msra.mxu0 %v1144_v18 }
  0x20   : > { %1071 = vmatpush3.bf16.msra.mxu1 %v1145_v19  ;;  %1032 = vmatprep.subr.bf16.mxu0 %v1146_v20 }
  0x21   : > { %1072 = vmatprep.subr.bf16.mxu1 %v1147_v21 }
  0x23   : > { %1033 = vmatpush3.bf16.msra.mxu0 %v1148_v22 }
  0x24   : > { %1073 = vmatpush3.bf16.msra.mxu1 %v1149_v23  ;;  %1034 = vmatprep.subr.bf16.mxu0 %v1150_v24 }
  0x25   : > { %1074 = vmatprep.subr.bf16.mxu1 %v1151_v25 }
  0x27   : > { %1035 = vmatpush3.bf16.msra.mxu0 %v1152_v26 }
  0x28   : > { %1075 = vmatpush3.bf16.msra.mxu1 %v1153_v27  ;;  %1036 = vmatprep.subr.bf16.mxu0 %v1154_v28 }
  0x29   : > { %1076 = vmatprep.subr.bf16.mxu1 %v1155_v29 }
  0x2b   : > { %1037 = vmatpush3.bf16.msra.mxu0 %v1156_v30 }
  0x2c   : > { %1077 = vmatpush3.bf16.msra.mxu1 %v1157_v31 }
  0x2e   : > { %647 = vmatmul.mubr.bf16.vlgmr.msra.gmra.mxu0 %v1158_v32 }
  0x2f   : > { %711 = vmatmul.mubr.bf16.vlgmr.msra.gmra.mxu1 %v1161_v34  ;;  %654 = vmatprep.mubr.bf16.mxu0 %v1164_v36 }
  0x30   : > { %718 = vmatprep.mubr.bf16.mxu1 %v1166_v37 }
  0x36   : > { %655 = vmatmul.mubr.bf16.gmra.mxu0 %v1168_v38 }
  0x37   : > { %719 = vmatmul.mubr.bf16.gmra.mxu1 %v1169_v39  ;;  %662 = vmatprep.mubr.bf16.mxu0 %v1170_v40 }
  0x38   : > { %726 = vmatprep.mubr.bf16.mxu1 %v1172_v41 }
  0x3e   : > { %663 = vmatmul.mubr.bf16.gmra.mxu0 %v1174_v44 }
  0x3f   : > { %727 = vmatmul.mubr.bf16.gmra.mxu1 %v1175_v45  ;;  %670 = vmatprep.mubr.bf16.mxu0 %v951_v46 }
  0x40   : > { %734 = vmatprep.mubr.bf16.mxu1 %v953_v47 }
  0x46   : > { %671 = vmatmul.mubr.bf16.gmra.mxu0 %v950_v48 }
  0x47   : > { %735 = vmatmul.mubr.bf16.gmra.mxu1 %v952_v49 }
  0xee   : > { %v1038_v50 = vpop.f32.mrf.mxu0 }
  0xef   : > { %v1078_v51 = vpop.f32.mrf.mxu1 }
  0xf0   : > { %v1039_v52 = vpop.f32.mrf.mxu0 }
  0xf1   : > { %v1040_v53 = vadd.f32 %v1039_v52, %v1038_v50  ;;  %v1079_v54 = vpop.f32.mrf.mxu1 }
  0xf2   : > { %v1080_v55 = vadd.f32 %v1079_v54, %v1078_v51  ;;  %v1041_v56 = vpop.f32.mrf.mxu0 }
  0xf3   : > { %v1081_v58 = vpop.f32.mrf.mxu1 }
  0xf4   : > { %v713_v59 = vadd.f32 %v1080_v55, %v1040_v53  ;;  %v1042_v60 = vpop.f32.mrf.mxu0 }
  0xf5   : > { %v1043_v61 = vadd.f32 %v1042_v60, %v1041_v56  ;;  %v1082_v62 = vpop.f32.mrf.mxu1 }
  0xf6   : > { %v749_v63 = vmul.f32 %v1355_v57, %v713_v59  ;;  %v1083_v0 = vadd.f32 %v1082_v62, %v1081_v58  ;;  %v1044_v1 = vpop.f32.mrf.mxu0 }
  0xf7   : > { %v1084_v3 = vpop.f32.mrf.mxu1 }
  0xf8   : > { %v716_v4 = vadd.f32 %v1083_v0, %v1043_v61  ;;  %v1045_v5 = vpop.f32.mrf.mxu0  ;;  %v763_v8 = vadd.f32 %v1361_v2, %v749_v63 }
  0xf9   : > { %v1046_v6 = vadd.f32 %v1045_v5, %v1044_v1  ;;  %v1085_v7 = vpop.f32.mrf.mxu1 }
  0xfa   : > { %v750_v9 = vmul.f32 %v1355_v57, %v716_v4  ;;  %v1086_v10 = vadd.f32 %v1085_v7, %v1084_v3  ;;  %v1047_v11 = vpop.f32.mrf.mxu0  ;;  %v770_v18 = vmax.f32 %v763_v8, 0.0 }
  0xfb   : > { %v1087_v12 = vpop.f32.mrf.mxu1 }
  0xfc   : > { %v764_v13 = vadd.f32 %v1361_v2, %v750_v9  ;;  %v721_v14 = vadd.f32 %v1086_v10, %v1046_v6  ;;  %v1048_v15 = vpop.f32.mrf.mxu0 }
  0xfd   : > { %v1049_v16 = vadd.f32 %v1048_v15, %v1047_v11  ;;  %v1088_v17 = vpop.f32.mrf.mxu1 }
  0xfe   : > { %v771_v19 = vmax.f32 %v764_v13, 0.0  ;;  %v751_v20 = vmul.f32 %v1355_v57, %v721_v14  ;;  %v1089_v21 = vadd.f32 %v1088_v17, %v1087_v12  ;;  %v1050_v22 = vpop.f32.mrf.mxu0 }
  0xff   : > { %v1090_v23 = vpop.f32.mrf.mxu1 }
 0x100   : > { %v1008_v24 = vpack.c.bf16 %v771_v19, %v770_v18  ;;  %v724_v25 = vadd.f32 %v1089_v21, %v1049_v16  ;;  %v1051_v26 = vpop.f32.mrf.mxu0  ;;  %v765_v29 = vadd.f32 %v1361_v2, %v751_v20 }
 0x101   : > { %v1052_v27 = vadd.f32 %v1051_v26, %v1050_v22  ;;  %v1091_v28 = vpop.f32.mrf.mxu1 }
 0x102   : > { %1009 = vst [vmem:[%s1371_s29] sm:$0xff] %v1008_v24   ;;  %v752_v30 = vmul.f32 %v1355_v57, %v724_v25  ;;  %v1092_v31 = vadd.f32 %v1091_v28, %v1090_v23  ;;  %v1053_v32 = vpop.f32.mrf.mxu0  ;;  %v772_v39 = vmax.f32 %v765_v29, 0.0 }
 0x103   : > { %v1093_v33 = vpop.f32.mrf.mxu1 }
 0x104   : > { %v766_v34 = vadd.f32 %v1361_v2, %v752_v30  ;;  %v729_v35 = vadd.f32 %v1092_v31, %v1052_v27  ;;  %v1054_v36 = vpop.f32.mrf.mxu0 }
 0x105   : > { %v1055_v37 = vadd.f32 %v1054_v36, %v1053_v32  ;;  %v1094_v38 = vpop.f32.mrf.mxu1 }
 0x106   : > { %v773_v40 = vmax.f32 %v766_v34, 0.0  ;;  %v753_v41 = vmul.f32 %v1355_v57, %v729_v35  ;;  %v1095_v42 = vadd.f32 %v1094_v38, %v1093_v33  ;;  %v1056_v43 = vpop.f32.mrf.mxu0 }
 0x107   : > { %v1096_v44 = vpop.f32.mrf.mxu1 }
 0x108   : > { %v1013_v45 = vpack.c.bf16 %v773_v40, %v772_v39  ;;  %v732_v46 = vadd.f32 %v1095_v42, %v1055_v37  ;;  %v1057_v47 = vpop.f32.mrf.mxu0  ;;  %v767_v50 = vadd.f32 %v1361_v2, %v753_v41 }
 0x109   : > { %v1058_v48 = vadd.f32 %v1057_v47, %v1056_v43  ;;  %v1097_v49 = vpop.f32.mrf.mxu1 }
 0x10a   : > { %1020 = vst [vmem:[%s1371_s29 + $0x8] sm:$0xff] %v1013_v45   ;;  %v754_v51 = vmul.f32 %v1355_v57, %v732_v46  ;;  %v1098_v52 = vadd.f32 %v1097_v49, %v1096_v44  ;;  %v1059_v53 = vpop.f32.mrf.mxu0  ;;  %v774_v60 = vmax.f32 %v767_v50, 0.0 }
 0x10b   : > { %v1099_v54 = vpop.f32.mrf.mxu1 }
 0x10c   : > { %v768_v55 = vadd.f32 %v1361_v2, %v754_v51  ;;  %v737_v56 = vadd.f32 %v1098_v52, %v1058_v48  ;;  %v1060_v58 = vpop.f32.mrf.mxu0 }
 0x10d   : > { %v1100_v59 = vpop.f32.mrf.mxu1 }
 0x10e   : > { %v775_v61 = vmax.f32 %v768_v55, 0.0  ;;  %v755_v62 = vmul.f32 %v1355_v57, %v737_v56 }
 0x110   : > { %v1018_v63 = vpack.c.bf16 %v775_v61, %v774_v60  ;;  %v769_v0 = vadd.f32 %v1361_v2, %v755_v62 }
 0x112   : > { %1021 = vst [vmem:[%s1371_s29 + $0x10] sm:$0xff] %v1018_v63   ;;  %v776_v1 = vmax.f32 %v769_v0, 0.0 }
 0x114   : > { %v1004_v3 = vpack.c.bf16 %v776_v1, %v776_v1 }
 0x116   : > { %812 = vst [vmem:[%s1371_s29 + $0x18] sm:$0xf] %v1004_v3 }
 0x117 PF: > { %s14_s17 = sadd.s32 1, %s1202_s17   ;;  %s1400_s15 = smov %s1198_s16 }
 0x118   : > { %p11_p5 = scmp.ge.s32.totalorder %s14_s17, 4   ;;  %s1401_s16 = smov %s1403_s18 }
 0x11a   :  { %13 = sbr.rel (!%p11_p5) target bundleno = 2 (0x2), region = 75 }

// kernel: inception_net_forward.20
= control target key start
LH: loop header
LB: loop body
LE: loop exit
PB: predicated region body
PF: predicated region fallthrough
CT: control target
= control target key end

     0   :  { %vm176_vm0 = vcmask 1045504   ;;  %vm767_vm1 = vcmask 1043456   ;;  %vm768_vm2 = vsmask.f32 3328  ;;  %s1420_s0 = inlined_call_operand.vmem [shape: bf16[2,9,9,128], index: 0, kind: input, shape index: {}]   ;;  %s1421_s1 = inlined_call_operand.vmem [shape: bf16[2,7,7,128], index: 1, kind: output, shape index: {}]  }
   0x1   :  { %v8_v0 = vld [vmem:[%s1420_s0] ss:$8 sps:$4 sm:$0xff]   ;;  %v93_v2 = vld [vmem:[%s1420_s0 + $0x4] sm:$0x1]  ;;  %v831_v8 = vld [vmem:[%s1420_s0 + $0xc] sm:$0x1] }
   0x2   :  { %v92_v1 = vld [vmem:[%s1420_s0] sm:$0xe]  ;;  %v22_v3 = vunpack.c.l.bf16 %v8_v0  ;;  %v121_v5 = vunpack.c.l.bf16 %v93_v2  ;;  %v262_v6 = vunpack.c.h.bf16 %v8_v0  ;;  %v830_v7 = vld [vmem:[%s1420_s0 + $0x8] sm:$0xe]  ;;  %v375_v11 = vunpack.c.l.bf16 %v831_v8  ;;  %v872_v13 = vld [vmem:[%s1420_s0 + $0x10] sm:$0xe] }
   0x3   :  { %v120_v4 = vunpack.c.l.bf16 %v92_v1  ;;  %v928_v9 = vld [vmem:[%s1420_s0 + $0x8] ss:$8 sps:$4 sm:$0xff]   ;;  %v374_v10 = vunpack.c.l.bf16 %v830_v7  ;;  %v873_v14 = vld [vmem:[%s1420_s0 + $0x14] sm:$0x1]  ;;  %v627_v22 = vunpack.c.l.bf16 %v872_v13  ;;  %v95_v28 = vld [vmem:[%s1420_s0 + $0xc] sm:$0x1] }
   0x4   :  { %v515_v12 = vunpack.c.h.bf16 %v928_v9  ;;  %v23_v15 = vunpack.c.l.bf16 %v928_v9  ;;  %v50_v16 = vrot.slane %v22_v3, 1  ;;  %v178_v18 = vrot.slane %v121_v5, 2  ;;  %v94_v23 = vld [vmem:[%s1420_s0 + $0x8] sm:$0xe]  ;;  %v948_v29 = vld [vmem:[%s1420_s0 + $0x10] ss:$8 sps:$4 sm:$0xff]   ;;  %vm1014_vm3 = vmand %vm767_vm1, %vm768_vm2 }
   0x5   :  { %v177_v17 = vrot.slane %v120_v4, 2  ;;  %v304_v19 = vrot.slane %v262_v6, 1  ;;  %v430_v20 = vrot.slane %v374_v10, 2  ;;  %v431_v21 = vrot.slane %v375_v11, 2  ;;  %v832_v34 = vld [vmem:[%s1420_s0 + $0x10] sm:$0xe] }
   0x6   :  { %v78_v24 = vmax.f32 %v22_v3, %v50_v16  ;;  %v628_v26 = vunpack.c.l.bf16 %v873_v14  ;;  %v51_v27 = vrot.slane %v23_v15, 1  ;;  %v952_v30 = vrot.slane %v515_v12, 1  ;;  %v833_v35 = vld [vmem:[%s1420_s0 + $0x14] sm:$0x1]  ;;  %v874_v40 = vld [vmem:[%s1420_s0 + $0x18] sm:$0xe] }
   0x7   :  { %v179_v25 = vsel %vm176_vm0, %v177_v17, %v178_v18  ;;  %v683_v31 = vrot.slane %v627_v22, 2  ;;  %v122_v32 = vunpack.c.l.bf16 %v94_v23  ;;  %v123_v33 = vunpack.c.l.bf16 %v95_v28  ;;  %v875_v45 = vld [vmem:[%s1420_s0 + $0x1c] sm:$0x1]  ;;  %v10_v50 = vld [vmem:[%s1420_s0 + $0x10] ss:$8 sps:$4 sm:$0xff]  }
   0x8   :  { %v233_v36 = vmax.f32 %v78_v24, %v179_v25  ;;  %v684_v37 = vrot.slane %v628_v26, 2  ;;  %v79_v38 = vmax.f32 %v23_v15, %v51_v27  ;;  %v263_v39 = vunpack.c.l.bf16 %v948_v29  ;;  %v96_v51 = vld [vmem:[%s1420_s0 + $0x10] sm:$0xe]  ;;  %v97_v56 = vld [vmem:[%s1420_s0 + $0x14] sm:$0x1] }
   0x9   :  { %v180_v41 = vrot.slane %v122_v32, 2  ;;  %v181_v42 = vrot.slane %v123_v33, 2  ;;  %v376_v43 = vunpack.c.l.bf16 %v832_v34  ;;  %v377_v44 = vunpack.c.l.bf16 %v833_v35  ;;  %v834_v61 = vld [vmem:[%s1420_s0 + $0x18] sm:$0xe]  ;;  %v876_v17 = vld [vmem:[%s1420_s0 + $0x20] sm:$0xe] }
   0xa   :  { %v276_v46 = vmax.f32 %v233_v36, %v262_v6  ;;  %v432_v47 = vsel %vm176_vm0, %v430_v20, %v431_v21  ;;  %v685_v48 = vsel %vm176_vm0, %v683_v31, %v684_v37  ;;  %v305_v49 = vrot.slane %v263_v39, 1  ;;  %v835_v6 = vld [vmem:[%s1420_s0 + $0x1c] sm:$0x1]  ;;  %v877_v18 = vld [vmem:[%s1420_s0 + $0x24] sm:$0x1] }
   0xb   :  { %v182_v52 = vsel %vm176_vm0, %v180_v41, %v181_v42  ;;  %v433_v53 = vrot.slane %v376_v43, 2  ;;  %v434_v54 = vrot.slane %v377_v44, 2  ;;  %v629_v55 = vunpack.c.l.bf16 %v874_v40  ;;  %v860_v9 = vld [vmem:[%s1420_s0 + $0x18] ss:$8 sps:$4 sm:$0xff]  }
   0xc   :  { %v332_v57 = vmax.f32 %v276_v46, %v304_v19  ;;  %v234_v58 = vmax.f32 %v79_v38, %v182_v52  ;;  %v516_v59 = vunpack.c.h.bf16 %v948_v29  ;;  %v630_v60 = vunpack.c.l.bf16 %v875_v45  ;;  %v98_v31 = vld [vmem:[%s1420_s0 + $0x18] sm:$0xe]  ;;  %v1010_v36 = vld [vmem:[%s1420_s0 + $0x20] ss:$8 sps:$4 sm:$0xff]  }
   0xd   :  { %v435_v62 = vsel %vm176_vm0, %v433_v53, %v434_v54  ;;  %v686_v63 = vrot.slane %v629_v55, 2  ;;  %v24_v0 = vunpack.c.l.bf16 %v10_v50  ;;  %v124_v1 = vunpack.c.l.bf16 %v96_v51  ;;  %v770_v38 = vld [vmem:[%s1421_s1] sm:$0xf]  ;;  %v837_v51 = vld [vmem:[%s1420_s0 + $0x24] sm:$0x1] }
   0xe   :  { %v486_v2 = vmax.f32 %v332_v57, %v432_v47  ;;  %v277_v3 = vmax.f32 %v234_v58, %v263_v39  ;;  %v687_v4 = vrot.slane %v630_v60, 2  ;;  %v125_v5 = vunpack.c.l.bf16 %v97_v56  ;;  %v836_v47 = vld [vmem:[%s1420_s0 + $0x20] sm:$0xe]  ;;  %v878_v52 = vld [vmem:[%s1420_s0 + $0x28] sm:$0xe] }
   0xf   :  { %v52_v7 = vrot.slane %v24_v0, 1  ;;  %v183_v8 = vrot.slane %v124_v1, 2  ;;  %v264_v10 = vunpack.c.h.bf16 %v10_v50  ;;  %v378_v11 = vunpack.c.l.bf16 %v834_v61  ;;  %v879_v57 = vld [vmem:[%s1420_s0 + $0x2c] sm:$0x1]  ;;  %v773_v58 = vld [vmem:[%s1421_s1 + $0x4] sm:$0xf] }
  0x10   :  { %v529_v13 = vmax.f32 %v486_v2, %v515_v12  ;;  %v333_v14 = vmax.f32 %v277_v3, %v305_v49  ;;  %v558_v15 = vrot.slane %v516_v59, 1  ;;  %v184_v16 = vrot.slane %v125_v5, 2  ;;  %v12_v3 = vld [vmem:[%s1420_s0 + $0x20] ss:$8 sps:$4 sm:$0xff]  }
  0x11   :  { %v688_v19 = vsel %vm176_vm0, %v686_v63, %v687_v4  ;;  %v80_v20 = vmax.f32 %v24_v0, %v52_v7  ;;  %v379_v21 = vunpack.c.l.bf16 %v835_v6  ;;  %v436_v22 = vrot.slane %v378_v11, 2 }
  0x12   :  { %v585_v12 = vmax.f32 %v529_v13, %v952_v30  ;;  %v487_v23 = vmax.f32 %v333_v14, %v435_v62  ;;  %v185_v24 = vsel %vm176_vm0, %v183_v8, %v184_v16  ;;  %v306_v25 = vrot.slane %v264_v10, 1  ;;  %v99_v30 = vld [vmem:[%s1420_s0 + $0x1c] sm:$0x1]  ;;  %v100_v8 = vld [vmem:[%s1420_s0 + $0x20] sm:$0xe] }
  0x13   :  { %v235_v26 = vmax.f32 %v80_v20, %v185_v24  ;;  %v437_v27 = vrot.slane %v379_v21, 2  ;;  %v631_v28 = vunpack.c.l.bf16 %v876_v17  ;;  %v632_v29 = vunpack.c.l.bf16 %v877_v18  ;;  %v838_v20 = vld [vmem:[%s1420_s0 + $0x28] sm:$0xe] }
  0x14   :  { %v739_v32 = vmax.f32 %v585_v12, %v685_v48  ;;  %v530_v33 = vmax.f32 %v487_v23, %v516_v59  ;;  %v517_v34 = vunpack.c.h.bf16 %v860_v9  ;;  %v25_v35 = vunpack.c.l.bf16 %v860_v9  ;;  %v839_v23 = vld [vmem:[%s1420_s0 + $0x2c] sm:$0x1] }
  0x15   :  { %v278_v39 = vmax.f32 %v235_v26, %v264_v10  ;;  %v438_v40 = vsel %vm176_vm0, %v436_v22, %v437_v27  ;;  %v689_v41 = vrot.slane %v631_v28, 2  ;;  %v690_v42 = vrot.slane %v632_v29, 2  ;;  %v101_v10 = vld [vmem:[%s1420_s0 + $0x24] sm:$0x1]  ;;  %v776_v28 = vld [vmem:[%s1421_s1 + $0x8] sm:$0xf] }
  0x16   :  { %v753_v43 = vpack.c.bf16 %v739_v32, %v739_v32  ;;  %v586_v44 = vmax.f32 %v530_v33, %v558_v15  ;;  %v53_v45 = vrot.slane %v25_v35, 1  ;;  %v126_v46 = vunpack.c.l.bf16 %v98_v31 }
  0x17   :  { %v334_v48 = vmax.f32 %v278_v39, %v306_v25  ;;  %v127_v49 = vunpack.c.l.bf16 %v99_v30  ;;  %v265_v50 = vunpack.c.l.bf16 %v1010_v36  ;;  %v559_v60 = vrot.slane %v517_v34, 1  ;;  %v862_v39 = vld [vmem:[%s1420_s0 + $0x28] ss:$8 sps:$4 sm:$0xff]  }
  0x18   :  { %v771_v53 = vsel %vm1014_vm3, %v753_v43, %v770_v38  ;;  %v740_v54 = vmax.f32 %v586_v44, %v688_v19  ;;  %v81_v55 = vmax.f32 %v25_v35, %v53_v45  ;;  %v186_v56 = vrot.slane %v126_v46, 2  ;;  %v102_v45 = vld [vmem:[%s1420_s0 + $0x28] sm:$0xe] }
  0x19   :  { %772 = vst [vmem:[%s1421_s1] sm:$0xf] %v771_v53  ;;  %v488_v59 = vmax.f32 %v334_v48, %v438_v40  ;;  %v187_v61 = vrot.slane %v127_v49, 2  ;;  %v380_v62 = vunpack.c.l.bf16 %v836_v47  ;;  %v691_v0 = vsel %vm176_vm0, %v689_v41, %v690_v42  ;;  %v881_v40 = vld [vmem:[%s1420_s0 + $0x34] sm:$0x1] }
  0x1a   :  { %v754_v63 = vpack.c.bf16 %v740_v54, %v740_v54  ;;  %v381_v1 = vunpack.c.l.bf16 %v837_v51  ;;  %v633_v2 = vunpack.c.l.bf16 %v878_v52  ;;  %v634_v7 = vunpack.c.l.bf16 %v879_v57 }
  0x1b   :  { %v531_v4 = vmax.f32 %v488_v59, %v517_v34  ;;  %v188_v5 = vsel %vm176_vm0, %v186_v56, %v187_v61  ;;  %v439_v6 = vrot.slane %v380_v62, 2  ;;  %v307_v14 = vrot.slane %v265_v50, 1  ;;  %v880_v34 = vld [vmem:[%s1420_s0 + $0x30] sm:$0xe] }
  0x1c   :  { %v774_v11 = vsel %vm1014_vm3, %v754_v63, %v773_v58  ;;  %v236_v13 = vmax.f32 %v81_v55, %v188_v5  ;;  %v440_v15 = vrot.slane %v381_v1, 2  ;;  %v518_v17 = vunpack.c.h.bf16 %v1010_v36  ;;  %v1095_v55 = vld [vmem:[%s1420_s0 + $0x30] ss:$8 sps:$4 sm:$0xff]   ;;  %v841_v1 = vld [vmem:[%s1420_s0 + $0x34] sm:$0x1] }
  0x1d   :  { %775 = vst [vmem:[%s1421_s1 + $0x4] sm:$0xf] %v774_v11  ;;  %v587_v16 = vmax.f32 %v531_v4, %v559_v60  ;;  %v692_v18 = vrot.slane %v633_v2, 2  ;;  %v26_v19 = vunpack.c.l.bf16 %v12_v3  ;;  %v693_v22 = vrot.slane %v634_v7, 2  ;;  %v840_v56 = vld [vmem:[%s1420_s0 + $0x30] sm:$0xe] }
  0x1e   :  { %v279_v21 = vmax.f32 %v236_v13, %v265_v50  ;;  %v128_v9 = vunpack.c.l.bf16 %v100_v8  ;;  %v129_v12 = vunpack.c.l.bf16 %v101_v10  ;;  %v441_v25 = vsel %vm176_vm0, %v439_v6, %v440_v15  ;;  %v103_v50 = vld [vmem:[%s1420_s0 + $0x2c] sm:$0x1]  ;;  %v882_v13 = vld [vmem:[%s1420_s0 + $0x38] sm:$0xe] }
  0x1f   :  { %v741_v24 = vmax.f32 %v587_v16, %v691_v0  ;;  %v54_v26 = vrot.slane %v26_v19, 1  ;;  %v266_v27 = vunpack.c.h.bf16 %v12_v3  ;;  %v382_v33 = vunpack.c.l.bf16 %v838_v20  ;;  %v779_v7 = vld [vmem:[%s1421_s1 + $0xc] sm:$0xf] }
  0x20   :  { %v335_v29 = vmax.f32 %v279_v21, %v307_v14  ;;  %v189_v31 = vrot.slane %v128_v9, 2  ;;  %v190_v32 = vrot.slane %v129_v12, 2  ;;  %v560_v30 = vrot.slane %v518_v17, 1 }
  0x21   :  { %v755_v35 = vpack.c.bf16 %v741_v24, %v741_v24  ;;  %v82_v36 = vmax.f32 %v26_v19, %v54_v26  ;;  %v383_v38 = vunpack.c.l.bf16 %v839_v23  ;;  %v308_v43 = vrot.slane %v266_v27, 1  ;;  %v14_v19 = vld [vmem:[%s1420_s0 + $0x30] ss:$8 sps:$4 sm:$0xff]  }
  0x22   :  { %v489_v41 = vmax.f32 %v335_v29, %v441_v25  ;;  %v191_v42 = vsel %vm176_vm0, %v189_v31, %v190_v32  ;;  %v442_v44 = vrot.slane %v382_v33, 2  ;;  %v635_v49 = vunpack.c.l.bf16 %v880_v34  ;;  %v104_v26 = vld [vmem:[%s1420_s0 + $0x30] sm:$0xe]  ;;  %v842_v33 = vld [vmem:[%s1420_s0 + $0x38] sm:$0xe] }
  0x23   :  { %v777_v46 = vsel %vm1014_vm3, %v755_v35, %v776_v28  ;;  %v237_v47 = vmax.f32 %v82_v36, %v191_v42  ;;  %v443_v48 = vrot.slane %v383_v38, 2  ;;  %v694_v52 = vsel %vm176_vm0, %v692_v18, %v693_v22  ;;  %v883_v18 = vld [vmem:[%s1420_s0 + $0x3c] sm:$0x1] }
  0x24   :  { %778 = vst [vmem:[%s1421_s1 + $0x8] sm:$0xf] %v777_v46  ;;  %v532_v51 = vmax.f32 %v489_v41, %v518_v17  ;;  %v636_v53 = vunpack.c.l.bf16 %v881_v40  ;;  %v27_v54 = vunpack.c.l.bf16 %v862_v39  ;;  %v519_v59 = vunpack.c.h.bf16 %v862_v39  ;;  %v843_v42 = vld [vmem:[%s1420_s0 + $0x3c] sm:$0x1] }
  0x25   :  { %v280_v57 = vmax.f32 %v237_v47, %v266_v27  ;;  %v444_v58 = vsel %vm176_vm0, %v442_v44, %v443_v48  ;;  %v130_v60 = vunpack.c.l.bf16 %v102_v45  ;;  %v695_v62 = vrot.slane %v635_v49, 2  ;;  %v105_v27 = vld [vmem:[%s1420_s0 + $0x34] sm:$0x1]  ;;  %v884_v47 = vld [vmem:[%s1420_s0 + $0x40] sm:$0xe] }
  0x26   :  { %v588_v61 = vmax.f32 %v532_v51, %v560_v30  ;;  %v55_v63 = vrot.slane %v27_v54, 1  ;;  %v131_v0 = vunpack.c.l.bf16 %v103_v50  ;;  %v267_v4 = vunpack.c.l.bf16 %v1095_v55  ;;  %v885_v48 = vld [vmem:[%s1420_s0 + $0x44] sm:$0x1]  ;;  %v782_v49 = vld [vmem:[%s1421_s1 + $0x10] sm:$0xf] }
  0x27   :  { %v336_v2 = vmax.f32 %v280_v57, %v308_v43  ;;  %v192_v3 = vrot.slane %v130_v60, 2  ;;  %v384_v5 = vunpack.c.l.bf16 %v840_v56  ;;  %v696_v8 = vrot.slane %v636_v53, 2 }
  0x28   :  { %v742_v6 = vmax.f32 %v588_v61, %v694_v52  ;;  %v83_v10 = vmax.f32 %v27_v54, %v55_v63  ;;  %v193_v11 = vrot.slane %v131_v0, 2  ;;  %v561_v15 = vrot.slane %v519_v59, 1  ;;  %v106_v63 = vld [vmem:[%s1420_s0 + $0x48] sm:$0xe] }
  0x29   :  { %v490_v14 = vmax.f32 %v336_v2, %v444_v58  ;;  %v385_v16 = vunpack.c.l.bf16 %v841_v1  ;;  %v445_v17 = vrot.slane %v384_v5, 2  ;;  %v309_v22 = vrot.slane %v267_v4, 1  ;;  %v864_v58 = vld [vmem:[%s1420_s0 + $0x40] ss:$8 sps:$4 sm:$0xff]   ;;  %v1162_v5 = vld [vmem:[%s1420_s0 + $0x50] ss:$8 sps:$4 sm:$0xff]  }
  0x2a   :  { %v756_v20 = vpack.c.bf16 %v742_v6, %v742_v6  ;;  %v194_v21 = vsel %vm176_vm0, %v192_v3, %v193_v11  ;;  %v520_v9 = vunpack.c.h.bf16 %v1095_v55  ;;  %v637_v25 = vunpack.c.l.bf16 %v882_v13  ;;  %v844_v11 = vld [vmem:[%s1420_s0 + $0x50] sm:$0xe] }
  0x2b   :  { %v533_v12 = vmax.f32 %v490_v14, %v519_v59  ;;  %v238_v23 = vmax.f32 %v83_v10, %v194_v21  ;;  %v446_v24 = vrot.slane %v385_v16, 2  ;;  %v697_v29 = vsel %vm176_vm0, %v695_v62, %v696_v8 }
  0x2c   :  { %v780_v28 = vsel %vm1014_vm3, %v756_v20, %v779_v7  ;;  %v638_v31 = vunpack.c.l.bf16 %v883_v18  ;;  %v28_v32 = vunpack.c.l.bf16 %v14_v19  ;;  %v562_v36 = vrot.slane %v520_v9, 1 }
  0x2d   :  { %781 = vst [vmem:[%s1421_s1 + $0xc] sm:$0xf] %v780_v28  ;;  %v589_v34 = vmax.f32 %v533_v12, %v561_v15  ;;  %v281_v35 = vmax.f32 %v238_v23, %v267_v4  ;;  %v447_v30 = vsel %vm176_vm0, %v445_v17, %v446_v24  ;;  %v132_v39 = vunpack.c.l.bf16 %v104_v26  ;;  %v107_v4 = vld [vmem:[%s1420_s0 + $0x4c] sm:$0x1]  ;;  %v845_v17 = vld [vmem:[%s1420_s0 + $0x54] sm:$0x1] }
  0x2e   :  { %v56_v38 = vrot.slane %v28_v32, 1  ;;  %v133_v40 = vunpack.c.l.bf16 %v105_v27  ;;  %v268_v41 = vunpack.c.h.bf16 %v14_v19  ;;  %v698_v45 = vrot.slane %v637_v25, 2  ;;  %v886_v24 = vld [vmem:[%s1420_s0 + $0x58] sm:$0xe]  ;;  %v887_v25 = vld [vmem:[%s1420_s0 + $0x5c] sm:$0x1] }
  0x2f   :  { %v743_v43 = vmax.f32 %v589_v34, %v697_v29  ;;  %v337_v44 = vmax.f32 %v281_v35, %v309_v22  ;;  %v386_v46 = vunpack.c.l.bf16 %v842_v33  ;;  %v699_v50 = vrot.slane %v638_v31, 2  ;;  %v785_v26 = vld [vmem:[%s1421_s1 + $0x14] sm:$0xf] }
  0x30   :  { %v84_v51 = vmax.f32 %v28_v32, %v56_v38  ;;  %v195_v52 = vrot.slane %v132_v39, 2  ;;  %v196_v53 = vrot.slane %v133_v40, 2  ;;  %v310_v56 = vrot.slane %v268_v41, 1 }
  0x31   :  { %v757_v54 = vpack.c.bf16 %v743_v43, %v743_v43  ;;  %v491_v55 = vmax.f32 %v337_v44, %v447_v30  ;;  %v387_v57 = vunpack.c.l.bf16 %v843_v42  ;;  %v448_v60 = vrot.slane %v386_v46, 2  ;;  %v16_v30 = vld [vmem:[%s1420_s0 + $0x50] ss:$8 sps:$4 sm:$0xff]   ;;  %v109_v42 = vld [vmem:[%s1420_s0 + $0x54] sm:$0x1] }
  0x32   :  { %v197_v59 = vsel %vm176_vm0, %v195_v52, %v196_v53  ;;  %v639_v61 = vunpack.c.l.bf16 %v884_v47  ;;  %v640_v62 = vunpack.c.l.bf16 %v885_v48  ;;  %v700_v6 = vsel %vm176_vm0, %v698_v45, %v699_v50  ;;  %v846_v47 = vld [vmem:[%s1420_s0 + $0x58] sm:$0xe] }
  0x33   :  { %v783_v0 = vsel %vm1014_vm3, %v757_v54, %v782_v49  ;;  %v534_v1 = vmax.f32 %v491_v55, %v520_v9  ;;  %v239_v2 = vmax.f32 %v84_v51, %v197_v59  ;;  %v449_v3 = vrot.slane %v387_v57, 2 }
  0x34   :  { %784 = vst [vmem:[%s1421_s1 + $0x10] sm:$0xf] %v783_v0  ;;  %v521_v7 = vunpack.c.l.bf16 %v864_v58  ;;  %v701_v8 = vrot.slane %v639_v61, 2  ;;  %v29_v10 = vunpack.c.h.bf16 %v864_v58  ;;  %v702_v15 = vrot.slane %v640_v62, 2 }
  0x35   :  { %v590_v13 = vmax.f32 %v534_v1, %v562_v36  ;;  %v282_v14 = vmax.f32 %v239_v2, %v268_v41  ;;  %v134_v16 = vunpack.c.l.bf16 %v106_v63  ;;  %v450_v18 = vsel %vm176_vm0, %v448_v60, %v449_v3  ;;  %v108_v41 = vld [vmem:[%s1420_s0 + $0x50] sm:$0xe]  ;;  %v888_v1 = vld [vmem:[%s1420_s0 + $0x60] sm:$0xe]  ;;  %v889_v2 = vld [vmem:[%s1420_s0 + $0x64] sm:$0x1] }
  0x36   :  { %v57_v19 = vrot.slane %v29_v10, 1  ;;  %v135_v20 = vunpack.c.l.bf16 %v107_v4  ;;  %v269_v21 = vunpack.c.l.bf16 %v1162_v5  ;;  %v388_v23 = vunpack.c.l.bf16 %v844_v11  ;;  %v788_v3 = vld [vmem:[%s1421_s1 + $0x18] sm:$0xf] }
  0x37   :  { %v744_v22 = vmax.f32 %v590_v13, %v700_v6  ;;  %v338_v9 = vmax.f32 %v282_v14, %v310_v56  ;;  %v198_v12 = vrot.slane %v134_v16, 2  ;;  %v563_v27 = vrot.slane %v521_v7, 1  ;;  %v847_v56 = vld [vmem:[%s1420_s0 + $0x5c] sm:$0x1] }
  0x38   :  { %v85_v28 = vmax.f32 %v29_v10, %v57_v19  ;;  %v199_v29 = vrot.slane %v135_v20, 2  ;;  %v389_v31 = vunpack.c.l.bf16 %v845_v17  ;;  %v703_v34 = vsel %vm176_vm0, %v701_v8, %v702_v15  ;;  %v866_v8 = vld [vmem:[%s1420_s0 + $0x58] ss:$8 sps:$4 sm:$0xff]   ;;  %v111_v20 = vld [vmem:[%s1420_s0 + $0x5c] sm:$0x1] }
  0x39   :  { %v758_v32 = vpack.c.bf16 %v744_v22, %v744_v22  ;;  %v492_v33 = vmax.f32 %v338_v9, %v450_v18  ;;  %v451_v35 = vrot.slane %v388_v23, 2  ;;  %v641_v39 = vunpack.c.l.bf16 %v886_v24  ;;  %v110_v19 = vld [vmem:[%s1420_s0 + $0x58] sm:$0xe]  ;;  %v1234_v23 = vld [vmem:[%s1420_s0 + $0x60] ss:$8 sps:$4 sm:$0xff]  }
  0x3a   :  { %v200_v36 = vsel %vm176_vm0, %v198_v12, %v199_v29  ;;  %v452_v38 = vrot.slane %v389_v31, 2  ;;  %v642_v40 = vunpack.c.l.bf16 %v887_v25  ;;  %v311_v46 = vrot.slane %v269_v21, 1  ;;  %v848_v24 = vld [vmem:[%s1420_s0 + $0x60] sm:$0xe] }
  0x3b   :  { %v786_v43 = vsel %vm1014_vm3, %v758_v32, %v785_v26  ;;  %v535_v44 = vmax.f32 %v492_v33, %v521_v7  ;;  %v240_v45 = vmax.f32 %v85_v28, %v200_v36  ;;  %v522_v49 = vunpack.c.h.bf16 %v1162_v5 }
  0x3c   :  { %787 = vst [vmem:[%s1421_s1 + $0x14] sm:$0xf] %v786_v43  ;;  %v453_v48 = vsel %vm176_vm0, %v451_v35, %v452_v38  ;;  %v704_v50 = vrot.slane %v641_v39, 2  ;;  %v30_v51 = vunpack.c.l.bf16 %v16_v30  ;;  %v136_v54 = vunpack.c.l.bf16 %v108_v41 }
  0x3d   :  { %v591_v52 = vmax.f32 %v535_v44, %v563_v27  ;;  %v283_v53 = vmax.f32 %v240_v45, %v269_v21  ;;  %v137_v55 = vunpack.c.l.bf16 %v109_v42  ;;  %v705_v57 = vrot.slane %v642_v40, 2  ;;  %v791_v40 = vld [vmem:[%s1421_s1 + $0x1c] sm:$0xf]  ;;  %v890_v44 = vld [vmem:[%s1420_s0 + $0x68] sm:$0xe] }
  0x3e   :  { %v58_v58 = vrot.slane %v30_v51, 1  ;;  %v270_v59 = vunpack.c.h.bf16 %v16_v30  ;;  %v390_v60 = vunpack.c.l.bf16 %v846_v47  ;;  %v201_v63 = vrot.slane %v136_v54, 2 }
  0x3f   :  { %v745_v61 = vmax.f32 %v591_v52, %v703_v34  ;;  %v339_v62 = vmax.f32 %v283_v53, %v311_v46  ;;  %v202_v0 = vrot.slane %v137_v55, 2  ;;  %v564_v4 = vrot.slane %v522_v49, 1  ;;  %v849_v34 = vld [vmem:[%s1420_s0 + $0x64] sm:$0x1] }
  0x40   :  { %v86_v5 = vmax.f32 %v30_v51, %v58_v58  ;;  %v391_v6 = vunpack.c.l.bf16 %v847_v56  ;;  %v454_v7 = vrot.slane %v390_v60, 2  ;;  %v312_v14 = vrot.slane %v270_v59, 1  ;;  %v113_v60 = vld [vmem:[%s1420_s0 + $0x64] sm:$0x1] }
  0x41   :  { %v759_v10 = vpack.c.bf16 %v745_v61, %v745_v61  ;;  %v493_v11 = vmax.f32 %v339_v62, %v453_v48  ;;  %v203_v13 = vsel %vm176_vm0, %v201_v63, %v202_v0  ;;  %v643_v17 = vunpack.c.l.bf16 %v888_v1  ;;  %v850_v1 = vld [vmem:[%s1420_s0 + $0x68] sm:$0xe] }
  0x42   :  { %v241_v15 = vmax.f32 %v86_v5, %v203_v13  ;;  %v455_v16 = vrot.slane %v391_v6, 2  ;;  %v644_v18 = vunpack.c.l.bf16 %v889_v2  ;;  %v706_v9 = vsel %vm176_vm0, %v704_v50, %v705_v57  ;;  %v18_v50 = vld [vmem:[%s1420_s0 + $0x60] ss:$8 sps:$4 sm:$0xff]  }
  0x43   :  { %v789_v21 = vsel %vm1014_vm3, %v759_v10, %v788_v3  ;;  %v536_v22 = vmax.f32 %v493_v11, %v522_v49  ;;  %v31_v12 = vunpack.c.l.bf16 %v866_v8  ;;  %v523_v27 = vunpack.c.h.bf16 %v866_v8  ;;  %v891_v49 = vld [vmem:[%s1420_s0 + $0x6c] sm:$0x1] }
  0x44   :  { %790 = vst [vmem:[%s1421_s1 + $0x18] sm:$0xf] %v789_v21  ;;  %v284_v25 = vmax.f32 %v241_v15, %v270_v59  ;;  %v456_v26 = vsel %vm176_vm0, %v454_v7, %v455_v16  ;;  %v707_v28 = vrot.slane %v643_v17, 2  ;;  %v138_v32 = vunpack.c.l.bf16 %v110_v19  ;;  %v112_v59 = vld [vmem:[%s1420_s0 + $0x60] sm:$0xe] }
  0x45   :  { %v592_v29 = vmax.f32 %v536_v22, %v564_v4  ;;  %v59_v31 = vrot.slane %v31_v12, 1  ;;  %v139_v33 = vunpack.c.l.bf16 %v111_v20  ;;  %v708_v30 = vrot.slane %v644_v18, 2  ;;  %v851_v11 = vld [vmem:[%s1420_s0 + $0x6c] sm:$0x1]  ;;  %v892_v17 = vld [vmem:[%s1420_s0 + $0x70] sm:$0xe] }
  0x46   :  { %v340_v35 = vmax.f32 %v284_v25, %v312_v14  ;;  %v271_v36 = vunpack.c.l.bf16 %v1234_v23  ;;  %v392_v38 = vunpack.c.l.bf16 %v848_v24  ;;  %v204_v42 = vrot.slane %v138_v32, 2  ;;  %v893_v18 = vld [vmem:[%s1420_s0 + $0x74] sm:$0x1]  ;;  %v794_v19 = vld [vmem:[%s1421_s1 + $0x20] sm:$0xf] }
  0x47   :  { %v746_v39 = vmax.f32 %v592_v29, %v706_v9  ;;  %v87_v41 = vmax.f32 %v31_v12, %v59_v31  ;;  %v205_v43 = vrot.slane %v139_v33, 2  ;;  %v565_v46 = vrot.slane %v523_v27, 1  ;;  %v114_v32 = vld [vmem:[%s1420_s0 + $0x68] sm:$0xe] }
  0x48   :  { %v494_v45 = vmax.f32 %v340_v35, %v456_v26  ;;  %v393_v47 = vunpack.c.l.bf16 %v849_v34  ;;  %v457_v48 = vrot.slane %v392_v38, 2  ;;  %v313_v53 = vrot.slane %v271_v36, 1  ;;  %v868_v26 = vld [vmem:[%s1420_s0 + $0x68] ss:$8 sps:$4 sm:$0xff]  }
  0x49   :  { %v760_v51 = vpack.c.bf16 %v746_v39, %v746_v39  ;;  %v206_v52 = vsel %vm176_vm0, %v204_v42, %v205_v43  ;;  %v524_v54 = vunpack.c.h.bf16 %v1234_v23  ;;  %v645_v58 = vunpack.c.l.bf16 %v890_v44  ;;  %v1304_v38 = vld [vmem:[%s1420_s0 + $0x70] ss:$8 sps:$4 sm:$0xff]  }
  0x4a   :  { %v537_v55 = vmax.f32 %v494_v45, %v523_v27  ;;  %v242_v56 = vmax.f32 %v87_v41, %v206_v52  ;;  %v458_v57 = vrot.slane %v393_v47, 2  ;;  %v709_v62 = vsel %vm176_vm0, %v707_v28, %v708_v30  ;;  %v852_v43 = vld [vmem:[%s1420_s0 + $0x70] sm:$0xe] }
  0x4b   :  { %v792_v61 = vsel %vm1014_vm3, %v760_v51, %v791_v40  ;;  %v646_v63 = vunpack.c.l.bf16 %v891_v49  ;;  %v32_v0 = vunpack.c.l.bf16 %v18_v50  ;;  %v566_v5 = vrot.slane %v524_v54, 1 }
  0x4c   :  { %793 = vst [vmem:[%s1421_s1 + $0x1c] sm:$0xf] %v792_v61  ;;  %v593_v2 = vmax.f32 %v537_v55, %v565_v46  ;;  %v285_v3 = vmax.f32 %v242_v56, %v271_v36  ;;  %v459_v4 = vsel %vm176_vm0, %v457_v48, %v458_v57  ;;  %v140_v7 = vunpack.c.l.bf16 %v112_v59  ;;  %v115_v36 = vld [vmem:[%s1420_s0 + $0x6c] sm:$0x1]  ;;  %v853_v48 = vld [vmem:[%s1420_s0 + $0x74] sm:$0x1] }
  0x4d   :  { %v60_v6 = vrot.slane %v32_v0, 1  ;;  %v141_v8 = vunpack.c.l.bf16 %v113_v60  ;;  %v272_v10 = vunpack.c.h.bf16 %v18_v50  ;;  %v710_v15 = vrot.slane %v645_v58, 2  ;;  %v894_v57 = vld [vmem:[%s1420_s0 + $0x78] sm:$0xe]  ;;  %v895_v58 = vld [vmem:[%s1420_s0 + $0x7c] sm:$0x1] }
  0x4e   :  { %v747_v13 = vmax.f32 %v593_v2, %v709_v62  ;;  %v341_v14 = vmax.f32 %v285_v3, %v313_v53  ;;  %v394_v16 = vunpack.c.l.bf16 %v850_v1  ;;  %v711_v20 = vrot.slane %v646_v63, 2  ;;  %v797_v59 = vld [vmem:[%s1421_s1 + $0x24] sm:$0xf] }
  0x4f   :  { %v88_v21 = vmax.f32 %v32_v0, %v60_v6  ;;  %v207_v22 = vrot.slane %v140_v7, 2  ;;  %v208_v9 = vrot.slane %v141_v8, 2  ;;  %v314_v24 = vrot.slane %v272_v10, 1 }
  0x50   :  { %v761_v12 = vpack.c.bf16 %v747_v13, %v747_v13  ;;  %v495_v23 = vmax.f32 %v341_v14, %v459_v4  ;;  %v395_v25 = vunpack.c.l.bf16 %v851_v11  ;;  %v460_v28 = vrot.slane %v394_v16, 2  ;;  %v20_v4 = vld [vmem:[%s1420_s0 + $0x70] ss:$8 sps:$4 sm:$0xff]   ;;  %v117_v11 = vld [vmem:[%s1420_s0 + $0x74] sm:$0x1] }
  0x51   :  { %v209_v27 = vsel %vm176_vm0, %v207_v22, %v208_v9  ;;  %v647_v29 = vunpack.c.l.bf16 %v892_v17  ;;  %v648_v31 = vunpack.c.l.bf16 %v893_v18  ;;  %v712_v39 = vsel %vm176_vm0, %v710_v15, %v711_v20  ;;  %v854_v17 = vld [vmem:[%s1420_s0 + $0x78] sm:$0xe] }
  0x52   :  { %v795_v33 = vsel %vm1014_vm3, %v761_v12, %v794_v19  ;;  %v538_v34 = vmax.f32 %v495_v23, %v524_v54  ;;  %v243_v35 = vmax.f32 %v88_v21, %v209_v27  ;;  %v461_v30 = vrot.slane %v395_v25, 2 }
  0x53   :  { %796 = vst [vmem:[%s1421_s1 + $0x20] sm:$0xf] %v795_v33  ;;  %v525_v40 = vunpack.c.h.bf16 %v868_v26  ;;  %v713_v41 = vrot.slane %v647_v29, 2  ;;  %v33_v42 = vunpack.c.l.bf16 %v868_v26  ;;  %v714_v46 = vrot.slane %v648_v31, 2 }
  0x54   :  { %v594_v44 = vmax.f32 %v538_v34, %v566_v5  ;;  %v286_v45 = vmax.f32 %v243_v35, %v272_v10  ;;  %v142_v47 = vunpack.c.l.bf16 %v114_v32  ;;  %v462_v49 = vsel %vm176_vm0, %v460_v28, %v461_v30  ;;  %v116_v10 = vld [vmem:[%s1420_s0 + $0x70] sm:$0xe]  ;;  %v896_v34 = vld [vmem:[%s1420_s0 + $0x80] sm:$0xe]  ;;  %v897_v35 = vld [vmem:[%s1420_s0 + $0x84] sm:$0x1] }
  0x55   :  { %v61_v50 = vrot.slane %v33_v42, 1  ;;  %v143_v51 = vunpack.c.l.bf16 %v115_v36  ;;  %v273_v52 = vunpack.c.l.bf16 %v1304_v38  ;;  %v396_v56 = vunpack.c.l.bf16 %v852_v43  ;;  %v800_v30 = vld [vmem:[%s1421_s1 + $0x28] sm:$0xf] }
  0x56   :  { %v748_v53 = vmax.f32 %v594_v44, %v712_v39  ;;  %v342_v54 = vmax.f32 %v286_v45, %v314_v24  ;;  %v210_v55 = vrot.slane %v142_v47, 2  ;;  %v567_v60 = vrot.slane %v525_v40, 1  ;;  %v855_v24 = vld [vmem:[%s1420_s0 + $0x7c] sm:$0x1] }
  0x57   :  { %v89_v61 = vmax.f32 %v33_v42, %v61_v50  ;;  %v211_v62 = vrot.slane %v143_v51, 2  ;;  %v397_v63 = vunpack.c.l.bf16 %v853_v48  ;;  %v715_v2 = vsel %vm176_vm0, %v713_v41, %v714_v46  ;;  %v870_v41 = vld [vmem:[%s1420_s0 + $0x78] ss:$8 sps:$4 sm:$0xff]   ;;  %v119_v51 = vld [vmem:[%s1420_s0 + $0x7c] sm:$0x1] }
  0x58   :  { %v762_v0 = vpack.c.bf16 %v748_v53, %v748_v53  ;;  %v496_v1 = vmax.f32 %v342_v54, %v462_v49  ;;  %v463_v3 = vrot.slane %v396_v56, 2  ;;  %v649_v7 = vunpack.c.l.bf16 %v894_v57  ;;  %v118_v50 = vld [vmem:[%s1420_s0 + $0x78] sm:$0xe]  ;;  %v829_v56 = vld [vmem:[%s1420_s0 + $0x80] ss:$8 sps:$4 sm:$0xff]  }
  0x59   :  { %v212_v5 = vsel %vm176_vm0, %v210_v55, %v211_v62  ;;  %v464_v6 = vrot.slane %v397_v63, 2  ;;  %v650_v8 = vunpack.c.l.bf16 %v895_v58  ;;  %v315_v16 = vrot.slane %v273_v52, 1  ;;  %v856_v57 = vld [vmem:[%s1420_s0 + $0x80] sm:$0xe] }
  0x5a   :  { %v798_v13 = vsel %vm1014_vm3, %v762_v0, %v797_v59  ;;  %v539_v14 = vmax.f32 %v496_v1, %v525_v40  ;;  %v244_v15 = vmax.f32 %v89_v61, %v212_v5  ;;  %v526_v19 = vunpack.c.h.bf16 %v1304_v38 }
  0x5b   :  { %799 = vst [vmem:[%s1421_s1 + $0x24] sm:$0xf] %v798_v13  ;;  %v465_v18 = vsel %vm176_vm0, %v463_v3, %v464_v6  ;;  %v716_v20 = vrot.slane %v649_v7, 2  ;;  %v34_v21 = vunpack.c.l.bf16 %v20_v4  ;;  %v144_v12 = vunpack.c.l.bf16 %v116_v10 }
  0x5c   :  { %v595_v22 = vmax.f32 %v539_v14, %v567_v60  ;;  %v287_v9 = vmax.f32 %v244_v15, %v273_v52  ;;  %v145_v23 = vunpack.c.l.bf16 %v117_v11  ;;  %v717_v25 = vrot.slane %v650_v8, 2  ;;  %v803_v8 = vld [vmem:[%s1421_s1 + $0x2c] sm:$0xf] }
  0x5d   :  { %v62_v26 = vrot.slane %v34_v21, 1  ;;  %v274_v27 = vunpack.c.h.bf16 %v20_v4  ;;  %v398_v28 = vunpack.c.l.bf16 %v854_v17  ;;  %v213_v32 = vrot.slane %v144_v12, 2  ;;  %v898_v17 = vld [vmem:[%s1420_s0 + $0x88] sm:$0xe] }
  0x5e   :  { %v749_v29 = vmax.f32 %v595_v22, %v715_v2  ;;  %v343_v31 = vmax.f32 %v287_v9, %v315_v16  ;;  %v214_v33 = vrot.slane %v145_v23, 2  ;;  %v568_v36 = vrot.slane %v526_v19, 1  ;;  %v857_v2 = vld [vmem:[%s1420_s0 + $0x84] sm:$0x1] }
  0x5f   :  { %v90_v38 = vmax.f32 %v34_v21, %v62_v26  ;;  %v399_v39 = vunpack.c.l.bf16 %v855_v24  ;;  %v466_v40 = vrot.slane %v398_v28, 2  ;;  %v316_v45 = vrot.slane %v274_v27, 1 }
  0x60   :  { %v763_v42 = vpack.c.bf16 %v749_v29, %v749_v29  ;;  %v497_v43 = vmax.f32 %v343_v31, %v465_v18  ;;  %v215_v44 = vsel %vm176_vm0, %v213_v32, %v214_v33  ;;  %v651_v48 = vunpack.c.l.bf16 %v896_v34  ;;  %v899_v18 = vld [vmem:[%s1420_s0 + $0x8c] sm:$0x1] }
  0x61   :  { %v245_v46 = vmax.f32 %v90_v38, %v215_v44  ;;  %v467_v47 = vrot.slane %v399_v39, 2  ;;  %v652_v49 = vunpack.c.l.bf16 %v897_v35  ;;  %v718_v54 = vsel %vm176_vm0, %v716_v20, %v717_v25  ;;  %v806_v35 = vld [vmem:[%s1421_s1 + $0x30] sm:$0xf] }
  0x62   :  { %v801_v52 = vsel %vm1014_vm3, %v763_v42, %v800_v30  ;;  %v540_v53 = vmax.f32 %v497_v43, %v526_v19  ;;  %v35_v55 = vunpack.c.l.bf16 %v870_v41  ;;  %v527_v60 = vunpack.c.h.bf16 %v870_v41 }
  0x63   :  { %802 = vst [vmem:[%s1421_s1 + $0x28] sm:$0xf] %v801_v52  ;;  %v288_v58 = vmax.f32 %v245_v46, %v274_v27  ;;  %v468_v59 = vsel %vm176_vm0, %v466_v40, %v467_v47  ;;  %v719_v61 = vrot.slane %v651_v48, 2  ;;  %v146_v0 = vunpack.c.l.bf16 %v118_v50  ;;  %v809_v46 = vld [vmem:[%s1421_s1 + $0x34] sm:$0xf] }
  0x64   :  { %v596_v62 = vmax.f32 %v540_v53, %v568_v36  ;;  %v63_v63 = vrot.slane %v35_v55, 1  ;;  %v147_v1 = vunpack.c.l.bf16 %v119_v51  ;;  %v720_v4 = vrot.slane %v652_v49, 2 }
  0x65   :  { %v344_v3 = vmax.f32 %v288_v58, %v316_v45  ;;  %v275_v5 = vunpack.c.l.bf16 %v829_v56  ;;  %v400_v6 = vunpack.c.l.bf16 %v856_v57  ;;  %v216_v11 = vrot.slane %v146_v0, 2 }
  0x66   :  { %v750_v7 = vmax.f32 %v596_v62, %v718_v54  ;;  %v91_v10 = vmax.f32 %v35_v55, %v63_v63  ;;  %v217_v13 = vrot.slane %v147_v1, 2  ;;  %v569_v15 = vrot.slane %v527_v60, 1 }
  0x67   :  { %v498_v14 = vmax.f32 %v344_v3, %v468_v59  ;;  %v401_v16 = vunpack.c.l.bf16 %v857_v2  ;;  %v469_v21 = vrot.slane %v400_v6, 2  ;;  %v317_v12 = vrot.slane %v275_v5, 1 }
  0x68   :  { %v764_v19 = vpack.c.bf16 %v750_v7, %v750_v7  ;;  %v218_v20 = vsel %vm176_vm0, %v216_v11, %v217_v13  ;;  %v721_v25 = vsel %vm176_vm0, %v719_v61, %v720_v4  ;;  %v653_v26 = vunpack.c.l.bf16 %v898_v17 }
  0x69   :  { %v541_v22 = vmax.f32 %v498_v14, %v527_v60  ;;  %v246_v9 = vmax.f32 %v91_v10, %v218_v20  ;;  %v470_v23 = vrot.slane %v401_v16, 2  ;;  %v654_v27 = vunpack.c.l.bf16 %v899_v18 }
  0x6a   :  { %v804_v24 = vsel %vm1014_vm3, %v764_v19, %v803_v8  ;;  %v528_v31 = vunpack.c.h.bf16 %v829_v56  ;;  %v722_v30 = vrot.slane %v653_v26, 2 }
  0x6b   :  { %805 = vst [vmem:[%s1421_s1 + $0x2c] sm:$0xf] %v804_v24  ;;  %v597_v28 = vmax.f32 %v541_v22, %v569_v15  ;;  %v289_v29 = vmax.f32 %v246_v9, %v275_v5  ;;  %v471_v32 = vsel %vm176_vm0, %v469_v21, %v470_v23  ;;  %v723_v36 = vrot.slane %v654_v27, 2 }
  0x6c   :  { %v570_v40 = vrot.slane %v528_v31, 1 }
  0x6d   :  { %v751_v33 = vmax.f32 %v597_v28, %v721_v25  ;;  %v345_v34 = vmax.f32 %v289_v29, %v317_v12  ;;  %v724_v43 = vsel %vm176_vm0, %v722_v30, %v723_v36 }
  0x6f   :  { %v765_v38 = vpack.c.bf16 %v751_v33, %v751_v33  ;;  %v499_v39 = vmax.f32 %v345_v34, %v471_v32 }
  0x71   :  { %v807_v41 = vsel %vm1014_vm3, %v765_v38, %v806_v35  ;;  %v542_v42 = vmax.f32 %v499_v39, %v528_v31 }
  0x72   :  { %808 = vst [vmem:[%s1421_s1 + $0x30] sm:$0xf] %v807_v41 }
  0x73   :  { %v598_v44 = vmax.f32 %v542_v42, %v570_v40 }
  0x75   :  { %v752_v45 = vmax.f32 %v598_v44, %v724_v43 }
  0x77   :  { %v766_v47 = vpack.c.bf16 %v752_v45, %v752_v45 }
  0x79   :  { %v810_v48 = vsel %vm1014_vm3, %v766_v47, %v809_v46 }
  0x7a   :  { %811 = vst [vmem:[%s1421_s1 + $0x34] sm:$0xf] %v810_v48 }

// kernel: inception_net_forward.21
= control target key start
LH: loop header
LB: loop body
LE: loop exit
PB: predicated region body
PF: predicated region fallthrough
CT: control target
= control target key end

     0   :  { %s2115_s15 = smov 0   ;;  %s2117_s16 = smov 0   ;;  %s2435_s0 = inlined_call_operand.vmem [shape: bf16[112,1152], index: 0, kind: input, shape index: {}]   ;;  %s2436_s1 = inlined_call_operand.vmem [shape: bf16[1152,128], index: 1, kind: input, shape index: {}]   ;;  %s2437_s2 = inlined_call_operand.vmem [shape: f32[1,128], index: 2, kind: input, shape index: {}]   ;;  %s2438_s3 = inlined_call_operand.vmem [shape: f32[1,128], index: 3, kind: input, shape index: {}]   ;;  %s2439_s4 = inlined_call_operand.vmem [shape: bf16[112,128], index: 4, kind: output, shape index: {}]  }
   0x1   :  { %s2119_s17 = smov 0  }
   0x2 LB: > { %s26_s18 = sadd.s32 1, %s2084_s16  ;;  %p1563_p0 = scmp.ge.s32.totalorder %s2088_s17, 1  ;;  %s2088_s17 = sphi %s2119_s17, %s14_s17   ;;  %s2084_s16 = sphi %s2117_s16, %s2443_s16   ;;  %s2080_s15 = sphi %s2115_s15, %s2442_s15  }
   0x3   : > { %p28_p1 = scmp.ge.s32.totalorder %s26_s18, 2  ;;  %p203_p2 = scmp.lt.s32.totalorder %s2088_s17, 3 }
   0x5   : > { %s2445_s18 = smov (%p28_p1, %s26_s18), 0  ;;  %p204_p3 = pnand %p1563_p0, %p203_p2 }
   0x7   : > { %207 = sbr.rel (%p204_p3) target bundleno = 322 (0x142), region = 36 }
   0xc   : > { %v1946_v0 = vld [vmem:[%s2436_s1 + $0x78] sm:$0xff]   ;;  %v1950_v4 = vld [vmem:[%s2436_s1 + $0x70] sm:$0xff]   ;;  %v1954_v8 = vld [vmem:[%s2436_s1 + $0x68] sm:$0xff]   ;;  %s243_s25 = smul.u32 7, %s2080_s15 }
   0xd   : > { %v1947_v1 = vld [vmem:[%s2436_s1 + $0xf8] sm:$0xff]   ;;  %1709 = vmatprep.subr.bf16.mxu0 %v1946_v0  ;;  %v1951_v5 = vld [vmem:[%s2436_s1 + $0xf0] sm:$0xff]   ;;  %v1955_v9 = vld [vmem:[%s2436_s1 + $0xe8] sm:$0xff]  }
   0xe   : > { %v1948_v2 = vld [vmem:[%s2436_s1 + $0x38] sm:$0xff]   ;;  %1749 = vmatprep.subr.bf16.mxu1 %v1947_v1  ;;  %v1952_v6 = vld [vmem:[%s2436_s1 + $0x30] sm:$0xff]   ;;  %v1956_v10 = vld [vmem:[%s2436_s1 + $0x28] sm:$0xff]   ;;  %p244_p4 = scmp.lt.s32.totalorder %s243_s25, 13 }
   0xf   : > { %v1949_v3 = vld [vmem:[%s2436_s1 + $0xb8] sm:$0xff]   ;;  %1710 = vmatpush3.bf16.msra.mxu0 %v1948_v2  ;;  %v1953_v7 = vld [vmem:[%s2436_s1 + $0xb0] sm:$0xff]   ;;  %v1957_v11 = vld [vmem:[%s2436_s1 + $0xa8] sm:$0xff]  }
  0x10   : > { %1750 = vmatpush3.bf16.msra.mxu1 %v1949_v3  ;;  %1711 = vmatprep.subr.bf16.mxu0 %v1950_v4  ;;  %v1958_v12 = vld [vmem:[%s2436_s1 + $0x60] sm:$0xff]   ;;  %v1962_v16 = vld [vmem:[%s2436_s1 + $0x58] sm:$0xff]   ;;  %v1966_v20 = vld [vmem:[%s2436_s1 + $0x50] sm:$0xff]   ;;  %s2447_s25 = smov (!%p244_p4, %s243_s25), 13 }
  0x11   : > { %1751 = vmatprep.subr.bf16.mxu1 %v1951_v5  ;;  %v1959_v13 = vld [vmem:[%s2436_s1 + $0xe0] sm:$0xff]   ;;  %v1963_v17 = vld [vmem:[%s2436_s1 + $0xd8] sm:$0xff]   ;;  %v1967_v21 = vld [vmem:[%s2436_s1 + $0xd0] sm:$0xff]   ;;  %s1921_s28 = smul.u32 36, %s2447_s25  ;;  %s1565_s20 = sshll.u32 %s2447_s25, 2 }
  0x12   : > { %v1960_v14 = vld [vmem:[%s2436_s1 + $0x20] sm:$0xff]   ;;  %v1964_v18 = vld [vmem:[%s2436_s1 + $0x18] sm:$0xff]   ;;  %v1968_v22 = vld [vmem:[%s2436_s1 + $0x10] sm:$0xff]   ;;  %s267_s23 = scalar_lea.vmem %s2439_s4, %s1565_s20 }
  0x13   : > { %1712 = vmatpush3.bf16.msra.mxu0 %v1952_v6  ;;  %v1961_v15 = vld [vmem:[%s2436_s1 + $0xa0] sm:$0xff]   ;;  %v1965_v19 = vld [vmem:[%s2436_s1 + $0x98] sm:$0xff]   ;;  %v1969_v23 = vld [vmem:[%s2436_s1 + $0x90] sm:$0xff]   ;;  %s2232_s12 = scalar_lea.vmem %s2435_s0, %s1921_s28 }
  0x14   : > { %1752 = vmatpush3.bf16.msra.mxu1 %v1953_v7  ;;  %1713 = vmatprep.subr.bf16.mxu0 %v1954_v8  ;;  %v1970_v24 = vld [vmem:[%s2436_s1 + $0x48] sm:$0xff]   ;;  %v1974_v28 = vld [vmem:[%s2436_s1 + $0x40] sm:$0xff]   ;;  %v1984_v36 = vld [vmem:[%s2436_s1 + $0x178] sm:$0xff]  }
  0x15   : > { %1753 = vmatprep.subr.bf16.mxu1 %v1955_v9  ;;  %v1971_v25 = vld [vmem:[%s2436_s1 + $0xc8] sm:$0xff]   ;;  %v1975_v29 = vld [vmem:[%s2436_s1 + $0xc0] sm:$0xff]   ;;  %v1985_v37 = vld [vmem:[%s2436_s1 + $0x1f8] sm:$0xff]  }
  0x16   : > { %v1972_v26 = vld [vmem:[%s2436_s1 + $0x8] sm:$0xff]   ;;  %v1976_v30 = vld [vmem:[%s2436_s1] sm:$0xff]   ;;  %v1986_v38 = vld [vmem:[%s2436_s1 + $0x138] sm:$0xff]  }
  0x17   : > { %1714 = vmatpush3.bf16.msra.mxu0 %v1956_v10  ;;  %v1973_v27 = vld [vmem:[%s2436_s1 + $0x88] sm:$0xff]   ;;  %v1977_v31 = vld [vmem:[%s2436_s1 + $0x80] sm:$0xff]   ;;  %v1987_v39 = vld [vmem:[%s2436_s1 + $0x1b8] sm:$0xff]  }
  0x18   : > { %1754 = vmatpush3.bf16.msra.mxu1 %v1957_v11  ;;  %1715 = vmatprep.subr.bf16.mxu0 %v1958_v12  ;;  %v1978_v32 = vld [vmem:[%s2232_s12] ss:$36 sps:$4 sm:$0xff]   ;;  %v1981_v34 = vld [vmem:[%s2232_s12 + $0x8] ss:$36 sps:$4 sm:$0xff]   ;;  %v1988_v40 = vld [vmem:[%s2436_s1 + $0x170] sm:$0xff]  }
  0x19   : > { %1755 = vmatprep.subr.bf16.mxu1 %v1959_v13  ;;  %v1980_v33 = vld [vmem:[%s2232_s12 + $0x4] ss:$36 sps:$4 sm:$0xff]   ;;  %v1983_v35 = vld [vmem:[%s2232_s12 + $0xc] ss:$36 sps:$4 sm:$0xff]   ;;  %v1994_v45 = vld [vmem:[%s2232_s12 + $0x54] ss:$36 sps:$4 sm:$0xff]  }
  0x1a   : > { %1083 = vmatprep.mubr.bf16.mxu0 %v1980_v33  ;;  %1147 = vmatprep.mubr.bf16.mxu1 %v1983_v35  ;;  %v1989_v41 = vld [vmem:[%s2436_s1 + $0x1f0] sm:$0xff]   ;;  %v1996_v46 = vld [vmem:[%s2232_s12 + $0x48] ss:$36 sps:$4 sm:$0xff]   ;;  %v2002_v52 = vld [vmem:[%s2436_s1 + $0x160] sm:$0xff]  }
  0x1b   : > { %1716 = vmatpush3.bf16.msra.mxu0 %v1960_v14  ;;  %v1990_v42 = vld [vmem:[%s2436_s1 + $0x130] sm:$0xff]   ;;  %v1998_v48 = vld [vmem:[%s2436_s1 + $0x168] sm:$0xff]   ;;  %v2003_v53 = vld [vmem:[%s2436_s1 + $0x1e0] sm:$0xff]  }
  0x1c   : > { %1756 = vmatpush3.bf16.msra.mxu1 %v1961_v15  ;;  %1717 = vmatprep.subr.bf16.mxu0 %v1962_v16  ;;  %v1991_v43 = vld [vmem:[%s2436_s1 + $0x1b0] sm:$0xff]   ;;  %v1999_v49 = vld [vmem:[%s2436_s1 + $0x1e8] sm:$0xff]   ;;  %v2004_v54 = vld [vmem:[%s2436_s1 + $0x120] sm:$0xff]  }
  0x1d   : > { %1757 = vmatprep.subr.bf16.mxu1 %v1963_v17  ;;  %v1992_v44 = vld [vmem:[%s2232_s12 + $0x4c] ss:$36 sps:$4 sm:$0xff]   ;;  %v2005_v55 = vld [vmem:[%s2436_s1 + $0x1a0] sm:$0xff]   ;;  %v2006_v56 = vld [vmem:[%s2232_s12 + $0x94] ss:$36 sps:$4 sm:$0xff]  }
  0x1e   : > { %v1997_v47 = vld [vmem:[%s2232_s12 + $0x50] ss:$36 sps:$4 sm:$0xff]   ;;  %v2000_v50 = vld [vmem:[%s2436_s1 + $0x128] sm:$0xff]   ;;  %v2008_v57 = vld [vmem:[%s2232_s12 + $0x9c] ss:$36 sps:$4 sm:$0xff]  }
  0x1f   : > { %1718 = vmatpush3.bf16.msra.mxu0 %v1964_v18  ;;  %v2001_v51 = vld [vmem:[%s2436_s1 + $0x1a8] sm:$0xff]   ;;  %v2010_v58 = vld [vmem:[%s2232_s12 + $0x90] ss:$36 sps:$4 sm:$0xff]   ;;  %v2011_v59 = vld [vmem:[%s2232_s12 + $0x98] ss:$36 sps:$4 sm:$0xff]  }
  0x20   : > { %1758 = vmatpush3.bf16.msra.mxu1 %v1965_v19  ;;  %1719 = vmatprep.subr.bf16.mxu0 %v1966_v20  ;;  %v2012_v60 = vld [vmem:[%s2436_s1 + $0x158] sm:$0xff]   ;;  %v2016_v0 = vld [vmem:[%s2436_s1 + $0x150] sm:$0xff]   ;;  %v301_v5 = vld [vmem:[%s2232_s12 + $0xe0] sm:$0xff] }
  0x21   : > { %1759 = vmatprep.subr.bf16.mxu1 %v1967_v21  ;;  %v2013_v61 = vld [vmem:[%s2436_s1 + $0x1d8] sm:$0xff]   ;;  %v2017_v1 = vld [vmem:[%s2436_s1 + $0x1d0] sm:$0xff]   ;;  %v1596_v7 = vcombine.high %v301_v5, %v301_v5  ;;  %v1595_v9 = vcombine.low %v301_v5, %v301_v5  ;;  %v2024_v10 = vld [vmem:[%s2436_s1 + $0x148] sm:$0xff]  }
  0x22   : > { %v2014_v62 = vld [vmem:[%s2436_s1 + $0x118] sm:$0xff]   ;;  %v2018_v2 = vld [vmem:[%s2436_s1 + $0x110] sm:$0xff]   ;;  %v2025_v11 = vld [vmem:[%s2436_s1 + $0x1c8] sm:$0xff]  }
  0x23   : > { %1720 = vmatpush3.bf16.msra.mxu0 %v1968_v22  ;;  %v2015_v63 = vld [vmem:[%s2436_s1 + $0x198] sm:$0xff]   ;;  %v2019_v3 = vld [vmem:[%s2436_s1 + $0x190] sm:$0xff]   ;;  %v2026_v12 = vld [vmem:[%s2436_s1 + $0x108] sm:$0xff]  }
  0x24   : > { %1760 = vmatpush3.bf16.msra.mxu1 %v1969_v23  ;;  %1721 = vmatprep.subr.bf16.mxu0 %v1970_v24  ;;  %v300_v4 = vld [vmem:[%s2232_s12 + $0xd8] sm:$0xff]  ;;  %v2027_v13 = vld [vmem:[%s2436_s1 + $0x188] sm:$0xff]   ;;  %v2028_v14 = vld [vmem:[%s2436_s1 + $0x140] sm:$0xff]  }
  0x25   : > { %1761 = vmatprep.subr.bf16.mxu1 %v1971_v25  ;;  %v1594_v6 = vcombine.high %v300_v4, %v300_v4  ;;  %v1593_v8 = vcombine.low %v300_v4, %v300_v4  ;;  %v2029_v15 = vld [vmem:[%s2436_s1 + $0x1c0] sm:$0xff]   ;;  %v2032_v18 = vld [vmem:[%s2232_s12 + $0x10] ss:$36 sps:$4 sm:$0xff]   ;;  %v2035_v20 = vld [vmem:[%s2232_s12 + $0x18] ss:$36 sps:$4 sm:$0xff]  }
  0x26   : > { %v2030_v16 = vld [vmem:[%s2436_s1 + $0x100] sm:$0xff]   ;;  %v2034_v19 = vld [vmem:[%s2232_s12 + $0x14] ss:$36 sps:$4 sm:$0xff]   ;;  %v302_v33 = vld [vmem:[%s2232_s12 + $0xe8] sm:$0xff] }
  0x27   : > { %1722 = vmatpush3.bf16.msra.mxu0 %v1972_v26  ;;  %v2031_v17 = vld [vmem:[%s2436_s1 + $0x180] sm:$0xff]   ;;  %v2038_v22 = vld [vmem:[%s2436_s1 + $0x238] sm:$0xff]   ;;  %v2039_v23 = vld [vmem:[%s2436_s1 + $0x230] sm:$0xff]  }
  0x28   : > { %1762 = vmatpush3.bf16.msra.mxu1 %v1973_v27  ;;  %1723 = vmatprep.subr.bf16.mxu0 %v1974_v28  ;;  %v2037_v21 = vld [vmem:[%s2232_s12 + $0x1c] ss:$36 sps:$4 sm:$0xff]   ;;  %v2042_v25 = vld [vmem:[%s2232_s12 + $0x64] ss:$36 sps:$4 sm:$0xff]  }
  0x29   : > { %1763 = vmatprep.subr.bf16.mxu1 %v1975_v29  ;;  %v2040_v24 = vld [vmem:[%s2232_s12 + $0x5c] ss:$36 sps:$4 sm:$0xff]   ;;  %v2046_v27 = vld [vmem:[%s2436_s1 + $0x228] sm:$0xff]  }
  0x2a   : > { %v2044_v26 = vld [vmem:[%s2232_s12 + $0x58] ss:$36 sps:$4 sm:$0xff]   ;;  %v2045_v28 = vld [vmem:[%s2232_s12 + $0x60] ss:$36 sps:$4 sm:$0xff]  }
  0x2b   : > { %1724 = vmatpush3.bf16.msra.mxu0 %v1976_v30  ;;  %v2048_v29 = vld [vmem:[%s2232_s12 + $0xa4] ss:$36 sps:$4 sm:$0xff]   ;;  %v2050_v30 = vld [vmem:[%s2232_s12 + $0xac] ss:$36 sps:$4 sm:$0xff]  }
  0x2c   : > { %1764 = vmatpush3.bf16.msra.mxu1 %v1977_v31  ;;  %1789 = vmatprep.subr.bf16.mxu0 %v1984_v36  ;;  %v2047_v31 = vld [vmem:[%s2436_s1 + $0x220] sm:$0xff]   ;;  %v2053_v36 = vld [vmem:[%s2232_s12 + $0xa8] ss:$36 sps:$4 sm:$0xff]  }
  0x2d   : > { %1829 = vmatprep.subr.bf16.mxu1 %v1985_v37  ;;  %v2052_v35 = vld [vmem:[%s2232_s12 + $0xa0] ss:$36 sps:$4 sm:$0xff]   ;;  %v1598_v37 = vcombine.high %v302_v33, %v302_v33 }
  0x2e   : > { %1084 = vmatmul.mubr.bf16.vlgmr.msra.gmra.mxu0 %v1978_v32  ;;  %v2054_v32 = vld [vmem:[%s2436_s1 + $0x218] sm:$0xff]  }
  0x2f   : > { %1148 = vmatmul.mubr.bf16.vlgmr.msra.gmra.mxu1 %v1981_v34  ;;  %1790 = vmatpush3.bf16.msra.mxu0 %v1986_v38  ;;  %v303_v34 = vld [vmem:[%s2232_s12 + $0xf0] sm:$0xff] }
  0x30   : > { %1830 = vmatpush3.bf16.msra.mxu1 %v1987_v39  ;;  %1791 = vmatprep.subr.bf16.mxu0 %v1988_v40  ;;  %v1600_v38 = vcombine.high %v303_v34, %v303_v34  ;;  %v2055_v39 = vld [vmem:[%s2436_s1 + $0x210] sm:$0xff]   ;;  %v2060_v40 = vld [vmem:[%s2436_s1 + $0x208] sm:$0xff]  }
  0x31   : > { %1831 = vmatprep.subr.bf16.mxu1 %v1989_v41  ;;  %1091 = vmatprep.mubr.bf16.mxu0 %v1992_v44  ;;  %v1597_v41 = vcombine.low %v302_v33, %v302_v33  ;;  %v2063_v44 = vld [vmem:[%s2232_s12 + $0xb0] ss:$36 sps:$4 sm:$0xff]  }
  0x32   : > { %1155 = vmatprep.mubr.bf16.mxu1 %v1994_v45  ;;  %v2061_v45 = vld [vmem:[%s2436_s1 + $0x200] sm:$0xff]  }
  0x33   : > { %1792 = vmatpush3.bf16.msra.mxu0 %v1990_v42  ;;  %v1599_v42 = vcombine.low %v303_v34, %v303_v34 }
  0x34   : > { %1832 = vmatpush3.bf16.msra.mxu1 %v1991_v43  ;;  %1793 = vmatprep.subr.bf16.mxu0 %v1998_v48  ;;  %v2062_v43 = vld [vmem:[%s2232_s12 + $0x20] ss:$36 sps:$4 sm:$0xff]  }
  0x35   : > { %1833 = vmatprep.subr.bf16.mxu1 %v1999_v49 }
  0x36   : > { %1092 = vmatmul.mubr.bf16.gmra.mxu0 %v1996_v46  ;;  %v2064_v46 = vld [vmem:[%s2232_s12 + $0x68] ss:$36 sps:$4 sm:$0xff]  }
  0x37   : > { %1156 = vmatmul.mubr.bf16.gmra.mxu1 %v1997_v47  ;;  %1794 = vmatpush3.bf16.msra.mxu0 %v2000_v50  ;;  %v2065_v47 = vld [vmem:[%s2232_s12 + $0xf8] ss:$0 sps:$4 sm:$0xff]  }
  0x38   : > { %1834 = vmatpush3.bf16.msra.mxu1 %v2001_v51  ;;  %1795 = vmatprep.subr.bf16.mxu0 %v2002_v52 }
  0x39   : > { %1835 = vmatprep.subr.bf16.mxu1 %v2003_v53  ;;  %1099 = vmatprep.mubr.bf16.mxu0 %v2006_v56 }
  0x3a   : > { %1163 = vmatprep.mubr.bf16.mxu1 %v2008_v57 }
  0x3b   : > { %1796 = vmatpush3.bf16.msra.mxu0 %v2004_v54 }
  0x3c   : > { %1836 = vmatpush3.bf16.msra.mxu1 %v2005_v55  ;;  %1797 = vmatprep.subr.bf16.mxu0 %v2012_v60 }
  0x3d   : > { %1837 = vmatprep.subr.bf16.mxu1 %v2013_v61 }
  0x3e   : > { %1100 = vmatmul.mubr.bf16.gmra.mxu0 %v2010_v58 }
  0x3f   : > { %1164 = vmatmul.mubr.bf16.gmra.mxu1 %v2011_v59  ;;  %1798 = vmatpush3.bf16.msra.mxu0 %v2014_v62 }
  0x40   : > { %1838 = vmatpush3.bf16.msra.mxu1 %v2015_v63  ;;  %1799 = vmatprep.subr.bf16.mxu0 %v2016_v0 }
  0x41   : > { %1839 = vmatprep.subr.bf16.mxu1 %v2017_v1  ;;  %1107 = vmatprep.mubr.bf16.mxu0 %v1594_v6 }
  0x42   : > { %1171 = vmatprep.mubr.bf16.mxu1 %v1596_v7 }
  0x43   : > { %1800 = vmatpush3.bf16.msra.mxu0 %v2018_v2 }
  0x44   : > { %1840 = vmatpush3.bf16.msra.mxu1 %v2019_v3  ;;  %1801 = vmatprep.subr.bf16.mxu0 %v2024_v10 }
  0x45   : > { %1841 = vmatprep.subr.bf16.mxu1 %v2025_v11 }
  0x46   : > { %1108 = vmatmul.mubr.bf16.gmra.mxu0 %v1593_v8 }
  0x47   : > { %1172 = vmatmul.mubr.bf16.gmra.mxu1 %v1595_v9  ;;  %1802 = vmatpush3.bf16.msra.mxu0 %v2026_v12 }
  0x48   : > { %1842 = vmatpush3.bf16.msra.mxu1 %v2027_v13  ;;  %1803 = vmatprep.subr.bf16.mxu0 %v2028_v14 }
  0x49   : > { %1843 = vmatprep.subr.bf16.mxu1 %v2029_v15  ;;  %1211 = vmatprep.mubr.bf16.mxu0 %v2034_v19 }
  0x4a   : > { %1275 = vmatprep.mubr.bf16.mxu1 %v2037_v21 }
  0x4b   : > { %1804 = vmatpush3.bf16.msra.mxu0 %v2030_v16 }
  0x4c   : > { %1844 = vmatpush3.bf16.msra.mxu1 %v2031_v17  ;;  %1881 = vmatprep.subr.bf16.mxu0 %v2038_v22 }
  0x4d   : > { %1905 = vmatprep.subr.bf16.mxu1 %v2038_v22 }
  0x4e   : > { %1212 = vmatmul.mubr.bf16.vlgmr.msra.gmra.mxu0 %v2032_v18 }
  0x4f   : > { %1276 = vmatmul.mubr.bf16.vlgmr.msra.gmra.mxu1 %v2035_v20  ;;  %1882 = vmatpush3.bf16.msra.mxu0 %v2038_v22 }
  0x50   : > { %1913 = vmatpush3.bf16.msra.mxu1 %v2038_v22  ;;  %1883 = vmatprep.subr.bf16.mxu0 %v2039_v23 }
  0x51   : > { %1906 = vmatprep.subr.bf16.mxu1 %v2039_v23  ;;  %1219 = vmatprep.mubr.bf16.mxu0 %v2040_v24 }
  0x52   : > { %1283 = vmatprep.mubr.bf16.mxu1 %v2042_v25 }
  0x53   : > { %1884 = vmatpush3.bf16.msra.mxu0 %v2039_v23 }
  0x54   : > { %1914 = vmatpush3.bf16.msra.mxu1 %v2039_v23  ;;  %1885 = vmatprep.subr.bf16.mxu0 %v2046_v27 }
  0x55   : > { %1907 = vmatprep.subr.bf16.mxu1 %v2046_v27 }
  0x56   : > { %1220 = vmatmul.mubr.bf16.gmra.mxu0 %v2044_v26 }
  0x57   : > { %1284 = vmatmul.mubr.bf16.gmra.mxu1 %v2045_v28  ;;  %1227 = vmatprep.mubr.bf16.mxu0 %v2048_v29 }
  0x58   : > { %1886 = vmatpush3.bf16.msra.mxu0 %v2046_v27  ;;  %1291 = vmatprep.mubr.bf16.mxu1 %v2050_v30 }
  0x59   : > { %1915 = vmatpush3.bf16.msra.mxu1 %v2046_v27  ;;  %1887 = vmatprep.subr.bf16.mxu0 %v2047_v31 }
  0x5a   : > { %1908 = vmatprep.subr.bf16.mxu1 %v2047_v31 }
  0x5c   : > { %1888 = vmatpush3.bf16.msra.mxu0 %v2047_v31 }
  0x5d   : > { %1916 = vmatpush3.bf16.msra.mxu1 %v2047_v31  ;;  %1889 = vmatprep.subr.bf16.mxu0 %v2054_v32 }
  0x5e   : > { %1228 = vmatmul.mubr.bf16.gmra.mxu0 %v2052_v35  ;;  %1909 = vmatprep.subr.bf16.mxu1 %v2054_v32 }
  0x5f   : > { %1292 = vmatmul.mubr.bf16.gmra.mxu1 %v2053_v36  ;;  %1235 = vmatprep.mubr.bf16.mxu0 %v1598_v37 }
  0x60   : > { %1890 = vmatpush3.bf16.msra.mxu0 %v2054_v32  ;;  %1299 = vmatprep.mubr.bf16.mxu1 %v1600_v38 }
  0x61   : > { %1917 = vmatpush3.bf16.msra.mxu1 %v2054_v32  ;;  %1891 = vmatprep.subr.bf16.mxu0 %v2055_v39 }
  0x62   : > { %1910 = vmatprep.subr.bf16.mxu1 %v2055_v39 }
  0x64   : > { %1892 = vmatpush3.bf16.msra.mxu0 %v2055_v39 }
  0x65   : > { %1918 = vmatpush3.bf16.msra.mxu1 %v2055_v39  ;;  %1893 = vmatprep.subr.bf16.mxu0 %v2060_v40 }
  0x66   : > { %1236 = vmatmul.mubr.bf16.gmra.mxu0 %v1597_v41  ;;  %1911 = vmatprep.subr.bf16.mxu1 %v2060_v40 }
  0x67   : > { %1300 = vmatmul.mubr.bf16.gmra.mxu1 %v1599_v42  ;;  %1897 = vmatprep.mubr.bf16.mxu0 %v2062_v43 }
  0x68   : > { %1894 = vmatpush3.bf16.msra.mxu0 %v2060_v40  ;;  %1901 = vmatprep.mubr.bf16.mxu1 %v2063_v44 }
  0x69   : > { %1919 = vmatpush3.bf16.msra.mxu1 %v2060_v40  ;;  %1895 = vmatprep.subr.bf16.mxu0 %v2061_v45 }
  0x6a   : > { %1912 = vmatprep.subr.bf16.mxu1 %v2061_v45 }
  0x6c   : > { %1896 = vmatpush3.bf16.msra.mxu0 %v2061_v45 }
  0x6d   : > { %1920 = vmatpush3.bf16.msra.mxu1 %v2061_v45 }
  0x6f   : > { %1898 = vmatmul.mubr.bf16.vlgmr.msra.gmra.mxu0 %v2064_v46 }
  0x70   : > { %1902 = vmatmul.mubr.bf16.vlgmr.msra.gmra.mxu1 %v2065_v47 }
  0xee   : > { %v1725_v48 = vpop.f32.mrf.mxu0 }
  0xef   : > { %v1765_v49 = vpop.f32.mrf.mxu1 }
  0xf0   : > { %v1726_v50 = vpop.f32.mrf.mxu0 }
  0xf1   : > { %v1727_v51 = vadd.f32 %v1726_v50, %v1725_v48  ;;  %v1766_v52 = vpop.f32.mrf.mxu1 }
  0xf2   : > { %v1767_v53 = vadd.f32 %v1766_v52, %v1765_v49  ;;  %v2392_v54 = vpop.f32.mrf.mxu0 }
  0xf3   : > { %v2394_v55 = vpop.f32.mrf.mxu1 }
  0xf4   : > { %v2396_v56 = vadd.f32 %v1767_v53, %v1727_v51  ;;  %v2398_v57 = vpop.f32.mrf.mxu0 }
  0xf5   : > { %v2400_v58 = vpop.f32.mrf.mxu1 }
  0xf6   : > { %v1731_v59 = vpop.f32.mrf.mxu0 }
  0xf7   : > { %v1771_v60 = vpop.f32.mrf.mxu1 }
  0xf8   : > { %v1732_v61 = vpop.f32.mrf.mxu0 }
  0xf9   : > { %v1772_v62 = vpop.f32.mrf.mxu1  ;;  %v1733_v41 = vadd.f32 %v1732_v61, %v1731_v59 }
  0xfa   : > { %v1734_v63 = vpop.f32.mrf.mxu0  ;;  %v1773_v42 = vadd.f32 %v1772_v62, %v1771_v60  ;;  %v1770_v62 = vadd.f32 %v2400_v58, %v2394_v55 }
  0xfb   : > { %v1774_v0 = vpop.f32.mrf.mxu1 }
  0xfc   : > { %v1735_v1 = vpop.f32.mrf.mxu0  ;;  %v1158_v52 = vadd.f32 %v1773_v42, %v1733_v41 }
  0xfd   : > { %v1775_v2 = vpop.f32.mrf.mxu1  ;;  %v1736_v53 = vadd.f32 %v1735_v1, %v1734_v63 }
  0xfe   : > { %v1737_v3 = vpop.f32.mrf.mxu0 }
  0xff   : > { %v1777_v4 = vpop.f32.mrf.mxu1 }
 0x100   : > { %v1738_v5 = vpop.f32.mrf.mxu0 }
 0x101   : > { %v1778_v6 = vpop.f32.mrf.mxu1  ;;  %v1739_v47 = vadd.f32 %v1738_v5, %v1737_v3 }
 0x102   : > { %v1740_v7 = vpop.f32.mrf.mxu0  ;;  %v1779_v48 = vadd.f32 %v1778_v6, %v1777_v4 }
 0x103   : > { %v1780_v8 = vpop.f32.mrf.mxu1 }
 0x104   : > { %v1741_v9 = vpop.f32.mrf.mxu0  ;;  %v1166_v3 = vadd.f32 %v1779_v48, %v1739_v47 }
 0x105   : > { %v1781_v10 = vpop.f32.mrf.mxu1 }
 0x106   : > { %v1743_v11 = vpop.f32.mrf.mxu0 }
 0x107   : > { %v1783_v12 = vpop.f32.mrf.mxu1 }
 0x108   : > { %v1744_v13 = vpop.f32.mrf.mxu0 }
 0x109   : > { %v1784_v14 = vpop.f32.mrf.mxu1  ;;  %v1745_v44 = vadd.f32 %v1744_v13, %v1743_v11  ;;  %v1742_v11 = vadd.f32 %v1741_v9, %v1740_v7  ;;  %v1674_v9 = vld [vmem:[%s2437_s2] ss:$0 sm:$0xff] }
 0x10a   : > { %v1746_v15 = vpop.f32.mrf.mxu0  ;;  %v1785_v45 = vadd.f32 %v1784_v14, %v1783_v12  ;;  %v1782_v12 = vadd.f32 %v1781_v10, %v1780_v8 }
 0x10b   : > { %v1786_v16 = vpop.f32.mrf.mxu1  ;;  %v1776_v15 = vadd.f32 %v1775_v2, %v1774_v0 }
 0x10c   : > { %v1747_v17 = vpop.f32.mrf.mxu0 }
 0x10d   : > { %v1787_v18 = vpop.f32.mrf.mxu1  ;;  %v1161_v2 = vadd.f32 %v1776_v15, %v1736_v53 }
 0x10e   : > { %v1805_v19 = vpop.f32.mrf.mxu0  ;;  %v1730_v18 = vadd.f32 %v2398_v57, %v2392_v54 }
 0x10f   : > { %v1845_v20 = vpop.f32.mrf.mxu1 }
 0x110   : > { %v1806_v21 = vpop.f32.mrf.mxu0  ;;  %v1153_v55 = vadd.f32 %v1770_v62, %v1730_v18 }
 0x111   : > { %v1846_v22 = vpop.f32.mrf.mxu1  ;;  %v1807_v16 = vadd.f32 %v1806_v21, %v1805_v19 }
 0x112   : > { %v1808_v23 = vpop.f32.mrf.mxu0  ;;  %v1847_v58 = vadd.f32 %v1846_v22, %v1845_v20 }
 0x113   : > { %v2402_v24 = vpop.f32.mrf.mxu1  ;;  %v1214_v13 = vadd.f32 %v1807_v16, %v2396_v56 }
 0x114   : > { %v1809_v25 = vpop.f32.mrf.mxu0 }
 0x115   : > { %v2404_v26 = vpop.f32.mrf.mxu1  ;;  %v1810_v54 = vadd.f32 %v1809_v25, %v1808_v23 }
 0x116   : > { %v1811_v27 = vpop.f32.mrf.mxu0  ;;  %v1850_v20 = vadd.f32 %v2404_v26, %v2402_v24 }
 0x117   : > { %v1851_v28 = vpop.f32.mrf.mxu1  ;;  %v1217_v10 = vadd.f32 %v1810_v54, %v1153_v55 }
 0x118   : > { %v1812_v29 = vpop.f32.mrf.mxu0 }
 0x119   : > { %v1852_v30 = vpop.f32.mrf.mxu1  ;;  %v1813_v49 = vadd.f32 %v1812_v29, %v1811_v27 }
 0x11a   : > { %v1814_v31 = vpop.f32.mrf.mxu0  ;;  %v1853_v57 = vadd.f32 %v1852_v30, %v1851_v28  ;;  %v1278_v28 = vadd.f32 %v1847_v58, %v1214_v13 }
 0x11b   : > { %v1854_v32 = vpop.f32.mrf.mxu1  ;;  %v1222_v4 = vadd.f32 %v1813_v49, %v1158_v52 }
 0x11c   : > { %v1815_v33 = vpop.f32.mrf.mxu0 }
 0x11d   : > { %v1855_v34 = vpop.f32.mrf.mxu1  ;;  %v1816_v5 = vadd.f32 %v1815_v33, %v1814_v31  ;;  %v1286_v31 = vadd.f32 %v1853_v57, %v1222_v4  ;;  %v1169_v33 = vadd.f32 %v1782_v12, %v1742_v11 }
 0x11e   : > { %v1817_v35 = vpop.f32.mrf.mxu0  ;;  %v1856_v56 = vadd.f32 %v1855_v34, %v1854_v32 }
 0x11f   : > { %v1857_v36 = vpop.f32.mrf.mxu1 }
 0x120   : > { %v1818_v37 = vpop.f32.mrf.mxu0 }
 0x121   : > { %v1858_v38 = vpop.f32.mrf.mxu1  ;;  %v1819_v59 = vadd.f32 %v1818_v37, %v1817_v35  ;;  %v1225_v35 = vadd.f32 %v1816_v5, %v1161_v2 }
 0x122   : > { %v1820_v39 = vpop.f32.mrf.mxu0  ;;  %v1859_v7 = vadd.f32 %v1858_v38, %v1857_v36  ;;  %v1675_v36 = vld [vmem:[%s2438_s3] ss:$0 sm:$0xff] }
 0x123   : > { %v2406_v40 = vpop.f32.mrf.mxu1  ;;  %v1230_v19 = vadd.f32 %v1819_v59, %v1166_v3  ;;  %v1289_v42 = vadd.f32 %v1856_v56, %v1225_v35 }
 0x124   : > { %2440 = vst [vmem:[#allocation2_spill] sm:$0xff] %v2406_v40  ;;  %v1821_v43 = vpop.f32.mrf.mxu0  ;;  %v1174_v40 = vadd.f32 %v1785_v45, %v1745_v44 }
 0x125   : > { %v1861_v46 = vpop.f32.mrf.mxu1  ;;  %v1822_v21 = vadd.f32 %v1821_v43, %v1820_v39 }
 0x126   : > { %v1823_v50 = vpop.f32.mrf.mxu0 }
 0x127   : > { %v1863_v51 = vpop.f32.mrf.mxu1  ;;  %v1233_v30 = vadd.f32 %v1822_v21, %v1169_v33 }
 0x128   : > { %v1824_v17 = vpop.f32.mrf.mxu0 }
 0x129   : > { %v1825_v60 = vadd.f32 %v1824_v17, %v1823_v50  ;;  %v1864_v61 = vpop.f32.mrf.mxu1  ;;  %v1281_v50 = vadd.f32 %v1850_v20, %v1217_v10 }
 0x12a   : > { %v1826_v6 = vpop.f32.mrf.mxu0  ;;  %v1865_v0 = vadd.f32 %v1864_v61, %v1863_v51 }
 0x12b   : > { %v1238_v63 = vadd.f32 %v1825_v60, %v1174_v40  ;;  %v1866_v1 = vpop.f32.mrf.mxu1  ;;  %v1294_v40 = vadd.f32 %v1859_v7, %v1230_v19  ;;  %v2441_v32 = vld [vmem:[#allocation2_spill] sm:$0xff] }
 0x12c   : > { %v1827_v14 = vpop.f32.mrf.mxu0  ;;  %v1862_v34 = vadd.f32 %v1861_v46, %v2441_v32 }
 0x12d   : > { %v1867_v27 = vpop.f32.mrf.mxu1  ;;  %v1302_v29 = vadd.f32 %v1865_v0, %v1238_v63 }
 0x12e   : > { %v1297_v52 = vadd.f32 %v1862_v34, %v1233_v30 }
 0x12f   : > { %v1899_v8 = vpop.f32.mrf.mxu0 }
 0x130   : > { %v1350_v23 = vadd.f32 %v1899_v8, %v1286_v31  ;;  %v1903_v25 = vpop.f32.mrf.mxu1 }
 0x131   : > { %v1366_v37 = vadd.f32 %v1903_v25, %v1302_v29  ;;  %v1341_v39 = vpop.f32.mrf.mxu0 }
 0x132   : > { %v1380_v22 = vmul.f32 %v1674_v9, %v1350_v23  ;;  %v1342_v38 = vadd.f32 %v1341_v39, %v1278_v28  ;;  %v1357_v41 = vpop.f32.mrf.mxu1 }
 0x133   : > { %v1384_v43 = vmul.f32 %v1674_v9, %v1366_v37  ;;  %v1358_v44 = vadd.f32 %v1357_v41, %v1294_v40  ;;  %v1900_v45 = vpop.f32.mrf.mxu0 }
 0x134   : > { %v1378_v47 = vmul.f32 %v1674_v9, %v1342_v38  ;;  %v1353_v48 = vadd.f32 %v1900_v45, %v1289_v42  ;;  %v1904_v49 = vpop.f32.mrf.mxu1  ;;  %v1394_v53 = vadd.f32 %v1675_v36, %v1380_v22 }
 0x135   : > { %v1398_v51 = vadd.f32 %v1675_v36, %v1384_v43  ;;  %v1382_v24 = vmul.f32 %v1674_v9, %v1358_v44  ;;  %v1344_v26 = vpop.f32.mrf.mxu0 }
 0x136   : > { %v1381_v15 = vmul.f32 %v1674_v9, %v1353_v48  ;;  %v1345_v16 = vadd.f32 %v1344_v26, %v1281_v50  ;;  %v1360_v17 = vpop.f32.mrf.mxu1  ;;  %v1392_v46 = vadd.f32 %v1675_v36, %v1378_v47  ;;  %v1401_v5 = vmax.f32 %v1394_v53, 0.0 }
 0x137   : > { %v1405_v18 = vmax.f32 %v1398_v51, 0.0  ;;  %v1361_v59 = vadd.f32 %v1360_v17, %v1297_v52  ;;  %v1396_v3 = vadd.f32 %v1675_v36, %v1382_v24 }
 0x138   : > { %v1395_v60 = vadd.f32 %v1675_v36, %v1381_v15  ;;  %v1379_v61 = vmul.f32 %v1674_v9, %v1345_v16  ;;  %v1399_v63 = vmax.f32 %v1392_v46, 0.0 }
 0x139   : > { %v1691_v62 = vpack.c.bf16 %v1405_v18, %v1405_v18  ;;  %v1383_v4 = vmul.f32 %v1674_v9, %v1361_v59  ;;  %v1403_v2 = vmax.f32 %v1396_v3, 0.0 }
 0x13a   : > { %v1402_v6 = vmax.f32 %v1395_v60, 0.0  ;;  %v1393_v11 = vadd.f32 %v1675_v36, %v1379_v61 }
 0x13b   : > { %1441 = vst [vmem:[%s267_s23 + $0x18] sm:$0xf] %v1691_v62  ;;  %v1397_v12 = vadd.f32 %v1675_v36, %v1383_v4 }
 0x13c   : > { %v1700_v0 = vpack.c.bf16 %v1402_v6, %v1401_v5  ;;  %v1400_v1 = vmax.f32 %v1393_v11, 0.0 }
 0x13d   : > { %v1404_v13 = vmax.f32 %v1397_v12, 0.0 }
 0x13e   : > { %1707 = vst [vmem:[%s267_s23 + $0x8] sm:$0xff] %v1700_v0   ;;  %v1695_v54 = vpack.c.bf16 %v1400_v1, %v1399_v63 }
 0x13f   : > { %v1705_v57 = vpack.c.bf16 %v1404_v13, %v1403_v2 }
 0x140   : > { %1696 = vst [vmem:[%s267_s23] sm:$0xff] %v1695_v54  }
 0x141   : > { %1708 = vst [vmem:[%s267_s23 + $0x10] sm:$0xff] %v1705_v57  }
 0x142 PF: > { %s14_s17 = sadd.s32 1, %s2088_s17   ;;  %s2442_s15 = smov %s2084_s16 }
 0x143   : > { %p11_p5 = scmp.ge.s32.totalorder %s14_s17, 4   ;;  %s2443_s16 = smov %s2445_s18 }
 0x145   :  { %13 = sbr.rel (!%p11_p5) target bundleno = 2 (0x2), region = 75 }

// kernel: inception_net_forward.22
= control target key start
LH: loop header
LB: loop body
LE: loop exit
PB: predicated region body
PF: predicated region fallthrough
CT: control target
= control target key end

     0   :  { %vm302_vm0 = vcmask 1045504   ;;  %vm1481_vm1 = vcmask 1043456   ;;  %vm1482_vm2 = vsmask.f32 3328  ;;  %vm1484_vm4 = vcmask 1047556   ;;  %s3853_s0 = inlined_call_operand.vmem [shape: bf16[2,9,9,256], index: 0, kind: input, shape index: {}]   ;;  %s3854_s1 = inlined_call_operand.vmem [shape: bf16[2,7,7,256], index: 1, kind: output, shape index: {}]  }
   0x1   :  { %v1659_v0 = vld [vmem:[%s3853_s0] sm:$0xff]  ;;  %v9_v1 = vld [vmem:[%s3853_s0 + $0x10] sm:$0xff]  ;;  %vm1483_vm3 = vmand %vm1481_vm1, %vm1482_vm2  ;;  %vm1485_vm5 = vsmask.f32 7424 }
   0x2   :  { %v10_v2 = vld [vmem:[%s3853_s0 + $0x20] sm:$0xff]  ;;  %v11_v3 = vld [vmem:[%s3853_s0 + $0x30] sm:$0xff]  ;;  %v22_v8 = vunpack.c.l.bf16 %v1659_v0  ;;  %v23_v9 = vunpack.c.h.bf16 %v1659_v0  ;;  %v1686_v10 = vunpack.c.l.bf16 %v9_v1  ;;  %v1688_v11 = vunpack.c.h.bf16 %v9_v1  ;;  %vm1486_vm6 = vmand %vm1484_vm4, %vm1485_vm5 }
   0x3   :  { %v12_v4 = vld [vmem:[%s3853_s0 + $0x40] sm:$0xff]  ;;  %v13_v5 = vld [vmem:[%s3853_s0 + $0x50] sm:$0xff]  ;;  %v1696_v14 = vunpack.c.l.bf16 %v10_v2  ;;  %v1698_v15 = vunpack.c.h.bf16 %v10_v2  ;;  %v1700_v16 = vunpack.c.l.bf16 %v11_v3  ;;  %v1702_v17 = vunpack.c.h.bf16 %v11_v3  ;;  %vm3767_vm7 = vmor %vm1486_vm6, %vm1483_vm3 }
   0x4   :  { %v14_v6 = vld [vmem:[%s3853_s0 + $0x60] sm:$0xff]  ;;  %v1682_v7 = vld [vmem:[%s3853_s0 + $0x90] sm:$0xff]  ;;  %3988 = vst [vmem:[#allocation2_spill] sm:$0xff] %v1686_v10  ;;  %3989 = vst [vmem:[#allocation3_spill] sm:$0xff] %v1688_v11  ;;  %v1710_v20 = vunpack.c.l.bf16 %v12_v4  ;;  %v1712_v21 = vunpack.c.h.bf16 %v12_v4  ;;  %v1714_v22 = vunpack.c.l.bf16 %v13_v5  ;;  %v1716_v23 = vunpack.c.h.bf16 %v13_v5 }
   0x5   :  { %v16_v12 = vld [vmem:[%s3853_s0 + $0xa0] sm:$0xff]  ;;  %v17_v13 = vld [vmem:[%s3853_s0 + $0xb0] sm:$0xff]  ;;  %3990 = vst [vmem:[#allocation4_spill] sm:$0xff] %v1696_v14  ;;  %3991 = vst [vmem:[#allocation5_spill] sm:$0xff] %v1698_v15  ;;  %v1724_v26 = vunpack.c.l.bf16 %v14_v6  ;;  %v1726_v27 = vunpack.c.h.bf16 %v14_v6  ;;  %v36_v28 = vunpack.c.l.bf16 %v1682_v7  ;;  %v37_v29 = vunpack.c.h.bf16 %v1682_v7 }
   0x6   :  { %3992 = vst [vmem:[#allocation6_spill] sm:$0xff] %v1700_v16  ;;  %3993 = vst [vmem:[#allocation7_spill] sm:$0xff] %v1702_v17  ;;  %v18_v18 = vld [vmem:[%s3853_s0 + $0xc0] sm:$0xff]  ;;  %v19_v19 = vld [vmem:[%s3853_s0 + $0xd0] sm:$0xff]  ;;  %v1730_v30 = vunpack.c.l.bf16 %v16_v12  ;;  %v1732_v31 = vunpack.c.h.bf16 %v16_v12  ;;  %v1734_v32 = vunpack.c.l.bf16 %v17_v13  ;;  %v1736_v33 = vunpack.c.h.bf16 %v17_v13 }
   0x7   :  { %3994 = vst [vmem:[#allocation8_spill] sm:$0xff] %v1710_v20  ;;  %3995 = vst [vmem:[#allocation9_spill] sm:$0xff] %v1712_v21  ;;  %v20_v24 = vld [vmem:[%s3853_s0 + $0xe0] sm:$0xff]  ;;  %v21_v25 = vld [vmem:[%s3853_s0 + $0xf0] sm:$0xff]  ;;  %v1738_v34 = vunpack.c.l.bf16 %v18_v18  ;;  %v1740_v35 = vunpack.c.h.bf16 %v18_v18  ;;  %v1742_v36 = vunpack.c.l.bf16 %v19_v19  ;;  %v1744_v37 = vunpack.c.h.bf16 %v19_v19 }
   0x8   :  { %3996 = vst [vmem:[#allocation10_spill] sm:$0xff] %v1714_v22  ;;  %3997 = vst [vmem:[#allocation11_spill] sm:$0xff] %v1716_v23  ;;  %v1746_v38 = vunpack.c.l.bf16 %v20_v24  ;;  %v1748_v39 = vunpack.c.h.bf16 %v20_v24  ;;  %v1750_v40 = vunpack.c.l.bf16 %v21_v25  ;;  %v1752_v41 = vunpack.c.h.bf16 %v21_v25 }
   0x9   :  { %3998 = vst [vmem:[#allocation12_spill] sm:$0xff] %v1724_v26  ;;  %3999 = vst [vmem:[#allocation13_spill] sm:$0xff] %v1726_v27  ;;  %v78_v42 = vrot.slane %v22_v8, 1  ;;  %v79_v43 = vrot.slane %v23_v9, 1  ;;  %v3878_v44 = vrot.slane %v1686_v10, 1  ;;  %v3877_v45 = vrot.slane %v1688_v11, 1 }
   0xa   :  { %4000 = vst [vmem:[#allocation14_spill] sm:$0xff] %v1730_v30  ;;  %4001 = vst [vmem:[#allocation15_spill] sm:$0xff] %v1732_v31  ;;  %v3876_v46 = vrot.slane %v1696_v14, 1  ;;  %v3875_v47 = vrot.slane %v1698_v15, 1  ;;  %v3858_v48 = vrot.slane %v1700_v16, 1  ;;  %v3857_v49 = vrot.slane %v1702_v17, 1 }
   0xb   :  { %4002 = vst [vmem:[#allocation16_spill] sm:$0xff] %v1734_v32  ;;  %4003 = vst [vmem:[#allocation17_spill] sm:$0xff] %v1736_v33  ;;  %v3855_v50 = vrot.slane %v1710_v20, 1  ;;  %v3856_v51 = vrot.slane %v1712_v21, 1  ;;  %v3859_v52 = vrot.slane %v1714_v22, 1  ;;  %v3860_v53 = vrot.slane %v1716_v23, 1 }
   0xc   :  { %4004 = vst [vmem:[#allocation18_spill] sm:$0xff] %v1738_v34  ;;  %4005 = vst [vmem:[#allocation19_spill] sm:$0xff] %v1740_v35  ;;  %v3861_v54 = vrot.slane %v1724_v26, 1  ;;  %v3870_v55 = vrot.slane %v1726_v27, 1  ;;  %v92_v56 = vrot.slane %v36_v28, 1  ;;  %v93_v57 = vrot.slane %v37_v29, 1 }
   0xd   :  { %4006 = vst [vmem:[#allocation20_spill] sm:$0xff] %v1742_v36  ;;  %4007 = vst [vmem:[#allocation21_spill] sm:$0xff] %v1744_v37  ;;  %v3869_v58 = vrot.slane %v1730_v30, 1  ;;  %v3864_v59 = vrot.slane %v1732_v31, 1  ;;  %v3863_v60 = vrot.slane %v1734_v32, 1  ;;  %v3862_v61 = vrot.slane %v1736_v33, 1 }
   0xe   :  { %4008 = vst [vmem:[#allocation22_spill] sm:$0xff] %v1746_v38  ;;  %4009 = vst [vmem:[#allocation23_spill] sm:$0xff] %v1748_v39  ;;  %v3865_v62 = vrot.slane %v1738_v34, 1  ;;  %v3866_v63 = vrot.slane %v1740_v35, 1  ;;  %v3867_v0 = vrot.slane %v1742_v36, 1  ;;  %v3868_v1 = vrot.slane %v1744_v37, 1 }
   0xf   :  { %4010 = vst [vmem:[#allocation24_spill] sm:$0xff] %v1750_v40  ;;  %4011 = vst [vmem:[#allocation25_spill] sm:$0xff] %v1752_v41  ;;  %v3871_v2 = vrot.slane %v1746_v38, 1  ;;  %v3872_v3 = vrot.slane %v1748_v39, 1  ;;  %v3873_v4 = vrot.slane %v1750_v40, 1  ;;  %v3874_v5 = vrot.slane %v1752_v41, 1 }
  0x10   :  { %v1778_v6 = vmax.f32 %v22_v8, %v78_v42  ;;  %v1780_v7 = vmax.f32 %v23_v9, %v79_v43  ;;  %v1785_v12 = vmax.f32 %v1686_v10, %v3878_v44  ;;  %v1790_v13 = vmax.f32 %v1688_v11, %v3877_v45  ;;  %v1967_v44 = vld [vmem:[%s3853_s0 + $0x50] sm:$0xee]  ;;  %v1981_v45 = vld [vmem:[%s3853_s0 + $0x60] sm:$0xee] }
  0x11   :  { %v1795_v18 = vmax.f32 %v1696_v14, %v3876_v46  ;;  %v1800_v8 = vmax.f32 %v1698_v15, %v3875_v47  ;;  %v1805_v9 = vmax.f32 %v1700_v16, %v3858_v48  ;;  %v1810_v19 = vmax.f32 %v1702_v17, %v3857_v49  ;;  %v1995_v46 = vld [vmem:[%s3853_s0 + $0x90] sm:$0xee]  ;;  %v2009_v47 = vld [vmem:[%s3853_s0 + $0xa0] sm:$0xee]  ;;  %v2092_v17 = vld [vmem:[%s3853_s0 + $0xf8] sm:$0x11] }
  0x12   :  { %v1815_v24 = vmax.f32 %v1710_v20, %v3855_v50  ;;  %v1820_v25 = vmax.f32 %v1712_v21, %v3856_v51  ;;  %v1825_v42 = vmax.f32 %v1714_v22, %v3859_v52  ;;  %v1830_v43 = vmax.f32 %v1716_v23, %v3860_v53  ;;  %v2056_v22 = vld [vmem:[%s3853_s0 + $0xd8] sm:$0x11]  ;;  %v2078_v20 = vld [vmem:[%s3853_s0 + $0xe8] sm:$0x11]  ;;  %v2083_v15 = vld [vmem:[%s3853_s0 + $0xf0] sm:$0xee] }
  0x13   :  { %v1835_v50 = vmax.f32 %v1724_v26, %v3861_v54  ;;  %v1840_v51 = vmax.f32 %v1726_v27, %v3870_v55  ;;  %v1842_v49 = vmax.f32 %v36_v28, %v92_v56  ;;  %v1844_v48 = vmax.f32 %v37_v29, %v93_v57  ;;  %v1869_v29 = vld [vmem:[%s3853_s0] sm:$0xee]  ;;  %v1874_v56 = vld [vmem:[%s3853_s0 + $0x8] sm:$0x11] }
  0x14   :  { %v1849_v52 = vmax.f32 %v1730_v30, %v3869_v58  ;;  %v1854_v53 = vmax.f32 %v1732_v31, %v3864_v59  ;;  %v1859_v54 = vmax.f32 %v1734_v32, %v3863_v60  ;;  %v1864_v28 = vmax.f32 %v1736_v33, %v3862_v61  ;;  %v2014_v32 = vld [vmem:[%s3853_s0 + $0xa8] sm:$0x11]  ;;  %v2028_v30 = vld [vmem:[%s3853_s0 + $0xb8] sm:$0x11]  ;;  %v2073_v31 = vld [vmem:[%s3853_s0 + $0xe0] sm:$0xee] }
  0x15   :  { %4012 = vst [vmem:[#allocation26_spill] sm:$0xff] %v1842_v49  ;;  %4013 = vst [vmem:[#allocation27_spill] sm:$0xff] %v1844_v48  ;;  %v1879_v57 = vmax.f32 %v1738_v34, %v3865_v62  ;;  %v1884_v61 = vmax.f32 %v1740_v35, %v3866_v63  ;;  %v1889_v60 = vmax.f32 %v1742_v36, %v3867_v0  ;;  %v1899_v62 = vld [vmem:[%s3853_s0 + $0x10] sm:$0xee]  ;;  %v1904_v63 = vld [vmem:[%s3853_s0 + $0x18] sm:$0x11]  ;;  %v4026_v33 = vunpack.c.l.bf16 %v1869_v29 }
  0x16   :  { %4014 = vst [vmem:[#allocation28_spill] sm:$0xff] %v1849_v52  ;;  %4015 = vst [vmem:[#allocation29_spill] sm:$0xff] %v1854_v53  ;;  %v1894_v59 = vmax.f32 %v1744_v37, %v3868_v1  ;;  %v1909_v0 = vmax.f32 %v1746_v38, %v3871_v2  ;;  %v1914_v1 = vmax.f32 %v1748_v39, %v3872_v3  ;;  %v1929_v2 = vld [vmem:[%s3853_s0 + $0x20] sm:$0xee]  ;;  %v1934_v3 = vld [vmem:[%s3853_s0 + $0x28] sm:$0x11]  ;;  %v4027_v11 = vunpack.c.l.bf16 %v1874_v56 }
  0x17   :  { %4016 = vst [vmem:[#allocation30_spill] sm:$0xff] %v1859_v54  ;;  %4017 = vst [vmem:[#allocation31_spill] sm:$0xff] %v1864_v28  ;;  %v1919_v58 = vmax.f32 %v1750_v40, %v3873_v4  ;;  %v1924_v55 = vmax.f32 %v1752_v41, %v3874_v5  ;;  %v1939_v4 = vld [vmem:[%s3853_s0 + $0x30] sm:$0xee]  ;;  %v1944_v5 = vld [vmem:[%s3853_s0 + $0x38] sm:$0x11]  ;;  %v4029_v21 = vunpack.c.h.bf16 %v1874_v56  ;;  %v4030_v23 = vunpack.c.l.bf16 %v1899_v62 }
  0x18   :  { %4018 = vst [vmem:[#allocation32_spill] sm:$0xff] %v1879_v57  ;;  %4019 = vst [vmem:[#allocation33_spill] sm:$0xff] %v1884_v61  ;;  %v1953_v41 = vld [vmem:[%s3853_s0 + $0x40] sm:$0xee]  ;;  %v1958_v40 = vld [vmem:[%s3853_s0 + $0x48] sm:$0x11] }
  0x19   :  { %4020 = vst [vmem:[#allocation34_spill] sm:$0xff] %v1889_v60  ;;  %4021 = vst [vmem:[#allocation35_spill] sm:$0xff] %v1894_v59  ;;  %v1972_v38 = vld [vmem:[%s3853_s0 + $0x58] sm:$0x11]  ;;  %v1986_v36 = vld [vmem:[%s3853_s0 + $0x68] sm:$0x11]  ;;  %v4032_v59 = vunpack.c.h.bf16 %v1899_v62  ;;  %v4036_v62 = vunpack.c.h.bf16 %v1929_v2 }
  0x1a   :  { %4022 = vst [vmem:[#allocation36_spill] sm:$0xff] %v1909_v0  ;;  %4023 = vst [vmem:[#allocation37_spill] sm:$0xff] %v1914_v1  ;;  %v2000_v34 = vld [vmem:[%s3853_s0 + $0x98] sm:$0x11]  ;;  %v2023_v39 = vld [vmem:[%s3853_s0 + $0xb0] sm:$0xee]  ;;  %v4031_v1 = vunpack.c.l.bf16 %v1904_v63 }
  0x1b   :  { %4024 = vst [vmem:[#allocation38_spill] sm:$0xff] %v1919_v58  ;;  %4025 = vst [vmem:[#allocation39_spill] sm:$0xff] %v1924_v55  ;;  %v2037_v37 = vld [vmem:[%s3853_s0 + $0xc0] sm:$0xee]  ;;  %v2042_v26 = vld [vmem:[%s3853_s0 + $0xc8] sm:$0x11]  ;;  %v4028_v55 = vunpack.c.h.bf16 %v1869_v29 }
  0x1c   :  { %v2051_v35 = vld [vmem:[%s3853_s0 + $0xd0] sm:$0xee]  ;;  %v303_v27 = vrot.slane %v4026_v33, 2  ;;  %v304_v10 = vrot.slane %v4027_v11, 2  ;;  %v307_v58 = vrot.slane %v4029_v21, 2  ;;  %v309_v16 = vrot.slane %v4030_v23, 2 }
  0x1d   :  { %v306_v14 = vrot.slane %v4028_v55, 2  ;;  %v310_v0 = vrot.slane %v4031_v1, 2  ;;  %v312_v60 = vrot.slane %v4032_v59, 2  ;;  %v4033_v33 = vunpack.c.h.bf16 %v1904_v63 }
  0x1e   :  { %v240_v55 = vunpack.c.l.bf16 %v2078_v20  ;;  %v2119_v59 = vsel %vm302_vm0, %v303_v27, %v304_v10  ;;  %v4035_v11 = vunpack.c.l.bf16 %v1934_v3  ;;  %v318_v1 = vrot.slane %v4036_v62, 2 }
  0x1f   :  { %v313_v61 = vrot.slane %v4033_v33, 2  ;;  %v2122_v63 = vsel %vm302_vm0, %v306_v14, %v307_v58  ;;  %v4034_v33 = vunpack.c.l.bf16 %v1929_v2  ;;  %v2129_v56 = vsel %vm302_vm0, %v309_v16, %v310_v0 }
  0x20   :  { %v316_v21 = vrot.slane %v4035_v11, 2  ;;  %v4037_v10 = vunpack.c.h.bf16 %v1934_v3  ;;  %v4038_v14 = vunpack.c.l.bf16 %v1939_v4  ;;  %v4040_v11 = vunpack.c.h.bf16 %v1939_v4 }
  0x21   :  { %v315_v29 = vrot.slane %v4034_v33, 2  ;;  %v2132_v23 = vsel %vm302_vm0, %v312_v60, %v313_v61  ;;  %v4039_v33 = vunpack.c.l.bf16 %v1944_v5  ;;  %v4041_v16 = vunpack.c.h.bf16 %v1944_v5 }
  0x22   :  { %v319_v27 = vrot.slane %v4037_v10, 2  ;;  %v321_v58 = vrot.slane %v4038_v14, 2  ;;  %v324_v28 = vrot.slane %v4040_v11, 2  ;;  %v4042_v60 = vunpack.c.l.bf16 %v1953_v41 }
  0x23   :  { %v322_v57 = vrot.slane %v4039_v33, 2  ;;  %v325_v0 = vrot.slane %v4041_v16, 2  ;;  %v4043_v2 = vunpack.c.l.bf16 %v1958_v40  ;;  %v4044_v3 = vunpack.c.h.bf16 %v1953_v41 }
  0x24   :  { %v327_v61 = vrot.slane %v4042_v60, 2  ;;  %v4045_v14 = vunpack.c.h.bf16 %v1958_v40  ;;  %v4046_v33 = vunpack.c.l.bf16 %v1967_v44  ;;  %v4047_v4 = vunpack.c.l.bf16 %v1972_v38 }
  0x25   :  { %v328_v62 = vrot.slane %v4043_v2, 2  ;;  %v330_v10 = vrot.slane %v4044_v3, 2  ;;  %v4048_v5 = vunpack.c.h.bf16 %v1967_v44  ;;  %v4049_v60 = vunpack.c.h.bf16 %v1972_v38 }
  0x26   :  { %v331_v54 = vrot.slane %v4045_v14, 2  ;;  %v333_v53 = vrot.slane %v4046_v33, 2  ;;  %v334_v11 = vrot.slane %v4047_v4, 2  ;;  %v4050_v2 = vunpack.c.l.bf16 %v1981_v45 }
  0x27   :  { %v336_v16 = vrot.slane %v4048_v5, 2  ;;  %v337_v52 = vrot.slane %v4049_v60, 2  ;;  %v4051_v41 = vunpack.c.l.bf16 %v1986_v36  ;;  %v4052_v40 = vunpack.c.h.bf16 %v1981_v45 }
  0x28   :  { %v339_v48 = vrot.slane %v4050_v2, 2  ;;  %v4053_v33 = vunpack.c.h.bf16 %v1986_v36  ;;  %v2171_v4 = vsel %vm302_vm0, %v315_v29, %v316_v21  ;;  %v2174_v44 = vsel %vm302_vm0, %v318_v1, %v319_v27 }
  0x29   :  { %v340_v3 = vrot.slane %v4051_v41, 2  ;;  %v342_v14 = vrot.slane %v4052_v40, 2  ;;  %v4054_v38 = vunpack.c.l.bf16 %v1995_v46  ;;  %v4055_v60 = vunpack.c.l.bf16 %v2000_v34 }
  0x2a   :  { %v343_v49 = vrot.slane %v4053_v33, 2  ;;  %v2181_v41 = vsel %vm302_vm0, %v321_v58, %v322_v57  ;;  %v2184_v45 = vsel %vm302_vm0, %v324_v28, %v325_v0  ;;  %v4056_v36 = vunpack.c.h.bf16 %v1995_v46 }
  0x2b   :  { %v345_v5 = vrot.slane %v4054_v38, 2  ;;  %v346_v2 = vrot.slane %v4055_v60, 2  ;;  %v4057_v29 = vunpack.c.h.bf16 %v2000_v34  ;;  %v2191_v1 = vsel %vm302_vm0, %v327_v61, %v328_v62 }
  0x2c   :  { %v348_v40 = vrot.slane %v4056_v36, 2  ;;  %v2194_v27 = vsel %vm302_vm0, %v330_v10, %v331_v54  ;;  %v2197_v33 = vsel %vm302_vm0, %v333_v53, %v334_v11  ;;  %v2200_v57 = vsel %vm302_vm0, %v336_v16, %v337_v52 }
  0x2d   :  { %v349_v21 = vrot.slane %v4057_v29, 2  ;;  %v2203_v28 = vsel %vm302_vm0, %v339_v48, %v340_v3  ;;  %v2206_v46 = vsel %vm302_vm0, %v342_v14, %v343_v49  ;;  %v4058_v34 = vunpack.c.l.bf16 %v2009_v47 }
  0x2e   :  { %v4059_v0 = vunpack.c.l.bf16 %v2014_v32  ;;  %v2213_v54 = vsel %vm302_vm0, %v345_v5, %v346_v2  ;;  %v4060_v53 = vunpack.c.h.bf16 %v2009_v47  ;;  %v4061_v52 = vunpack.c.h.bf16 %v2014_v32 }
  0x2f   :  { %v351_v58 = vrot.slane %v4058_v34, 2  ;;  %v4062_v48 = vunpack.c.l.bf16 %v2023_v39  ;;  %v2222_v49 = vsel %vm302_vm0, %v348_v40, %v349_v21  ;;  %v4063_v16 = vunpack.c.l.bf16 %v2028_v30 }
  0x30   :  { %v352_v61 = vrot.slane %v4059_v0, 2  ;;  %v354_v62 = vrot.slane %v4060_v53, 2  ;;  %v355_v10 = vrot.slane %v4061_v52, 2  ;;  %v4064_v14 = vunpack.c.h.bf16 %v2023_v39 }
  0x31   :  { %v357_v11 = vrot.slane %v4062_v48, 2  ;;  %v358_v3 = vrot.slane %v4063_v16, 2  ;;  %v4065_v5 = vunpack.c.h.bf16 %v2028_v30  ;;  %v4066_v47 = vunpack.c.l.bf16 %v2037_v37 }
  0x32   :  { %v360_v38 = vrot.slane %v4064_v14, 2  ;;  %v4067_v32 = vunpack.c.l.bf16 %v2042_v26  ;;  %v4068_v29 = vunpack.c.h.bf16 %v2037_v37  ;;  %v4069_v40 = vunpack.c.h.bf16 %v2042_v26 }
  0x33   :  { %v361_v60 = vrot.slane %v4065_v5, 2  ;;  %v363_v2 = vrot.slane %v4066_v47, 2  ;;  %v4070_v0 = vunpack.c.l.bf16 %v2051_v35  ;;  %v4071_v39 = vunpack.c.l.bf16 %v2056_v22 }
  0x34   :  { %v364_v36 = vrot.slane %v4067_v32, 2  ;;  %v366_v34 = vrot.slane %v4068_v29, 2  ;;  %v367_v21 = vrot.slane %v4069_v40, 2  ;;  %v4072_v30 = vunpack.c.h.bf16 %v2051_v35 }
  0x35   :  { %v369_v53 = vrot.slane %v4070_v0, 2  ;;  %v370_v52 = vrot.slane %v4071_v39, 2  ;;  %v4073_v16 = vunpack.c.h.bf16 %v2056_v22  ;;  %v4074_v5 = vunpack.c.l.bf16 %v2073_v31 }
  0x36   :  { %v372_v48 = vrot.slane %v4072_v30, 2  ;;  %v376_v37 = vrot.slane %v240_v55, 2  ;;  %v4075_v32 = vunpack.c.h.bf16 %v2073_v31  ;;  %v4076_v29 = vunpack.c.h.bf16 %v2078_v20 }
  0x37   :  { %v373_v14 = vrot.slane %v4073_v16, 2  ;;  %v375_v47 = vrot.slane %v4074_v5, 2  ;;  %v2253_v0 = vsel %vm302_vm0, %v351_v58, %v352_v61  ;;  %v2256_v39 = vsel %vm302_vm0, %v354_v62, %v355_v10 }
  0x38   :  { %v378_v26 = vrot.slane %v4075_v32, 2  ;;  %v379_v40 = vrot.slane %v4076_v29, 2  ;;  %v4077_v35 = vunpack.c.l.bf16 %v2083_v15  ;;  %v4078_v30 = vunpack.c.l.bf16 %v2092_v17  ;;  %v4094_v29 = vld [vmem:[#allocation39_spill] sm:$0xff] }
  0x39   :  { %v2263_v55 = vsel %vm302_vm0, %v357_v11, %v358_v3  ;;  %v2266_v31 = vsel %vm302_vm0, %v360_v38, %v361_v60  ;;  %v4079_v20 = vunpack.c.h.bf16 %v2083_v15  ;;  %v4080_v58 = vunpack.c.h.bf16 %v2092_v17 }
  0x3a   :  { %v381_v22 = vrot.slane %v4077_v35, 2  ;;  %v382_v16 = vrot.slane %v4078_v30, 2  ;;  %v2273_v62 = vsel %vm302_vm0, %v363_v2, %v364_v36  ;;  %v2276_v10 = vsel %vm302_vm0, %v366_v34, %v367_v21  ;;  %v4099_v30 = vld [vmem:[#allocation2_spill] sm:$0xff] }
  0x3b   :  { %v384_v5 = vrot.slane %v4079_v20, 2  ;;  %v385_v61 = vrot.slane %v4080_v58, 2  ;;  %v2279_v32 = vsel %vm302_vm0, %v369_v53, %v370_v52  ;;  %v2282_v11 = vsel %vm302_vm0, %v372_v48, %v373_v14  ;;  %v4091_v52 = vld [vmem:[#allocation36_spill] sm:$0xff]  ;;  %v4092_v14 = vld [vmem:[#allocation37_spill] sm:$0xff] }
  0x3c   :  { %v2285_v3 = vsel %vm302_vm0, %v375_v47, %v376_v37  ;;  %v2288_v15 = vsel %vm302_vm0, %v378_v26, %v379_v40  ;;  %v415_v17 = vmax.f32 %v1778_v6, %v2119_v59  ;;  %v416_v38 = vmax.f32 %v1780_v7, %v2122_v63  ;;  %v4093_v37 = vld [vmem:[#allocation38_spill] sm:$0xff]  ;;  %v4101_v20 = vld [vmem:[#allocation4_spill] sm:$0xff]  ;;  %v4102_v58 = vld [vmem:[#allocation5_spill] sm:$0xff] }
  0x3d   :  { %v383_v60 = vsel %vm302_vm0, %v381_v22, %v382_v16  ;;  %v417_v2 = vmax.f32 %v1785_v12, %v2129_v56  ;;  %v418_v36 = vmax.f32 %v1790_v13, %v2132_v23  ;;  %v419_v34 = vmax.f32 %v1795_v18, %v2171_v4 }
  0x3e   :  { %v386_v21 = vsel %vm302_vm0, %v384_v5, %v385_v61  ;;  %v420_v53 = vmax.f32 %v1800_v8, %v2174_v44  ;;  %v421_v6 = vmax.f32 %v1805_v9, %v2181_v41  ;;  %v422_v7 = vmax.f32 %v1810_v19, %v2184_v45  ;;  %v4081_v19 = vld [vmem:[#allocation26_spill] sm:$0xff] }
  0x3f   :  { %v423_v12 = vmax.f32 %v1815_v24, %v2191_v1  ;;  %v424_v13 = vmax.f32 %v1820_v25, %v2194_v27  ;;  %v425_v18 = vmax.f32 %v1825_v42, %v2197_v33  ;;  %v426_v56 = vmax.f32 %v1830_v43, %v2200_v57  ;;  %v4082_v24 = vld [vmem:[#allocation27_spill] sm:$0xff]  ;;  %v4083_v25 = vld [vmem:[#allocation28_spill] sm:$0xff]  ;;  %v4084_v42 = vld [vmem:[#allocation29_spill] sm:$0xff] }
  0x40   :  { %v427_v8 = vmax.f32 %v1835_v50, %v2203_v28  ;;  %v428_v9 = vmax.f32 %v1840_v51, %v2206_v46  ;;  %v429_v23 = vmax.f32 %v4081_v19, %v2213_v54  ;;  %v430_v59 = vmax.f32 %v4082_v24, %v2222_v49  ;;  %v4085_v43 = vld [vmem:[#allocation30_spill] sm:$0xff]  ;;  %v4086_v50 = vld [vmem:[#allocation31_spill] sm:$0xff]  ;;  %v1540_v51 = vld [vmem:[%s3853_s0 + $0x70] sm:$0xff] }
  0x41   :  { %v431_v63 = vmax.f32 %v4083_v25, %v2253_v0  ;;  %v432_v4 = vmax.f32 %v4084_v42, %v2256_v39  ;;  %v433_v44 = vmax.f32 %v4085_v43, %v2263_v55  ;;  %v434_v41 = vmax.f32 %v4086_v50, %v2266_v31  ;;  %v1547_v45 = vld [vmem:[%s3853_s0 + $0x100] sm:$0xff]  ;;  %v4087_v1 = vld [vmem:[#allocation32_spill] sm:$0xff]  ;;  %v4088_v33 = vld [vmem:[#allocation33_spill] sm:$0xff] }
  0x42   :  { %v435_v27 = vmax.f32 %v4087_v1, %v2273_v62  ;;  %v436_v57 = vmax.f32 %v4088_v33, %v2276_v10  ;;  %v4089_v28 = vld [vmem:[#allocation34_spill] sm:$0xff]  ;;  %v4090_v54 = vld [vmem:[#allocation35_spill] sm:$0xff]  ;;  %v439_v48 = vmax.f32 %v4091_v52, %v2285_v3  ;;  %v440_v47 = vmax.f32 %v4092_v14, %v2288_v15  ;;  %v4105_v3 = vld [vmem:[#allocation8_spill] sm:$0xff] }
  0x43   :  { %v437_v46 = vmax.f32 %v4089_v28, %v2279_v32  ;;  %v438_v49 = vmax.f32 %v4090_v54, %v2282_v11  ;;  %v441_v26 = vmax.f32 %v4093_v37, %v383_v60  ;;  %v442_v40 = vmax.f32 %v4094_v29, %v386_v21  ;;  %v4100_v55 = vld [vmem:[#allocation3_spill] sm:$0xff]  ;;  %v4103_v62 = vld [vmem:[#allocation6_spill] sm:$0xff]  ;;  %v4106_v60 = vld [vmem:[#allocation9_spill] sm:$0xff] }
  0x44   :  { %v2352_v0 = vunpack.c.l.bf16 %v1540_v51  ;;  %v2354_v39 = vunpack.c.h.bf16 %v1540_v51  ;;  %v2356_v35 = vunpack.c.l.bf16 %v1547_v45  ;;  %v2358_v22 = vunpack.c.h.bf16 %v1547_v45  ;;  %v4104_v32 = vld [vmem:[#allocation7_spill] sm:$0xff]  ;;  %v4107_v19 = vld [vmem:[#allocation10_spill] sm:$0xff]  ;;  %v4109_v43 = vld [vmem:[#allocation12_spill] sm:$0xff] }
  0x45   :  { %v486_v16 = vmax.f32 %v415_v17, %v4099_v30  ;;  %v487_v31 = vmax.f32 %v416_v38, %v4100_v55  ;;  %v488_v5 = vmax.f32 %v417_v2, %v4101_v20  ;;  %v489_v61 = vmax.f32 %v418_v36, %v4102_v58  ;;  %v4108_v25 = vld [vmem:[#allocation11_spill] sm:$0xff]  ;;  %v4110_v50 = vld [vmem:[#allocation13_spill] sm:$0xff]  ;;  %v4111_v51 = vld [vmem:[#allocation14_spill] sm:$0xff] }
  0x46   :  { %4095 = vst [vmem:[#allocation26_spill] sm:$0xff] %v2352_v0  ;;  %4096 = vst [vmem:[#allocation27_spill] sm:$0xff] %v2354_v39  ;;  %v490_v10 = vmax.f32 %v419_v34, %v4103_v62  ;;  %v491_v11 = vmax.f32 %v420_v53, %v4104_v32  ;;  %v492_v15 = vmax.f32 %v421_v6, %v4105_v3  ;;  %v4112_v45 = vld [vmem:[#allocation15_spill] sm:$0xff]  ;;  %v4113_v1 = vld [vmem:[#allocation16_spill] sm:$0xff] }
  0x47   :  { %4097 = vst [vmem:[#allocation28_spill] sm:$0xff] %v2356_v35  ;;  %4098 = vst [vmem:[#allocation29_spill] sm:$0xff] %v2358_v22  ;;  %v493_v21 = vmax.f32 %v422_v7, %v4106_v60  ;;  %v494_v24 = vmax.f32 %v423_v12, %v4107_v19  ;;  %v495_v42 = vmax.f32 %v424_v13, %v4108_v25  ;;  %v4114_v33 = vld [vmem:[#allocation17_spill] sm:$0xff]  ;;  %v4115_v28 = vld [vmem:[#allocation18_spill] sm:$0xff] }
  0x48   :  { %v496_v17 = vmax.f32 %v425_v18, %v4109_v43  ;;  %v497_v38 = vmax.f32 %v426_v56, %v4110_v50  ;;  %v498_v2 = vmax.f32 %v427_v8, %v2352_v0  ;;  %v499_v36 = vmax.f32 %v428_v9, %v2354_v39  ;;  %v4116_v54 = vld [vmem:[#allocation19_spill] sm:$0xff]  ;;  %v4117_v52 = vld [vmem:[#allocation20_spill] sm:$0xff]  ;;  %v4118_v14 = vld [vmem:[#allocation21_spill] sm:$0xff] }
  0x49   :  { %v500_v34 = vmax.f32 %v429_v23, %v4111_v51  ;;  %v501_v53 = vmax.f32 %v430_v59, %v4112_v45  ;;  %v502_v6 = vmax.f32 %v431_v63, %v4113_v1  ;;  %v503_v7 = vmax.f32 %v432_v4, %v4114_v33  ;;  %v4119_v37 = vld [vmem:[#allocation22_spill] sm:$0xff]  ;;  %v4120_v29 = vld [vmem:[#allocation23_spill] sm:$0xff]  ;;  %v4121_v50 = vld [vmem:[#allocation24_spill] sm:$0xff] }
  0x4a   :  { %v504_v12 = vmax.f32 %v433_v44, %v4115_v28  ;;  %v505_v13 = vmax.f32 %v434_v41, %v4116_v54  ;;  %v506_v18 = vmax.f32 %v435_v27, %v4117_v52  ;;  %v507_v56 = vmax.f32 %v436_v57, %v4118_v14  ;;  %v4122_v51 = vld [vmem:[#allocation25_spill] sm:$0xff] }
  0x4b   :  { %v508_v8 = vmax.f32 %v437_v46, %v4119_v37  ;;  %v509_v9 = vmax.f32 %v438_v49, %v4120_v29  ;;  %v510_v23 = vmax.f32 %v439_v48, %v4121_v50  ;;  %v511_v59 = vmax.f32 %v440_v47, %v4122_v51 }
  0x4c   :  { %v512_v63 = vmax.f32 %v441_v26, %v2356_v35  ;;  %v513_v4 = vmax.f32 %v442_v40, %v2358_v22  ;;  %v3927_v57 = vrot.slane %v2358_v22, 1  ;;  %v4123_v46 = vrot.slane %v4099_v30, 1  ;;  %v2681_v22 = vld [vmem:[%s3853_s0 + $0x100] sm:$0xee] }
  0x4d   :  { %v4124_v49 = vrot.slane %v4100_v55, 1  ;;  %v4125_v47 = vrot.slane %v4101_v20, 1  ;;  %v4126_v40 = vrot.slane %v4102_v58, 1  ;;  %v4127_v27 = vrot.slane %v4103_v62, 1 }
  0x4e   :  { %v2394_v37 = vmax.f32 %v486_v16, %v4123_v46  ;;  %v4128_v30 = vrot.slane %v4104_v32, 1  ;;  %v4129_v55 = vrot.slane %v4105_v3, 1  ;;  %v4130_v20 = vrot.slane %v4106_v60, 1  ;;  %v4140_v46 = vld [vmem:[#allocation14_spill] sm:$0xff] }
  0x4f   :  { %v2398_v48 = vmax.f32 %v487_v31, %v4124_v49  ;;  %v2402_v26 = vmax.f32 %v488_v5, %v4125_v47  ;;  %v2406_v44 = vmax.f32 %v489_v61, %v4126_v40  ;;  %v2410_v41 = vmax.f32 %v490_v10, %v4127_v27  ;;  %v4134_v27 = vld [vmem:[#allocation13_spill] sm:$0xff] }
  0x50   :  { %v2414_v16 = vmax.f32 %v491_v11, %v4128_v30  ;;  %v2418_v31 = vmax.f32 %v492_v15, %v4129_v55  ;;  %v2422_v5 = vmax.f32 %v493_v21, %v4130_v20  ;;  %v4131_v58 = vrot.slane %v4107_v19, 1  ;;  %v2501_v20 = vld [vmem:[%s3853_s0 + $0x20] sm:$0xee] }
  0x51   :  { %v4132_v62 = vrot.slane %v4108_v25, 1  ;;  %v4133_v32 = vrot.slane %v4109_v43, 1  ;;  %v4135_v3 = vrot.slane %v4134_v27, 1  ;;  %v4136_v60 = vrot.slane %v2352_v0, 1  ;;  %v2551_v27 = vld [vmem:[%s3853_s0 + $0x50] sm:$0xee] }
  0x52   :  { %v2426_v61 = vmax.f32 %v494_v24, %v4131_v58  ;;  %v4138_v19 = vrot.slane %v2354_v39, 1  ;;  %v4141_v25 = vrot.slane %v4140_v46, 1  ;;  %v4143_v43 = vrot.slane %v4112_v45, 1  ;;  %v2475_v45 = vld [vmem:[%s3853_s0 + $0x10] sm:$0xee] }
  0x53   :  { %v2430_v10 = vmax.f32 %v495_v42, %v4132_v62  ;;  %v2434_v11 = vmax.f32 %v496_v17, %v4133_v32  ;;  %v2438_v15 = vmax.f32 %v497_v38, %v4135_v3  ;;  %v2442_v21 = vmax.f32 %v498_v2, %v4136_v60  ;;  %v2527_v62 = vld [vmem:[%s3853_s0 + $0x30] sm:$0xee]  ;;  %v2556_v3 = vld [vmem:[%s3853_s0 + $0x58] sm:$0x11]  ;;  %v2654_v60 = vld [vmem:[%s3853_s0 + $0xe8] sm:$0x11] }
  0x54   :  { %v2446_v24 = vmax.f32 %v499_v36, %v4138_v19  ;;  %v2450_v42 = vmax.f32 %v500_v34, %v4141_v25  ;;  %v2454_v17 = vmax.f32 %v501_v53, %v4143_v43  ;;  %v4145_v49 = vrot.slane %v4113_v1, 1  ;;  %v2480_v53 = vld [vmem:[%s3853_s0 + $0x18] sm:$0x11]  ;;  %v2565_v43 = vld [vmem:[%s3853_s0 + $0x60] sm:$0xee] }
  0x55   :  { %4137 = vst [vmem:[#allocation30_spill] sm:$0xff] %v2442_v21  ;;  %v4147_v47 = vrot.slane %v4114_v33, 1  ;;  %v4149_v40 = vrot.slane %v4115_v28, 1  ;;  %v4151_v30 = vrot.slane %v4116_v54, 1  ;;  %v4153_v1 = vrot.slane %v4117_v52, 1  ;;  %v4157_v28 = vld [vmem:[#allocation22_spill] sm:$0xff] }
  0x56   :  { %4139 = vst [vmem:[#allocation31_spill] sm:$0xff] %v2446_v24  ;;  %4142 = vst [vmem:[#allocation32_spill] sm:$0xff] %v2450_v42  ;;  %v2458_v38 = vmax.f32 %v502_v6, %v4145_v49  ;;  %v4155_v33 = vrot.slane %v4118_v14, 1  ;;  %v2506_v52 = vld [vmem:[%s3853_s0 + $0x28] sm:$0x11]  ;;  %v2522_v58 = vmax.f32 %v513_v4, %v3927_v57  ;;  %v4170_v39 = vunpack.c.l.bf16 %v2480_v53 }
  0x57   :  { %4144 = vst [vmem:[#allocation33_spill] sm:$0xff] %v2454_v17  ;;  %v2462_v2 = vmax.f32 %v503_v7, %v4147_v47  ;;  %v2466_v36 = vmax.f32 %v504_v12, %v4149_v40  ;;  %v2470_v34 = vmax.f32 %v505_v13, %v4151_v30  ;;  %v2484_v6 = vmax.f32 %v506_v18, %v4153_v1  ;;  %v2570_v49 = vld [vmem:[%s3853_s0 + $0x68] sm:$0x11]  ;;  %v2612_v40 = vld [vmem:[%s3853_s0 + $0xb8] sm:$0x11] }
  0x58   :  { %4146 = vst [vmem:[#allocation34_spill] sm:$0xff] %v2458_v38  ;;  %v2488_v7 = vmax.f32 %v507_v56, %v4155_v33  ;;  %v4158_v12 = vrot.slane %v4157_v28, 1  ;;  %v4160_v13 = vrot.slane %v4120_v29, 1  ;;  %v4162_v18 = vrot.slane %v4121_v50, 1  ;;  %4168 = vst [vmem:[#allocation7_spill] sm:$0xff] %v2522_v58 }
  0x59   :  { %4148 = vst [vmem:[#allocation35_spill] sm:$0xff] %v2462_v2  ;;  %4150 = vst [vmem:[#allocation36_spill] sm:$0xff] %v2466_v36  ;;  %v4164_v56 = vrot.slane %v4122_v51, 1  ;;  %v4166_v29 = vrot.slane %v2356_v35, 1  ;;  %v2532_v50 = vld [vmem:[%s3853_s0 + $0x38] sm:$0x11]  ;;  %v4169_v1 = vunpack.c.l.bf16 %v2475_v45  ;;  %v4171_v58 = vunpack.c.h.bf16 %v2475_v45 }
  0x5a   :  { %4152 = vst [vmem:[#allocation37_spill] sm:$0xff] %v2470_v34  ;;  %4154 = vst [vmem:[#allocation38_spill] sm:$0xff] %v2484_v6  ;;  %v2492_v54 = vmax.f32 %v508_v8, %v4158_v12  ;;  %v2496_v55 = vmax.f32 %v509_v9, %v4160_v13  ;;  %v2510_v14 = vmax.f32 %v510_v23, %v4162_v18  ;;  %v2537_v51 = vld [vmem:[%s3853_s0 + $0x40] sm:$0xee]  ;;  %v2542_v23 = vld [vmem:[%s3853_s0 + $0x48] sm:$0x11]  ;;  %v4172_v32 = vunpack.c.h.bf16 %v2480_v53 }
  0x5b   :  { %4156 = vst [vmem:[#allocation39_spill] sm:$0xff] %v2488_v7  ;;  %v2514_v8 = vmax.f32 %v511_v59, %v4164_v56  ;;  %v2518_v9 = vmax.f32 %v512_v63, %v4166_v29  ;;  %v2579_v33 = vld [vmem:[%s3853_s0 + $0x70] sm:$0xee]  ;;  %v2584_v28 = vld [vmem:[%s3853_s0 + $0x78] sm:$0x11]  ;;  %v766_v25 = vrot.slane %v4169_v1, 2  ;;  %v4173_v46 = vunpack.c.l.bf16 %v2501_v20 }
  0x5c   :  { %4159 = vst [vmem:[#allocation2_spill] sm:$0xff] %v2492_v54  ;;  %4161 = vst [vmem:[#allocation3_spill] sm:$0xff] %v2496_v55  ;;  %v2593_v29 = vld [vmem:[%s3853_s0 + $0xa0] sm:$0xee]  ;;  %v2598_v57 = vld [vmem:[%s3853_s0 + $0xa8] sm:$0x11]  ;;  %v4175_v55 = vunpack.c.h.bf16 %v2501_v20  ;;  %v4176_v1 = vunpack.c.h.bf16 %v2506_v52  ;;  %v4179_v20 = vunpack.c.h.bf16 %v2527_v62 }
  0x5d   :  { %4163 = vst [vmem:[#allocation4_spill] sm:$0xff] %v2510_v14  ;;  %4165 = vst [vmem:[#allocation5_spill] sm:$0xff] %v2514_v8  ;;  %v2607_v56 = vld [vmem:[%s3853_s0 + $0xb0] sm:$0xee]  ;;  %v2621_v18 = vld [vmem:[%s3853_s0 + $0xc0] sm:$0xee]  ;;  %v4174_v8 = vunpack.c.l.bf16 %v2506_v52 }
  0x5e   :  { %4167 = vst [vmem:[#allocation6_spill] sm:$0xff] %v2518_v9  ;;  %v2626_v47 = vld [vmem:[%s3853_s0 + $0xc8] sm:$0x11]  ;;  %v2635_v13 = vld [vmem:[%s3853_s0 + $0xd0] sm:$0xee]  ;;  %v767_v0 = vrot.slane %v4170_v39, 2  ;;  %v4178_v39 = vunpack.c.l.bf16 %v2532_v50 }
  0x5f   :  { %v2640_v19 = vld [vmem:[%s3853_s0 + $0xd8] sm:$0x11]  ;;  %v2649_v12 = vld [vmem:[%s3853_s0 + $0xe0] sm:$0xee]  ;;  %v2671_v30 = vld [vmem:[%s3853_s0 + $0xf0] sm:$0xee] }
  0x60   :  { %v2676_v63 = vld [vmem:[%s3853_s0 + $0xf8] sm:$0x11]  ;;  %v2690_v4 = vld [vmem:[%s3853_s0 + $0x108] sm:$0x11]  ;;  %v769_v35 = vrot.slane %v4171_v58, 2  ;;  %v770_v9 = vrot.slane %v4172_v32, 2 }
  0x61   :  { %v772_v59 = vrot.slane %v4173_v46, 2  ;;  %v773_v14 = vrot.slane %v4174_v8, 2  ;;  %v775_v54 = vrot.slane %v4175_v55, 2  ;;  %v776_v7 = vrot.slane %v4176_v1, 2 }
  0x62   :  { %v704_v58 = vunpack.c.l.bf16 %v2676_v63  ;;  %v2717_v55 = vsel %vm302_vm0, %v766_v25, %v767_v0  ;;  %v2720_v52 = vsel %vm302_vm0, %v769_v35, %v770_v9  ;;  %v4177_v1 = vunpack.c.l.bf16 %v2527_v62 }
  0x63   :  { %v779_v53 = vrot.slane %v4178_v39, 2  ;;  %v2727_v32 = vsel %vm302_vm0, %v772_v59, %v773_v14  ;;  %v2730_v46 = vsel %vm302_vm0, %v775_v54, %v776_v7  ;;  %v781_v8 = vrot.slane %v4179_v20, 2 }
  0x64   :  { %v778_v45 = vrot.slane %v4177_v1, 2  ;;  %v4180_v0 = vunpack.c.h.bf16 %v2532_v50  ;;  %v4181_v35 = vunpack.c.l.bf16 %v2537_v51  ;;  %v4182_v1 = vunpack.c.l.bf16 %v2542_v23 }
  0x65   :  { %v4183_v39 = vunpack.c.h.bf16 %v2537_v51  ;;  %v4184_v14 = vunpack.c.h.bf16 %v2542_v23  ;;  %v4185_v7 = vunpack.c.l.bf16 %v2551_v27  ;;  %v4186_v62 = vunpack.c.l.bf16 %v2556_v3 }
  0x66   :  { %v782_v25 = vrot.slane %v4180_v0, 2  ;;  %v784_v9 = vrot.slane %v4181_v35, 2  ;;  %v785_v6 = vrot.slane %v4182_v1, 2  ;;  %v4187_v50 = vunpack.c.h.bf16 %v2551_v27 }
  0x67   :  { %v787_v34 = vrot.slane %v4183_v39, 2  ;;  %v788_v59 = vrot.slane %v4184_v14, 2  ;;  %v790_v54 = vrot.slane %v4185_v7, 2  ;;  %v791_v20 = vrot.slane %v4186_v62, 2 }
  0x68   :  { %v793_v0 = vrot.slane %v4187_v50, 2  ;;  %v4188_v35 = vunpack.c.h.bf16 %v2556_v3  ;;  %v4189_v1 = vunpack.c.l.bf16 %v2565_v43  ;;  %v4190_v51 = vunpack.c.l.bf16 %v2570_v49 }
  0x69   :  { %v4191_v23 = vunpack.c.h.bf16 %v2565_v43  ;;  %v4192_v7 = vunpack.c.h.bf16 %v2570_v49  ;;  %v4193_v62 = vunpack.c.l.bf16 %v2579_v33  ;;  %v4194_v27 = vunpack.c.l.bf16 %v2584_v28 }
  0x6a   :  { %v794_v36 = vrot.slane %v4188_v35, 2  ;;  %v796_v2 = vrot.slane %v4189_v1, 2  ;;  %v797_v39 = vrot.slane %v4190_v51, 2  ;;  %v4195_v3 = vunpack.c.h.bf16 %v2579_v33 }
  0x6b   :  { %v799_v14 = vrot.slane %v4191_v23, 2  ;;  %v800_v38 = vrot.slane %v4192_v7, 2  ;;  %v802_v17 = vrot.slane %v4193_v62, 2  ;;  %v803_v50 = vrot.slane %v4194_v27, 2 }
  0x6c   :  { %v805_v35 = vrot.slane %v4195_v3, 2  ;;  %v4196_v1 = vunpack.c.h.bf16 %v2584_v28  ;;  %v2769_v51 = vsel %vm302_vm0, %v778_v45, %v779_v53  ;;  %v2772_v43 = vsel %vm302_vm0, %v781_v8, %v782_v25 }
  0x6d   :  { %v4197_v49 = vunpack.c.l.bf16 %v2593_v29  ;;  %v4198_v7 = vunpack.c.l.bf16 %v2598_v57  ;;  %v2779_v27 = vsel %vm302_vm0, %v784_v9, %v785_v6  ;;  %v2782_v33 = vsel %vm302_vm0, %v787_v34, %v788_v59 }
  0x6e   :  { %v806_v42 = vrot.slane %v4196_v1, 2  ;;  %v4199_v28 = vunpack.c.h.bf16 %v2593_v29  ;;  %v4200_v45 = vunpack.c.h.bf16 %v2598_v57  ;;  %v2789_v8 = vsel %vm302_vm0, %v790_v54, %v791_v20 }
  0x6f   :  { %v808_v23 = vrot.slane %v4197_v49, 2  ;;  %v809_v62 = vrot.slane %v4198_v7, 2  ;;  %v2792_v25 = vsel %vm302_vm0, %v793_v0, %v794_v36  ;;  %v2795_v1 = vsel %vm302_vm0, %v796_v2, %v797_v39 }
  0x70   :  { %v811_v3 = vrot.slane %v4199_v28, 2  ;;  %v812_v53 = vrot.slane %v4200_v45, 2  ;;  %v2798_v6 = vsel %vm302_vm0, %v799_v14, %v800_v38  ;;  %v2801_v34 = vsel %vm302_vm0, %v802_v17, %v803_v50 }
  0x71   :  { %4201 = vst [vmem:[#allocation8_spill] sm:$0xff] %v2798_v6  ;;  %4202 = vst [vmem:[#allocation9_spill] sm:$0xff] %v2801_v34  ;;  %v2804_v29 = vsel %vm302_vm0, %v805_v35, %v806_v42  ;;  %v4204_v57 = vunpack.c.l.bf16 %v2607_v56  ;;  %v4205_v59 = vunpack.c.l.bf16 %v2612_v40  ;;  %v2811_v36 = vsel %vm302_vm0, %v808_v23, %v809_v62 }
  0x72   :  { %4203 = vst [vmem:[#allocation10_spill] sm:$0xff] %v2804_v29  ;;  %4206 = vst [vmem:[#allocation11_spill] sm:$0xff] %v2811_v36  ;;  %v4207_v2 = vunpack.c.h.bf16 %v2607_v56  ;;  %v4208_v38 = vunpack.c.h.bf16 %v2612_v40  ;;  %v4209_v17 = vunpack.c.l.bf16 %v2621_v18  ;;  %v2820_v42 = vsel %vm302_vm0, %v811_v3, %v812_v53 }
  0x73   :  { %v814_v9 = vrot.slane %v4204_v57, 2  ;;  %v815_v54 = vrot.slane %v4205_v59, 2  ;;  %4210 = vst [vmem:[#allocation12_spill] sm:$0xff] %v2820_v42  ;;  %v4211_v14 = vunpack.c.l.bf16 %v2626_v47  ;;  %v4212_v35 = vunpack.c.h.bf16 %v2621_v18 }
  0x74   :  { %v817_v20 = vrot.slane %v4207_v2, 2  ;;  %v818_v0 = vrot.slane %v4208_v38, 2  ;;  %v820_v39 = vrot.slane %v4209_v17, 2  ;;  %v4213_v23 = vunpack.c.h.bf16 %v2626_v47 }
  0x75   :  { %v821_v50 = vrot.slane %v4211_v14, 2  ;;  %v823_v49 = vrot.slane %v4212_v35, 2  ;;  %v4214_v56 = vunpack.c.l.bf16 %v2635_v13  ;;  %v4215_v40 = vunpack.c.l.bf16 %v2640_v19 }
  0x76   :  { %v824_v7 = vrot.slane %v4213_v23, 2  ;;  %v4216_v45 = vunpack.c.h.bf16 %v2635_v13  ;;  %v4217_v3 = vunpack.c.h.bf16 %v2640_v19  ;;  %v4218_v59 = vunpack.c.l.bf16 %v2649_v12 }
  0x77   :  { %v826_v62 = vrot.slane %v4214_v56, 2  ;;  %v827_v28 = vrot.slane %v4215_v40, 2  ;;  %v4219_v18 = vunpack.c.l.bf16 %v2654_v60  ;;  %v4220_v47 = vunpack.c.h.bf16 %v2649_v12 }
  0x78   :  { %v829_v57 = vrot.slane %v4216_v45, 2  ;;  %v830_v53 = vrot.slane %v4217_v3, 2  ;;  %v832_v2 = vrot.slane %v4218_v59, 2  ;;  %v4221_v14 = vunpack.c.h.bf16 %v2654_v60 }
  0x79   :  { %v833_v38 = vrot.slane %v4219_v18, 2  ;;  %v835_v17 = vrot.slane %v4220_v47, 2  ;;  %v4222_v23 = vunpack.c.l.bf16 %v2671_v30  ;;  %v839_v13 = vrot.slane %v704_v58, 2 }
  0x7a   :  { %v836_v35 = vrot.slane %v4221_v14, 2  ;;  %v4223_v40 = vunpack.c.h.bf16 %v2671_v30  ;;  %v4224_v45 = vunpack.c.h.bf16 %v2676_v63  ;;  %v2851_v59 = vsel %vm302_vm0, %v814_v9, %v815_v54 }
  0x7b   :  { %v838_v56 = vrot.slane %v4222_v23, 2  ;;  %4225 = vst [vmem:[#allocation15_spill] sm:$0xff] %v2851_v59  ;;  %v2854_v18 = vsel %vm302_vm0, %v817_v20, %v818_v0  ;;  %v4227_v12 = vunpack.c.l.bf16 %v2681_v22  ;;  %v4228_v47 = vunpack.c.l.bf16 %v2690_v4 }
  0x7c   :  { %v841_v19 = vrot.slane %v4223_v40, 2  ;;  %v842_v3 = vrot.slane %v4224_v45, 2  ;;  %4226 = vst [vmem:[#allocation16_spill] sm:$0xff] %v2854_v18  ;;  %v2861_v58 = vsel %vm302_vm0, %v820_v39, %v821_v50  ;;  %v2864_v30 = vsel %vm302_vm0, %v823_v49, %v824_v7  ;;  %v3016_v45 = vld [vmem:[%s3853_s0 + $0x110] sm:$0xff] }
  0x7d   :  { %v844_v60 = vrot.slane %v4227_v12, 2  ;;  %v845_v14 = vrot.slane %v4228_v47, 2  ;;  %4229 = vst [vmem:[#allocation17_spill] sm:$0xff] %v2861_v58  ;;  %4230 = vst [vmem:[#allocation18_spill] sm:$0xff] %v2864_v30  ;;  %v4231_v63 = vunpack.c.h.bf16 %v2681_v22  ;;  %v4232_v9 = vunpack.c.h.bf16 %v2690_v4 }
  0x7e   :  { %v2871_v20 = vsel %vm302_vm0, %v826_v62, %v827_v28  ;;  %v2874_v0 = vsel %vm302_vm0, %v829_v57, %v830_v53  ;;  %v2877_v40 = vsel %vm302_vm0, %v832_v2, %v833_v38  ;;  %v2880_v39 = vsel %vm302_vm0, %v835_v17, %v836_v35  ;;  %v2955_v2 = vld [vmem:[%s3853_s0 + $0x40] sm:$0xff]  ;;  %v2960_v57 = vld [vmem:[%s3853_s0 + $0x50] sm:$0xff] }
  0x7f   :  { %v847_v23 = vrot.slane %v4231_v63, 2  ;;  %v848_v54 = vrot.slane %v4232_v9, 2  ;;  %v2883_v50 = vsel %vm302_vm0, %v838_v56, %v839_v13  ;;  %v2886_v22 = vsel %vm302_vm0, %v841_v19, %v842_v3  ;;  %v2937_v3 = vld [vmem:[%s3853_s0 + $0x20] sm:$0xff]  ;;  %v4242_v56 = vld [vmem:[#allocation3_spill] sm:$0xff] }
  0x80   :  { %v2893_v7 = vsel %vm302_vm0, %v844_v60, %v845_v14  ;;  %v2942_v14 = vld [vmem:[%s3853_s0 + $0x30] sm:$0xff]  ;;  %v4241_v13 = vld [vmem:[#allocation2_spill] sm:$0xff]  ;;  %v901_v38 = vmax.f32 %v4242_v56, %v2880_v39  ;;  %v4246_v39 = vld [vmem:[#allocation7_spill] sm:$0xff]  ;;  %v925_v49 = vunpack.c.l.bf16 %v2955_v2  ;;  %v926_v4 = vunpack.c.h.bf16 %v2955_v2 }
  0x81   :  { %v2902_v53 = vsel %vm302_vm0, %v847_v23, %v848_v54  ;;  %v4239_v23 = vld [vmem:[#allocation38_spill] sm:$0xff]  ;;  %v4240_v54 = vld [vmem:[#allocation39_spill] sm:$0xff]  ;;  %v900_v17 = vmax.f32 %v4241_v13, %v2877_v40  ;;  %v928_v30 = vunpack.c.h.bf16 %v2960_v57  ;;  %v947_v29 = vunpack.c.l.bf16 %v3016_v45 }
  0x82   :  { %v898_v60 = vmax.f32 %v4239_v23, %v2871_v20  ;;  %v899_v35 = vmax.f32 %v4240_v54, %v2874_v0  ;;  %v4243_v20 = vld [vmem:[#allocation4_spill] sm:$0xff]  ;;  %v4244_v0 = vld [vmem:[#allocation5_spill] sm:$0xff]  ;;  %v4245_v40 = vld [vmem:[#allocation6_spill] sm:$0xff]  ;;  %v905_v56 = vmax.f32 %v4246_v39, %v2902_v53  ;;  %v922_v53 = vunpack.c.h.bf16 %v2937_v3 }
  0x83   :  { %v902_v23 = vmax.f32 %v4243_v20, %v2883_v50  ;;  %v903_v54 = vmax.f32 %v4244_v0, %v2886_v22  ;;  %v904_v13 = vmax.f32 %v4245_v40, %v2893_v7  ;;  %v2973_v28 = vld [vmem:[%s3853_s0 + $0x60] sm:$0xff]  ;;  %v2983_v50 = vld [vmem:[%s3853_s0 + $0xb0] sm:$0xff]  ;;  %v921_v7 = vunpack.c.l.bf16 %v2937_v3 }
  0x84   :  { %v2978_v62 = vld [vmem:[%s3853_s0 + $0x80] sm:$0xff]  ;;  %v923_v20 = vunpack.c.l.bf16 %v2942_v14  ;;  %v924_v0 = vunpack.c.h.bf16 %v2942_v14  ;;  %v2997_v40 = vld [vmem:[%s3853_s0 + $0xd0] sm:$0xff]  ;;  %v927_v3 = vunpack.c.l.bf16 %v2960_v57  ;;  %v929_v58 = vunpack.c.l.bf16 %v2973_v28 }
  0x85   :  { %v2988_v22 = vld [vmem:[%s3853_s0 + $0xc0] sm:$0xff]  ;;  %v3011_v14 = vld [vmem:[%s3853_s0 + $0xf0] sm:$0xff]  ;;  %v930_v19 = vunpack.c.h.bf16 %v2973_v28  ;;  %v933_v2 = vunpack.c.l.bf16 %v2978_v62  ;;  %v934_v18 = vunpack.c.h.bf16 %v2978_v62  ;;  %v935_v57 = vunpack.c.l.bf16 %v2983_v50 }
  0x86   :  { %v3002_v39 = vld [vmem:[%s3853_s0 + $0xe0] sm:$0xff]  ;;  %v936_v9 = vunpack.c.h.bf16 %v2983_v50  ;;  %v937_v59 = vunpack.c.l.bf16 %v2988_v22  ;;  %v938_v63 = vunpack.c.h.bf16 %v2988_v22  ;;  %v939_v42 = vunpack.c.l.bf16 %v2997_v40 }
  0x87   :  { %v940_v47 = vunpack.c.h.bf16 %v2997_v40  ;;  %v941_v36 = vunpack.c.l.bf16 %v3002_v39  ;;  %v942_v28 = vunpack.c.h.bf16 %v3002_v39  ;;  %v943_v12 = vunpack.c.l.bf16 %v3011_v14 }
  0x88   :  { %v944_v62 = vunpack.c.h.bf16 %v3011_v14  ;;  %v948_v50 = vunpack.c.h.bf16 %v3016_v45  ;;  %v4247_v24 = vmax.f32 %v2394_v37, %v2717_v55  ;;  %v4248_v40 = vmax.f32 %v2398_v48, %v2720_v52  ;;  %v4262_v45 = vld [vmem:[#allocation27_spill] sm:$0xff] }
  0x89   :  { %v4249_v39 = vmax.f32 %v2402_v26, %v2727_v32  ;;  %v4250_v14 = vmax.f32 %v2406_v44, %v2730_v46  ;;  %v4251_v37 = vmax.f32 %v2410_v41, %v2769_v51  ;;  %v4252_v48 = vmax.f32 %v2414_v16, %v2772_v43  ;;  %v4260_v43 = vld [vmem:[#allocation26_spill] sm:$0xff] }
  0x8a   :  { %v3037_v22 = vmax.f32 %v4247_v24, %v921_v7  ;;  %v3042_v34 = vmax.f32 %v4248_v40, %v922_v53  ;;  %v4253_v26 = vmax.f32 %v2418_v31, %v2779_v27  ;;  %v4254_v44 = vmax.f32 %v2422_v5, %v2782_v33  ;;  %v4263_v5 = vld [vmem:[#allocation8_spill] sm:$0xff] }
  0x8b   :  { %v3047_v21 = vmax.f32 %v4249_v39, %v923_v20  ;;  %v3052_v6 = vmax.f32 %v4250_v14, %v924_v0  ;;  %v3057_v24 = vmax.f32 %v4251_v37, %v925_v49  ;;  %v3062_v55 = vmax.f32 %v4252_v48, %v926_v4  ;;  %v4265_v39 = vld [vmem:[#allocation30_spill] sm:$0xff]  ;;  %v4266_v14 = vld [vmem:[#allocation9_spill] sm:$0xff]  ;;  %v4269_v37 = vld [vmem:[#allocation31_spill] sm:$0xff] }
  0x8c   :  { %v3067_v32 = vmax.f32 %v4253_v26, %v927_v3  ;;  %v3072_v46 = vmax.f32 %v4254_v44, %v928_v30  ;;  %v4256_v41 = vmax.f32 %v2426_v61, %v2789_v8  ;;  %v4258_v16 = vmax.f32 %v2430_v10, %v2792_v25  ;;  %v4270_v48 = vld [vmem:[#allocation10_spill] sm:$0xff]  ;;  %v4273_v26 = vld [vmem:[#allocation32_spill] sm:$0xff]  ;;  %v4274_v44 = vld [vmem:[#allocation11_spill] sm:$0xff] }
  0x8d   :  { %v4261_v31 = vmax.f32 %v2434_v11, %v2795_v1  ;;  %v4264_v33 = vmax.f32 %v2438_v15, %v4263_v5  ;;  %v4267_v61 = vmax.f32 %v4265_v39, %v4266_v14  ;;  %v4271_v10 = vmax.f32 %v4269_v37, %v4270_v48  ;;  %v4277_v1 = vld [vmem:[#allocation33_spill] sm:$0xff]  ;;  %v4281_v5 = vld [vmem:[#allocation34_spill] sm:$0xff] }
  0x8e   :  { %4255 = vst [vmem:[#allocation19_spill] sm:$0xff] %v3072_v46  ;;  %v3077_v52 = vmax.f32 %v4256_v41, %v929_v58  ;;  %v3082_v51 = vmax.f32 %v4258_v16, %v930_v19  ;;  %v4275_v41 = vmax.f32 %v4273_v26, %v4274_v44  ;;  %v4278_v16 = vld [vmem:[#allocation12_spill] sm:$0xff] }
  0x8f   :  { %v959_v27 = vmax.f32 %v4261_v31, %v4260_v43  ;;  %v960_v40 = vmax.f32 %v4264_v33, %v4262_v45  ;;  %v3095_v8 = vmax.f32 %v4267_v61, %v933_v2  ;;  %v3100_v25 = vmax.f32 %v4271_v10, %v934_v18  ;;  %v4282_v33 = vld [vmem:[#allocation15_spill] sm:$0xff]  ;;  %v4289_v10 = vld [vmem:[#allocation36_spill] sm:$0xff] }
  0x90   :  { %4257 = vst [vmem:[#allocation20_spill] sm:$0xff] %v3077_v52  ;;  %4259 = vst [vmem:[#allocation21_spill] sm:$0xff] %v3082_v51  ;;  %v3105_v11 = vmax.f32 %v4275_v41, %v935_v57  ;;  %v4279_v31 = vmax.f32 %v4277_v1, %v4278_v16  ;;  %v4283_v39 = vmax.f32 %v4281_v5, %v4282_v33  ;;  %v4285_v61 = vld [vmem:[#allocation35_spill] sm:$0xff]  ;;  %v4293_v41 = vld [vmem:[#allocation37_spill] sm:$0xff] }
  0x91   :  { %4268 = vst [vmem:[#allocation23_spill] sm:$0xff] %v3095_v8  ;;  %4272 = vst [vmem:[#allocation24_spill] sm:$0xff] %v3100_v25  ;;  %v4286_v8 = vld [vmem:[#allocation16_spill] sm:$0xff]  ;;  %v4290_v25 = vld [vmem:[#allocation17_spill] sm:$0xff]  ;;  %v3134_v5 = vmax.f32 %v899_v35, %v942_v28  ;;  %v3136_v33 = vmax.f32 %v900_v17, %v943_v12  ;;  %v3152_v35 = vrot.slane %v924_v0, 1  ;;  %v3154_v17 = vrot.slane %v925_v49, 1 }
  0x92   :  { %4276 = vst [vmem:[#allocation25_spill] sm:$0xff] %v3105_v11  ;;  %v3110_v15 = vmax.f32 %v4279_v31, %v936_v9  ;;  %v3115_v14 = vmax.f32 %v4283_v39, %v937_v59  ;;  %v4287_v37 = vmax.f32 %v4285_v61, %v4286_v8  ;;  %v4291_v26 = vmax.f32 %v4289_v10, %v4290_v25  ;;  %v4294_v11 = vld [vmem:[#allocation18_spill] sm:$0xff]  ;;  %v4301_v8 = vld [vmem:[#allocation28_spill] sm:$0xff] }
  0x93   :  { %v4295_v1 = vmax.f32 %v4293_v41, %v4294_v11  ;;  %v3132_v31 = vmax.f32 %v898_v60, %v941_v36  ;;  %4298 = vst [vmem:[#allocation3_spill] sm:$0xff] %v3134_v5  ;;  %4299 = vst [vmem:[#allocation4_spill] sm:$0xff] %v3136_v33  ;;  %v3138_v39 = vmax.f32 %v901_v38, %v944_v62  ;;  %v3148_v11 = vrot.slane %v922_v53, 1  ;;  %v3366_v33 = vld [vmem:[%s3853_s0 + $0xc8] sm:$0x11] }
  0x94   :  { %4280 = vst [vmem:[#allocation13_spill] sm:$0xff] %v3110_v15  ;;  %4284 = vst [vmem:[#allocation14_spill] sm:$0xff] %v3115_v14  ;;  %v3120_v48 = vmax.f32 %v4287_v37, %v938_v63  ;;  %v3125_v44 = vmax.f32 %v4291_v26, %v939_v42  ;;  %v973_v61 = vmax.f32 %v902_v23, %v4301_v8  ;;  %v4302_v37 = vld [vmem:[#allocation29_spill] sm:$0xff]  ;;  %v3146_v26 = vrot.slane %v921_v7, 1 }
  0x95   :  { %v3130_v16 = vmax.f32 %v4295_v1, %v940_v47  ;;  %4297 = vst [vmem:[#allocation2_spill] sm:$0xff] %v3132_v31  ;;  %4300 = vst [vmem:[#allocation5_spill] sm:$0xff] %v3138_v39  ;;  %v3142_v25 = vmax.f32 %v904_v13, %v947_v29  ;;  %v3144_v10 = vmax.f32 %v905_v56, %v948_v50  ;;  %v3150_v60 = vrot.slane %v923_v20, 1  ;;  %v3352_v39 = vld [vmem:[%s3853_s0 + $0xb8] sm:$0x11] }
  0x96   :  { %4288 = vst [vmem:[#allocation22_spill] sm:$0xff] %v3120_v48  ;;  %4292 = vst [vmem:[#allocation38_spill] sm:$0xff] %v3125_v44  ;;  %v974_v48 = vmax.f32 %v903_v54, %v4302_v37  ;;  %v3156_v38 = vrot.slane %v926_v4, 1  ;;  %v3158_v41 = vrot.slane %v927_v3, 1  ;;  %v3160_v23 = vrot.slane %v928_v30, 1 }
  0x97   :  { %4296 = vst [vmem:[#allocation39_spill] sm:$0xff] %v3130_v16  ;;  %4303 = vst [vmem:[#allocation6_spill] sm:$0xff] %v3142_v25  ;;  %v3162_v54 = vrot.slane %v929_v58, 1  ;;  %v3164_v13 = vrot.slane %v930_v19, 1  ;;  %v3166_v56 = vrot.slane %v933_v2, 1  ;;  %v3168_v7 = vrot.slane %v934_v18, 1 }
  0x98   :  { %4304 = vst [vmem:[#allocation7_spill] sm:$0xff] %v3144_v10  ;;  %4305 = vst [vmem:[#allocation26_spill] sm:$0xff] %v3158_v41  ;;  %v3170_v53 = vrot.slane %v935_v57, 1  ;;  %v3172_v20 = vrot.slane %v936_v9, 1  ;;  %v3174_v49 = vrot.slane %v937_v59, 1  ;;  %v3176_v4 = vrot.slane %v938_v63, 1 }
  0x99   :  { %4306 = vst [vmem:[#allocation27_spill] sm:$0xff] %v3160_v23  ;;  %4307 = vst [vmem:[#allocation8_spill] sm:$0xff] %v3162_v54  ;;  %v3178_v0 = vrot.slane %v939_v42, 1  ;;  %v3180_v30 = vrot.slane %v940_v47, 1  ;;  %v3182_v58 = vrot.slane %v941_v36, 1  ;;  %v3184_v19 = vrot.slane %v942_v28, 1 }
  0x9a   :  { %4308 = vst [vmem:[#allocation30_spill] sm:$0xff] %v3164_v13  ;;  %4309 = vst [vmem:[#allocation9_spill] sm:$0xff] %v3166_v56  ;;  %v3186_v3 = vrot.slane %v943_v12, 1  ;;  %v3188_v18 = vrot.slane %v944_v62, 1  ;;  %v3190_v2 = vrot.slane %v947_v29, 1  ;;  %v3192_v9 = vrot.slane %v948_v50, 1 }
  0x9b   :  { %4310 = vst [vmem:[#allocation31_spill] sm:$0xff] %v3168_v7  ;;  %4311 = vst [vmem:[#allocation10_spill] sm:$0xff] %v3170_v53  ;;  %v4323_v50 = vrot.slane %v4260_v43, 1  ;;  %v4325_v12 = vrot.slane %v4262_v45, 1  ;;  %v3246_v62 = vld [vmem:[%s3853_s0 + $0x28] sm:$0x11] }
  0x9c   :  { %4312 = vst [vmem:[#allocation32_spill] sm:$0xff] %v3172_v20  ;;  %4313 = vst [vmem:[#allocation11_spill] sm:$0xff] %v3174_v49  ;;  %v3259_v28 = vld [vmem:[%s3853_s0 + $0x30] sm:$0xee]  ;;  %v3264_v57 = vld [vmem:[%s3853_s0 + $0x38] sm:$0x11]  ;;  %v4336_v20 = vunpack.c.l.bf16 %v3246_v62 }
  0x9d   :  { %4314 = vst [vmem:[#allocation33_spill] sm:$0xff] %v3176_v4  ;;  %4315 = vst [vmem:[#allocation12_spill] sm:$0xff] %v3178_v0  ;;  %v3216_v1 = vmax.f32 %v959_v27, %v4323_v50  ;;  %v3220_v47 = vmax.f32 %v960_v40, %v4325_v12  ;;  %v3241_v50 = vld [vmem:[%s3853_s0 + $0x20] sm:$0xee]  ;;  %v4331_v43 = vrot.slane %v4301_v8, 1  ;;  %v4333_v45 = vrot.slane %v4302_v37, 1 }
  0x9e   :  { %4316 = vst [vmem:[#allocation34_spill] sm:$0xff] %v3180_v30  ;;  %4317 = vst [vmem:[#allocation15_spill] sm:$0xff] %v3182_v58  ;;  %v3286_v8 = vld [vmem:[%s3853_s0 + $0x48] sm:$0x11]  ;;  %v3305_v12 = vld [vmem:[%s3853_s0 + $0x60] sm:$0xee]  ;;  %v4337_v53 = vunpack.c.h.bf16 %v3241_v50  ;;  %v4338_v0 = vunpack.c.h.bf16 %v3246_v62  ;;  %v4339_v30 = vunpack.c.l.bf16 %v3259_v28  ;;  %v4340_v7 = vunpack.c.l.bf16 %v3264_v57 }
  0x9f   :  { %4318 = vst [vmem:[#allocation35_spill] sm:$0xff] %v3184_v19  ;;  %4319 = vst [vmem:[#allocation16_spill] sm:$0xff] %v3186_v3  ;;  %v3268_v63 = vmax.f32 %v973_v61, %v4331_v43  ;;  %v3272_v40 = vmax.f32 %v974_v48, %v4333_v45  ;;  %v3291_v48 = vld [vmem:[%s3853_s0 + $0x50] sm:$0xee]  ;;  %v3296_v61 = vld [vmem:[%s3853_s0 + $0x58] sm:$0x11]  ;;  %v4335_v3 = vunpack.c.l.bf16 %v3241_v50  ;;  %v4341_v56 = vunpack.c.h.bf16 %v3259_v28 }
  0xa0   :  { %4320 = vst [vmem:[#allocation36_spill] sm:$0xff] %v3188_v18  ;;  %4321 = vst [vmem:[#allocation17_spill] sm:$0xff] %v3190_v2  ;;  %v3281_v18 = vld [vmem:[%s3853_s0 + $0x40] sm:$0xee]  ;;  %v3319_v59 = vld [vmem:[%s3853_s0 + $0x70] sm:$0xee] }
  0xa1   :  { %4322 = vst [vmem:[#allocation37_spill] sm:$0xff] %v3192_v9  ;;  %4324 = vst [vmem:[#allocation18_spill] sm:$0xff] %v3216_v1  ;;  %v3310_v9 = vld [vmem:[%s3853_s0 + $0x68] sm:$0x11]  ;;  %v3324_v2 = vld [vmem:[%s3853_s0 + $0x78] sm:$0x11]  ;;  %v4345_v28 = vunpack.c.h.bf16 %v3281_v18 }
  0xa2   :  { %4326 = vst [vmem:[#allocation28_spill] sm:$0xff] %v3220_v47  ;;  %4332 = vst [vmem:[#allocation29_spill] sm:$0xff] %v3268_v63  ;;  %v3333_v45 = vld [vmem:[%s3853_s0 + $0x80] sm:$0xee]  ;;  %v3347_v43 = vld [vmem:[%s3853_s0 + $0xb0] sm:$0xee] }
  0xa3   :  { %4334 = vst [vmem:[#allocation40_spill] sm:$0xff] %v3272_v40  ;;  %v3338_v40 = vld [vmem:[%s3853_s0 + $0x88] sm:$0x11]  ;;  %v3361_v37 = vld [vmem:[%s3853_s0 + $0xc0] sm:$0xee]  ;;  %v1229_v58 = vrot.slane %v4335_v3, 2  ;;  %v4342_v3 = vunpack.c.h.bf16 %v3264_v57 }
  0xa4   :  { %v3375_v10 = vld [vmem:[%s3853_s0 + $0xd0] sm:$0xee]  ;;  %v3380_v5 = vld [vmem:[%s3853_s0 + $0xd8] sm:$0x11]  ;;  %v3389_v25 = vld [vmem:[%s3853_s0 + $0xe0] sm:$0xee] }
  0xa5   :  { %v3394_v31 = vld [vmem:[%s3853_s0 + $0xe8] sm:$0x11]  ;;  %v3403_v63 = vld [vmem:[%s3853_s0 + $0xf0] sm:$0xee]  ;;  %v3408_v16 = vld [vmem:[%s3853_s0 + $0xf8] sm:$0x11] }
  0xa6   :  { %v3425_v19 = vld [vmem:[%s3853_s0 + $0x100] sm:$0xee]  ;;  %v3430_v44 = vld [vmem:[%s3853_s0 + $0x108] sm:$0x11]  ;;  %v3435_v49 = vld [vmem:[%s3853_s0 + $0x110] sm:$0xee] }
  0xa7   :  { %v3444_v4 = vld [vmem:[%s3853_s0 + $0x118] sm:$0x11]  ;;  %v1230_v15 = vrot.slane %v4336_v20, 2  ;;  %v1232_v14 = vrot.slane %v4337_v53, 2  ;;  %v1233_v42 = vrot.slane %v4338_v0, 2  ;;  %v1235_v27 = vrot.slane %v4339_v30, 2 }
  0xa8   :  { %v1236_v36 = vrot.slane %v4340_v7, 2  ;;  %v1238_v29 = vrot.slane %v4341_v56, 2  ;;  %v1239_v47 = vrot.slane %v4342_v3, 2  ;;  %v1167_v53 = vunpack.c.l.bf16 %v3430_v44 }
  0xa9   :  { %v3471_v56 = vsel %vm302_vm0, %v1229_v58, %v1230_v15  ;;  %v3474_v57 = vsel %vm302_vm0, %v1232_v14, %v1233_v42  ;;  %v4343_v3 = vunpack.c.l.bf16 %v3281_v18  ;;  %v4344_v20 = vunpack.c.l.bf16 %v3286_v8 }
  0xaa   :  { %v3481_v62 = vsel %vm302_vm0, %v1235_v27, %v1236_v36  ;;  %v3484_v30 = vsel %vm302_vm0, %v1238_v29, %v1239_v47  ;;  %v1244_v7 = vrot.slane %v4345_v28, 2  ;;  %v4346_v15 = vunpack.c.h.bf16 %v3286_v8 }
  0xab   :  { %v1241_v50 = vrot.slane %v4343_v3, 2  ;;  %v1242_v0 = vrot.slane %v4344_v20, 2  ;;  %v4347_v14 = vunpack.c.l.bf16 %v3291_v48  ;;  %v4348_v3 = vunpack.c.l.bf16 %v3296_v61 }
  0xac   :  { %v1245_v58 = vrot.slane %v4346_v15, 2  ;;  %v4349_v20 = vunpack.c.h.bf16 %v3291_v48  ;;  %v4350_v36 = vunpack.c.h.bf16 %v3296_v61  ;;  %v4351_v47 = vunpack.c.l.bf16 %v3305_v12 }
  0xad   :  { %v1247_v42 = vrot.slane %v4347_v14, 2  ;;  %v1248_v1 = vrot.slane %v4348_v3, 2  ;;  %v4352_v18 = vunpack.c.l.bf16 %v3310_v9  ;;  %v4353_v8 = vunpack.c.h.bf16 %v3305_v12 }
  0xae   :  { %v1250_v13 = vrot.slane %v4349_v20, 2  ;;  %v1251_v27 = vrot.slane %v4350_v36, 2  ;;  %v1253_v29 = vrot.slane %v4351_v47, 2  ;;  %v4354_v14 = vunpack.c.h.bf16 %v3310_v9 }
  0xaf   :  { %v1254_v28 = vrot.slane %v4352_v18, 2  ;;  %v1256_v15 = vrot.slane %v4353_v8, 2  ;;  %v4355_v3 = vunpack.c.l.bf16 %v3319_v59  ;;  %v4356_v48 = vunpack.c.l.bf16 %v3324_v2 }
  0xb0   :  { %v1257_v51 = vrot.slane %v4354_v14, 2  ;;  %v4357_v61 = vunpack.c.h.bf16 %v3319_v59  ;;  %v4358_v47 = vunpack.c.h.bf16 %v3324_v2  ;;  %v4359_v18 = vunpack.c.l.bf16 %v3333_v45 }
  0xb1   :  { %v1259_v54 = vrot.slane %v4355_v3, 2  ;;  %v1260_v20 = vrot.slane %v4356_v48, 2  ;;  %v4360_v12 = vunpack.c.l.bf16 %v3338_v40  ;;  %v4361_v9 = vunpack.c.h.bf16 %v3333_v45 }
  0xb2   :  { %v1262_v36 = vrot.slane %v4357_v61, 2  ;;  %v1263_v52 = vrot.slane %v4358_v47, 2  ;;  %v1265_v23 = vrot.slane %v4359_v18, 2  ;;  %v4362_v3 = vunpack.c.h.bf16 %v3338_v40 }
  0xb3   :  { %v1266_v8 = vrot.slane %v4360_v12, 2  ;;  %v1268_v14 = vrot.slane %v4361_v9, 2  ;;  %v1243_v48 = vsel %vm302_vm0, %v1241_v50, %v1242_v0  ;;  %v1246_v59 = vsel %vm302_vm0, %v1244_v7, %v1245_v58 }
  0xb4   :  { %v1269_v46 = vrot.slane %v4362_v3, 2  ;;  %v4363_v61 = vunpack.c.l.bf16 %v3347_v43  ;;  %v4364_v47 = vunpack.c.l.bf16 %v3352_v39  ;;  %v1249_v18 = vsel %vm302_vm0, %v1247_v42, %v1248_v1 }
  0xb5   :  { %v1252_v12 = vsel %vm302_vm0, %v1250_v13, %v1251_v27  ;;  %v4365_v45 = vunpack.c.h.bf16 %v3347_v43  ;;  %v4366_v40 = vunpack.c.h.bf16 %v3352_v39  ;;  %v1255_v50 = vsel %vm302_vm0, %v1253_v29, %v1254_v28 }
  0xb6   :  { %v1271_v2 = vrot.slane %v4363_v61, 2  ;;  %v1272_v41 = vrot.slane %v4364_v47, 2  ;;  %v1258_v0 = vsel %vm302_vm0, %v1256_v15, %v1257_v51  ;;  %v3537_v7 = vsel %vm302_vm0, %v1259_v54, %v1260_v20 }
  0xb7   :  { %v1274_v9 = vrot.slane %v4365_v45, 2  ;;  %v1275_v3 = vrot.slane %v4366_v40, 2  ;;  %v3540_v58 = vsel %vm302_vm0, %v1262_v36, %v1263_v52  ;;  %v1267_v1 = vsel %vm302_vm0, %v1265_v23, %v1266_v8 }
  0xb8   :  { %v1270_v13 = vsel %vm302_vm0, %v1268_v14, %v1269_v46  ;;  %v4367_v43 = vunpack.c.l.bf16 %v3361_v37  ;;  %v4368_v39 = vunpack.c.l.bf16 %v3366_v33  ;;  %v1273_v29 = vsel %vm302_vm0, %v1271_v2, %v1272_v41 }
  0xb9   :  { %v4369_v51 = vunpack.c.h.bf16 %v3361_v37  ;;  %v4370_v54 = vunpack.c.h.bf16 %v3366_v33  ;;  %v4371_v52 = vunpack.c.l.bf16 %v3375_v10  ;;  %v1276_v23 = vsel %vm302_vm0, %v1274_v9, %v1275_v3 }
  0xba   :  { %v1277_v42 = vrot.slane %v4367_v43, 2  ;;  %v1278_v27 = vrot.slane %v4368_v39, 2  ;;  %v4372_v46 = vunpack.c.l.bf16 %v3380_v5  ;;  %v4373_v8 = vunpack.c.h.bf16 %v3375_v10 }
  0xbb   :  { %v1280_v28 = vrot.slane %v4369_v51, 2  ;;  %v1281_v15 = vrot.slane %v4370_v54, 2  ;;  %v1283_v20 = vrot.slane %v4371_v52, 2  ;;  %v4374_v61 = vunpack.c.h.bf16 %v3380_v5 }
  0xbc   :  { %v1284_v36 = vrot.slane %v4372_v46, 2  ;;  %v1286_v14 = vrot.slane %v4373_v8, 2  ;;  %v4375_v37 = vunpack.c.l.bf16 %v3389_v25  ;;  %v4376_v33 = vunpack.c.l.bf16 %v3394_v31 }
  0xbd   :  { %v1287_v41 = vrot.slane %v4374_v61, 2  ;;  %v4377_v45 = vunpack.c.h.bf16 %v3389_v25  ;;  %v4378_v9 = vunpack.c.h.bf16 %v3394_v31  ;;  %v4379_v43 = vunpack.c.l.bf16 %v3403_v63 }
  0xbe   :  { %v1289_v2 = vrot.slane %v4375_v37, 2  ;;  %v1290_v47 = vrot.slane %v4376_v33, 2  ;;  %v4380_v10 = vunpack.c.l.bf16 %v3408_v16  ;;  %v4381_v5 = vunpack.c.h.bf16 %v3403_v63 }
  0xbf   :  { %v1292_v40 = vrot.slane %v4377_v45, 2  ;;  %v1293_v3 = vrot.slane %v4378_v9, 2  ;;  %v1295_v39 = vrot.slane %v4379_v43, 2  ;;  %v4382_v52 = vunpack.c.h.bf16 %v3408_v16 }
  0xc0   :  { %v1296_v51 = vrot.slane %v4380_v10, 2  ;;  %v1298_v54 = vrot.slane %v4381_v5, 2  ;;  %v4383_v8 = vunpack.c.l.bf16 %v3425_v19  ;;  %v1302_v25 = vrot.slane %v1167_v53, 2 }
  0xc1   :  { %v1299_v46 = vrot.slane %v4382_v52, 2  ;;  %v4384_v37 = vunpack.c.h.bf16 %v3425_v19  ;;  %v4385_v33 = vunpack.c.h.bf16 %v3430_v44  ;;  %v1279_v9 = vsel %vm302_vm0, %v1277_v42, %v1278_v27 }
  0xc2   :  { %v1301_v61 = vrot.slane %v4383_v8, 2  ;;  %v1282_v43 = vsel %vm302_vm0, %v1280_v28, %v1281_v15  ;;  %v4386_v63 = vunpack.c.l.bf16 %v3435_v49  ;;  %v4387_v16 = vunpack.c.l.bf16 %v3444_v4 }
  0xc3   :  { %v1304_v31 = vrot.slane %v4384_v37, 2  ;;  %v1305_v45 = vrot.slane %v4385_v33, 2  ;;  %v1285_v52 = vsel %vm302_vm0, %v1283_v20, %v1284_v36  ;;  %v1288_v53 = vsel %vm302_vm0, %v1286_v14, %v1287_v41 }
  0xc4   :  { %v1307_v10 = vrot.slane %v4386_v63, 2  ;;  %v1308_v5 = vrot.slane %v4387_v16, 2  ;;  %v4388_v19 = vunpack.c.h.bf16 %v3435_v49  ;;  %v4389_v44 = vunpack.c.h.bf16 %v3444_v4  ;;  %v4413_v63 = vld [vmem:[#allocation31_spill] sm:$0xff]  ;;  %v4415_v16 = vld [vmem:[#allocation25_spill] sm:$0xff] }
  0xc5   :  { %v1291_v42 = vsel %vm302_vm0, %v1289_v2, %v1290_v47  ;;  %v1294_v27 = vsel %vm302_vm0, %v1292_v40, %v1293_v3  ;;  %v1297_v28 = vsel %vm302_vm0, %v1295_v39, %v1296_v51  ;;  %v1300_v15 = vsel %vm302_vm0, %v1298_v54, %v1299_v46  ;;  %v4398_v3 = vld [vmem:[#allocation19_spill] sm:$0xff]  ;;  %v4402_v51 = vld [vmem:[#allocation8_spill] sm:$0xff] }
  0xc6   :  { %v1310_v8 = vrot.slane %v4388_v19, 2  ;;  %v1311_v37 = vrot.slane %v4389_v44, 2  ;;  %v1303_v33 = vsel %vm302_vm0, %v1301_v61, %v1302_v25  ;;  %v1306_v20 = vsel %vm302_vm0, %v1304_v31, %v1305_v45  ;;  %v4399_v39 = vld [vmem:[#allocation27_spill] sm:$0xff]  ;;  %v4410_v25 = vld [vmem:[#allocation9_spill] sm:$0xff]  ;;  %v4412_v45 = vld [vmem:[#allocation24_spill] sm:$0xff] }
  0xc7   :  { %v4390_v49 = vmax.f32 %v3037_v22, %v3146_v26  ;;  %v4391_v4 = vmax.f32 %v3042_v34, %v3148_v11  ;;  %v1309_v41 = vsel %vm302_vm0, %v1307_v10, %v1308_v5  ;;  %v4392_v2 = vmax.f32 %v3047_v21, %v3150_v60  ;;  %v4396_v21 = vld [vmem:[#allocation26_spill] sm:$0xff] }
  0xc8   :  { %v4393_v22 = vmax.f32 %v3052_v6, %v3152_v35  ;;  %v1312_v11 = vsel %vm302_vm0, %v1310_v8, %v1311_v37  ;;  %v4397_v60 = vmax.f32 %v3067_v32, %v4396_v21  ;;  %v4400_v6 = vmax.f32 %v4398_v3, %v4399_v39  ;;  %v4408_v32 = vld [vmem:[#allocation28_spill] sm:$0xff]  ;;  %v4416_v5 = vld [vmem:[#allocation10_spill] sm:$0xff]  ;;  %v4418_v8 = vld [vmem:[#allocation13_spill] sm:$0xff] }
  0xc9   :  { %v3606_v36 = vmax.f32 %v4390_v49, %v3471_v56  ;;  %v3612_v14 = vmax.f32 %v4391_v4, %v3474_v57  ;;  %v3619_v47 = vmax.f32 %v4392_v2, %v3481_v62  ;;  %v4394_v56 = vmax.f32 %v3057_v24, %v3154_v17  ;;  %v4404_v17 = vld [vmem:[#allocation21_spill] sm:$0xff]  ;;  %v4422_v49 = vld [vmem:[#allocation11_spill] sm:$0xff]  ;;  %v4428_v21 = vld [vmem:[#allocation12_spill] sm:$0xff] }
  0xca   :  { %v3625_v26 = vmax.f32 %v4393_v22, %v3484_v30  ;;  %v4395_v57 = vmax.f32 %v3062_v55, %v3156_v38  ;;  %v1347_v62 = vmax.f32 %v4397_v60, %v1249_v18  ;;  %v1348_v35 = vmax.f32 %v4400_v6, %v1252_v12  ;;  %v4401_v30 = vld [vmem:[#allocation20_spill] sm:$0xff]  ;;  %v4407_v55 = vld [vmem:[#allocation18_spill] sm:$0xff]  ;;  %v4409_v18 = vld [vmem:[#allocation23_spill] sm:$0xff] }
  0xcb   :  { %v3630_v34 = vmax.f32 %v4394_v56, %v1243_v48  ;;  %v4403_v54 = vmax.f32 %v4401_v30, %v4402_v51  ;;  %v4405_v48 = vld [vmem:[#allocation30_spill] sm:$0xff]  ;;  %v1351_v38 = vmax.f32 %v4407_v55, %v3537_v7  ;;  %v4411_v31 = vmax.f32 %v4409_v18, %v4410_v25  ;;  %v4419_v7 = vld [vmem:[#allocation32_spill] sm:$0xff]  ;;  %v4425_v22 = vld [vmem:[#allocation33_spill] sm:$0xff] }
  0xcc   :  { %v1346_v40 = vmax.f32 %v4395_v57, %v1246_v59  ;;  %v4406_v46 = vmax.f32 %v4404_v17, %v4405_v48  ;;  %v1352_v59 = vmax.f32 %v4408_v32, %v3540_v58  ;;  %v4420_v44 = vmax.f32 %v4418_v8, %v4419_v7  ;;  %v4421_v58 = vld [vmem:[#allocation14_spill] sm:$0xff]  ;;  %v4434_v51 = vld [vmem:[#allocation15_spill] sm:$0xff]  ;;  %v4439_v55 = vld [vmem:[#allocation4_spill] sm:$0xff] }
  0xcd   :  { %v3645_v24 = vmax.f32 %v4403_v54, %v1255_v50  ;;  %v3659_v12 = vmax.f32 %v4411_v31, %v1267_v1  ;;  %v4414_v50 = vmax.f32 %v4412_v45, %v4413_v63  ;;  %v4423_v4 = vmax.f32 %v4421_v58, %v4422_v49  ;;  %v4424_v1 = vld [vmem:[#allocation22_spill] sm:$0xff]  ;;  %v4436_v17 = vld [vmem:[#allocation3_spill] sm:$0xff]  ;;  %v4440_v32 = vld [vmem:[#allocation16_spill] sm:$0xff] }
  0xce   :  { %v3650_v61 = vmax.f32 %v4406_v46, %v1258_v0  ;;  %v4417_v0 = vmax.f32 %v4415_v16, %v4416_v5  ;;  %v1356_v37 = vmax.f32 %v4420_v44, %v1276_v23  ;;  %v4426_v56 = vmax.f32 %v4424_v1, %v4425_v22  ;;  %v4431_v39 = vld [vmem:[#allocation34_spill] sm:$0xff]  ;;  %v4437_v48 = vld [vmem:[#allocation35_spill] sm:$0xff]  ;;  %v4443_v31 = vld [vmem:[#allocation36_spill] sm:$0xff] }
  0xcf   :  { %v3664_v10 = vmax.f32 %v4414_v50, %v1270_v13  ;;  %v3677_v2 = vmax.f32 %v4423_v4, %v1279_v9  ;;  %v4427_v13 = vld [vmem:[#allocation38_spill] sm:$0xff]  ;;  %v4438_v46 = vmax.f32 %v4436_v17, %v4437_v48  ;;  %v4441_v18 = vmax.f32 %v4439_v55, %v4440_v32  ;;  %v4445_v50 = vld [vmem:[#allocation29_spill] sm:$0xff]  ;;  %v4446_v16 = vld [vmem:[#allocation40_spill] sm:$0xff] }
  0xd0   :  { %v3669_v19 = vmax.f32 %v4417_v0, %v1273_v29  ;;  %v3682_v57 = vmax.f32 %v4426_v56, %v1282_v43  ;;  %v4429_v60 = vmax.f32 %v4427_v13, %v4428_v21  ;;  %v4430_v29 = vld [vmem:[#allocation39_spill] sm:$0xff]  ;;  %v4433_v23 = vld [vmem:[#allocation2_spill] sm:$0xff]  ;;  %v1366_v5 = vmax.f32 %v4446_v16, %v1306_v20  ;;  %v4448_v8 = vld [vmem:[#allocation17_spill] sm:$0xff] }
  0xd1   :  { %v4432_v6 = vmax.f32 %v4430_v29, %v4431_v39  ;;  %v4435_v54 = vmax.f32 %v4433_v23, %v4434_v51  ;;  %v1362_v43 = vmax.f32 %v4438_v46, %v1294_v27  ;;  %v1363_v25 = vmax.f32 %v4441_v18, %v1297_v28  ;;  %v4447_v0 = vld [vmem:[#allocation6_spill] sm:$0xff]  ;;  %v4450_v44 = vld [vmem:[#allocation7_spill] sm:$0xff]  ;;  %v4451_v58 = vld [vmem:[#allocation37_spill] sm:$0xff] }
  0xd2   :  { %v3687_v3 = vmax.f32 %v4429_v60, %v1285_v52  ;;  %v4442_v52 = vld [vmem:[#allocation5_spill] sm:$0xff]  ;;  %v4452_v27 = vmax.f32 %v4450_v44, %v4451_v58  ;;  %v1632_v28 = vpack.c.bf16 %v3612_v14, %v3606_v36  ;;  %v1635_v4 = vpack.c.bf16 %v1348_v35, %v1347_v62  ;;  %v1488_v20 = vld [vmem:[%s3854_s1] sm:$0xff]  ;;  %v1506_v35 = vld [vmem:[%s3854_s1 + $0x30] sm:$0xff] }
  0xd3   :  { %v3692_v30 = vmax.f32 %v4432_v6, %v1288_v53  ;;  %v3697_v9 = vmax.f32 %v4435_v54, %v1291_v42  ;;  %v4444_v45 = vmax.f32 %v4442_v52, %v4443_v31  ;;  %v1365_v53 = vmax.f32 %v4445_v50, %v1303_v33  ;;  %v1518_v22 = vld [vmem:[%s3854_s1 + $0x50] sm:$0xff]  ;;  %v1521_v56 = vld [vmem:[%s3854_s1 + $0x58] sm:$0xff]  ;;  %v1527_v29 = vld [vmem:[%s3854_s1 + $0x68] sm:$0xff] }
  0xd4   :  { %v4449_v42 = vmax.f32 %v4447_v0, %v4448_v8  ;;  %v3718_v49 = vmax.f32 %v4452_v27, %v1312_v11  ;;  %v1634_v33 = vpack.c.bf16 %v1346_v40, %v3630_v34  ;;  %v1494_v11 = vld [vmem:[%s3854_s1 + $0x10] sm:$0xff]  ;;  %v1636_v36 = vpack.c.bf16 %v3650_v61, %v3645_v24  ;;  %v1503_v34 = vld [vmem:[%s3854_s1 + $0x28] sm:$0xff]  ;;  %v1509_v24 = vld [vmem:[%s3854_s1 + $0x38] sm:$0xff] }
  0xd5   :  { %v1364_v63 = vmax.f32 %v4444_v45, %v1300_v15  ;;  %v1633_v15 = vpack.c.bf16 %v3625_v26, %v3619_v47  ;;  %v1637_v14 = vpack.c.bf16 %v1352_v59, %v1351_v38  ;;  %v1497_v47 = vld [vmem:[%s3854_s1 + $0x18] sm:$0xff]  ;;  %v1500_v26 = vld [vmem:[%s3854_s1 + $0x20] sm:$0xff]  ;;  %v1638_v40 = vpack.c.bf16 %v3664_v10, %v3659_v12 }
  0xd6   :  { %v3713_v7 = vmax.f32 %v4449_v42, %v1309_v41  ;;  %v1491_v41 = vld [vmem:[%s3854_s1 + $0x8] sm:$0xff]  ;;  %v1639_v62 = vpack.c.bf16 %v1356_v37, %v3669_v19  ;;  %v1640_v61 = vpack.c.bf16 %v3682_v57, %v3677_v2  ;;  %v1641_v38 = vpack.c.bf16 %v3692_v30, %v3687_v3  ;;  %v1512_v10 = vld [vmem:[%s3854_s1 + $0x40] sm:$0xff] }
  0xd7   :  { %v1642_v59 = vpack.c.bf16 %v1362_v43, %v3697_v9  ;;  %v1643_v12 = vpack.c.bf16 %v1364_v63, %v1363_v25  ;;  %v1515_v19 = vld [vmem:[%s3854_s1 + $0x48] sm:$0xff]  ;;  %v1644_v37 = vpack.c.bf16 %v1366_v5, %v1365_v53  ;;  %v1489_v57 = vsel %vm3767_vm7, %v1632_v28, %v1488_v20  ;;  %v1524_v3 = vld [vmem:[%s3854_s1 + $0x60] sm:$0xff] }
  0xd8   :  { %v1645_v1 = vpack.c.bf16 %v3718_v49, %v3713_v7  ;;  %v1492_v13 = vsel %vm3767_vm7, %v1633_v15, %v1491_v41  ;;  %v1495_v21 = vsel %vm3767_vm7, %v1634_v33, %v1494_v11  ;;  %v1498_v60 = vsel %vm3767_vm7, %v1635_v4, %v1497_v47  ;;  %1490 = vst [vmem:[%s3854_s1] sm:$0xff] %v1489_v57 }
  0xd9   :  { %1493 = vst [vmem:[%s3854_s1 + $0x8] sm:$0xff] %v1492_v13  ;;  %1496 = vst [vmem:[%s3854_s1 + $0x10] sm:$0xff] %v1495_v21  ;;  %v1501_v39 = vsel %vm3767_vm7, %v1636_v36, %v1500_v26  ;;  %v1504_v6 = vsel %vm3767_vm7, %v1637_v14, %v1503_v34  ;;  %v1507_v30 = vsel %vm3767_vm7, %v1638_v40, %v1506_v35 }
  0xda   :  { %1499 = vst [vmem:[%s3854_s1 + $0x18] sm:$0xff] %v1498_v60  ;;  %v1510_v23 = vsel %vm3767_vm7, %v1639_v62, %v1509_v24  ;;  %1502 = vst [vmem:[%s3854_s1 + $0x20] sm:$0xff] %v1501_v39  ;;  %v1513_v51 = vsel %vm3767_vm7, %v1640_v61, %v1512_v10  ;;  %v1516_v54 = vsel %vm3767_vm7, %v1641_v38, %v1515_v19 }
  0xdb   :  { %1505 = vst [vmem:[%s3854_s1 + $0x28] sm:$0xff] %v1504_v6  ;;  %1508 = vst [vmem:[%s3854_s1 + $0x30] sm:$0xff] %v1507_v30  ;;  %v1519_v9 = vsel %vm3767_vm7, %v1642_v59, %v1518_v22  ;;  %v1522_v17 = vsel %vm3767_vm7, %v1643_v12, %v1521_v56  ;;  %v1525_v48 = vsel %vm3767_vm7, %v1644_v37, %v1524_v3 }
  0xdc   :  { %1511 = vst [vmem:[%s3854_s1 + $0x38] sm:$0xff] %v1510_v23  ;;  %1514 = vst [vmem:[%s3854_s1 + $0x40] sm:$0xff] %v1513_v51  ;;  %v1528_v46 = vsel %vm3767_vm7, %v1645_v1, %v1527_v29 }
  0xdd   :  { %1517 = vst [vmem:[%s3854_s1 + $0x48] sm:$0xff] %v1516_v54  ;;  %1520 = vst [vmem:[%s3854_s1 + $0x50] sm:$0xff] %v1519_v9 }
  0xde   :  { %1523 = vst [vmem:[%s3854_s1 + $0x58] sm:$0xff] %v1522_v17  ;;  %1526 = vst [vmem:[%s3854_s1 + $0x60] sm:$0xff] %v1525_v48 }
  0xdf   :  { %1529 = vst [vmem:[%s3854_s1 + $0x68] sm:$0xff] %v1528_v46 }

// kernel: inception_net_forward.23
= control target key start
LH: loop header
LB: loop body
LE: loop exit
PB: predicated region body
PF: predicated region fallthrough
CT: control target
= control target key end

     0   :  { %v288_v36 = vlaneseq  ;;  %s647_s1 = inlined_call_operand.vmem [shape: bf16[256,256], index: 1, kind: input, shape index: {}]   ;;  %s648_s0 = inlined_call_operand.vmem [shape: bf16[32,256], index: 0, kind: input, shape index: {}]   ;;  %s649_s2 = inlined_call_operand.vmem [shape: f32[1,256], index: 2, kind: input, shape index: {}]   ;;  %s650_s3 = inlined_call_operand.vmem [shape: f32[1,256], index: 3, kind: input, shape index: {}]   ;;  %s651_s4 = inlined_call_operand.vmem [shape: bf16[32,256], index: 4, kind: output, shape index: {}]  }
   0x1   :  { %v442_v0 = vld [vmem:[%s647_s1 + $0x74] ss:$8 sps:$4 sm:$0xff]   ;;  %v444_v1 = vld [vmem:[%s647_s1 + $0x70] ss:$8 sps:$4 sm:$0xff]   ;;  %v445_v2 = vld [vmem:[%s647_s1 + $0x64] ss:$8 sps:$4 sm:$0xff]  }
   0x2   :  { %233 = vmatprep.subr.bf16.mxu0 %v442_v0  ;;  %410 = vmatprep.subr.bf16.mxu1 %v442_v0  ;;  %v447_v3 = vld [vmem:[%s647_s1 + $0x60] ss:$8 sps:$4 sm:$0xff]   ;;  %v448_v4 = vld [vmem:[%s647_s1 + $0x54] ss:$8 sps:$4 sm:$0xff]   ;;  %v450_v5 = vld [vmem:[%s647_s1 + $0x50] ss:$8 sps:$4 sm:$0xff]  }
   0x3   :  { %234 = vmatpush1.bf16.msra.mxu0 %v444_v1  ;;  %426 = vmatpush1.bf16.msra.mxu1 %v444_v1  ;;  %v451_v6 = vld [vmem:[%s647_s1 + $0x44] ss:$8 sps:$4 sm:$0xff]   ;;  %v453_v7 = vld [vmem:[%s647_s1 + $0x40] ss:$8 sps:$4 sm:$0xff]   ;;  %v454_v8 = vld [vmem:[%s647_s1 + $0x34] ss:$8 sps:$4 sm:$0xff]  }
   0x4   :  { %235 = vmatprep.subr.bf16.mxu0 %v445_v2  ;;  %411 = vmatprep.subr.bf16.mxu1 %v445_v2  ;;  %v456_v9 = vld [vmem:[%s647_s1 + $0x30] ss:$8 sps:$4 sm:$0xff]   ;;  %v457_v10 = vld [vmem:[%s647_s1 + $0x24] ss:$8 sps:$4 sm:$0xff]   ;;  %v459_v11 = vld [vmem:[%s647_s1 + $0x20] ss:$8 sps:$4 sm:$0xff]  }
   0x5   :  { %v460_v12 = vld [vmem:[%s647_s1 + $0x14] ss:$8 sps:$4 sm:$0xff]   ;;  %v492_v13 = vld [vmem:[%s648_s0 + $0x4] ss:$8 sps:$4 sm:$0xff]   ;;  %v462_v14 = vld [vmem:[%s647_s1 + $0x10] ss:$8 sps:$4 sm:$0xff]  }
   0x6   :  { %v495_v15 = vld [vmem:[%s648_s0 + $0x14] ss:$8 sps:$4 sm:$0xff]   ;;  %v463_v16 = vld [vmem:[%s647_s1 + $0x4] ss:$8 sps:$4 sm:$0xff]   ;;  %265 = vmatprep.mubr.bf16.mxu0 %v492_v13  ;;  %v465_v17 = vld [vmem:[%s647_s1] ss:$8 sps:$4 sm:$0xff]  }
   0x7   :  { %236 = vmatpush1.bf16.msra.mxu0 %v447_v3  ;;  %427 = vmatpush1.bf16.msra.mxu1 %v447_v3  ;;  %v466_v18 = vld [vmem:[%s647_s1 + $0xf4] ss:$8 sps:$4 sm:$0xff]   ;;  %v468_v19 = vld [vmem:[%s647_s1 + $0xf0] ss:$8 sps:$4 sm:$0xff]   ;;  %v469_v20 = vld [vmem:[%s647_s1 + $0xe4] ss:$8 sps:$4 sm:$0xff]  }
   0x8   :  { %237 = vmatprep.subr.bf16.mxu0 %v448_v4  ;;  %412 = vmatprep.subr.bf16.mxu1 %v448_v4  ;;  %v471_v21 = vld [vmem:[%s647_s1 + $0xe0] ss:$8 sps:$4 sm:$0xff]   ;;  %v472_v22 = vld [vmem:[%s647_s1 + $0xd4] ss:$8 sps:$4 sm:$0xff]   ;;  %v474_v23 = vld [vmem:[%s647_s1 + $0xd0] ss:$8 sps:$4 sm:$0xff]  }
   0x9   :  { %275 = vmatprep.mubr.bf16.mxu1 %v495_v15  ;;  %v475_v24 = vld [vmem:[%s647_s1 + $0xc4] ss:$8 sps:$4 sm:$0xff]   ;;  %v477_v25 = vld [vmem:[%s647_s1 + $0xc0] ss:$8 sps:$4 sm:$0xff]   ;;  %v478_v26 = vld [vmem:[%s647_s1 + $0xb4] ss:$8 sps:$4 sm:$0xff]  }
   0xa   :  { %v480_v27 = vld [vmem:[%s647_s1 + $0xb0] ss:$8 sps:$4 sm:$0xff]   ;;  %v481_v28 = vld [vmem:[%s647_s1 + $0xa4] ss:$8 sps:$4 sm:$0xff]   ;;  %v483_v29 = vld [vmem:[%s647_s1 + $0xa0] ss:$8 sps:$4 sm:$0xff]  }
   0xb   :  { %238 = vmatpush1.bf16.msra.mxu0 %v450_v5  ;;  %428 = vmatpush1.bf16.msra.mxu1 %v450_v5  ;;  %v484_v30 = vld [vmem:[%s647_s1 + $0x94] ss:$8 sps:$4 sm:$0xff]   ;;  %v486_v31 = vld [vmem:[%s647_s1 + $0x90] ss:$8 sps:$4 sm:$0xff]   ;;  %v487_v32 = vld [vmem:[%s647_s1 + $0x84] ss:$8 sps:$4 sm:$0xff]  }
   0xc   :  { %239 = vmatprep.subr.bf16.mxu0 %v451_v6  ;;  %413 = vmatprep.subr.bf16.mxu1 %v451_v6  ;;  %v489_v33 = vld [vmem:[%s647_s1 + $0x80] ss:$8 sps:$4 sm:$0xff]   ;;  %v493_v35 = vld [vmem:[%s648_s0 + $0x10] ss:$8 sps:$4 sm:$0xff]   ;;  %v289_v37 = vshrl.u32 %v288_v36, 7 }
   0xd   :  { %v490_v34 = vld [vmem:[%s648_s0] ss:$8 sps:$4 sm:$0xff]  }
   0xe   :  { %v290_v38 = vsub.s32 0, %v289_v37  ;;  %v286_v39 = vld [vmem:[%s649_s2] sm:$0x3]  ;;  %v294_v40 = vsub.s32 1, %v289_v37 }
   0xf   :  { %240 = vmatpush1.bf16.msra.mxu0 %v453_v7  ;;  %429 = vmatpush1.bf16.msra.mxu1 %v453_v7  ;;  %v306_v41 = vld [vmem:[%s650_s3] sm:$0x3] }
  0x10   :  { %241 = vmatprep.subr.bf16.mxu0 %v454_v8  ;;  %414 = vmatprep.subr.bf16.mxu1 %v454_v8  ;;  %v291_v42 = vrot.slane %v286_v39, %v290_v38  ;;  %v311_v43 = vrot.slane %v306_v41, %v290_v38  ;;  %v295_v44 = vrot.slane %v286_v39, %v294_v40 }
  0x11   :  { %v315_v49 = vrot.slane %v306_v41, %v294_v40 }
  0x13   :  { %242 = vmatpush1.bf16.msra.mxu0 %v456_v9  ;;  %430 = vmatpush1.bf16.msra.mxu1 %v456_v9 }
  0x14   :  { %243 = vmatprep.subr.bf16.mxu0 %v457_v10  ;;  %415 = vmatprep.subr.bf16.mxu1 %v457_v10 }
  0x17   :  { %244 = vmatpush1.bf16.msra.mxu0 %v459_v11  ;;  %431 = vmatpush1.bf16.msra.mxu1 %v459_v11 }
  0x18   :  { %245 = vmatprep.subr.bf16.mxu0 %v460_v12  ;;  %416 = vmatprep.subr.bf16.mxu1 %v460_v12 }
  0x1b   :  { %246 = vmatpush1.bf16.msra.mxu0 %v462_v14  ;;  %432 = vmatpush1.bf16.msra.mxu1 %v462_v14 }
  0x1c   :  { %247 = vmatprep.subr.bf16.mxu0 %v463_v16  ;;  %417 = vmatprep.subr.bf16.mxu1 %v463_v16 }
  0x1f   :  { %248 = vmatpush1.bf16.msra.mxu0 %v465_v17  ;;  %433 = vmatpush1.bf16.msra.mxu1 %v465_v17 }
  0x20   :  { %249 = vmatprep.subr.bf16.mxu0 %v466_v18  ;;  %418 = vmatprep.subr.bf16.mxu1 %v466_v18 }
  0x23   :  { %250 = vmatpush2.bf16.msra.mxu0 %v468_v19  ;;  %434 = vmatpush2.bf16.msra.mxu1 %v468_v19 }
  0x24   :  { %251 = vmatprep.subr.bf16.mxu0 %v469_v20  ;;  %419 = vmatprep.subr.bf16.mxu1 %v469_v20 }
  0x27   :  { %252 = vmatpush2.bf16.msra.mxu0 %v471_v21  ;;  %435 = vmatpush2.bf16.msra.mxu1 %v471_v21 }
  0x28   :  { %253 = vmatprep.subr.bf16.mxu0 %v472_v22  ;;  %420 = vmatprep.subr.bf16.mxu1 %v472_v22 }
  0x2b   :  { %254 = vmatpush2.bf16.msra.mxu0 %v474_v23  ;;  %436 = vmatpush2.bf16.msra.mxu1 %v474_v23 }
  0x2c   :  { %255 = vmatprep.subr.bf16.mxu0 %v475_v24  ;;  %421 = vmatprep.subr.bf16.mxu1 %v475_v24 }
  0x2f   :  { %256 = vmatpush2.bf16.msra.mxu0 %v477_v25  ;;  %437 = vmatpush2.bf16.msra.mxu1 %v477_v25 }
  0x30   :  { %257 = vmatprep.subr.bf16.mxu0 %v478_v26  ;;  %422 = vmatprep.subr.bf16.mxu1 %v478_v26 }
  0x33   :  { %258 = vmatpush2.bf16.msra.mxu0 %v480_v27  ;;  %438 = vmatpush2.bf16.msra.mxu1 %v480_v27 }
  0x34   :  { %259 = vmatprep.subr.bf16.mxu0 %v481_v28  ;;  %423 = vmatprep.subr.bf16.mxu1 %v481_v28 }
  0x37   :  { %260 = vmatpush2.bf16.msra.mxu0 %v483_v29  ;;  %439 = vmatpush2.bf16.msra.mxu1 %v483_v29 }
  0x38   :  { %261 = vmatprep.subr.bf16.mxu0 %v484_v30  ;;  %424 = vmatprep.subr.bf16.mxu1 %v484_v30 }
  0x3b   :  { %262 = vmatpush2.bf16.msra.mxu0 %v486_v31  ;;  %440 = vmatpush2.bf16.msra.mxu1 %v486_v31 }
  0x3c   :  { %263 = vmatprep.subr.bf16.mxu0 %v487_v32  ;;  %425 = vmatprep.subr.bf16.mxu1 %v487_v32 }
  0x3f   :  { %264 = vmatpush2.bf16.msra.mxu0 %v489_v33  ;;  %441 = vmatpush2.bf16.msra.mxu1 %v489_v33 }
  0x42   :  { %266 = vmatmul.mubr.bf16.vlgmr.msra.gmra.mxu0 %v490_v34  ;;  %276 = vmatmul.mubr.bf16.vlgmr.msra.gmra.mxu1 %v493_v35 }
 0x102   :  { %v267_v45 = vpop.f32.mrf.mxu0  ;;  %v277_v46 = vpop.f32.mrf.mxu1 }
 0x103   :  { %v298_v47 = vmul.f32 %v291_v42, %v267_v45  ;;  %v302_v48 = vmul.f32 %v291_v42, %v277_v46 }
 0x104   :  { %v269_v50 = vpop.f32.mrf.mxu0  ;;  %v279_v51 = vpop.f32.mrf.mxu1 }
 0x105   :  { %v318_v52 = vadd.f32 %v311_v43, %v298_v47  ;;  %v322_v53 = vadd.f32 %v311_v43, %v302_v48  ;;  %v299_v54 = vmul.f32 %v295_v44, %v269_v50  ;;  %v303_v55 = vmul.f32 %v295_v44, %v279_v51 }
 0x106   :  { %v271_v56 = vpop.f32.mrf.mxu0  ;;  %v281_v57 = vpop.f32.mrf.mxu1 }
 0x107   :  { %v319_v58 = vadd.f32 %v315_v49, %v299_v54  ;;  %v323_v59 = vadd.f32 %v315_v49, %v303_v55  ;;  %v326_v60 = vmax.f32 %v318_v52, 0.0  ;;  %v330_v61 = vmax.f32 %v322_v53, 0.0 }
 0x108   :  { %v300_v62 = vmul.f32 %v291_v42, %v271_v56  ;;  %v304_v63 = vmul.f32 %v291_v42, %v281_v57  ;;  %v273_v0 = vpop.f32.mrf.mxu0  ;;  %v283_v1 = vpop.f32.mrf.mxu1 }
 0x109   :  { %v327_v2 = vmax.f32 %v319_v58, 0.0  ;;  %v331_v3 = vmax.f32 %v323_v59, 0.0  ;;  %v301_v4 = vmul.f32 %v295_v44, %v273_v0  ;;  %v305_v5 = vmul.f32 %v295_v44, %v283_v1 }
 0x10a   :  { %v320_v6 = vadd.f32 %v311_v43, %v300_v62  ;;  %v324_v7 = vadd.f32 %v311_v43, %v304_v63 }
 0x10b   :  { %v406_v8 = vpack.c.bf16 %v327_v2, %v326_v60  ;;  %v408_v9 = vpack.c.bf16 %v331_v3, %v330_v61  ;;  %v321_v10 = vadd.f32 %v315_v49, %v301_v4  ;;  %v325_v11 = vadd.f32 %v315_v49, %v305_v5 }
 0x10c   :  { %v328_v12 = vmax.f32 %v320_v6, 0.0  ;;  %v332_v13 = vmax.f32 %v324_v7, 0.0 }
 0x10d   :  { %358 = vst [vmem:[%s651_s4] sm:$0xff] %v406_v8  ;;  %360 = vst [vmem:[%s651_s4 + $0x10] sm:$0xff] %v408_v9  ;;  %v329_v14 = vmax.f32 %v321_v10, 0.0  ;;  %v333_v15 = vmax.f32 %v325_v11, 0.0 }
 0x10f   :  { %v407_v16 = vpack.c.bf16 %v329_v14, %v328_v12  ;;  %v409_v17 = vpack.c.bf16 %v333_v15, %v332_v13 }
 0x111   :  { %359 = vst [vmem:[%s651_s4 + $0x8] sm:$0xff] %v407_v16  ;;  %361 = vst [vmem:[%s651_s4 + $0x18] sm:$0xff] %v409_v17 }

// kernel: inception_net_forward.24
= control target key start
LH: loop header
LB: loop body
LE: loop exit
PB: predicated region body
PF: predicated region fallthrough
CT: control target
= control target key end

     0   :  { %s666_s1 = inlined_call_operand.vmem [shape: bf16[384,128], index: 1, kind: input, shape index: {}]   ;;  %s667_s0 = inlined_call_operand.vmem [shape: bf16[32,384], index: 0, kind: input, shape index: {}]   ;;  %s668_s2 = inlined_call_operand.vmem [shape: f32[1,128], index: 2, kind: input, shape index: {}]   ;;  %s669_s3 = inlined_call_operand.vmem [shape: f32[1,128], index: 3, kind: input, shape index: {}]   ;;  %s670_s4 = inlined_call_operand.vmem [shape: bf16[32,128], index: 4, kind: output, shape index: {}]  }
   0x1   :  { %v507_v0 = vld [vmem:[%s666_s1 + $0x78] sm:$0xff]   ;;  %v510_v3 = vld [vmem:[%s666_s1 + $0x70] sm:$0xff]   ;;  %v513_v6 = vld [vmem:[%s666_s1 + $0x68] sm:$0xff]  }
   0x2   :  { %v508_v1 = vld [vmem:[%s666_s1 + $0x38] sm:$0xff]   ;;  %449 = vmatprep.subr.bf16.mxu0 %v507_v0  ;;  %v511_v4 = vld [vmem:[%s666_s1 + $0x30] sm:$0xff]   ;;  %v514_v7 = vld [vmem:[%s666_s1 + $0x28] sm:$0xff]  }
   0x3   :  { %v509_v2 = vld [vmem:[%s666_s1 + $0xb8] sm:$0xff]   ;;  %450 = vmatpush3.bf16.msra.mxu0 %v508_v1  ;;  %v512_v5 = vld [vmem:[%s666_s1 + $0xb0] sm:$0xff]   ;;  %v515_v8 = vld [vmem:[%s666_s1 + $0xa8] sm:$0xff]  }
   0x4   :  { %487 = vmatprep.subr.bf16.mxu1 %v509_v2  ;;  %451 = vmatprep.subr.bf16.mxu0 %v510_v3  ;;  %v516_v9 = vld [vmem:[%s666_s1 + $0x60] sm:$0xff]   ;;  %v519_v12 = vld [vmem:[%s666_s1 + $0x58] sm:$0xff]   ;;  %v522_v15 = vld [vmem:[%s666_s1 + $0x50] sm:$0xff]  }
   0x5   :  { %488 = vmatpush3.bf16.msra.mxu1 %v509_v2  ;;  %v517_v10 = vld [vmem:[%s666_s1 + $0x20] sm:$0xff]   ;;  %v521_v13 = vld [vmem:[%s666_s1 + $0x98] sm:$0xff]   ;;  %v524_v16 = vld [vmem:[%s666_s1 + $0x90] sm:$0xff]  }
   0x6   :  { %489 = vmatprep.subr.bf16.mxu1 %v512_v5  ;;  %v518_v11 = vld [vmem:[%s666_s1 + $0xa0] sm:$0xff]   ;;  %v520_v14 = vld [vmem:[%s666_s1 + $0x18] sm:$0xff]   ;;  %v523_v17 = vld [vmem:[%s666_s1 + $0x10] sm:$0xff]  }
   0x7   :  { %452 = vmatpush3.bf16.msra.mxu0 %v511_v4  ;;  %v525_v18 = vld [vmem:[%s666_s1 + $0x48] sm:$0xff]   ;;  %v528_v21 = vld [vmem:[%s666_s1 + $0x40] sm:$0xff]  }
   0x8   :  { %453 = vmatprep.subr.bf16.mxu0 %v513_v6  ;;  %v526_v19 = vld [vmem:[%s666_s1 + $0x8] sm:$0xff]   ;;  %v530_v22 = vld [vmem:[%s666_s1 + $0x80] sm:$0xff]  }
   0x9   :  { %490 = vmatpush3.bf16.msra.mxu1 %v512_v5  ;;  %v527_v20 = vld [vmem:[%s666_s1 + $0x88] sm:$0xff]   ;;  %v533_v23 = vld [vmem:[%s667_s0 + $0x4] ss:$12 sps:$4 sm:$0xff]   ;;  %v428_v36 = vld [vmem:[%s668_s2] ss:$0 sm:$0xff] }
   0xa   :  { %491 = vmatprep.subr.bf16.mxu1 %v515_v8  ;;  %v534_v24 = vld [vmem:[%s667_s0 + $0x8] ss:$12 sps:$4 sm:$0xff]   ;;  %v529_v25 = vld [vmem:[%s666_s1] sm:$0xff]   ;;  %282 = vmatprep.mubr.bf16.mxu0 %v533_v23 }
   0xb   :  { %454 = vmatpush3.bf16.msra.mxu0 %v514_v7  ;;  %503 = vmatprep.mubr.bf16.mxu1 %v534_v24  ;;  %v531_v26 = vld [vmem:[%s667_s0] ss:$12 sps:$4 sm:$0xff]   ;;  %v536_v27 = vld [vmem:[%s667_s0 + $0x1c] ss:$12 sps:$4 sm:$0xff]   ;;  %v538_v29 = vld [vmem:[%s667_s0 + $0x18] ss:$12 sps:$4 sm:$0xff]  }
   0xc   :  { %455 = vmatprep.subr.bf16.mxu0 %v516_v9  ;;  %v535_v28 = vld [vmem:[%s667_s0 + $0x20] ss:$12 sps:$4 sm:$0xff]  }
   0xd   :  { %492 = vmatpush3.bf16.msra.mxu1 %v515_v8  ;;  %v429_v42 = vld [vmem:[%s669_s3] ss:$0 sm:$0xff] }
   0xe   :  { %493 = vmatprep.subr.bf16.mxu1 %v518_v11 }
   0xf   :  { %456 = vmatpush3.bf16.msra.mxu0 %v517_v10 }
  0x10   :  { %457 = vmatprep.subr.bf16.mxu0 %v519_v12 }
  0x11   :  { %494 = vmatpush3.bf16.msra.mxu1 %v518_v11 }
  0x12   :  { %495 = vmatprep.subr.bf16.mxu1 %v521_v13 }
  0x13   :  { %458 = vmatpush3.bf16.msra.mxu0 %v520_v14 }
  0x14   :  { %459 = vmatprep.subr.bf16.mxu0 %v522_v15 }
  0x15   :  { %496 = vmatpush3.bf16.msra.mxu1 %v521_v13 }
  0x16   :  { %497 = vmatprep.subr.bf16.mxu1 %v524_v16 }
  0x17   :  { %460 = vmatpush3.bf16.msra.mxu0 %v523_v17 }
  0x18   :  { %461 = vmatprep.subr.bf16.mxu0 %v525_v18 }
  0x19   :  { %498 = vmatpush3.bf16.msra.mxu1 %v524_v16 }
  0x1a   :  { %499 = vmatprep.subr.bf16.mxu1 %v527_v20 }
  0x1b   :  { %462 = vmatpush3.bf16.msra.mxu0 %v526_v19 }
  0x1c   :  { %463 = vmatprep.subr.bf16.mxu0 %v528_v21 }
  0x1d   :  { %500 = vmatpush3.bf16.msra.mxu1 %v527_v20 }
  0x1e   :  { %501 = vmatprep.subr.bf16.mxu1 %v530_v22 }
  0x1f   :  { %464 = vmatpush3.bf16.msra.mxu0 %v529_v25 }
  0x21   :  { %502 = vmatpush3.bf16.msra.mxu1 %v530_v22 }
  0x22   :  { %283 = vmatmul.mubr.bf16.vlgmr.msra.gmra.mxu0 %v531_v26 }
  0x23   :  { %290 = vmatprep.mubr.bf16.mxu0 %v536_v27 }
  0x24   :  { %504 = vmatmul.mubr.bf16.vlgmr.msra.gmra.mxu1 %v535_v28 }
  0x2a   :  { %291 = vmatmul.mubr.bf16.gmra.mxu0 %v538_v29 }
  0xe2   :  { %v465_v30 = vpop.f32.mrf.mxu0 }
  0xe4   :  { %v466_v31 = vpop.f32.mrf.mxu0  ;;  %v505_v32 = vpop.f32.mrf.mxu1 }
  0xe5   :  { %v467_v33 = vadd.f32 %v466_v31, %v465_v30 }
  0xe6   :  { %v468_v34 = vpop.f32.mrf.mxu0  ;;  %v333_v35 = vpop.f32.mrf.mxu1 }
  0xe7   :  { %v334_v37 = vadd.f32 %v467_v33, %v333_v35 }
  0xe8   :  { %v469_v38 = vpop.f32.mrf.mxu0  ;;  %v506_v39 = vpop.f32.mrf.mxu1 }
  0xe9   :  { %v355_v40 = vmul.f32 %v428_v36, %v334_v37  ;;  %v470_v41 = vadd.f32 %v469_v38, %v468_v34 }
  0xea   :  { %v471_v43 = vpop.f32.mrf.mxu0  ;;  %v336_v44 = vpop.f32.mrf.mxu1 }
  0xeb   :  { %v337_v45 = vadd.f32 %v470_v41, %v336_v44  ;;  %v366_v47 = vadd.f32 %v429_v42, %v355_v40 }
  0xec   :  { %v472_v46 = vpop.f32.mrf.mxu0 }
  0xed   :  { %v356_v48 = vmul.f32 %v428_v36, %v337_v45  ;;  %v473_v49 = vadd.f32 %v472_v46, %v471_v43  ;;  %v370_v54 = vmax.f32 %v366_v47, 0.0 }
  0xee   :  { %v474_v50 = vpop.f32.mrf.mxu0 }
  0xef   :  { %v367_v51 = vadd.f32 %v429_v42, %v356_v48  ;;  %v342_v52 = vadd.f32 %v505_v32, %v473_v49 }
  0xf0   :  { %v475_v53 = vpop.f32.mrf.mxu0 }
  0xf1   :  { %v371_v55 = vmax.f32 %v367_v51, 0.0  ;;  %v357_v56 = vmul.f32 %v428_v36, %v342_v52  ;;  %v476_v57 = vadd.f32 %v475_v53, %v474_v50 }
  0xf3   :  { %v441_v58 = vpack.c.bf16 %v371_v55, %v370_v54  ;;  %v345_v59 = vadd.f32 %v506_v39, %v476_v57  ;;  %v368_v60 = vadd.f32 %v429_v42, %v357_v56 }
  0xf5   :  { %442 = vst [vmem:[%s670_s4] sm:$0xff] %v441_v58   ;;  %v358_v61 = vmul.f32 %v428_v36, %v345_v59  ;;  %v372_v63 = vmax.f32 %v368_v60, 0.0 }
  0xf7   :  { %v369_v62 = vadd.f32 %v429_v42, %v358_v61 }
  0xf9   :  { %v373_v0 = vmax.f32 %v369_v62, 0.0 }
  0xfb   :  { %v446_v1 = vpack.c.bf16 %v373_v0, %v372_v63 }
  0xfd   :  { %448 = vst [vmem:[%s670_s4 + $0x8] sm:$0xff] %v446_v1  }

// kernel: inception_net_forward.25
= control target key start
LH: loop header
LB: loop body
LE: loop exit
PB: predicated region body
PF: predicated region fallthrough
CT: control target
= control target key end

     0   :  { %s1328_s1 = inlined_call_operand.vmem [shape: bf16[896,128], index: 1, kind: input, shape index: {}]   ;;  %s1329_s0 = inlined_call_operand.vmem [shape: bf16[32,896], index: 0, kind: input, shape index: {}]   ;;  %s1330_s2 = inlined_call_operand.vmem [shape: f32[1,128], index: 2, kind: input, shape index: {}]   ;;  %s1331_s3 = inlined_call_operand.vmem [shape: f32[1,128], index: 3, kind: input, shape index: {}]   ;;  %s1332_s4 = inlined_call_operand.vmem [shape: bf16[32,128], index: 4, kind: output, shape index: {}]  }
   0x1   :  { %v1005_v0 = vld [vmem:[%s1328_s1 + $0x78] sm:$0xff]   ;;  %v1009_v4 = vld [vmem:[%s1328_s1 + $0x70] sm:$0xff]   ;;  %v1013_v8 = vld [vmem:[%s1328_s1 + $0x68] sm:$0xff]  }
   0x2   :  { %v1006_v1 = vld [vmem:[%s1328_s1 + $0xf8] sm:$0xff]   ;;  %891 = vmatprep.subr.bf16.mxu0 %v1005_v0  ;;  %v1010_v5 = vld [vmem:[%s1328_s1 + $0xf0] sm:$0xff]   ;;  %v1014_v9 = vld [vmem:[%s1328_s1 + $0xe8] sm:$0xff]  }
   0x3   :  { %v1007_v2 = vld [vmem:[%s1328_s1 + $0x38] sm:$0xff]   ;;  %919 = vmatprep.subr.bf16.mxu1 %v1006_v1  ;;  %v1011_v6 = vld [vmem:[%s1328_s1 + $0x30] sm:$0xff]   ;;  %v1015_v10 = vld [vmem:[%s1328_s1 + $0x28] sm:$0xff]  }
   0x4   :  { %v1008_v3 = vld [vmem:[%s1328_s1 + $0xb8] sm:$0xff]   ;;  %892 = vmatpush3.bf16.msra.mxu0 %v1007_v2  ;;  %v1012_v7 = vld [vmem:[%s1328_s1 + $0xb0] sm:$0xff]   ;;  %v1016_v11 = vld [vmem:[%s1328_s1 + $0xa8] sm:$0xff]  }
   0x5   :  { %920 = vmatpush3.bf16.msra.mxu1 %v1008_v3  ;;  %893 = vmatprep.subr.bf16.mxu0 %v1009_v4  ;;  %v1017_v12 = vld [vmem:[%s1328_s1 + $0x60] sm:$0xff]   ;;  %v1021_v16 = vld [vmem:[%s1328_s1 + $0x58] sm:$0xff]   ;;  %v1025_v20 = vld [vmem:[%s1328_s1 + $0x50] sm:$0xff]  }
   0x6   :  { %921 = vmatprep.subr.bf16.mxu1 %v1010_v5  ;;  %v1018_v13 = vld [vmem:[%s1328_s1 + $0xe0] sm:$0xff]   ;;  %v1022_v17 = vld [vmem:[%s1328_s1 + $0xd8] sm:$0xff]   ;;  %v1026_v21 = vld [vmem:[%s1328_s1 + $0xd0] sm:$0xff]  }
   0x7   :  { %v1019_v14 = vld [vmem:[%s1328_s1 + $0x20] sm:$0xff]   ;;  %v1023_v18 = vld [vmem:[%s1328_s1 + $0x18] sm:$0xff]   ;;  %v1027_v22 = vld [vmem:[%s1328_s1 + $0x10] sm:$0xff]  }
   0x8   :  { %894 = vmatpush3.bf16.msra.mxu0 %v1011_v6  ;;  %v1020_v15 = vld [vmem:[%s1328_s1 + $0xa0] sm:$0xff]   ;;  %v1024_v19 = vld [vmem:[%s1328_s1 + $0x98] sm:$0xff]   ;;  %v1028_v23 = vld [vmem:[%s1328_s1 + $0x90] sm:$0xff]  }
   0x9   :  { %922 = vmatpush3.bf16.msra.mxu1 %v1012_v7  ;;  %895 = vmatprep.subr.bf16.mxu0 %v1013_v8  ;;  %v1029_v24 = vld [vmem:[%s1328_s1 + $0x48] sm:$0xff]   ;;  %v1033_v28 = vld [vmem:[%s1328_s1 + $0x40] sm:$0xff]   ;;  %v1043_v36 = vld [vmem:[%s1328_s1 + $0x178] sm:$0xff]  }
   0xa   :  { %923 = vmatprep.subr.bf16.mxu1 %v1014_v9  ;;  %v1030_v25 = vld [vmem:[%s1328_s1 + $0xc8] sm:$0xff]   ;;  %v1034_v29 = vld [vmem:[%s1328_s1 + $0xc0] sm:$0xff]   ;;  %v1044_v37 = vld [vmem:[%s1328_s1 + $0x138] sm:$0xff]  }
   0xb   :  { %v1031_v26 = vld [vmem:[%s1328_s1 + $0x8] sm:$0xff]   ;;  %v1035_v30 = vld [vmem:[%s1328_s1] sm:$0xff]   ;;  %v1045_v38 = vld [vmem:[%s1328_s1 + $0x170] sm:$0xff]  }
   0xc   :  { %896 = vmatpush3.bf16.msra.mxu0 %v1015_v10  ;;  %v1032_v27 = vld [vmem:[%s1328_s1 + $0x88] sm:$0xff]   ;;  %v1036_v31 = vld [vmem:[%s1328_s1 + $0x80] sm:$0xff]   ;;  %v1046_v39 = vld [vmem:[%s1328_s1 + $0x1b8] sm:$0xff]  }
   0xd   :  { %924 = vmatpush3.bf16.msra.mxu1 %v1016_v11  ;;  %897 = vmatprep.subr.bf16.mxu0 %v1017_v12  ;;  %v1037_v32 = vld [vmem:[%s1329_s0] ss:$28 sps:$4 sm:$0xff]   ;;  %v1040_v34 = vld [vmem:[%s1329_s0 + $0x8] ss:$28 sps:$4 sm:$0xff]   ;;  %v1047_v40 = vld [vmem:[%s1328_s1 + $0x130] sm:$0xff]  }
   0xe   :  { %925 = vmatprep.subr.bf16.mxu1 %v1018_v13  ;;  %v1039_v33 = vld [vmem:[%s1329_s0 + $0x4] ss:$28 sps:$4 sm:$0xff]   ;;  %v1042_v35 = vld [vmem:[%s1329_s0 + $0xc] ss:$28 sps:$4 sm:$0xff]   ;;  %v1049_v42 = vld [vmem:[%s1328_s1 + $0x1b0] sm:$0xff]  }
   0xf   :  { %586 = vmatprep.mubr.bf16.mxu0 %v1039_v33  ;;  %635 = vmatprep.mubr.bf16.mxu1 %v1042_v35  ;;  %v1048_v41 = vld [vmem:[%s1328_s1 + $0x168] sm:$0xff]   ;;  %v1051_v44 = vld [vmem:[%s1328_s1 + $0x160] sm:$0xff]   ;;  %v1054_v47 = vld [vmem:[%s1328_s1 + $0x158] sm:$0xff]  }
  0x10   :  { %898 = vmatpush3.bf16.msra.mxu0 %v1019_v14  ;;  %v1050_v43 = vld [vmem:[%s1328_s1 + $0x128] sm:$0xff]   ;;  %v1053_v46 = vld [vmem:[%s1328_s1 + $0x120] sm:$0xff]   ;;  %v1056_v49 = vld [vmem:[%s1329_s0 + $0x3c] ss:$28 sps:$4 sm:$0xff]  }
  0x11   :  { %926 = vmatpush3.bf16.msra.mxu1 %v1020_v15  ;;  %899 = vmatprep.subr.bf16.mxu0 %v1021_v16  ;;  %v1052_v45 = vld [vmem:[%s1328_s1 + $0x1a8] sm:$0xff]   ;;  %v1055_v48 = vld [vmem:[%s1328_s1 + $0x1a0] sm:$0xff]   ;;  %v1060_v51 = vld [vmem:[%s1328_s1 + $0x118] sm:$0xff]  }
  0x12   :  { %927 = vmatprep.subr.bf16.mxu1 %v1022_v17  ;;  %v1058_v50 = vld [vmem:[%s1329_s0 + $0x44] ss:$28 sps:$4 sm:$0xff]   ;;  %v1061_v52 = vld [vmem:[%s1329_s0 + $0x38] ss:$28 sps:$4 sm:$0xff]   ;;  %v1066_v57 = vld [vmem:[%s1328_s1 + $0x148] sm:$0xff]  }
  0x13   :  { %v1062_v53 = vld [vmem:[%s1329_s0 + $0x40] ss:$28 sps:$4 sm:$0xff]   ;;  %v1063_v54 = vld [vmem:[%s1328_s1 + $0x150] sm:$0xff]   ;;  %v1068_v59 = vld [vmem:[%s1328_s1 + $0x108] sm:$0xff]  }
  0x14   :  { %900 = vmatpush3.bf16.msra.mxu0 %v1023_v18  ;;  %v1064_v55 = vld [vmem:[%s1328_s1 + $0x198] sm:$0xff]   ;;  %v1065_v56 = vld [vmem:[%s1328_s1 + $0x110] sm:$0xff]   ;;  %v1069_v60 = vld [vmem:[%s1328_s1 + $0x140] sm:$0xff]  }
  0x15   :  { %928 = vmatpush3.bf16.msra.mxu1 %v1024_v19  ;;  %901 = vmatprep.subr.bf16.mxu0 %v1025_v20  ;;  %v1067_v58 = vld [vmem:[%s1328_s1 + $0x190] sm:$0xff]   ;;  %v1070_v61 = vld [vmem:[%s1328_s1 + $0x188] sm:$0xff]   ;;  %v1071_v62 = vld [vmem:[%s1328_s1 + $0x100] sm:$0xff]  }
  0x16   :  { %929 = vmatprep.subr.bf16.mxu1 %v1026_v21  ;;  %v1074_v63 = vld [vmem:[%s1329_s0 + $0x14] ss:$28 sps:$4 sm:$0xff]   ;;  %v1075_v0 = vld [vmem:[%s1328_s1 + $0x180] sm:$0xff]   ;;  %v1078_v3 = vld [vmem:[%s1329_s0 + $0x4c] ss:$28 sps:$4 sm:$0xff]  }
  0x17   :  { %v1076_v1 = vld [vmem:[%s1329_s0 + $0x18] ss:$28 sps:$4 sm:$0xff]   ;;  %v1072_v2 = vld [vmem:[%s1329_s0 + $0x10] ss:$28 sps:$4 sm:$0xff]   ;;  %v1080_v5 = vld [vmem:[%s1329_s0 + $0x48] ss:$28 sps:$4 sm:$0xff]  }
  0x18   :  { %902 = vmatpush3.bf16.msra.mxu0 %v1027_v22  ;;  %v1077_v4 = vld [vmem:[%s1329_s0 + $0x50] ss:$28 sps:$4 sm:$0xff]  }
  0x19   :  { %930 = vmatpush3.bf16.msra.mxu1 %v1028_v23  ;;  %903 = vmatprep.subr.bf16.mxu0 %v1029_v24 }
  0x1a   :  { %931 = vmatprep.subr.bf16.mxu1 %v1030_v25 }
  0x1c   :  { %904 = vmatpush3.bf16.msra.mxu0 %v1031_v26 }
  0x1d   :  { %932 = vmatpush3.bf16.msra.mxu1 %v1032_v27  ;;  %905 = vmatprep.subr.bf16.mxu0 %v1033_v28 }
  0x1e   :  { %933 = vmatprep.subr.bf16.mxu1 %v1034_v29 }
  0x20   :  { %906 = vmatpush3.bf16.msra.mxu0 %v1035_v30 }
  0x21   :  { %934 = vmatpush3.bf16.msra.mxu1 %v1036_v31  ;;  %947 = vmatprep.subr.bf16.mxu0 %v1043_v36 }
  0x22   :  { %985 = vmatprep.subr.bf16.mxu1 %v1046_v39 }
  0x23   :  { %587 = vmatmul.mubr.bf16.vlgmr.msra.gmra.mxu0 %v1037_v32 }
  0x24   :  { %636 = vmatmul.mubr.bf16.vlgmr.msra.gmra.mxu1 %v1040_v34  ;;  %948 = vmatpush3.bf16.msra.mxu0 %v1044_v37  ;;  %v870_v37 = vld [vmem:[%s1330_s2] ss:$0 sm:$0xff] }
  0x25   :  { %949 = vmatprep.subr.bf16.mxu0 %v1045_v38  ;;  %986 = vmatpush3.bf16.msra.mxu1 %v1046_v39 }
  0x26   :  { %987 = vmatprep.subr.bf16.mxu1 %v1049_v42  ;;  %594 = vmatprep.mubr.bf16.mxu0 %v1056_v49 }
  0x27   :  { %643 = vmatprep.mubr.bf16.mxu1 %v1058_v50 }
  0x28   :  { %950 = vmatpush3.bf16.msra.mxu0 %v1047_v40 }
  0x29   :  { %951 = vmatprep.subr.bf16.mxu0 %v1048_v41  ;;  %988 = vmatpush3.bf16.msra.mxu1 %v1049_v42 }
  0x2a   :  { %989 = vmatprep.subr.bf16.mxu1 %v1052_v45 }
  0x2b   :  { %595 = vmatmul.mubr.bf16.gmra.mxu0 %v1061_v52 }
  0x2c   :  { %952 = vmatpush3.bf16.msra.mxu0 %v1050_v43  ;;  %644 = vmatmul.mubr.bf16.gmra.mxu1 %v1062_v53 }
  0x2d   :  { %953 = vmatprep.subr.bf16.mxu0 %v1051_v44  ;;  %990 = vmatpush3.bf16.msra.mxu1 %v1052_v45 }
  0x2e   :  { %991 = vmatprep.subr.bf16.mxu1 %v1055_v48  ;;  %684 = vmatprep.mubr.bf16.mxu0 %v1074_v63 }
  0x2f   :  { %1001 = vmatprep.mubr.bf16.mxu1 %v1076_v1 }
  0x30   :  { %954 = vmatpush3.bf16.msra.mxu0 %v1053_v46 }
  0x31   :  { %955 = vmatprep.subr.bf16.mxu0 %v1054_v47  ;;  %992 = vmatpush3.bf16.msra.mxu1 %v1055_v48  ;;  %v871_v47 = vld [vmem:[%s1331_s3] ss:$0 sm:$0xff] }
  0x32   :  { %993 = vmatprep.subr.bf16.mxu1 %v1064_v55 }
  0x34   :  { %956 = vmatpush3.bf16.msra.mxu0 %v1060_v51 }
  0x35   :  { %957 = vmatprep.subr.bf16.mxu0 %v1063_v54  ;;  %994 = vmatpush3.bf16.msra.mxu1 %v1064_v55 }
  0x36   :  { %995 = vmatprep.subr.bf16.mxu1 %v1067_v58 }
  0x38   :  { %958 = vmatpush3.bf16.msra.mxu0 %v1065_v56 }
  0x39   :  { %959 = vmatprep.subr.bf16.mxu0 %v1066_v57  ;;  %996 = vmatpush3.bf16.msra.mxu1 %v1067_v58 }
  0x3a   :  { %997 = vmatprep.subr.bf16.mxu1 %v1070_v61 }
  0x3c   :  { %960 = vmatpush3.bf16.msra.mxu0 %v1068_v59 }
  0x3d   :  { %961 = vmatprep.subr.bf16.mxu0 %v1069_v60  ;;  %998 = vmatpush3.bf16.msra.mxu1 %v1070_v61 }
  0x3e   :  { %999 = vmatprep.subr.bf16.mxu1 %v1075_v0 }
  0x40   :  { %962 = vmatpush3.bf16.msra.mxu0 %v1071_v62 }
  0x41   :  { %1000 = vmatpush3.bf16.msra.mxu1 %v1075_v0 }
  0x43   :  { %685 = vmatmul.mubr.bf16.vlgmr.msra.gmra.mxu0 %v1072_v2 }
  0x44   :  { %692 = vmatprep.mubr.bf16.mxu0 %v1078_v3  ;;  %1002 = vmatmul.mubr.bf16.vlgmr.msra.gmra.mxu1 %v1077_v4 }
  0x4b   :  { %693 = vmatmul.mubr.bf16.gmra.mxu0 %v1080_v5 }
  0xe3   :  { %v907_v6 = vpop.f32.mrf.mxu0 }
  0xe4   :  { %v935_v7 = vpop.f32.mrf.mxu1 }
  0xe5   :  { %v908_v8 = vpop.f32.mrf.mxu0 }
  0xe6   :  { %v936_v9 = vpop.f32.mrf.mxu1  ;;  %v909_v21 = vadd.f32 %v908_v8, %v907_v6 }
  0xe7   :  { %v910_v10 = vpop.f32.mrf.mxu0  ;;  %v937_v22 = vadd.f32 %v936_v9, %v935_v7 }
  0xe8   :  { %v938_v11 = vpop.f32.mrf.mxu1 }
  0xe9   :  { %v911_v12 = vpop.f32.mrf.mxu0  ;;  %v638_v26 = vadd.f32 %v937_v22, %v909_v21 }
  0xea   :  { %v939_v14 = vpop.f32.mrf.mxu1  ;;  %v912_v27 = vadd.f32 %v911_v12, %v910_v10 }
  0xeb   :  { %v913_v13 = vpop.f32.mrf.mxu0  ;;  %v940_v28 = vadd.f32 %v939_v14, %v938_v11 }
  0xec   :  { %v941_v15 = vpop.f32.mrf.mxu1 }
  0xed   :  { %v914_v16 = vpop.f32.mrf.mxu0  ;;  %v641_v38 = vadd.f32 %v940_v28, %v912_v27 }
  0xee   :  { %v942_v17 = vpop.f32.mrf.mxu1  ;;  %v915_v34 = vadd.f32 %v914_v16, %v913_v13 }
  0xef   :  { %v916_v18 = vpop.f32.mrf.mxu0  ;;  %v943_v35 = vadd.f32 %v942_v17, %v941_v15 }
  0xf0   :  { %v944_v19 = vpop.f32.mrf.mxu1 }
  0xf1   :  { %v917_v20 = vpop.f32.mrf.mxu0  ;;  %v646_v46 = vadd.f32 %v943_v35, %v915_v34 }
  0xf2   :  { %v945_v24 = vpop.f32.mrf.mxu1  ;;  %v918_v49 = vadd.f32 %v917_v20, %v916_v18 }
  0xf3   :  { %v946_v50 = vadd.f32 %v945_v24, %v944_v19 }
  0xf5   :  { %v649_v58 = vadd.f32 %v946_v50, %v918_v49 }
 0x103   :  { %v963_v23 = vpop.f32.mrf.mxu0 }
 0x104   :  { %v1003_v30 = vpop.f32.mrf.mxu1 }
 0x105   :  { %v964_v25 = vpop.f32.mrf.mxu0 }
 0x106   :  { %v965_v29 = vadd.f32 %v964_v25, %v963_v23  ;;  %v735_v33 = vpop.f32.mrf.mxu1 }
 0x107   :  { %v966_v31 = vpop.f32.mrf.mxu0 }
 0x108   :  { %v687_v32 = vadd.f32 %v965_v29, %v638_v26  ;;  %v1004_v41 = vpop.f32.mrf.mxu1 }
 0x109   :  { %v967_v36 = vpop.f32.mrf.mxu0 }
 0x10a   :  { %v968_v39 = vadd.f32 %v967_v36, %v966_v31  ;;  %v736_v40 = vadd.f32 %v735_v33, %v687_v32  ;;  %v738_v45 = vpop.f32.mrf.mxu1 }
 0x10b   :  { %v969_v42 = vpop.f32.mrf.mxu0 }
 0x10c   :  { %v757_v43 = vmul.f32 %v870_v37, %v736_v40  ;;  %v690_v44 = vadd.f32 %v968_v39, %v641_v38 }
 0x10d   :  { %v970_v48 = vpop.f32.mrf.mxu0 }
 0x10e   :  { %v971_v51 = vadd.f32 %v970_v48, %v969_v42  ;;  %v739_v52 = vadd.f32 %v738_v45, %v690_v44  ;;  %v768_v54 = vadd.f32 %v871_v47, %v757_v43 }
 0x10f   :  { %v972_v53 = vpop.f32.mrf.mxu0 }
 0x110   :  { %v695_v55 = vadd.f32 %v971_v51, %v646_v46  ;;  %v758_v56 = vmul.f32 %v870_v37, %v739_v52  ;;  %v772_v62 = vmax.f32 %v768_v54, 0.0 }
 0x111   :  { %v973_v57 = vpop.f32.mrf.mxu0 }
 0x112   :  { %v744_v59 = vadd.f32 %v1003_v30, %v695_v55  ;;  %v769_v60 = vadd.f32 %v871_v47, %v758_v56  ;;  %v974_v61 = vadd.f32 %v973_v57, %v972_v53 }
 0x114   :  { %v759_v63 = vmul.f32 %v870_v37, %v744_v59  ;;  %v773_v0 = vmax.f32 %v769_v60, 0.0  ;;  %v698_v1 = vadd.f32 %v974_v61, %v649_v58 }
 0x116   :  { %v883_v2 = vpack.c.bf16 %v773_v0, %v772_v62  ;;  %v747_v3 = vadd.f32 %v1004_v41, %v698_v1  ;;  %v770_v4 = vadd.f32 %v871_v47, %v759_v63 }
 0x118   :  { %884 = vst [vmem:[%s1332_s4] sm:$0xff] %v883_v2   ;;  %v760_v5 = vmul.f32 %v870_v37, %v747_v3  ;;  %v774_v7 = vmax.f32 %v770_v4, 0.0 }
 0x11a   :  { %v771_v6 = vadd.f32 %v871_v47, %v760_v5 }
 0x11c   :  { %v775_v8 = vmax.f32 %v771_v6, 0.0 }
 0x11e   :  { %v888_v9 = vpack.c.bf16 %v775_v8, %v774_v7 }
 0x120   :  { %890 = vst [vmem:[%s1332_s4 + $0x8] sm:$0xff] %v888_v9  }

// kernel: inception_net_forward.26
= control target key start
LH: loop header
LB: loop body
LE: loop exit
PB: predicated region body
PF: predicated region fallthrough
CT: control target
= control target key end

     0   :  { %s1072_s0 = inlined_call_operand.vmem [shape: bf16[2,6,6,256], index: 0, kind: input, shape index: {}]   ;;  %s1073_s1 = inlined_call_operand.vmem [shape: bf16[2,4,4,256], index: 1, kind: output, shape index: {}]  }
   0x1   :  { %v8_v0 = vld [vmem:[%s1072_s0] sm:$0x33]  ;;  %v758_v7 = vld [vmem:[%s1072_s0 + $0x8] sm:$0x33]  ;;  %v782_v18 = vld [vmem:[%s1072_s0 + $0x10] sm:$0x33] }
   0x2   :  { %v32_v1 = vld [vmem:[%s1072_s0] sm:$0x77]  ;;  %v16_v3 = vunpack.c.l.bf16 %v8_v0  ;;  %v17_v4 = vunpack.c.h.bf16 %v8_v0  ;;  %v766_v8 = vld [vmem:[%s1072_s0 + $0x8] sm:$0x77]  ;;  %v217_v12 = vunpack.c.l.bf16 %v758_v7  ;;  %v218_v13 = vunpack.c.h.bf16 %v758_v7  ;;  %v790_v23 = vld [vmem:[%s1072_s0 + $0x10] sm:$0x77] }
   0x3   :  { %v120_v2 = vld [vmem:[%s1072_s0] sm:$0x66]  ;;  %v40_v5 = vunpack.c.l.bf16 %v32_v1  ;;  %v41_v6 = vunpack.c.h.bf16 %v32_v1  ;;  %v774_v9 = vld [vmem:[%s1072_s0 + $0x8] sm:$0x66]  ;;  %v257_v16 = vunpack.c.l.bf16 %v766_v8  ;;  %v258_v17 = vunpack.c.h.bf16 %v766_v8  ;;  %v798_v28 = vld [vmem:[%s1072_s0 + $0x10] sm:$0x66] }
   0x4   :  { %v128_v10 = vunpack.c.l.bf16 %v120_v2  ;;  %v129_v11 = vunpack.c.h.bf16 %v120_v2  ;;  %v345_v21 = vunpack.c.l.bf16 %v774_v9  ;;  %v346_v22 = vunpack.c.h.bf16 %v774_v9  ;;  %v9_v29 = vld [vmem:[%s1072_s0 + $0x8] sm:$0x33]  ;;  %v759_v48 = vld [vmem:[%s1072_s0 + $0x10] sm:$0x33] }
   0x5   :  { %v72_v14 = vrot.slane %v40_v5, 1  ;;  %v73_v15 = vrot.slane %v41_v6, 1  ;;  %v289_v26 = vrot.slane %v257_v16, 1  ;;  %v290_v27 = vrot.slane %v258_v17, 1  ;;  %v33_v38 = vld [vmem:[%s1072_s0 + $0x8] sm:$0x77] }
   0x6   :  { %v160_v19 = vrot.slane %v128_v10, 2  ;;  %v161_v20 = vrot.slane %v129_v11, 2  ;;  %v377_v30 = vrot.slane %v345_v21, 2  ;;  %v378_v31 = vrot.slane %v346_v22, 2  ;;  %v121_v43 = vld [vmem:[%s1072_s0 + $0x8] sm:$0x66] }
   0x7   :  { %v104_v24 = vmax.f32 %v16_v3, %v72_v14  ;;  %v105_v25 = vmax.f32 %v17_v4, %v73_v15  ;;  %v434_v32 = vunpack.c.l.bf16 %v782_v18  ;;  %v435_v33 = vunpack.c.h.bf16 %v782_v18  ;;  %v767_v57 = vld [vmem:[%s1072_s0 + $0x10] sm:$0x77]  ;;  %v783_v11 = vld [vmem:[%s1072_s0 + $0x18] sm:$0x33] }
   0x8   :  { %v474_v36 = vunpack.c.l.bf16 %v790_v23  ;;  %v475_v37 = vunpack.c.h.bf16 %v790_v23  ;;  %v562_v39 = vunpack.c.l.bf16 %v798_v28  ;;  %v563_v40 = vunpack.c.h.bf16 %v798_v28  ;;  %v775_v62 = vld [vmem:[%s1072_s0 + $0x10] sm:$0x66]  ;;  %v791_v16 = vld [vmem:[%s1072_s0 + $0x18] sm:$0x77] }
   0x9   :  { %v192_v34 = vmax.f32 %v104_v24, %v160_v19  ;;  %v193_v35 = vmax.f32 %v105_v25, %v161_v20  ;;  %v18_v41 = vunpack.c.l.bf16 %v9_v29  ;;  %v19_v42 = vunpack.c.h.bf16 %v9_v29  ;;  %v799_v21 = vld [vmem:[%s1072_s0 + $0x18] sm:$0x66] }
   0xa   :  { %v506_v46 = vrot.slane %v474_v36, 1  ;;  %v507_v47 = vrot.slane %v475_v37, 1  ;;  %v594_v49 = vrot.slane %v562_v39, 2  ;;  %v595_v50 = vrot.slane %v563_v40, 2  ;;  %v122_v36 = vld [vmem:[%s1072_s0 + $0x10] sm:$0x66] }
   0xb   :  { %v233_v44 = vmax.f32 %v192_v34, %v217_v12  ;;  %v234_v45 = vmax.f32 %v193_v35, %v218_v13  ;;  %v42_v51 = vunpack.c.l.bf16 %v33_v38  ;;  %v43_v52 = vunpack.c.h.bf16 %v33_v38  ;;  %v34_v35 = vld [vmem:[%s1072_s0 + $0x10] sm:$0x77] }
   0xc   :  { %v130_v55 = vunpack.c.l.bf16 %v121_v43  ;;  %v131_v56 = vunpack.c.h.bf16 %v121_v43  ;;  %v219_v60 = vunpack.c.l.bf16 %v759_v48  ;;  %v220_v61 = vunpack.c.h.bf16 %v759_v48 }
   0xd   :  { %v321_v53 = vmax.f32 %v233_v44, %v289_v26  ;;  %v322_v54 = vmax.f32 %v234_v45, %v290_v27  ;;  %v74_v58 = vrot.slane %v42_v51, 1  ;;  %v75_v59 = vrot.slane %v43_v52, 1  ;;  %v10_v26 = vld [vmem:[%s1072_s0 + $0x10] sm:$0x33] }
   0xe   :  { %v162_v1 = vrot.slane %v130_v55, 2  ;;  %v163_v2 = vrot.slane %v131_v56, 2  ;;  %v259_v5 = vunpack.c.l.bf16 %v767_v57  ;;  %v260_v6 = vunpack.c.h.bf16 %v767_v57  ;;  %v776_v55 = vld [vmem:[%s1072_s0 + $0x18] sm:$0x66] }
   0xf   :  { %v409_v63 = vmax.f32 %v321_v53, %v377_v30  ;;  %v410_v0 = vmax.f32 %v322_v54, %v378_v31  ;;  %v106_v3 = vmax.f32 %v18_v41, %v74_v58  ;;  %v107_v4 = vmax.f32 %v19_v42, %v75_v59  ;;  %v760_v41 = vld [vmem:[%s1072_s0 + $0x18] sm:$0x33] }
  0x10   :  { %v347_v9 = vunpack.c.l.bf16 %v775_v62  ;;  %v348_v10 = vunpack.c.h.bf16 %v775_v62  ;;  %v291_v14 = vrot.slane %v259_v5, 1  ;;  %v292_v15 = vrot.slane %v260_v6, 1 }
  0x11   :  { %v450_v7 = vmax.f32 %v409_v63, %v434_v32  ;;  %v451_v8 = vmax.f32 %v410_v0, %v435_v33  ;;  %v194_v12 = vmax.f32 %v106_v3, %v162_v1  ;;  %v195_v13 = vmax.f32 %v107_v4, %v163_v2  ;;  %v784_v4 = vld [vmem:[%s1072_s0 + $0x20] sm:$0x33] }
  0x12   :  { %v379_v19 = vrot.slane %v347_v9, 2  ;;  %v380_v20 = vrot.slane %v348_v10, 2  ;;  %v436_v24 = vunpack.c.l.bf16 %v783_v11  ;;  %v437_v25 = vunpack.c.h.bf16 %v783_v11  ;;  %v792_v9 = vld [vmem:[%s1072_s0 + $0x20] sm:$0x77] }
  0x13   :  { %v538_v17 = vmax.f32 %v450_v7, %v506_v46  ;;  %v539_v18 = vmax.f32 %v451_v8, %v507_v47  ;;  %v235_v22 = vmax.f32 %v194_v12, %v219_v60  ;;  %v236_v23 = vmax.f32 %v195_v13, %v220_v61 }
  0x14   :  { %v476_v29 = vunpack.c.l.bf16 %v791_v16  ;;  %v477_v30 = vunpack.c.h.bf16 %v791_v16  ;;  %v564_v33 = vunpack.c.l.bf16 %v799_v21  ;;  %v565_v34 = vunpack.c.h.bf16 %v799_v21 }
  0x15   :  { %v626_v27 = vmax.f32 %v538_v17, %v594_v49  ;;  %v627_v28 = vmax.f32 %v539_v18, %v595_v50  ;;  %v323_v31 = vmax.f32 %v235_v22, %v291_v14  ;;  %v324_v32 = vmax.f32 %v236_v23, %v292_v15  ;;  %v768_v50 = vld [vmem:[%s1072_s0 + $0x18] sm:$0x77]  ;;  %v800_v14 = vld [vmem:[%s1072_s0 + $0x20] sm:$0x66] }
  0x16   :  { %v508_v38 = vrot.slane %v476_v29, 1  ;;  %v509_v39 = vrot.slane %v477_v30, 1  ;;  %v20_v40 = vunpack.c.l.bf16 %v10_v26  ;;  %v596_v44 = vrot.slane %v564_v33, 2  ;;  %v11_v15 = vld [vmem:[%s1072_s0 + $0x18] sm:$0x33] }
  0x17   :  { %v806_v37 = vpack.c.bf16 %v627_v28, %v626_v27  ;;  %v411_v42 = vmax.f32 %v323_v31, %v379_v19  ;;  %v412_v43 = vmax.f32 %v324_v32, %v380_v20  ;;  %v597_v45 = vrot.slane %v565_v34, 2  ;;  %v123_v29 = vld [vmem:[%s1072_s0 + $0x18] sm:$0x66]  ;;  %v761_v34 = vld [vmem:[%s1072_s0 + $0x20] sm:$0x33] }
  0x18   :  { %v21_v46 = vunpack.c.h.bf16 %v10_v26  ;;  %v44_v47 = vunpack.c.l.bf16 %v34_v35  ;;  %v45_v48 = vunpack.c.h.bf16 %v34_v35  ;;  %v132_v49 = vunpack.c.l.bf16 %v122_v36 }
  0x19   :  { %814 = vst.sshfl [vmem:[%s1073_s1] sm:$0x33 pattern:$0x76325410] %v806_v37  ;;  %v452_v51 = vmax.f32 %v411_v42, %v436_v24  ;;  %v453_v52 = vmax.f32 %v412_v43, %v437_v25  ;;  %v133_v53 = vunpack.c.h.bf16 %v122_v36  ;;  %v221_v54 = vunpack.c.l.bf16 %v760_v41  ;;  %v35_v24 = vld [vmem:[%s1072_s0 + $0x18] sm:$0x77] }
  0x1a   :  { %v76_v56 = vrot.slane %v44_v47, 1  ;;  %v77_v57 = vrot.slane %v45_v48, 1  ;;  %v164_v58 = vrot.slane %v132_v49, 2  ;;  %v222_v59 = vunpack.c.h.bf16 %v760_v41  ;;  %v769_v43 = vld [vmem:[%s1072_s0 + $0x20] sm:$0x77] }
  0x1b   :  { %v540_v60 = vmax.f32 %v452_v51, %v508_v38  ;;  %v541_v61 = vmax.f32 %v453_v52, %v509_v39  ;;  %v165_v62 = vrot.slane %v133_v53, 2  ;;  %v261_v63 = vunpack.c.l.bf16 %v768_v50  ;;  %v777_v48 = vld [vmem:[%s1072_s0 + $0x20] sm:$0x66] }
  0x1c   :  { %v108_v0 = vmax.f32 %v20_v40, %v76_v56  ;;  %v109_v1 = vmax.f32 %v21_v46, %v77_v57  ;;  %v262_v2 = vunpack.c.h.bf16 %v768_v50  ;;  %v349_v3 = vunpack.c.l.bf16 %v776_v55 }
  0x1d   :  { %v628_v5 = vmax.f32 %v540_v60, %v596_v44  ;;  %v629_v6 = vmax.f32 %v541_v61, %v597_v45  ;;  %v293_v7 = vrot.slane %v261_v63, 1  ;;  %v350_v8 = vunpack.c.h.bf16 %v776_v55  ;;  %v785_v61 = vld [vmem:[%s1072_s0 + $0x28] sm:$0x33] }
  0x1e   :  { %v196_v10 = vmax.f32 %v108_v0, %v164_v58  ;;  %v197_v11 = vmax.f32 %v109_v1, %v165_v62  ;;  %v294_v12 = vrot.slane %v262_v2, 1  ;;  %v381_v13 = vrot.slane %v349_v3, 2  ;;  %v793_v2 = vld [vmem:[%s1072_s0 + $0x28] sm:$0x77] }
  0x1f   :  { %v807_v16 = vpack.c.bf16 %v629_v6, %v628_v5  ;;  %v382_v17 = vrot.slane %v350_v8, 2  ;;  %v438_v18 = vunpack.c.l.bf16 %v784_v4  ;;  %v439_v19 = vunpack.c.h.bf16 %v784_v4  ;;  %v801_v3 = vld [vmem:[%s1072_s0 + $0x28] sm:$0x66]  ;;  %v12_v8 = vld [vmem:[%s1072_s0 + $0x30] sm:$0x33] }
  0x20   :  { %v237_v20 = vmax.f32 %v196_v10, %v221_v54  ;;  %v238_v21 = vmax.f32 %v197_v11, %v222_v59  ;;  %v478_v22 = vunpack.c.l.bf16 %v792_v9  ;;  %v479_v23 = vunpack.c.h.bf16 %v792_v9 }
  0x21   :  { %815 = vst.sshfl [vmem:[%s1073_s1 + $0x4] sm:$0x33 pattern:$0x76325410] %v807_v16  ;;  %v566_v25 = vunpack.c.l.bf16 %v800_v14  ;;  %v567_v26 = vunpack.c.h.bf16 %v800_v14  ;;  %v22_v27 = vunpack.c.l.bf16 %v11_v15  ;;  %v23_v28 = vunpack.c.h.bf16 %v11_v15 }
  0x22   :  { %v325_v30 = vmax.f32 %v237_v20, %v293_v7  ;;  %v326_v31 = vmax.f32 %v238_v21, %v294_v12  ;;  %v510_v32 = vrot.slane %v478_v22, 1  ;;  %v511_v33 = vrot.slane %v479_v23, 1  ;;  %v124_v22 = vld [vmem:[%s1072_s0 + $0x30] sm:$0x66]  ;;  %v762_v23 = vld [vmem:[%s1072_s0 + $0x38] sm:$0x33] }
  0x23   :  { %v598_v35 = vrot.slane %v566_v25, 2  ;;  %v599_v36 = vrot.slane %v567_v26, 2  ;;  %v46_v37 = vunpack.c.l.bf16 %v35_v24  ;;  %v47_v38 = vunpack.c.h.bf16 %v35_v24 }
  0x24   :  { %v413_v39 = vmax.f32 %v325_v30, %v381_v13  ;;  %v414_v40 = vmax.f32 %v326_v31, %v382_v17  ;;  %v134_v41 = vunpack.c.l.bf16 %v123_v29  ;;  %v135_v42 = vunpack.c.h.bf16 %v123_v29  ;;  %v36_v17 = vld [vmem:[%s1072_s0 + $0x30] sm:$0x77] }
  0x25   :  { %v78_v44 = vrot.slane %v46_v37, 1  ;;  %v79_v45 = vrot.slane %v47_v38, 1  ;;  %v223_v46 = vunpack.c.l.bf16 %v761_v34  ;;  %v224_v47 = vunpack.c.h.bf16 %v761_v34 }
  0x26   :  { %v454_v49 = vmax.f32 %v413_v39, %v438_v18  ;;  %v455_v50 = vmax.f32 %v414_v40, %v439_v19  ;;  %v166_v51 = vrot.slane %v134_v41, 2  ;;  %v167_v52 = vrot.slane %v135_v42, 2  ;;  %v778_v41 = vld [vmem:[%s1072_s0 + $0x38] sm:$0x66] }
  0x27   :  { %v110_v53 = vmax.f32 %v22_v27, %v78_v44  ;;  %v111_v54 = vmax.f32 %v23_v28, %v79_v45  ;;  %v263_v55 = vunpack.c.l.bf16 %v769_v43  ;;  %v264_v56 = vunpack.c.h.bf16 %v769_v43 }
  0x28   :  { %v542_v57 = vmax.f32 %v454_v49, %v510_v32  ;;  %v543_v58 = vmax.f32 %v455_v50, %v511_v33  ;;  %v351_v59 = vunpack.c.l.bf16 %v777_v48  ;;  %v352_v60 = vunpack.c.h.bf16 %v777_v48  ;;  %v770_v32 = vld [vmem:[%s1072_s0 + $0x38] sm:$0x77]  ;;  %v786_v50 = vld [vmem:[%s1072_s0 + $0x40] sm:$0x33] }
  0x29   :  { %v198_v62 = vmax.f32 %v110_v53, %v166_v51  ;;  %v199_v63 = vmax.f32 %v111_v54, %v167_v52  ;;  %v295_v0 = vrot.slane %v263_v55, 1  ;;  %v296_v1 = vrot.slane %v264_v56, 1  ;;  %v794_v55 = vld [vmem:[%s1072_s0 + $0x40] sm:$0x77] }
  0x2a   :  { %v630_v4 = vmax.f32 %v542_v57, %v598_v35  ;;  %v631_v5 = vmax.f32 %v543_v58, %v599_v36  ;;  %v383_v6 = vrot.slane %v351_v59, 2  ;;  %v384_v7 = vrot.slane %v352_v60, 2  ;;  %v802_v60 = vld [vmem:[%s1072_s0 + $0x40] sm:$0x66] }
  0x2b   :  { %v239_v9 = vmax.f32 %v198_v62, %v223_v46  ;;  %v240_v10 = vmax.f32 %v199_v63, %v224_v47  ;;  %v440_v11 = vunpack.c.l.bf16 %v785_v61  ;;  %v441_v12 = vunpack.c.h.bf16 %v785_v61 }
  0x2c   :  { %v808_v13 = vpack.c.bf16 %v631_v5, %v630_v4  ;;  %v480_v14 = vunpack.c.l.bf16 %v793_v2  ;;  %v481_v15 = vunpack.c.h.bf16 %v793_v2  ;;  %v568_v16 = vunpack.c.l.bf16 %v801_v3 }
  0x2d   :  { %v327_v18 = vmax.f32 %v239_v9, %v295_v0  ;;  %v328_v19 = vmax.f32 %v240_v10, %v296_v1  ;;  %v569_v20 = vunpack.c.h.bf16 %v801_v3  ;;  %v24_v21 = vunpack.c.l.bf16 %v12_v8  ;;  %v13_v1 = vld [vmem:[%s1072_s0 + $0x38] sm:$0x33] }
  0x2e   :  { %816 = vst.sshfl [vmem:[%s1073_s1 + $0x8] sm:$0x33 pattern:$0x76325410] %v808_v13  ;;  %v512_v24 = vrot.slane %v480_v14, 1  ;;  %v513_v25 = vrot.slane %v481_v15, 1  ;;  %v25_v27 = vunpack.c.h.bf16 %v12_v8  ;;  %v48_v31 = vunpack.c.l.bf16 %v36_v17 }
  0x2f   :  { %v600_v26 = vrot.slane %v568_v16, 2  ;;  %v415_v28 = vmax.f32 %v327_v18, %v383_v6  ;;  %v416_v29 = vmax.f32 %v328_v19, %v384_v7  ;;  %v601_v30 = vrot.slane %v569_v20, 2  ;;  %v37_v10 = vld [vmem:[%s1072_s0 + $0x38] sm:$0x77]  ;;  %v763_v16 = vld [vmem:[%s1072_s0 + $0x40] sm:$0x33] }
  0x30   :  { %v49_v33 = vunpack.c.h.bf16 %v36_v17  ;;  %v136_v34 = vunpack.c.l.bf16 %v124_v22  ;;  %v137_v35 = vunpack.c.h.bf16 %v124_v22  ;;  %v225_v36 = vunpack.c.l.bf16 %v762_v23 }
  0x31   :  { %v456_v37 = vmax.f32 %v415_v28, %v440_v11  ;;  %v457_v38 = vmax.f32 %v416_v29, %v441_v12  ;;  %v80_v39 = vrot.slane %v48_v31, 1  ;;  %v226_v40 = vunpack.c.h.bf16 %v762_v23  ;;  %v125_v11 = vld [vmem:[%s1072_s0 + $0x38] sm:$0x66] }
  0x32   :  { %v81_v42 = vrot.slane %v49_v33, 1  ;;  %v168_v43 = vrot.slane %v136_v34, 2  ;;  %v169_v44 = vrot.slane %v137_v35, 2  ;;  %v265_v45 = vunpack.c.l.bf16 %v770_v32 }
  0x33   :  { %v544_v46 = vmax.f32 %v456_v37, %v512_v24  ;;  %v545_v47 = vmax.f32 %v457_v38, %v513_v25  ;;  %v112_v48 = vmax.f32 %v24_v21, %v80_v39  ;;  %v266_v49 = vunpack.c.h.bf16 %v770_v32  ;;  %v771_v25 = vld [vmem:[%s1072_s0 + $0x40] sm:$0x77] }
  0x34   :  { %v113_v51 = vmax.f32 %v25_v27, %v81_v42  ;;  %v297_v52 = vrot.slane %v265_v45, 1  ;;  %v353_v53 = vunpack.c.l.bf16 %v778_v41  ;;  %v354_v54 = vunpack.c.h.bf16 %v778_v41 }
  0x35   :  { %v632_v56 = vmax.f32 %v544_v46, %v600_v26  ;;  %v633_v57 = vmax.f32 %v545_v47, %v601_v30  ;;  %v200_v58 = vmax.f32 %v112_v48, %v168_v43  ;;  %v298_v59 = vrot.slane %v266_v49, 1  ;;  %v779_v30 = vld [vmem:[%s1072_s0 + $0x40] sm:$0x66]  ;;  %v787_v43 = vld [vmem:[%s1072_s0 + $0x48] sm:$0x33] }
  0x36   :  { %v201_v61 = vmax.f32 %v113_v51, %v169_v44  ;;  %v385_v62 = vrot.slane %v353_v53, 2  ;;  %v386_v63 = vrot.slane %v354_v54, 2  ;;  %v442_v0 = vunpack.c.l.bf16 %v786_v50  ;;  %v795_v48 = vld [vmem:[%s1072_s0 + $0x48] sm:$0x77]  ;;  %v14_v54 = vld [vmem:[%s1072_s0 + $0x40] sm:$0x33] }
  0x37   :  { %v809_v2 = vpack.c.bf16 %v633_v57, %v632_v56  ;;  %v241_v3 = vmax.f32 %v200_v58, %v225_v36  ;;  %v443_v4 = vunpack.c.h.bf16 %v786_v50  ;;  %v482_v5 = vunpack.c.l.bf16 %v794_v55  ;;  %v803_v53 = vld [vmem:[%s1072_s0 + $0x48] sm:$0x66] }
  0x38   :  { %v242_v6 = vmax.f32 %v201_v61, %v226_v40  ;;  %v483_v7 = vunpack.c.h.bf16 %v794_v55  ;;  %v570_v8 = vunpack.c.l.bf16 %v802_v60  ;;  %v571_v9 = vunpack.c.h.bf16 %v802_v60 }
  0x39   :  { %817 = vst.sshfl [vmem:[%s1073_s1 + $0xc] sm:$0x33 pattern:$0x76325410] %v809_v2  ;;  %v329_v12 = vmax.f32 %v241_v3, %v297_v52  ;;  %v514_v13 = vrot.slane %v482_v5, 1  ;;  %v26_v14 = vunpack.c.l.bf16 %v13_v1  ;;  %v27_v15 = vunpack.c.h.bf16 %v13_v1 }
  0x3a   :  { %v330_v17 = vmax.f32 %v242_v6, %v298_v59  ;;  %v515_v18 = vrot.slane %v483_v7, 1  ;;  %v602_v19 = vrot.slane %v570_v8, 2  ;;  %v603_v20 = vrot.slane %v571_v9, 2  ;;  %v764_v9 = vld [vmem:[%s1072_s0 + $0x48] sm:$0x33] }
  0x3b   :  { %v417_v21 = vmax.f32 %v329_v12, %v385_v62  ;;  %v50_v22 = vunpack.c.l.bf16 %v37_v10  ;;  %v51_v23 = vunpack.c.h.bf16 %v37_v10  ;;  %v138_v24 = vunpack.c.l.bf16 %v125_v11 }
  0x3c   :  { %v418_v26 = vmax.f32 %v330_v17, %v386_v63  ;;  %v139_v27 = vunpack.c.h.bf16 %v125_v11  ;;  %v227_v28 = vunpack.c.l.bf16 %v763_v16  ;;  %v228_v29 = vunpack.c.h.bf16 %v763_v16  ;;  %v38_v63 = vld [vmem:[%s1072_s0 + $0x40] sm:$0x77] }
  0x3d   :  { %v458_v31 = vmax.f32 %v417_v21, %v442_v0  ;;  %v82_v32 = vrot.slane %v50_v22, 1  ;;  %v83_v33 = vrot.slane %v51_v23, 1  ;;  %v170_v34 = vrot.slane %v138_v24, 2  ;;  %v780_v23 = vld [vmem:[%s1072_s0 + $0x48] sm:$0x66] }
  0x3e   :  { %v459_v35 = vmax.f32 %v418_v26, %v443_v4  ;;  %v171_v36 = vrot.slane %v139_v27, 2  ;;  %v267_v37 = vunpack.c.l.bf16 %v771_v25  ;;  %v268_v38 = vunpack.c.h.bf16 %v771_v25  ;;  %v126_v4 = vld [vmem:[%s1072_s0 + $0x40] sm:$0x66] }
  0x3f   :  { %v546_v39 = vmax.f32 %v458_v31, %v514_v13  ;;  %v114_v40 = vmax.f32 %v26_v14, %v82_v32  ;;  %v115_v41 = vmax.f32 %v27_v15, %v83_v33  ;;  %v355_v42 = vunpack.c.l.bf16 %v779_v30 }
  0x40   :  { %v547_v44 = vmax.f32 %v459_v35, %v515_v18  ;;  %v299_v45 = vrot.slane %v267_v37, 1  ;;  %v300_v46 = vrot.slane %v268_v38, 1  ;;  %v356_v47 = vunpack.c.h.bf16 %v779_v30  ;;  %v772_v18 = vld [vmem:[%s1072_s0 + $0x48] sm:$0x77] }
  0x41   :  { %v634_v49 = vmax.f32 %v546_v39, %v602_v19  ;;  %v202_v50 = vmax.f32 %v114_v40, %v170_v34  ;;  %v203_v51 = vmax.f32 %v115_v41, %v171_v36  ;;  %v387_v52 = vrot.slane %v355_v42, 2  ;;  %v788_v36 = vld [vmem:[%s1072_s0 + $0x50] sm:$0x33] }
  0x42   :  { %v635_v55 = vmax.f32 %v547_v44, %v603_v20  ;;  %v388_v56 = vrot.slane %v356_v47, 2  ;;  %v444_v57 = vunpack.c.l.bf16 %v787_v43  ;;  %v445_v58 = vunpack.c.h.bf16 %v787_v43  ;;  %v796_v41 = vld [vmem:[%s1072_s0 + $0x50] sm:$0x77]  ;;  %v15_v47 = vld [vmem:[%s1072_s0 + $0x48] sm:$0x33] }
  0x43   :  { %v243_v59 = vmax.f32 %v202_v50, %v227_v28  ;;  %v244_v60 = vmax.f32 %v203_v51, %v228_v29  ;;  %v484_v61 = vunpack.c.l.bf16 %v795_v48  ;;  %v485_v62 = vunpack.c.h.bf16 %v795_v48 }
  0x44   :  { %v810_v0 = vpack.c.bf16 %v635_v55, %v634_v49  ;;  %v572_v1 = vunpack.c.l.bf16 %v803_v53  ;;  %v573_v2 = vunpack.c.h.bf16 %v803_v53  ;;  %v28_v3 = vunpack.c.l.bf16 %v14_v54 }
  0x45   :  { %v331_v5 = vmax.f32 %v243_v59, %v299_v45  ;;  %v332_v6 = vmax.f32 %v244_v60, %v300_v46  ;;  %v516_v7 = vrot.slane %v484_v61, 1  ;;  %v517_v8 = vrot.slane %v485_v62, 1  ;;  %v804_v46 = vld [vmem:[%s1072_s0 + $0x50] sm:$0x66]  ;;  %v127_v61 = vld [vmem:[%s1072_s0 + $0x48] sm:$0x66] }
  0x46   :  { %818 = vst.sshfl [vmem:[%s1073_s1 + $0x10] sm:$0x33 pattern:$0x76325410] %v810_v0  ;;  %v604_v10 = vrot.slane %v572_v1, 2  ;;  %v605_v11 = vrot.slane %v573_v2, 2  ;;  %v29_v12 = vunpack.c.h.bf16 %v14_v54  ;;  %v52_v13 = vunpack.c.l.bf16 %v38_v63 }
  0x47   :  { %v419_v14 = vmax.f32 %v331_v5, %v387_v52  ;;  %v420_v15 = vmax.f32 %v332_v6, %v388_v56  ;;  %v53_v16 = vunpack.c.h.bf16 %v38_v63  ;;  %v140_v17 = vunpack.c.l.bf16 %v126_v4  ;;  %v39_v56 = vld [vmem:[%s1072_s0 + $0x48] sm:$0x77]  ;;  %v765_v2 = vld [vmem:[%s1072_s0 + $0x50] sm:$0x33] }
  0x48   :  { %v84_v19 = vrot.slane %v52_v13, 1  ;;  %v141_v20 = vunpack.c.h.bf16 %v126_v4  ;;  %v229_v21 = vunpack.c.l.bf16 %v764_v9  ;;  %v230_v22 = vunpack.c.h.bf16 %v764_v9 }
  0x49   :  { %v460_v24 = vmax.f32 %v419_v14, %v444_v57  ;;  %v461_v25 = vmax.f32 %v420_v15, %v445_v58  ;;  %v85_v26 = vrot.slane %v53_v16, 1  ;;  %v172_v27 = vrot.slane %v140_v17, 2  ;;  %v781_v16 = vld [vmem:[%s1072_s0 + $0x50] sm:$0x66] }
  0x4a   :  { %v116_v28 = vmax.f32 %v28_v3, %v84_v19  ;;  %v173_v29 = vrot.slane %v141_v20, 2  ;;  %v269_v30 = vunpack.c.l.bf16 %v772_v18  ;;  %v270_v31 = vunpack.c.h.bf16 %v772_v18 }
  0x4b   :  { %v548_v32 = vmax.f32 %v460_v24, %v516_v7  ;;  %v549_v33 = vmax.f32 %v461_v25, %v517_v8  ;;  %v117_v34 = vmax.f32 %v29_v12, %v85_v26  ;;  %v357_v35 = vunpack.c.l.bf16 %v780_v23 }
  0x4c   :  { %v204_v37 = vmax.f32 %v116_v28, %v172_v27  ;;  %v301_v38 = vrot.slane %v269_v30, 1  ;;  %v302_v39 = vrot.slane %v270_v31, 1  ;;  %v358_v40 = vunpack.c.h.bf16 %v780_v23 }
  0x4d   :  { %v636_v42 = vmax.f32 %v548_v32, %v604_v10  ;;  %v637_v43 = vmax.f32 %v549_v33, %v605_v11  ;;  %v205_v44 = vmax.f32 %v117_v34, %v173_v29  ;;  %v389_v45 = vrot.slane %v357_v35, 2  ;;  %v773_v11 = vld [vmem:[%s1072_s0 + $0x50] sm:$0x77]  ;;  %v797_v29 = vld [vmem:[%s1072_s0 + $0x58] sm:$0x77] }
  0x4e   :  { %v245_v48 = vmax.f32 %v204_v37, %v229_v21  ;;  %v390_v49 = vrot.slane %v358_v40, 2  ;;  %v446_v50 = vunpack.c.l.bf16 %v788_v36  ;;  %v447_v51 = vunpack.c.h.bf16 %v788_v36  ;;  %v789_v36 = vld [vmem:[%s1072_s0 + $0x58] sm:$0x33] }
  0x4f   :  { %v811_v52 = vpack.c.bf16 %v637_v43, %v636_v42  ;;  %v246_v53 = vmax.f32 %v205_v44, %v230_v22  ;;  %v486_v54 = vunpack.c.l.bf16 %v796_v41  ;;  %v487_v55 = vunpack.c.h.bf16 %v796_v41  ;;  %v805_v37 = vld [vmem:[%s1072_s0 + $0x58] sm:$0x66] }
  0x50   :  { %v333_v57 = vmax.f32 %v245_v48, %v301_v38  ;;  %v574_v58 = vunpack.c.l.bf16 %v804_v46  ;;  %v575_v59 = vunpack.c.h.bf16 %v804_v46  ;;  %v30_v60 = vunpack.c.l.bf16 %v15_v47 }
  0x51   :  { %819 = vst.sshfl [vmem:[%s1073_s1 + $0x14] sm:$0x33 pattern:$0x76325410] %v811_v52  ;;  %v334_v62 = vmax.f32 %v246_v53, %v302_v39  ;;  %v518_v63 = vrot.slane %v486_v54, 1  ;;  %v519_v0 = vrot.slane %v487_v55, 1  ;;  %v31_v1 = vunpack.c.h.bf16 %v15_v47 }
  0x52   :  { %v421_v3 = vmax.f32 %v333_v57, %v389_v45  ;;  %v606_v4 = vrot.slane %v574_v58, 2  ;;  %v607_v5 = vrot.slane %v575_v59, 2  ;;  %v54_v6 = vunpack.c.l.bf16 %v39_v56 }
  0x53   :  { %v422_v7 = vmax.f32 %v334_v62, %v390_v49  ;;  %v55_v8 = vunpack.c.h.bf16 %v39_v56  ;;  %v142_v9 = vunpack.c.l.bf16 %v127_v61  ;;  %v143_v10 = vunpack.c.h.bf16 %v127_v61 }
  0x54   :  { %v462_v12 = vmax.f32 %v421_v3, %v446_v50  ;;  %v86_v13 = vrot.slane %v54_v6, 1  ;;  %v231_v14 = vunpack.c.l.bf16 %v765_v2  ;;  %v232_v15 = vunpack.c.h.bf16 %v765_v2 }
  0x55   :  { %v463_v17 = vmax.f32 %v422_v7, %v447_v51  ;;  %v87_v18 = vrot.slane %v55_v8, 1  ;;  %v174_v19 = vrot.slane %v142_v9, 2  ;;  %v175_v20 = vrot.slane %v143_v10, 2 }
  0x56   :  { %v550_v21 = vmax.f32 %v462_v12, %v518_v63  ;;  %v118_v22 = vmax.f32 %v30_v60, %v86_v13  ;;  %v271_v23 = vunpack.c.l.bf16 %v773_v11  ;;  %v272_v24 = vunpack.c.h.bf16 %v773_v11 }
  0x57   :  { %v551_v25 = vmax.f32 %v463_v17, %v519_v0  ;;  %v119_v26 = vmax.f32 %v31_v1, %v87_v18  ;;  %v359_v27 = vunpack.c.l.bf16 %v781_v16  ;;  %v360_v28 = vunpack.c.h.bf16 %v781_v16 }
  0x58   :  { %v638_v30 = vmax.f32 %v550_v21, %v606_v4  ;;  %v206_v31 = vmax.f32 %v118_v22, %v174_v19  ;;  %v303_v32 = vrot.slane %v271_v23, 1  ;;  %v304_v35 = vrot.slane %v272_v24, 1 }
  0x59   :  { %v639_v33 = vmax.f32 %v551_v25, %v607_v5  ;;  %v207_v34 = vmax.f32 %v119_v26, %v175_v20  ;;  %v391_v39 = vrot.slane %v359_v27, 2  ;;  %v488_v40 = vunpack.c.l.bf16 %v797_v29 }
  0x5a   :  { %v247_v38 = vmax.f32 %v206_v31, %v231_v14  ;;  %v392_v43 = vrot.slane %v360_v28, 2  ;;  %v489_v44 = vunpack.c.h.bf16 %v797_v29  ;;  %v448_v46 = vunpack.c.l.bf16 %v789_v36 }
  0x5b   :  { %v812_v41 = vpack.c.bf16 %v639_v33, %v638_v30  ;;  %v248_v42 = vmax.f32 %v207_v34, %v232_v15  ;;  %v576_v47 = vunpack.c.l.bf16 %v805_v37  ;;  %v449_v49 = vunpack.c.h.bf16 %v789_v36 }
  0x5c   :  { %v335_v45 = vmax.f32 %v247_v38, %v303_v32  ;;  %v577_v50 = vunpack.c.h.bf16 %v805_v37  ;;  %v520_v52 = vrot.slane %v488_v40, 1  ;;  %v521_v54 = vrot.slane %v489_v44, 1 }
  0x5d   :  { %820 = vst.sshfl [vmem:[%s1073_s1 + $0x18] sm:$0x33 pattern:$0x76325410] %v812_v41  ;;  %v336_v48 = vmax.f32 %v248_v42, %v304_v35  ;;  %v608_v56 = vrot.slane %v576_v47, 2 }
  0x5e   :  { %v423_v51 = vmax.f32 %v335_v45, %v391_v39  ;;  %v609_v58 = vrot.slane %v577_v50, 2 }
  0x5f   :  { %v424_v53 = vmax.f32 %v336_v48, %v392_v43 }
  0x60   :  { %v464_v55 = vmax.f32 %v423_v51, %v448_v46 }
  0x61   :  { %v465_v57 = vmax.f32 %v424_v53, %v449_v49 }
  0x62   :  { %v552_v59 = vmax.f32 %v464_v55, %v520_v52 }
  0x63   :  { %v553_v60 = vmax.f32 %v465_v57, %v521_v54 }
  0x64   :  { %v640_v61 = vmax.f32 %v552_v59, %v608_v56 }
  0x65   :  { %v641_v62 = vmax.f32 %v553_v60, %v609_v58 }
  0x67   :  { %v813_v63 = vpack.c.bf16 %v641_v62, %v640_v61 }
  0x69   :  { %821 = vst.sshfl [vmem:[%s1073_s1 + $0x1c] sm:$0x33 pattern:$0x76325410] %v813_v63 }

// kernel: inception_net_forward.27
= control target key start
LH: loop header
LB: loop body
LE: loop exit
PB: predicated region body
PF: predicated region fallthrough
CT: control target
= control target key end

     0   :  { %s3145_s1 = inlined_call_operand.vmem [shape: bf16[2304,128], index: 1, kind: input, shape index: {}]   ;;  %s3146_s0 = inlined_call_operand.vmem [shape: bf16[32,2304], index: 0, kind: input, shape index: {}]   ;;  %s3147_s2 = inlined_call_operand.vmem [shape: f32[1,128], index: 2, kind: input, shape index: {}]   ;;  %s3148_s3 = inlined_call_operand.vmem [shape: f32[1,128], index: 3, kind: input, shape index: {}]   ;;  %s3149_s4 = inlined_call_operand.vmem [shape: bf16[32,128], index: 4, kind: output, shape index: {}]  }
   0x1   :  { %v2346_v0 = vld [vmem:[%s3145_s1 + $0x78] sm:$0xff]   ;;  %v2350_v4 = vld [vmem:[%s3145_s1 + $0x70] sm:$0xff]   ;;  %v2354_v8 = vld [vmem:[%s3145_s1 + $0x68] sm:$0xff]  }
   0x2   :  { %v2347_v1 = vld [vmem:[%s3145_s1 + $0xf8] sm:$0xff]   ;;  %2078 = vmatprep.subr.bf16.mxu0 %v2346_v0  ;;  %v2351_v5 = vld [vmem:[%s3145_s1 + $0xf0] sm:$0xff]   ;;  %v2355_v9 = vld [vmem:[%s3145_s1 + $0xe8] sm:$0xff]  }
   0x3   :  { %v2348_v2 = vld [vmem:[%s3145_s1 + $0x38] sm:$0xff]   ;;  %2106 = vmatprep.subr.bf16.mxu1 %v2347_v1  ;;  %v2352_v6 = vld [vmem:[%s3145_s1 + $0x30] sm:$0xff]   ;;  %v2356_v10 = vld [vmem:[%s3145_s1 + $0x28] sm:$0xff]  }
   0x4   :  { %v2349_v3 = vld [vmem:[%s3145_s1 + $0xb8] sm:$0xff]   ;;  %2079 = vmatpush3.bf16.msra.mxu0 %v2348_v2  ;;  %v2353_v7 = vld [vmem:[%s3145_s1 + $0xb0] sm:$0xff]   ;;  %v2357_v11 = vld [vmem:[%s3145_s1 + $0xa8] sm:$0xff]  }
   0x5   :  { %2107 = vmatpush3.bf16.msra.mxu1 %v2349_v3  ;;  %2080 = vmatprep.subr.bf16.mxu0 %v2350_v4  ;;  %v2358_v12 = vld [vmem:[%s3145_s1 + $0x60] sm:$0xff]   ;;  %v2362_v16 = vld [vmem:[%s3145_s1 + $0x58] sm:$0xff]   ;;  %v2366_v20 = vld [vmem:[%s3145_s1 + $0x50] sm:$0xff]  }
   0x6   :  { %2108 = vmatprep.subr.bf16.mxu1 %v2351_v5  ;;  %v2359_v13 = vld [vmem:[%s3145_s1 + $0xe0] sm:$0xff]   ;;  %v2363_v17 = vld [vmem:[%s3145_s1 + $0xd8] sm:$0xff]   ;;  %v2367_v21 = vld [vmem:[%s3145_s1 + $0xd0] sm:$0xff]  }
   0x7   :  { %v2360_v14 = vld [vmem:[%s3145_s1 + $0x20] sm:$0xff]   ;;  %v2364_v18 = vld [vmem:[%s3145_s1 + $0x18] sm:$0xff]   ;;  %v2368_v22 = vld [vmem:[%s3145_s1 + $0x10] sm:$0xff]  }
   0x8   :  { %2081 = vmatpush3.bf16.msra.mxu0 %v2352_v6  ;;  %v2361_v15 = vld [vmem:[%s3145_s1 + $0xa0] sm:$0xff]   ;;  %v2365_v19 = vld [vmem:[%s3145_s1 + $0x98] sm:$0xff]   ;;  %v2369_v23 = vld [vmem:[%s3145_s1 + $0x90] sm:$0xff]  }
   0x9   :  { %2109 = vmatpush3.bf16.msra.mxu1 %v2353_v7  ;;  %2082 = vmatprep.subr.bf16.mxu0 %v2354_v8  ;;  %v2370_v24 = vld [vmem:[%s3145_s1 + $0x48] sm:$0xff]   ;;  %v2374_v28 = vld [vmem:[%s3145_s1 + $0x40] sm:$0xff]   ;;  %v2384_v36 = vld [vmem:[%s3145_s1 + $0x178] sm:$0xff]  }
   0xa   :  { %2110 = vmatprep.subr.bf16.mxu1 %v2355_v9  ;;  %v2371_v25 = vld [vmem:[%s3145_s1 + $0xc8] sm:$0xff]   ;;  %v2375_v29 = vld [vmem:[%s3145_s1 + $0xc0] sm:$0xff]   ;;  %v2385_v37 = vld [vmem:[%s3145_s1 + $0x1f8] sm:$0xff]  }
   0xb   :  { %v2372_v26 = vld [vmem:[%s3145_s1 + $0x8] sm:$0xff]   ;;  %v2376_v30 = vld [vmem:[%s3145_s1] sm:$0xff]   ;;  %v2386_v38 = vld [vmem:[%s3145_s1 + $0x138] sm:$0xff]  }
   0xc   :  { %2083 = vmatpush3.bf16.msra.mxu0 %v2356_v10  ;;  %v2373_v27 = vld [vmem:[%s3145_s1 + $0x88] sm:$0xff]   ;;  %v2377_v31 = vld [vmem:[%s3145_s1 + $0x80] sm:$0xff]   ;;  %v2387_v39 = vld [vmem:[%s3145_s1 + $0x1b8] sm:$0xff]  }
   0xd   :  { %2111 = vmatpush3.bf16.msra.mxu1 %v2357_v11  ;;  %2084 = vmatprep.subr.bf16.mxu0 %v2358_v12  ;;  %v2378_v32 = vld [vmem:[%s3146_s0] ss:$72 sps:$4 sm:$0xff]   ;;  %v2380_v33 = vld [vmem:[%s3146_s0 + $0x4] ss:$72 sps:$4 sm:$0xff]   ;;  %v2388_v40 = vld [vmem:[%s3145_s1 + $0x170] sm:$0xff]  }
   0xe   :  { %2112 = vmatprep.subr.bf16.mxu1 %v2359_v13  ;;  %v2381_v34 = vld [vmem:[%s3146_s0 + $0x8] ss:$72 sps:$4 sm:$0xff]   ;;  %v2383_v35 = vld [vmem:[%s3146_s0 + $0xc] ss:$72 sps:$4 sm:$0xff]   ;;  %1418 = vmatprep.mubr.bf16.mxu0 %v2380_v33  ;;  %v2396_v48 = vld [vmem:[%s3145_s1 + $0x160] sm:$0xff]  }
   0xf   :  { %1467 = vmatprep.mubr.bf16.mxu1 %v2383_v35  ;;  %v2389_v41 = vld [vmem:[%s3145_s1 + $0x1f0] sm:$0xff]   ;;  %v2392_v44 = vld [vmem:[%s3145_s1 + $0x168] sm:$0xff]   ;;  %v2397_v49 = vld [vmem:[%s3145_s1 + $0x1e0] sm:$0xff]  }
  0x10   :  { %2085 = vmatpush3.bf16.msra.mxu0 %v2360_v14  ;;  %v2390_v42 = vld [vmem:[%s3145_s1 + $0x130] sm:$0xff]   ;;  %v2393_v45 = vld [vmem:[%s3145_s1 + $0x1e8] sm:$0xff]   ;;  %v2398_v50 = vld [vmem:[%s3145_s1 + $0x120] sm:$0xff]  }
  0x11   :  { %2113 = vmatpush3.bf16.msra.mxu1 %v2361_v15  ;;  %2086 = vmatprep.subr.bf16.mxu0 %v2362_v16  ;;  %v2391_v43 = vld [vmem:[%s3145_s1 + $0x1b0] sm:$0xff]   ;;  %v2394_v46 = vld [vmem:[%s3145_s1 + $0x128] sm:$0xff]   ;;  %v2399_v51 = vld [vmem:[%s3145_s1 + $0x1a0] sm:$0xff]  }
  0x12   :  { %2114 = vmatprep.subr.bf16.mxu1 %v2363_v17  ;;  %v2395_v47 = vld [vmem:[%s3145_s1 + $0x1a8] sm:$0xff]   ;;  %v2400_v52 = vld [vmem:[%s3145_s1 + $0x158] sm:$0xff]   ;;  %v2410_v60 = vld [vmem:[%s3145_s1 + $0x150] sm:$0xff]  }
  0x13   :  { %v2401_v53 = vld [vmem:[%s3145_s1 + $0x1d8] sm:$0xff]   ;;  %v2411_v61 = vld [vmem:[%s3145_s1 + $0x1d0] sm:$0xff]   ;;  %v2414_v0 = vld [vmem:[%s3145_s1 + $0x148] sm:$0xff]  }
  0x14   :  { %2087 = vmatpush3.bf16.msra.mxu0 %v2364_v18  ;;  %v2402_v54 = vld [vmem:[%s3145_s1 + $0x118] sm:$0xff]   ;;  %v2412_v62 = vld [vmem:[%s3145_s1 + $0x110] sm:$0xff]   ;;  %v2415_v1 = vld [vmem:[%s3145_s1 + $0x1c8] sm:$0xff]  }
  0x15   :  { %2115 = vmatpush3.bf16.msra.mxu1 %v2365_v19  ;;  %2088 = vmatprep.subr.bf16.mxu0 %v2366_v20  ;;  %v2403_v55 = vld [vmem:[%s3145_s1 + $0x198] sm:$0xff]   ;;  %v2413_v63 = vld [vmem:[%s3145_s1 + $0x190] sm:$0xff]   ;;  %v2416_v2 = vld [vmem:[%s3145_s1 + $0x108] sm:$0xff]  }
  0x16   :  { %2116 = vmatprep.subr.bf16.mxu1 %v2367_v21  ;;  %v2404_v56 = vld [vmem:[%s3146_s0 + $0x94] ss:$72 sps:$4 sm:$0xff]   ;;  %v2408_v58 = vld [vmem:[%s3146_s0 + $0x90] ss:$72 sps:$4 sm:$0xff]   ;;  %v2417_v3 = vld [vmem:[%s3145_s1 + $0x188] sm:$0xff]  }
  0x17   :  { %v2406_v57 = vld [vmem:[%s3146_s0 + $0x9c] ss:$72 sps:$4 sm:$0xff]   ;;  %v2409_v59 = vld [vmem:[%s3146_s0 + $0x98] ss:$72 sps:$4 sm:$0xff]   ;;  %v2432_v16 = vld [vmem:[%s3145_s1 + $0x270] sm:$0xff]  }
  0x18   :  { %2089 = vmatpush3.bf16.msra.mxu0 %v2368_v22  ;;  %v2418_v4 = vld [vmem:[%s3145_s1 + $0x140] sm:$0xff]   ;;  %v2422_v8 = vld [vmem:[%s3146_s0 + $0x10] ss:$72 sps:$4 sm:$0xff]   ;;  %v2424_v9 = vld [vmem:[%s3146_s0 + $0x14] ss:$72 sps:$4 sm:$0xff]  }
  0x19   :  { %2117 = vmatpush3.bf16.msra.mxu1 %v2369_v23  ;;  %2090 = vmatprep.subr.bf16.mxu0 %v2370_v24  ;;  %v2419_v5 = vld [vmem:[%s3145_s1 + $0x1c0] sm:$0xff]   ;;  %v2428_v12 = vld [vmem:[%s3145_s1 + $0x278] sm:$0xff]   ;;  %v2433_v17 = vld [vmem:[%s3145_s1 + $0x2f0] sm:$0xff]  }
  0x1a   :  { %2118 = vmatprep.subr.bf16.mxu1 %v2371_v25  ;;  %v2420_v6 = vld [vmem:[%s3145_s1 + $0x100] sm:$0xff]   ;;  %v2429_v13 = vld [vmem:[%s3145_s1 + $0x2f8] sm:$0xff]   ;;  %v2434_v18 = vld [vmem:[%s3145_s1 + $0x230] sm:$0xff]  }
  0x1b   :  { %v2421_v7 = vld [vmem:[%s3145_s1 + $0x180] sm:$0xff]   ;;  %v2430_v14 = vld [vmem:[%s3145_s1 + $0x238] sm:$0xff]   ;;  %v2435_v19 = vld [vmem:[%s3145_s1 + $0x2b0] sm:$0xff]  }
  0x1c   :  { %2091 = vmatpush3.bf16.msra.mxu0 %v2372_v26  ;;  %v2425_v10 = vld [vmem:[%s3146_s0 + $0x18] ss:$72 sps:$4 sm:$0xff]   ;;  %v2427_v11 = vld [vmem:[%s3146_s0 + $0x1c] ss:$72 sps:$4 sm:$0xff]   ;;  %v2439_v22 = vld [vmem:[%s3145_s1 + $0x268] sm:$0xff]  }
  0x1d   :  { %2119 = vmatpush3.bf16.msra.mxu1 %v2373_v27  ;;  %2092 = vmatprep.subr.bf16.mxu0 %v2374_v28  ;;  %v2431_v15 = vld [vmem:[%s3145_s1 + $0x2b8] sm:$0xff]   ;;  %v2436_v20 = vld [vmem:[%s3146_s0 + $0xa4] ss:$72 sps:$4 sm:$0xff]   ;;  %v2438_v21 = vld [vmem:[%s3146_s0 + $0xa0] ss:$72 sps:$4 sm:$0xff]  }
  0x1e   :  { %2120 = vmatprep.subr.bf16.mxu1 %v2375_v29  ;;  %v2440_v23 = vld [vmem:[%s3145_s1 + $0x2e8] sm:$0xff]   ;;  %v2446_v28 = vld [vmem:[%s3145_s1 + $0x260] sm:$0xff]   ;;  %v2451_v33 = vld [vmem:[%s3145_s1 + $0x2d8] sm:$0xff]  }
  0x1f   :  { %v2441_v24 = vld [vmem:[%s3146_s0 + $0xac] ss:$72 sps:$4 sm:$0xff]   ;;  %v2445_v27 = vld [vmem:[%s3146_s0 + $0xa8] ss:$72 sps:$4 sm:$0xff]   ;;  %v2447_v29 = vld [vmem:[%s3145_s1 + $0x2e0] sm:$0xff]  }
  0x20   :  { %2093 = vmatpush3.bf16.msra.mxu0 %v2376_v30  ;;  %v2443_v25 = vld [vmem:[%s3145_s1 + $0x228] sm:$0xff]   ;;  %v2448_v30 = vld [vmem:[%s3145_s1 + $0x220] sm:$0xff]   ;;  %v2453_v35 = vld [vmem:[%s3145_s1 + $0x298] sm:$0xff]  }
  0x21   :  { %2121 = vmatpush3.bf16.msra.mxu1 %v2377_v31  ;;  %2134 = vmatprep.subr.bf16.mxu0 %v2384_v36  ;;  %v2444_v26 = vld [vmem:[%s3145_s1 + $0x2a8] sm:$0xff]   ;;  %v2449_v31 = vld [vmem:[%s3145_s1 + $0x2a0] sm:$0xff]   ;;  %v2454_v36 = vld [vmem:[%s3145_s1 + $0x250] sm:$0xff]  }
  0x22   :  { %2162 = vmatprep.subr.bf16.mxu1 %v2385_v37  ;;  %v2455_v37 = vld [vmem:[%s3145_s1 + $0x2d0] sm:$0xff]  }
  0x23   :  { %1419 = vmatmul.mubr.bf16.vlgmr.msra.gmra.mxu0 %v2378_v32  ;;  %v2450_v32 = vld [vmem:[%s3145_s1 + $0x258] sm:$0xff]  }
  0x24   :  { %1468 = vmatmul.mubr.bf16.vlgmr.msra.gmra.mxu1 %v2381_v34  ;;  %2135 = vmatpush3.bf16.msra.mxu0 %v2386_v38  ;;  %v2452_v34 = vld [vmem:[%s3145_s1 + $0x218] sm:$0xff]   ;;  %v2456_v38 = vld [vmem:[%s3145_s1 + $0x210] sm:$0xff]  }
  0x25   :  { %2163 = vmatpush3.bf16.msra.mxu1 %v2387_v39  ;;  %2136 = vmatprep.subr.bf16.mxu0 %v2388_v40  ;;  %v2457_v39 = vld [vmem:[%s3145_s1 + $0x290] sm:$0xff]   ;;  %v2458_v40 = vld [vmem:[%s3145_s1 + $0x248] sm:$0xff]  }
  0x26   :  { %2164 = vmatprep.subr.bf16.mxu1 %v2389_v41  ;;  %1426 = vmatprep.mubr.bf16.mxu0 %v2404_v56  ;;  %v2459_v41 = vld [vmem:[%s3145_s1 + $0x2c8] sm:$0xff]   ;;  %v2476_v56 = vld [vmem:[%s3145_s1 + $0x370] sm:$0xff]  }
  0x27   :  { %1475 = vmatprep.mubr.bf16.mxu1 %v2406_v57  ;;  %v2477_v57 = vld [vmem:[%s3145_s1 + $0x3f0] sm:$0xff]  }
  0x28   :  { %2137 = vmatpush3.bf16.msra.mxu0 %v2390_v42  ;;  %v2460_v42 = vld [vmem:[%s3145_s1 + $0x208] sm:$0xff]  }
  0x29   :  { %2165 = vmatpush3.bf16.msra.mxu1 %v2391_v43  ;;  %2138 = vmatprep.subr.bf16.mxu0 %v2392_v44  ;;  %v2461_v43 = vld [vmem:[%s3145_s1 + $0x288] sm:$0xff]   ;;  %v2462_v44 = vld [vmem:[%s3145_s1 + $0x240] sm:$0xff]  }
  0x2a   :  { %2166 = vmatprep.subr.bf16.mxu1 %v2393_v45  ;;  %v2463_v45 = vld [vmem:[%s3145_s1 + $0x2c0] sm:$0xff]  }
  0x2b   :  { %1427 = vmatmul.mubr.bf16.gmra.mxu0 %v2408_v58  ;;  %v2478_v58 = vld [vmem:[%s3145_s1 + $0x330] sm:$0xff]  }
  0x2c   :  { %2139 = vmatpush3.bf16.msra.mxu0 %v2394_v46  ;;  %1476 = vmatmul.mubr.bf16.gmra.mxu1 %v2409_v59  ;;  %v2464_v46 = vld [vmem:[%s3145_s1 + $0x200] sm:$0xff]   ;;  %v2479_v59 = vld [vmem:[%s3145_s1 + $0x3b0] sm:$0xff]  }
  0x2d   :  { %2167 = vmatpush3.bf16.msra.mxu1 %v2395_v47  ;;  %2140 = vmatprep.subr.bf16.mxu0 %v2396_v48  ;;  %v2465_v47 = vld [vmem:[%s3145_s1 + $0x280] sm:$0xff]  }
  0x2e   :  { %2168 = vmatprep.subr.bf16.mxu1 %v2397_v49  ;;  %1516 = vmatprep.mubr.bf16.mxu0 %v2424_v9  ;;  %v2466_v48 = vld [vmem:[%s3146_s0 + $0x20] ss:$72 sps:$4 sm:$0xff]   ;;  %v2468_v49 = vld [vmem:[%s3146_s0 + $0x24] ss:$72 sps:$4 sm:$0xff]   ;;  %v2495_v9 = vld [vmem:[%s3145_s1 + $0x3d8] sm:$0xff]  }
  0x2f   :  { %1565 = vmatprep.mubr.bf16.mxu1 %v2427_v11  ;;  %v2497_v11 = vld [vmem:[%s3145_s1 + $0x398] sm:$0xff]  }
  0x30   :  { %2141 = vmatpush3.bf16.msra.mxu0 %v2398_v50  ;;  %v2469_v50 = vld [vmem:[%s3146_s0 + $0x28] ss:$72 sps:$4 sm:$0xff]  }
  0x31   :  { %2169 = vmatpush3.bf16.msra.mxu1 %v2399_v51  ;;  %2142 = vmatprep.subr.bf16.mxu0 %v2400_v52  ;;  %v2471_v51 = vld [vmem:[%s3146_s0 + $0x2c] ss:$72 sps:$4 sm:$0xff]   ;;  %v2472_v52 = vld [vmem:[%s3145_s1 + $0x378] sm:$0xff]  }
  0x32   :  { %2170 = vmatprep.subr.bf16.mxu1 %v2401_v53  ;;  %v2473_v53 = vld [vmem:[%s3145_s1 + $0x3f8] sm:$0xff]  }
  0x34   :  { %2143 = vmatpush3.bf16.msra.mxu0 %v2402_v54  ;;  %v2474_v54 = vld [vmem:[%s3145_s1 + $0x338] sm:$0xff]  }
  0x35   :  { %2171 = vmatpush3.bf16.msra.mxu1 %v2403_v55  ;;  %2144 = vmatprep.subr.bf16.mxu0 %v2410_v60  ;;  %v2475_v55 = vld [vmem:[%s3145_s1 + $0x3b8] sm:$0xff]  }
  0x36   :  { %2172 = vmatprep.subr.bf16.mxu1 %v2411_v61  ;;  %v2480_v60 = vld [vmem:[%s3146_s0 + $0xb4] ss:$72 sps:$4 sm:$0xff]   ;;  %v2482_v61 = vld [vmem:[%s3146_s0 + $0xb0] ss:$72 sps:$4 sm:$0xff]  }
  0x38   :  { %2145 = vmatpush3.bf16.msra.mxu0 %v2412_v62  ;;  %v2483_v62 = vld [vmem:[%s3145_s1 + $0x368] sm:$0xff]  }
  0x39   :  { %2173 = vmatpush3.bf16.msra.mxu1 %v2413_v63  ;;  %2146 = vmatprep.subr.bf16.mxu0 %v2414_v0  ;;  %v2484_v63 = vld [vmem:[%s3145_s1 + $0x3e8] sm:$0xff]   ;;  %v2485_v0 = vld [vmem:[%s3146_s0 + $0xbc] ss:$72 sps:$4 sm:$0xff]  }
  0x3a   :  { %2174 = vmatprep.subr.bf16.mxu1 %v2415_v1  ;;  %v2487_v1 = vld [vmem:[%s3145_s1 + $0x328] sm:$0xff]  }
  0x3c   :  { %2147 = vmatpush3.bf16.msra.mxu0 %v2416_v2  ;;  %v2488_v2 = vld [vmem:[%s3145_s1 + $0x3a8] sm:$0xff]  }
  0x3d   :  { %2175 = vmatpush3.bf16.msra.mxu1 %v2417_v3  ;;  %2148 = vmatprep.subr.bf16.mxu0 %v2418_v4  ;;  %v2489_v3 = vld [vmem:[%s3146_s0 + $0xb8] ss:$72 sps:$4 sm:$0xff]  }
  0x3e   :  { %2176 = vmatprep.subr.bf16.mxu1 %v2419_v5  ;;  %v2490_v4 = vld [vmem:[%s3145_s1 + $0x360] sm:$0xff]  }
  0x3f   :  { %v2491_v5 = vld [vmem:[%s3145_s1 + $0x3e0] sm:$0xff]  }
  0x40   :  { %2149 = vmatpush3.bf16.msra.mxu0 %v2420_v6  ;;  %v2492_v6 = vld [vmem:[%s3145_s1 + $0x320] sm:$0xff]  }
  0x41   :  { %2177 = vmatpush3.bf16.msra.mxu1 %v2421_v7  ;;  %2190 = vmatprep.subr.bf16.mxu0 %v2428_v12  ;;  %v2493_v7 = vld [vmem:[%s3145_s1 + $0x3a0] sm:$0xff]   ;;  %v2498_v12 = vld [vmem:[%s3145_s1 + $0x350] sm:$0xff]  }
  0x42   :  { %2218 = vmatprep.subr.bf16.mxu1 %v2429_v13  ;;  %v2499_v13 = vld [vmem:[%s3145_s1 + $0x3d0] sm:$0xff]  }
  0x43   :  { %1517 = vmatmul.mubr.bf16.vlgmr.msra.gmra.mxu0 %v2422_v8  ;;  %v2494_v8 = vld [vmem:[%s3145_s1 + $0x358] sm:$0xff]  }
  0x44   :  { %1566 = vmatmul.mubr.bf16.vlgmr.msra.gmra.mxu1 %v2425_v10  ;;  %2191 = vmatpush3.bf16.msra.mxu0 %v2430_v14  ;;  %v2496_v10 = vld [vmem:[%s3145_s1 + $0x318] sm:$0xff]   ;;  %v2500_v14 = vld [vmem:[%s3145_s1 + $0x310] sm:$0xff]  }
  0x45   :  { %2219 = vmatpush3.bf16.msra.mxu1 %v2431_v15  ;;  %2192 = vmatprep.subr.bf16.mxu0 %v2432_v16  ;;  %v2501_v15 = vld [vmem:[%s3145_s1 + $0x390] sm:$0xff]   ;;  %v2502_v16 = vld [vmem:[%s3145_s1 + $0x348] sm:$0xff]  }
  0x46   :  { %2220 = vmatprep.subr.bf16.mxu1 %v2433_v17  ;;  %1524 = vmatprep.mubr.bf16.mxu0 %v2436_v20  ;;  %v2503_v17 = vld [vmem:[%s3145_s1 + $0x3c8] sm:$0xff]   ;;  %v2506_v20 = vld [vmem:[%s3145_s1 + $0x340] sm:$0xff]  }
  0x47   :  { %1573 = vmatprep.mubr.bf16.mxu1 %v2441_v24  ;;  %v2510_v24 = vld [vmem:[%s3146_s0 + $0x30] ss:$72 sps:$4 sm:$0xff]  }
  0x48   :  { %2193 = vmatpush3.bf16.msra.mxu0 %v2434_v18  ;;  %v2504_v18 = vld [vmem:[%s3145_s1 + $0x308] sm:$0xff]  }
  0x49   :  { %2221 = vmatpush3.bf16.msra.mxu1 %v2435_v19  ;;  %2194 = vmatprep.subr.bf16.mxu0 %v2439_v22  ;;  %v2505_v19 = vld [vmem:[%s3145_s1 + $0x388] sm:$0xff]   ;;  %v2508_v22 = vld [vmem:[%s3145_s1 + $0x300] sm:$0xff]  }
  0x4a   :  { %2222 = vmatprep.subr.bf16.mxu1 %v2440_v23  ;;  %v2509_v23 = vld [vmem:[%s3145_s1 + $0x380] sm:$0xff]  }
  0x4b   :  { %1525 = vmatmul.mubr.bf16.gmra.mxu0 %v2438_v21  ;;  %v2507_v21 = vld [vmem:[%s3145_s1 + $0x3c0] sm:$0xff]  }
  0x4c   :  { %2195 = vmatpush3.bf16.msra.mxu0 %v2443_v25  ;;  %1574 = vmatmul.mubr.bf16.gmra.mxu1 %v2445_v27  ;;  %v2512_v25 = vld [vmem:[%s3146_s0 + $0x34] ss:$72 sps:$4 sm:$0xff]  }
  0x4d   :  { %2223 = vmatpush3.bf16.msra.mxu1 %v2444_v26  ;;  %2196 = vmatprep.subr.bf16.mxu0 %v2446_v28  ;;  %v2513_v26 = vld [vmem:[%s3146_s0 + $0x38] ss:$72 sps:$4 sm:$0xff]   ;;  %v2515_v27 = vld [vmem:[%s3146_s0 + $0x3c] ss:$72 sps:$4 sm:$0xff]  }
  0x4e   :  { %2224 = vmatprep.subr.bf16.mxu1 %v2447_v29  ;;  %1614 = vmatprep.mubr.bf16.mxu0 %v2468_v49  ;;  %v2516_v28 = vld [vmem:[%s3145_s1 + $0x478] sm:$0xff]   ;;  %v2537_v49 = vld [vmem:[%s3145_s1 + $0x400] sm:$0xff]  }
  0x4f   :  { %1663 = vmatprep.mubr.bf16.mxu1 %v2471_v51  ;;  %v2517_v29 = vld [vmem:[%s3145_s1 + $0x438] sm:$0xff]  }
  0x50   :  { %2197 = vmatpush3.bf16.msra.mxu0 %v2448_v30  ;;  %v2518_v30 = vld [vmem:[%s3145_s1 + $0x470] sm:$0xff]  }
  0x51   :  { %2225 = vmatpush3.bf16.msra.mxu1 %v2449_v31  ;;  %2198 = vmatprep.subr.bf16.mxu0 %v2450_v32  ;;  %v2519_v31 = vld [vmem:[%s3145_s1 + $0x430] sm:$0xff]   ;;  %v2520_v32 = vld [vmem:[%s3146_s0 + $0xc4] ss:$72 sps:$4 sm:$0xff]  }
  0x52   :  { %2226 = vmatprep.subr.bf16.mxu1 %v2451_v33  ;;  %v2522_v33 = vld [vmem:[%s3146_s0 + $0xc0] ss:$72 sps:$4 sm:$0xff]   ;;  %v2541_v51 = vld [vmem:[%s3146_s0 + $0xd0] ss:$72 sps:$4 sm:$0xff]  }
  0x54   :  { %2199 = vmatpush3.bf16.msra.mxu0 %v2452_v34  ;;  %v2523_v34 = vld [vmem:[%s3145_s1 + $0x468] sm:$0xff]  }
  0x55   :  { %2227 = vmatpush3.bf16.msra.mxu1 %v2453_v35  ;;  %2200 = vmatprep.subr.bf16.mxu0 %v2454_v36  ;;  %v2524_v35 = vld [vmem:[%s3146_s0 + $0xcc] ss:$72 sps:$4 sm:$0xff]  }
  0x56   :  { %2228 = vmatprep.subr.bf16.mxu1 %v2455_v37  ;;  %v2526_v36 = vld [vmem:[%s3145_s1 + $0x428] sm:$0xff]  }
  0x57   :  { %v2527_v37 = vld [vmem:[%s3146_s0 + $0xc8] ss:$72 sps:$4 sm:$0xff]  }
  0x58   :  { %2201 = vmatpush3.bf16.msra.mxu0 %v2456_v38  ;;  %v2528_v38 = vld [vmem:[%s3145_s1 + $0x460] sm:$0xff]  }
  0x59   :  { %2229 = vmatpush3.bf16.msra.mxu1 %v2457_v39  ;;  %2202 = vmatprep.subr.bf16.mxu0 %v2458_v40  ;;  %v2529_v39 = vld [vmem:[%s3145_s1 + $0x420] sm:$0xff]   ;;  %v2530_v40 = vld [vmem:[%s3145_s1 + $0x458] sm:$0xff]  }
  0x5a   :  { %2230 = vmatprep.subr.bf16.mxu1 %v2459_v41  ;;  %v2531_v41 = vld [vmem:[%s3145_s1 + $0x418] sm:$0xff]  }
  0x5c   :  { %2203 = vmatpush3.bf16.msra.mxu0 %v2460_v42  ;;  %v2532_v42 = vld [vmem:[%s3145_s1 + $0x450] sm:$0xff]  }
  0x5d   :  { %2231 = vmatpush3.bf16.msra.mxu1 %v2461_v43  ;;  %2204 = vmatprep.subr.bf16.mxu0 %v2462_v44  ;;  %v2533_v43 = vld [vmem:[%s3145_s1 + $0x410] sm:$0xff]   ;;  %v2540_v44 = vld [vmem:[%s3146_s0 + $0x44] ss:$72 sps:$4 sm:$0xff]  }
  0x5e   :  { %2232 = vmatprep.subr.bf16.mxu1 %v2463_v45  ;;  %v2534_v45 = vld [vmem:[%s3145_s1 + $0x448] sm:$0xff]  }
  0x60   :  { %2205 = vmatpush3.bf16.msra.mxu0 %v2464_v46  ;;  %v2543_v46 = vld [vmem:[%s3146_s0 + $0xd4] ss:$72 sps:$4 sm:$0xff]  }
  0x61   :  { %2233 = vmatpush3.bf16.msra.mxu1 %v2465_v47  ;;  %2246 = vmatprep.subr.bf16.mxu0 %v2472_v52  ;;  %v2535_v47 = vld [vmem:[%s3145_s1 + $0x408] sm:$0xff]  }
  0x62   :  { %2274 = vmatprep.subr.bf16.mxu1 %v2473_v53 }
  0x63   :  { %1615 = vmatmul.mubr.bf16.vlgmr.msra.gmra.mxu0 %v2466_v48  ;;  %v2536_v48 = vld [vmem:[%s3145_s1 + $0x440] sm:$0xff]  }
  0x64   :  { %1664 = vmatmul.mubr.bf16.vlgmr.msra.gmra.mxu1 %v2469_v50  ;;  %2247 = vmatpush3.bf16.msra.mxu0 %v2474_v54  ;;  %v2538_v50 = vld [vmem:[%s3146_s0 + $0x40] ss:$72 sps:$4 sm:$0xff]  }
  0x65   :  { %2275 = vmatpush3.bf16.msra.mxu1 %v2475_v55  ;;  %2248 = vmatprep.subr.bf16.mxu0 %v2476_v56 }
  0x66   :  { %2276 = vmatprep.subr.bf16.mxu1 %v2477_v57  ;;  %1622 = vmatprep.mubr.bf16.mxu0 %v2480_v60 }
  0x67   :  { %1671 = vmatprep.mubr.bf16.mxu1 %v2485_v0 }
  0x68   :  { %2249 = vmatpush3.bf16.msra.mxu0 %v2478_v58 }
  0x69   :  { %2277 = vmatpush3.bf16.msra.mxu1 %v2479_v59  ;;  %2250 = vmatprep.subr.bf16.mxu0 %v2483_v62 }
  0x6a   :  { %2278 = vmatprep.subr.bf16.mxu1 %v2484_v63 }
  0x6b   :  { %1623 = vmatmul.mubr.bf16.gmra.mxu0 %v2482_v61 }
  0x6c   :  { %2251 = vmatpush3.bf16.msra.mxu0 %v2487_v1  ;;  %1672 = vmatmul.mubr.bf16.gmra.mxu1 %v2489_v3 }
  0x6d   :  { %2279 = vmatpush3.bf16.msra.mxu1 %v2488_v2  ;;  %2252 = vmatprep.subr.bf16.mxu0 %v2490_v4 }
  0x6e   :  { %2280 = vmatprep.subr.bf16.mxu1 %v2491_v5  ;;  %1712 = vmatprep.mubr.bf16.mxu0 %v2512_v25 }
  0x6f   :  { %1761 = vmatprep.mubr.bf16.mxu1 %v2515_v27 }
  0x70   :  { %2253 = vmatpush3.bf16.msra.mxu0 %v2492_v6 }
  0x71   :  { %2281 = vmatpush3.bf16.msra.mxu1 %v2493_v7  ;;  %2254 = vmatprep.subr.bf16.mxu0 %v2494_v8 }
  0x72   :  { %2282 = vmatprep.subr.bf16.mxu1 %v2495_v9 }
  0x74   :  { %2255 = vmatpush3.bf16.msra.mxu0 %v2496_v10 }
  0x75   :  { %2283 = vmatpush3.bf16.msra.mxu1 %v2497_v11  ;;  %2256 = vmatprep.subr.bf16.mxu0 %v2498_v12 }
  0x76   :  { %2284 = vmatprep.subr.bf16.mxu1 %v2499_v13 }
  0x78   :  { %2257 = vmatpush3.bf16.msra.mxu0 %v2500_v14 }
  0x79   :  { %2285 = vmatpush3.bf16.msra.mxu1 %v2501_v15  ;;  %2258 = vmatprep.subr.bf16.mxu0 %v2502_v16 }
  0x7a   :  { %2286 = vmatprep.subr.bf16.mxu1 %v2503_v17 }
  0x7c   :  { %2259 = vmatpush3.bf16.msra.mxu0 %v2504_v18 }
  0x7d   :  { %2287 = vmatpush3.bf16.msra.mxu1 %v2505_v19  ;;  %2260 = vmatprep.subr.bf16.mxu0 %v2506_v20 }
  0x7e   :  { %2288 = vmatprep.subr.bf16.mxu1 %v2507_v21 }
  0x80   :  { %2261 = vmatpush3.bf16.msra.mxu0 %v2508_v22 }
  0x81   :  { %2289 = vmatpush3.bf16.msra.mxu1 %v2509_v23  ;;  %2302 = vmatprep.subr.bf16.mxu0 %v2516_v28 }
  0x82   :  { %2330 = vmatprep.subr.bf16.mxu1 %v2516_v28 }
  0x83   :  { %1713 = vmatmul.mubr.bf16.vlgmr.msra.gmra.mxu0 %v2510_v24 }
  0x84   :  { %1762 = vmatmul.mubr.bf16.vlgmr.msra.gmra.mxu1 %v2513_v26  ;;  %2303 = vmatpush3.bf16.msra.mxu0 %v2517_v29 }
  0x85   :  { %2338 = vmatpush3.bf16.msra.mxu1 %v2517_v29  ;;  %2304 = vmatprep.subr.bf16.mxu0 %v2518_v30 }
  0x86   :  { %2331 = vmatprep.subr.bf16.mxu1 %v2518_v30  ;;  %1720 = vmatprep.mubr.bf16.mxu0 %v2520_v32 }
  0x87   :  { %1769 = vmatprep.mubr.bf16.mxu1 %v2524_v35 }
  0x88   :  { %2305 = vmatpush3.bf16.msra.mxu0 %v2519_v31 }
  0x89   :  { %2339 = vmatpush3.bf16.msra.mxu1 %v2519_v31  ;;  %2306 = vmatprep.subr.bf16.mxu0 %v2523_v34 }
  0x8a   :  { %2332 = vmatprep.subr.bf16.mxu1 %v2523_v34 }
  0x8b   :  { %1721 = vmatmul.mubr.bf16.gmra.mxu0 %v2522_v33 }
  0x8c   :  { %2307 = vmatpush3.bf16.msra.mxu0 %v2526_v36  ;;  %1770 = vmatmul.mubr.bf16.gmra.mxu1 %v2527_v37 }
  0x8d   :  { %2340 = vmatpush3.bf16.msra.mxu1 %v2526_v36  ;;  %2308 = vmatprep.subr.bf16.mxu0 %v2528_v38 }
  0x8e   :  { %2333 = vmatprep.subr.bf16.mxu1 %v2528_v38  ;;  %1810 = vmatprep.mubr.bf16.mxu0 %v2540_v44 }
  0x8f   :  { %1818 = vmatprep.mubr.bf16.mxu1 %v2543_v46 }
  0x90   :  { %2309 = vmatpush3.bf16.msra.mxu0 %v2529_v39 }
  0x91   :  { %2341 = vmatpush3.bf16.msra.mxu1 %v2529_v39  ;;  %2310 = vmatprep.subr.bf16.mxu0 %v2530_v40 }
  0x92   :  { %2334 = vmatprep.subr.bf16.mxu1 %v2530_v40 }
  0x94   :  { %2311 = vmatpush3.bf16.msra.mxu0 %v2531_v41 }
  0x95   :  { %2342 = vmatpush3.bf16.msra.mxu1 %v2531_v41  ;;  %2312 = vmatprep.subr.bf16.mxu0 %v2532_v42 }
  0x96   :  { %2335 = vmatprep.subr.bf16.mxu1 %v2532_v42 }
  0x98   :  { %2313 = vmatpush3.bf16.msra.mxu0 %v2533_v43 }
  0x99   :  { %2343 = vmatpush3.bf16.msra.mxu1 %v2533_v43  ;;  %2314 = vmatprep.subr.bf16.mxu0 %v2534_v45 }
  0x9a   :  { %2336 = vmatprep.subr.bf16.mxu1 %v2534_v45 }
  0x9c   :  { %2315 = vmatpush3.bf16.msra.mxu0 %v2535_v47 }
  0x9d   :  { %2344 = vmatpush3.bf16.msra.mxu1 %v2535_v47  ;;  %2316 = vmatprep.subr.bf16.mxu0 %v2536_v48 }
  0x9e   :  { %2337 = vmatprep.subr.bf16.mxu1 %v2536_v48 }
  0xa0   :  { %2317 = vmatpush3.bf16.msra.mxu0 %v2537_v49 }
  0xa1   :  { %2345 = vmatpush3.bf16.msra.mxu1 %v2537_v49 }
  0xa3   :  { %1811 = vmatmul.mubr.bf16.vlgmr.msra.gmra.mxu0 %v2538_v50 }
  0xa4   :  { %1819 = vmatmul.mubr.bf16.vlgmr.msra.gmra.mxu1 %v2541_v51 }
  0xe3   :  { %v2094_v52 = vpop.f32.mrf.mxu0 }
  0xe4   :  { %v2122_v54 = vpop.f32.mrf.mxu1 }
  0xe5   :  { %v2095_v53 = vpop.f32.mrf.mxu0 }
  0xe6   :  { %v2123_v56 = vpop.f32.mrf.mxu1  ;;  %v2096_v41 = vadd.f32 %v2095_v53, %v2094_v52 }
  0xe7   :  { %v2097_v55 = vpop.f32.mrf.mxu0  ;;  %v2124_v42 = vadd.f32 %v2123_v56, %v2122_v54 }
  0xe8   :  { %v2125_v59 = vpop.f32.mrf.mxu1 }
  0xe9   :  { %v2098_v57 = vpop.f32.mrf.mxu0  ;;  %v1470_v49 = vadd.f32 %v2124_v42, %v2096_v41 }
  0xea   :  { %v2126_v61 = vpop.f32.mrf.mxu1  ;;  %v2099_v50 = vadd.f32 %v2098_v57, %v2097_v55 }
  0xeb   :  { %v2100_v58 = vpop.f32.mrf.mxu0  ;;  %v2127_v51 = vadd.f32 %v2126_v61, %v2125_v59 }
  0xec   :  { %v2128_v62 = vpop.f32.mrf.mxu1 }
  0xed   :  { %v2101_v60 = vpop.f32.mrf.mxu0 }
  0xee   :  { %v2129_v0 = vpop.f32.mrf.mxu1  ;;  %v2102_v45 = vadd.f32 %v2101_v60, %v2100_v58  ;;  %v1473_v58 = vadd.f32 %v2127_v51, %v2099_v50 }
  0xef   :  { %v2103_v63 = vpop.f32.mrf.mxu0  ;;  %v2130_v46 = vadd.f32 %v2129_v0, %v2128_v62 }
  0xf0   :  { %v2131_v3 = vpop.f32.mrf.mxu1 }
  0xf1   :  { %v2104_v1 = vpop.f32.mrf.mxu0 }
  0xf2   :  { %v2132_v5 = vpop.f32.mrf.mxu1 }
 0x103   :  { %v2150_v2 = vpop.f32.mrf.mxu0 }
 0x104   :  { %v2178_v6 = vpop.f32.mrf.mxu1 }
 0x105   :  { %v2151_v4 = vpop.f32.mrf.mxu0 }
 0x106   :  { %v2179_v8 = vpop.f32.mrf.mxu1  ;;  %v2152_v47 = vadd.f32 %v2151_v4, %v2150_v2 }
 0x107   :  { %v2153_v7 = vpop.f32.mrf.mxu0  ;;  %v2180_v60 = vadd.f32 %v2179_v8, %v2178_v6 }
 0x108   :  { %v3109_v10 = vpop.f32.mrf.mxu1 }
 0x109   :  { %v2154_v9 = vpop.f32.mrf.mxu0  ;;  %3150 = vst [vmem:[#allocation2_spill] sm:$0xff] %v3109_v10  ;;  %v2133_v10 = vadd.f32 %v2132_v5, %v2131_v3 }
 0x10a   :  { %v3111_v12 = vpop.f32.mrf.mxu1  ;;  %v2155_v52 = vadd.f32 %v2154_v9, %v2153_v7 }
 0x10b   :  { %v2156_v11 = vpop.f32.mrf.mxu0  ;;  %3151 = vst [vmem:[#allocation3_spill] sm:$0xff] %v3111_v12  ;;  %v2105_v12 = vadd.f32 %v2104_v1, %v2103_v63 }
 0x10c   :  { %v2184_v14 = vpop.f32.mrf.mxu1  ;;  %v1522_v57 = vadd.f32 %v2155_v52, %v1473_v58 }
 0x10d   :  { %v2157_v13 = vpop.f32.mrf.mxu0  ;;  %v1481_v2 = vadd.f32 %v2133_v10, %v2105_v12 }
 0x10e   :  { %v2185_v16 = vpop.f32.mrf.mxu1  ;;  %v2158_v48 = vadd.f32 %v2157_v13, %v2156_v11 }
 0x10f   :  { %v2159_v15 = vpop.f32.mrf.mxu0  ;;  %v2186_v56 = vadd.f32 %v2185_v16, %v2184_v14 }
 0x110   :  { %v2187_v18 = vpop.f32.mrf.mxu1  ;;  %v3157_v63 = vld [vmem:[#allocation2_spill] sm:$0xff] }
 0x111   :  { %v2160_v17 = vpop.f32.mrf.mxu0 }
 0x112   :  { %v2188_v20 = vpop.f32.mrf.mxu1  ;;  %v3158_v1 = vld [vmem:[#allocation3_spill] sm:$0xff] }
 0x113   :  { %v2189_v13 = vadd.f32 %v2188_v20, %v2187_v18  ;;  %v2183_v3 = vadd.f32 %v3158_v1, %v3157_v63 }
 0x115   :  { %v1571_v6 = vadd.f32 %v2183_v3, %v1522_v57 }
 0x123   :  { %v2206_v19 = vpop.f32.mrf.mxu0 }
 0x124   :  { %v2234_v22 = vpop.f32.mrf.mxu1 }
 0x125   :  { %v2207_v21 = vpop.f32.mrf.mxu0 }
 0x126   :  { %v2235_v24 = vpop.f32.mrf.mxu1  ;;  %v2208_v62 = vadd.f32 %v2207_v21, %v2206_v19 }
 0x127   :  { %v2209_v23 = vpop.f32.mrf.mxu0  ;;  %v2236_v8 = vadd.f32 %v2235_v24, %v2234_v22 }
 0x128   :  { %v3113_v26 = vpop.f32.mrf.mxu1 }
 0x129   :  { %v2210_v25 = vpop.f32.mrf.mxu0  ;;  %3152 = vst [vmem:[#allocation4_spill] sm:$0xff] %v3113_v26 }
 0x12a   :  { %v3115_v28 = vpop.f32.mrf.mxu1  ;;  %v2211_v7 = vadd.f32 %v2210_v25, %v2209_v23 }
 0x12b   :  { %v2212_v27 = vpop.f32.mrf.mxu0  ;;  %3153 = vst [vmem:[#allocation5_spill] sm:$0xff] %v3115_v28 }
 0x12c   :  { %v2240_v30 = vpop.f32.mrf.mxu1 }
 0x12d   :  { %v2213_v29 = vpop.f32.mrf.mxu0 }
 0x12e   :  { %v2241_v32 = vpop.f32.mrf.mxu1  ;;  %v2214_v4 = vadd.f32 %v2213_v29, %v2212_v27  ;;  %v1620_v27 = vadd.f32 %v2211_v7, %v1571_v6 }
 0x12f   :  { %v2215_v31 = vpop.f32.mrf.mxu0 }
 0x130   :  { %v2243_v34 = vpop.f32.mrf.mxu1 }
 0x131   :  { %v2216_v33 = vpop.f32.mrf.mxu0 }
 0x132   :  { %v2244_v36 = vpop.f32.mrf.mxu1  ;;  %v2217_v16 = vadd.f32 %v2216_v33, %v2215_v31  ;;  %v3160_v41 = vld [vmem:[#allocation5_spill] sm:$0xff] }
 0x133   :  { %v2245_v20 = vadd.f32 %v2244_v36, %v2243_v34 }
 0x143   :  { %v2262_v35 = vpop.f32.mrf.mxu0 }
 0x144   :  { %v3117_v37 = vpop.f32.mrf.mxu1 }
 0x145   :  { %3154 = vst [vmem:[#allocation6_spill] sm:$0xff] %v3117_v37  ;;  %v2263_v38 = vpop.f32.mrf.mxu0  ;;  %v1478_v37 = vadd.f32 %v2130_v46, %v2102_v45 }
 0x146   :  { %v3119_v39 = vpop.f32.mrf.mxu1 }
 0x147   :  { %3155 = vst [vmem:[#allocation7_spill] sm:$0xff] %v3119_v39  ;;  %v2265_v40 = vpop.f32.mrf.mxu0  ;;  %v1519_v39 = vadd.f32 %v2152_v47, %v1470_v49  ;;  %v1527_v54 = vadd.f32 %v2158_v48, %v1478_v37 }
 0x148   :  { %v3121_v43 = vpop.f32.mrf.mxu1 }
 0x149   :  { %3156 = vst [vmem:[#allocation8_spill] sm:$0xff] %v3121_v43  ;;  %v2266_v44 = vpop.f32.mrf.mxu0  ;;  %v2161_v43 = vadd.f32 %v2160_v17, %v2159_v15  ;;  %v1568_v55 = vadd.f32 %v2180_v60, %v1519_v39  ;;  %v1576_v61 = vadd.f32 %v2186_v56, %v1527_v54  ;;  %v2242_v15 = vadd.f32 %v2241_v32, %v2240_v30  ;;  %v3159_v39 = vld [vmem:[#allocation4_spill] sm:$0xff] }
 0x14a   :  { %v3123_v28 = vpop.f32.mrf.mxu1  ;;  %v2264_v17 = vadd.f32 %v2263_v38, %v2262_v35  ;;  %v2239_v42 = vadd.f32 %v3160_v41, %v3159_v39  ;;  %v2267_v25 = vadd.f32 %v2266_v44, %v2265_v40  ;;  %v2057_v40 = vld [vmem:[%s3147_s2] ss:$0 sm:$0xff] }
 0x14b   :  { %v2268_v26 = vpop.f32.mrf.mxu0  ;;  %v1530_v11 = vadd.f32 %v2161_v43, %v1481_v2  ;;  %v1617_v5 = vadd.f32 %v2208_v62, %v1568_v55  ;;  %v1625_v14 = vadd.f32 %v2214_v4, %v1576_v61 }
 0x14c   :  { %v2296_v53 = vpop.f32.mrf.mxu1  ;;  %v1669_v24 = vadd.f32 %v2239_v42, %v1620_v27  ;;  %v3161_v33 = vld [vmem:[#allocation6_spill] sm:$0xff] }
 0x14d   :  { %v2269_v0 = vpop.f32.mrf.mxu0  ;;  %v1579_v12 = vadd.f32 %v2189_v13, %v1530_v11  ;;  %v1666_v21 = vadd.f32 %v2236_v8, %v1617_v5  ;;  %v1674_v37 = vadd.f32 %v2242_v15, %v1625_v14 }
 0x14e   :  { %v2297_v59 = vpop.f32.mrf.mxu1  ;;  %v2270_v19 = vadd.f32 %v2269_v0, %v2268_v26  ;;  %v3162_v35 = vld [vmem:[#allocation7_spill] sm:$0xff]  ;;  %v1718_v48 = vadd.f32 %v2267_v25, %v1669_v24 }
 0x14f   :  { %v2271_v9 = vpop.f32.mrf.mxu0  ;;  %v1628_v18 = vadd.f32 %v2217_v16, %v1579_v12  ;;  %v1715_v23 = vadd.f32 %v2264_v17, %v1666_v21  ;;  %v2298_v31 = vadd.f32 %v2297_v59, %v2296_v53  ;;  %v2292_v26 = vadd.f32 %v3162_v35, %v3161_v33  ;;  %v2058_v59 = vld [vmem:[%s3148_s3] ss:$0 sm:$0xff] }
 0x150   :  { %v2299_v10 = vpop.f32.mrf.mxu1  ;;  %v1723_v30 = vadd.f32 %v2270_v19, %v1674_v37  ;;  %v3163_v53 = vld [vmem:[#allocation8_spill] sm:$0xff] }
 0x151   :  { %v2272_v29 = vpop.f32.mrf.mxu0  ;;  %v1677_v45 = vadd.f32 %v2245_v20, %v1628_v18  ;;  %v1764_v47 = vadd.f32 %v2292_v26, %v1715_v23  ;;  %v2295_v54 = vadd.f32 %v3123_v28, %v3163_v53 }
 0x152   :  { %v2300_v43 = vpop.f32.mrf.mxu1  ;;  %v2273_v32 = vadd.f32 %v2272_v29, %v2271_v9  ;;  %v1772_v49 = vadd.f32 %v2298_v31, %v1723_v30 }
 0x153   :  { %v2301_v51 = vadd.f32 %v2300_v43, %v2299_v10  ;;  %v1767_v0 = vadd.f32 %v2295_v54, %v1718_v48 }
 0x154   :  { %v1726_v50 = vadd.f32 %v2273_v32, %v1677_v45 }
 0x156   :  { %v1775_v57 = vadd.f32 %v2301_v51, %v1726_v50 }
 0x163   :  { %v2318_v22 = vpop.f32.mrf.mxu0 }
 0x164   :  { %v2324_v38 = vpop.f32.mrf.mxu1 }
 0x165   :  { %v2319_v46 = vpop.f32.mrf.mxu0 }
 0x166   :  { %v2320_v34 = vadd.f32 %v2319_v46, %v2318_v22  ;;  %v2325_v36 = vpop.f32.mrf.mxu1 }
 0x167   :  { %v2326_v44 = vadd.f32 %v2325_v36, %v2324_v38  ;;  %v2321_v52 = vpop.f32.mrf.mxu0 }
 0x168   :  { %v1813_v56 = vadd.f32 %v2320_v34, %v1764_v47  ;;  %v2327_v58 = vpop.f32.mrf.mxu1 }
 0x169   :  { %v1821_v60 = vadd.f32 %v2326_v44, %v1772_v49  ;;  %v2322_v62 = vpop.f32.mrf.mxu0 }
 0x16a   :  { %v1834_v2 = vmul.f32 %v2057_v40, %v1813_v56  ;;  %v2323_v4 = vadd.f32 %v2322_v62, %v2321_v52  ;;  %v2328_v55 = vpop.f32.mrf.mxu1 }
 0x16b   :  { %v1836_v61 = vmul.f32 %v2057_v40, %v1821_v60  ;;  %v2329_v11 = vadd.f32 %v2328_v55, %v2327_v58 }
 0x16c   :  { %v1816_v13 = vadd.f32 %v2323_v4, %v1767_v0  ;;  %v1845_v1 = vadd.f32 %v2058_v59, %v1834_v2 }
 0x16d   :  { %v1824_v63 = vadd.f32 %v2329_v11, %v1775_v57  ;;  %v1847_v28 = vadd.f32 %v2058_v59, %v1836_v61 }
 0x16e   :  { %v1835_v3 = vmul.f32 %v2057_v40, %v1816_v13  ;;  %v1849_v14 = vmax.f32 %v1845_v1, 0.0 }
 0x16f   :  { %v1837_v5 = vmul.f32 %v2057_v40, %v1824_v63  ;;  %v1851_v16 = vmax.f32 %v1847_v28, 0.0 }
 0x170   :  { %v1846_v7 = vadd.f32 %v2058_v59, %v1835_v3 }
 0x171   :  { %v1848_v9 = vadd.f32 %v2058_v59, %v1837_v5 }
 0x172   :  { %v1850_v15 = vmax.f32 %v1846_v7, 0.0 }
 0x173   :  { %v1852_v6 = vmax.f32 %v1848_v9, 0.0 }
 0x174   :  { %v2070_v8 = vpack.c.bf16 %v1850_v15, %v1849_v14 }
 0x175   :  { %v2075_v17 = vpack.c.bf16 %v1852_v6, %v1851_v16 }
 0x176   :  { %2071 = vst [vmem:[%s3149_s4] sm:$0xff] %v2070_v8  }
 0x177   :  { %2077 = vst [vmem:[%s3149_s4 + $0x8] sm:$0xff] %v2075_v17  }

// kernel: inception_net_forward.28
= control target key start
LH: loop header
LB: loop body
LE: loop exit
PB: predicated region body
PF: predicated region fallthrough
CT: control target
= control target key end

     0   :  { %s2586_s0 = inlined_call_operand.vmem [shape: bf16[2,6,6,384], index: 0, kind: input, shape index: {}]   ;;  %s2587_s1 = inlined_call_operand.vmem [shape: bf16[2,4,4,384], index: 1, kind: output, shape index: {}]  }
   0x1   :  { %v1309_v0 = vld [vmem:[%s2586_s0] sm:$0x33]  ;;  %v1314_v1 = vld [vmem:[%s2586_s0 + $0x8] sm:$0x3]  ;;  %v1319_v2 = vld [vmem:[%s2586_s0 + $0xc] sm:$0x33] }
   0x2   :  { %v1324_v3 = vld [vmem:[%s2586_s0 + $0x14] sm:$0x3]  ;;  %v1329_v4 = vld [vmem:[%s2586_s0 + $0x18] sm:$0x33]  ;;  %v1334_v5 = vld [vmem:[%s2586_s0 + $0x20] sm:$0x3]  ;;  %v24_v9 = vunpack.c.l.bf16 %v1309_v0  ;;  %v25_v10 = vunpack.c.h.bf16 %v1309_v0  ;;  %v26_v14 = vunpack.c.l.bf16 %v1314_v1  ;;  %v27_v15 = vunpack.c.l.bf16 %v1319_v2 }
   0x3   :  { %v1339_v6 = vld [vmem:[%s2586_s0 + $0x24] sm:$0x33]  ;;  %v1344_v7 = vld [vmem:[%s2586_s0 + $0x2c] sm:$0x3]  ;;  %v1356_v11 = vld [vmem:[%s2586_s0 + $0x50] sm:$0x3]  ;;  %v2666_v0 = vunpack.c.l.bf16 %v1329_v4  ;;  %v2667_v1 = vunpack.c.h.bf16 %v1329_v4 }
   0x4   :  { %v1349_v8 = vld [vmem:[%s2586_s0 + $0x48] sm:$0x33]  ;;  %v1361_v12 = vld [vmem:[%s2586_s0 + $0x54] sm:$0x33]  ;;  %v1366_v13 = vld [vmem:[%s2586_s0 + $0x5c] sm:$0x3] }
   0x5   :  { %v1375_v18 = vld [vmem:[%s2586_s0 + $0x60] sm:$0x33]  ;;  %v1380_v19 = vld [vmem:[%s2586_s0 + $0x68] sm:$0x3]  ;;  %v1385_v20 = vld [vmem:[%s2586_s0 + $0x6c] sm:$0x33]  ;;  %v2672_v4 = vunpack.c.l.bf16 %v1349_v8 }
   0x6   :  { %v1394_v25 = vld [vmem:[%s2586_s0 + $0x74] sm:$0x3]  ;;  %v48_v30 = vld [vmem:[%s2586_s0] sm:$0x77]  ;;  %v49_v35 = vld [vmem:[%s2586_s0 + $0x8] sm:$0x7] }
   0x7   :  { %v50_v36 = vld [vmem:[%s2586_s0 + $0xc] sm:$0x77]  ;;  %v51_v37 = vld [vmem:[%s2586_s0 + $0x14] sm:$0x7]  ;;  %v52_v42 = vld [vmem:[%s2586_s0 + $0x18] sm:$0x77]  ;;  %v64_v49 = vunpack.c.l.bf16 %v48_v30  ;;  %v65_v50 = vunpack.c.h.bf16 %v48_v30  ;;  %v66_v54 = vunpack.c.l.bf16 %v49_v35 }
   0x8   :  { %v53_v43 = vld [vmem:[%s2586_s0 + $0x20] sm:$0x7]  ;;  %v54_v44 = vld [vmem:[%s2586_s0 + $0x24] sm:$0x77]  ;;  %v55_v47 = vld [vmem:[%s2586_s0 + $0x2c] sm:$0x7]  ;;  %v67_v55 = vunpack.c.l.bf16 %v50_v36  ;;  %v68_v56 = vunpack.c.h.bf16 %v50_v36  ;;  %v69_v57 = vunpack.c.l.bf16 %v51_v37  ;;  %v70_v61 = vunpack.c.l.bf16 %v52_v42 }
   0x9   :  { %v56_v48 = vld [vmem:[%s2586_s0 + $0x48] sm:$0x77]  ;;  %v57_v51 = vld [vmem:[%s2586_s0 + $0x50] sm:$0x7]  ;;  %v58_v52 = vld [vmem:[%s2586_s0 + $0x54] sm:$0x77]  ;;  %v71_v62 = vunpack.c.h.bf16 %v52_v42  ;;  %v72_v63 = vunpack.c.l.bf16 %v53_v43  ;;  %v73_v30 = vunpack.c.l.bf16 %v54_v44  ;;  %v74_v36 = vunpack.c.h.bf16 %v54_v44 }
   0xa   :  { %v59_v53 = vld [vmem:[%s2586_s0 + $0x5c] sm:$0x7]  ;;  %v60_v58 = vld [vmem:[%s2586_s0 + $0x60] sm:$0x77]  ;;  %v61_v59 = vld [vmem:[%s2586_s0 + $0x68] sm:$0x7]  ;;  %v75_v37 = vunpack.c.l.bf16 %v55_v47  ;;  %v76_v46 = vunpack.c.l.bf16 %v56_v48  ;;  %v77_v45 = vunpack.c.h.bf16 %v56_v48  ;;  %v78_v41 = vunpack.c.l.bf16 %v57_v51 }
   0xb   :  { %v62_v60 = vld [vmem:[%s2586_s0 + $0x6c] sm:$0x77]  ;;  %v63_v35 = vld [vmem:[%s2586_s0 + $0x74] sm:$0x7]  ;;  %v79_v40 = vunpack.c.l.bf16 %v58_v52  ;;  %v80_v39 = vunpack.c.h.bf16 %v58_v52  ;;  %v81_v38 = vunpack.c.l.bf16 %v59_v53  ;;  %v82_v34 = vunpack.c.l.bf16 %v60_v58 }
   0xc   :  { %v83_v33 = vunpack.c.h.bf16 %v60_v58  ;;  %v84_v32 = vunpack.c.l.bf16 %v61_v59  ;;  %v85_v31 = vunpack.c.l.bf16 %v62_v60  ;;  %v86_v29 = vunpack.c.h.bf16 %v62_v60 }
   0xd   :  { %v87_v42 = vunpack.c.l.bf16 %v63_v35  ;;  %v112_v43 = vrot.slane %v64_v49, 1  ;;  %v113_v28 = vrot.slane %v65_v50, 1  ;;  %v114_v27 = vrot.slane %v66_v54, 1 }
   0xe   :  { %v115_v26 = vrot.slane %v67_v55, 1  ;;  %v116_v24 = vrot.slane %v68_v56, 1  ;;  %v117_v23 = vrot.slane %v69_v57, 1  ;;  %v118_v44 = vrot.slane %v70_v61, 1  ;;  %v185_v61 = vld [vmem:[%s2586_s0 + $0x8] sm:$0x6] }
   0xf   :  { %v119_v47 = vrot.slane %v71_v62, 1  ;;  %v120_v22 = vrot.slane %v72_v63, 1  ;;  %v121_v48 = vrot.slane %v73_v30, 1  ;;  %v122_v51 = vrot.slane %v74_v36, 1 }
  0x10   :  { %v123_v21 = vrot.slane %v75_v37, 1  ;;  %v124_v52 = vrot.slane %v76_v46, 1  ;;  %v125_v53 = vrot.slane %v77_v45, 1  ;;  %v126_v17 = vrot.slane %v78_v41, 1 }
  0x11   :  { %v127_v58 = vrot.slane %v79_v40, 1  ;;  %v128_v59 = vrot.slane %v80_v39, 1  ;;  %v129_v16 = vrot.slane %v81_v38, 1  ;;  %v130_v60 = vrot.slane %v82_v34, 1  ;;  %v184_v38 = vld [vmem:[%s2586_s0] sm:$0x66] }
  0x12   :  { %v131_v35 = vrot.slane %v83_v33, 1  ;;  %v132_v49 = vrot.slane %v84_v32, 1  ;;  %v133_v50 = vrot.slane %v85_v31, 1  ;;  %v134_v54 = vrot.slane %v86_v29, 1 }
  0x13   :  { %v135_v55 = vrot.slane %v87_v42, 1  ;;  %v1460_v56 = vmax.f32 %v24_v9, %v112_v43  ;;  %v1464_v57 = vmax.f32 %v25_v10, %v113_v28  ;;  %v1468_v41 = vmax.f32 %v26_v14, %v114_v27  ;;  %v188_v42 = vld [vmem:[%s2586_s0 + $0x18] sm:$0x66]  ;;  %v189_v43 = vld [vmem:[%s2586_s0 + $0x20] sm:$0x6] }
  0x14   :  { %v1472_v34 = vmax.f32 %v27_v15, %v115_v26  ;;  %v2664_v31 = vunpack.c.h.bf16 %v1319_v2  ;;  %v2665_v32 = vunpack.c.l.bf16 %v1324_v3  ;;  %v1484_v10 = vmax.f32 %v2666_v0, %v118_v44 }
  0x15   :  { %v1488_v14 = vmax.f32 %v2667_v1, %v119_v47  ;;  %v2668_v27 = vunpack.c.l.bf16 %v1334_v5  ;;  %v2669_v2 = vunpack.c.l.bf16 %v1339_v6  ;;  %v2670_v3 = vunpack.c.h.bf16 %v1339_v6 }
  0x16   :  { %v1476_v29 = vmax.f32 %v2664_v31, %v116_v24  ;;  %v1480_v9 = vmax.f32 %v2665_v32, %v117_v23  ;;  %v2671_v26 = vunpack.c.l.bf16 %v1344_v7  ;;  %v1508_v33 = vmax.f32 %v2672_v4, %v124_v52  ;;  %v192_v52 = vld [vmem:[%s2586_s0 + $0x48] sm:$0x66] }
  0x17   :  { %v1492_v15 = vmax.f32 %v2668_v27, %v120_v22  ;;  %v1496_v24 = vmax.f32 %v2669_v2, %v121_v48  ;;  %v1500_v23 = vmax.f32 %v2670_v3, %v122_v51  ;;  %v2673_v5 = vunpack.c.h.bf16 %v1349_v8  ;;  %v191_v51 = vld [vmem:[%s2586_s0 + $0x2c] sm:$0x6]  ;;  %v199_v2 = vld [vmem:[%s2586_s0 + $0x74] sm:$0x6] }
  0x18   :  { %v1504_v28 = vmax.f32 %v2671_v26, %v123_v21  ;;  %v2674_v6 = vunpack.c.l.bf16 %v1356_v11  ;;  %v2676_v7 = vunpack.c.l.bf16 %v1361_v12  ;;  %v2678_v40 = vunpack.c.h.bf16 %v1361_v12  ;;  %v186_v11 = vld [vmem:[%s2586_s0 + $0xc] sm:$0x66] }
  0x19   :  { %v1512_v22 = vmax.f32 %v2673_v5, %v125_v53  ;;  %v2680_v8 = vunpack.c.l.bf16 %v1366_v13  ;;  %v2682_v12 = vunpack.c.l.bf16 %v1375_v18  ;;  %v2684_v13 = vunpack.c.h.bf16 %v1375_v18  ;;  %v190_v18 = vld [vmem:[%s2586_s0 + $0x24] sm:$0x66]  ;;  %v198_v31 = vld [vmem:[%s2586_s0 + $0x6c] sm:$0x66] }
  0x1a   :  { %v1519_v39 = vmax.f32 %v2674_v6, %v126_v17  ;;  %v1523_v21 = vmax.f32 %v2676_v7, %v127_v58  ;;  %v1527_v45 = vmax.f32 %v2678_v40, %v128_v59  ;;  %v187_v17 = vld [vmem:[%s2586_s0 + $0x14] sm:$0x6]  ;;  %v2686_v63 = vunpack.c.l.bf16 %v1380_v19  ;;  %v195_v59 = vld [vmem:[%s2586_s0 + $0x5c] sm:$0x6] }
  0x1b   :  { %v1531_v46 = vmax.f32 %v2680_v8, %v129_v16  ;;  %v1544_v62 = vmax.f32 %v2682_v12, %v130_v60  ;;  %v1548_v16 = vmax.f32 %v2684_v13, %v131_v35  ;;  %v2688_v36 = vunpack.c.l.bf16 %v1385_v20 }
  0x1c   :  { %2675 = vst [vmem:[#allocation2_spill] sm:$0xff] %v1519_v39  ;;  %2677 = vst [vmem:[#allocation3_spill] sm:$0xff] %v1523_v21  ;;  %v1552_v30 = vmax.f32 %v2686_v63, %v132_v49  ;;  %v2690_v19 = vunpack.c.h.bf16 %v1385_v20  ;;  %v2692_v47 = vunpack.c.l.bf16 %v1394_v25  ;;  %v200_v53 = vunpack.c.l.bf16 %v184_v38  ;;  %v193_v20 = vld [vmem:[%s2586_s0 + $0x50] sm:$0x6]  ;;  %v194_v25 = vld [vmem:[%s2586_s0 + $0x54] sm:$0x66] }
  0x1d   :  { %2679 = vst [vmem:[#allocation4_spill] sm:$0xff] %v1527_v45  ;;  %2681 = vst [vmem:[#allocation5_spill] sm:$0xff] %v1531_v46  ;;  %v1556_v37 = vmax.f32 %v2688_v36, %v133_v50  ;;  %v201_v58 = vunpack.c.h.bf16 %v184_v38  ;;  %v202_v60 = vunpack.c.l.bf16 %v185_v61  ;;  %v203_v35 = vunpack.c.l.bf16 %v186_v11 }
  0x1e   :  { %2683 = vst [vmem:[#allocation6_spill] sm:$0xff] %v1544_v62  ;;  %2685 = vst [vmem:[#allocation7_spill] sm:$0xff] %v1548_v16  ;;  %v1569_v44 = vmax.f32 %v2690_v19, %v134_v54  ;;  %v1573_v48 = vmax.f32 %v2692_v47, %v135_v55  ;;  %v204_v49 = vunpack.c.h.bf16 %v186_v11  ;;  %v205_v50 = vunpack.c.l.bf16 %v187_v17  ;;  %v196_v54 = vld [vmem:[%s2586_s0 + $0x60] sm:$0x66]  ;;  %v197_v55 = vld [vmem:[%s2586_s0 + $0x68] sm:$0x6] }
  0x1f   :  { %2687 = vst [vmem:[#allocation8_spill] sm:$0xff] %v1552_v30  ;;  %2689 = vst [vmem:[#allocation9_spill] sm:$0xff] %v1556_v37  ;;  %v206_v32 = vunpack.c.l.bf16 %v188_v42  ;;  %v207_v0 = vunpack.c.h.bf16 %v188_v42  ;;  %v208_v1 = vunpack.c.l.bf16 %v189_v43  ;;  %v209_v27 = vunpack.c.l.bf16 %v190_v18 }
  0x20   :  { %2691 = vst [vmem:[#allocation10_spill] sm:$0xff] %v1569_v44  ;;  %2693 = vst [vmem:[#allocation11_spill] sm:$0xff] %v1573_v48  ;;  %v210_v3 = vunpack.c.h.bf16 %v190_v18  ;;  %v211_v26 = vunpack.c.l.bf16 %v191_v51  ;;  %v212_v4 = vunpack.c.l.bf16 %v192_v52  ;;  %v213_v5 = vunpack.c.h.bf16 %v192_v52  ;;  %v1204_v44 = vld [vmem:[%s2586_s0 + $0x78] sm:$0x33] }
  0x21   :  { %v214_v38 = vunpack.c.l.bf16 %v193_v20  ;;  %v215_v6 = vunpack.c.l.bf16 %v194_v25  ;;  %v216_v7 = vunpack.c.h.bf16 %v194_v25  ;;  %v217_v40 = vunpack.c.l.bf16 %v195_v59 }
  0x22   :  { %v218_v8 = vunpack.c.l.bf16 %v196_v54  ;;  %v219_v61 = vunpack.c.h.bf16 %v196_v54  ;;  %v220_v11 = vunpack.c.l.bf16 %v197_v55  ;;  %v221_v17 = vunpack.c.l.bf16 %v198_v31 }
  0x23   :  { %v222_v12 = vunpack.c.h.bf16 %v198_v31  ;;  %v223_v13 = vunpack.c.l.bf16 %v199_v2  ;;  %v1602_v63 = vrot.slane %v200_v53, 2  ;;  %v1604_v36 = vrot.slane %v201_v58, 2 }
  0x24   :  { %v1606_v42 = vrot.slane %v202_v60, 2  ;;  %v1608_v43 = vrot.slane %v203_v35, 2  ;;  %v1610_v18 = vrot.slane %v204_v49, 2  ;;  %v1612_v19 = vrot.slane %v205_v50, 2 }
  0x25   :  { %v1614_v47 = vrot.slane %v206_v32, 2  ;;  %v1616_v51 = vrot.slane %v207_v0, 2  ;;  %v1618_v52 = vrot.slane %v208_v1, 2  ;;  %v1620_v20 = vrot.slane %v209_v27, 2 }
  0x26   :  { %v1622_v53 = vrot.slane %v210_v3, 2  ;;  %v1624_v58 = vrot.slane %v211_v26, 2  ;;  %v1626_v25 = vrot.slane %v212_v4, 2  ;;  %v1628_v59 = vrot.slane %v213_v5, 2  ;;  %v1198_v5 = vld [vmem:[%s2586_s0 + $0x54] sm:$0x33] }
  0x27   :  { %v1630_v60 = vrot.slane %v214_v38, 2  ;;  %v1632_v35 = vrot.slane %v215_v6, 2  ;;  %v1634_v49 = vrot.slane %v216_v7, 2  ;;  %v1636_v50 = vrot.slane %v217_v40, 2  ;;  %v1194_v6 = vld [vmem:[%s2586_s0 + $0x24] sm:$0x33] }
  0x28   :  { %v1638_v54 = vrot.slane %v218_v8, 2  ;;  %v1640_v55 = vrot.slane %v219_v61, 2  ;;  %v1642_v31 = vrot.slane %v220_v11, 2  ;;  %v1644_v32 = vrot.slane %v221_v17, 2  ;;  %v1191_v17 = vld [vmem:[%s2586_s0 + $0x14] sm:$0x3] }
  0x29   :  { %2694 = vst [vmem:[#allocation12_spill] sm:$0xff] %v1630_v60  ;;  %2695 = vst [vmem:[#allocation13_spill] sm:$0xff] %v1632_v35  ;;  %v1646_v0 = vrot.slane %v222_v12, 2  ;;  %v1648_v1 = vrot.slane %v223_v13, 2  ;;  %v1190_v12 = vld [vmem:[%s2586_s0 + $0xc] sm:$0x33]  ;;  %v339_v2 = vunpack.c.l.bf16 %v1191_v17  ;;  %v344_v37 = vunpack.c.h.bf16 %v1194_v6 }
  0x2a   :  { %2696 = vst [vmem:[#allocation14_spill] sm:$0xff] %v1634_v49  ;;  %2697 = vst [vmem:[#allocation15_spill] sm:$0xff] %v1636_v50  ;;  %v1192_v11 = vld [vmem:[%s2586_s0 + $0x18] sm:$0x33]  ;;  %v1193_v13 = vld [vmem:[%s2586_s0 + $0x20] sm:$0x3]  ;;  %v337_v4 = vunpack.c.l.bf16 %v1190_v12  ;;  %v338_v26 = vunpack.c.h.bf16 %v1190_v12  ;;  %v350_v16 = vunpack.c.h.bf16 %v1198_v5  ;;  %v358_v21 = vunpack.c.l.bf16 %v1204_v44 }
  0x2b   :  { %2698 = vst [vmem:[#allocation16_spill] sm:$0xff] %v1638_v54  ;;  %2699 = vst [vmem:[#allocation17_spill] sm:$0xff] %v1640_v55  ;;  %v1195_v38 = vld [vmem:[%s2586_s0 + $0x2c] sm:$0x3]  ;;  %v1196_v40 = vld [vmem:[%s2586_s0 + $0x30] sm:$0x33]  ;;  %v340_v27 = vunpack.c.l.bf16 %v1192_v11  ;;  %v342_v48 = vunpack.c.l.bf16 %v1193_v13  ;;  %v349_v55 = vunpack.c.l.bf16 %v1198_v5  ;;  %v359_v60 = vunpack.c.h.bf16 %v1204_v44 }
  0x2c   :  { %2700 = vst [vmem:[#allocation18_spill] sm:$0xff] %v1642_v31  ;;  %2701 = vst [vmem:[#allocation19_spill] sm:$0xff] %v1644_v32  ;;  %v1197_v7 = vld [vmem:[%s2586_s0 + $0x38] sm:$0x3]  ;;  %v1199_v3 = vld [vmem:[%s2586_s0 + $0x5c] sm:$0x3]  ;;  %v343_v32 = vunpack.c.l.bf16 %v1194_v6  ;;  %v345_v31 = vunpack.c.l.bf16 %v1195_v38  ;;  %v346_v30 = vunpack.c.l.bf16 %v1196_v40  ;;  %v347_v17 = vunpack.c.h.bf16 %v1196_v40 }
  0x2d   :  { %2702 = vst [vmem:[#allocation20_spill] sm:$0xff] %v1646_v0  ;;  %2703 = vst [vmem:[#allocation21_spill] sm:$0xff] %v1648_v1  ;;  %v1200_v8 = vld [vmem:[%s2586_s0 + $0x60] sm:$0x33]  ;;  %v1201_v61 = vld [vmem:[%s2586_s0 + $0x68] sm:$0x3]  ;;  %v341_v1 = vunpack.c.h.bf16 %v1192_v11  ;;  %v348_v13 = vunpack.c.l.bf16 %v1197_v7  ;;  %v351_v54 = vunpack.c.l.bf16 %v1199_v3  ;;  %v2704_v38 = vmax.f32 %v1460_v56, %v1602_v63 }
  0x2e   :  { %v1202_v12 = vld [vmem:[%s2586_s0 + $0x6c] sm:$0x33]  ;;  %v1203_v0 = vld [vmem:[%s2586_s0 + $0x74] sm:$0x3]  ;;  %v1205_v11 = vld [vmem:[%s2586_s0 + $0x80] sm:$0x3]  ;;  %v352_v62 = vunpack.c.l.bf16 %v1200_v8  ;;  %v353_v50 = vunpack.c.h.bf16 %v1200_v8  ;;  %v354_v46 = vunpack.c.l.bf16 %v1201_v61  ;;  %v2705_v7 = vmax.f32 %v1464_v57, %v1604_v36 }
  0x2f   :  { %v355_v49 = vunpack.c.l.bf16 %v1202_v12  ;;  %v356_v45 = vunpack.c.h.bf16 %v1202_v12  ;;  %v357_v35 = vunpack.c.l.bf16 %v1203_v0  ;;  %v360_v6 = vunpack.c.l.bf16 %v1205_v11  ;;  %v2742_v61 = vld [vmem:[#allocation7_spill] sm:$0xff] }
  0x30   :  { %v1749_v39 = vmax.f32 %v2704_v38, %v337_v4  ;;  %v1754_v40 = vmax.f32 %v2705_v7, %v338_v26  ;;  %v2706_v3 = vmax.f32 %v1468_v41, %v1606_v42  ;;  %v2707_v0 = vmax.f32 %v1472_v34, %v1608_v43  ;;  %v2738_v26 = vld [vmem:[#allocation6_spill] sm:$0xff] }
  0x31   :  { %v2708_v56 = vmax.f32 %v1476_v29, %v1610_v18  ;;  %v2709_v57 = vmax.f32 %v1480_v9, %v1612_v19  ;;  %v2710_v41 = vmax.f32 %v1484_v10, %v1614_v47  ;;  %v2711_v34 = vmax.f32 %v1488_v14, %v1616_v51  ;;  %v2722_v51 = vld [vmem:[#allocation2_spill] sm:$0xff] }
  0x32   :  { %v1759_v5 = vmax.f32 %v2706_v3, %v339_v2  ;;  %v1764_v44 = vmax.f32 %v2707_v0, %v340_v27  ;;  %v2712_v29 = vmax.f32 %v1492_v15, %v1618_v52  ;;  %v2713_v9 = vmax.f32 %v1496_v24, %v1620_v20  ;;  %v2723_v52 = vld [vmem:[#allocation12_spill] sm:$0xff]  ;;  %v1208_v2 = vld [vmem:[%s2586_s0 + $0x18] sm:$0x77] }
  0x33   :  { %v1769_v63 = vmax.f32 %v2708_v56, %v341_v1  ;;  %v1774_v36 = vmax.f32 %v2709_v57, %v342_v48  ;;  %v1779_v42 = vmax.f32 %v2710_v41, %v343_v32  ;;  %v1784_v43 = vmax.f32 %v2711_v34, %v344_v37  ;;  %v2750_v3 = vld [vmem:[#allocation9_spill] sm:$0xff]  ;;  %v2751_v0 = vld [vmem:[#allocation19_spill] sm:$0xff]  ;;  %v2754_v34 = vld [vmem:[#allocation10_spill] sm:$0xff] }
  0x34   :  { %v1789_v18 = vmax.f32 %v2712_v29, %v345_v31  ;;  %v1794_v48 = vmax.f32 %v2713_v9, %v346_v30  ;;  %v2714_v10 = vmax.f32 %v1500_v23, %v1622_v53  ;;  %v2716_v14 = vmax.f32 %v1504_v28, %v1624_v58  ;;  %v1206_v23 = vld [vmem:[%s2586_s0 + $0xc] sm:$0x77]  ;;  %v2727_v58 = vld [vmem:[#allocation13_spill] sm:$0xff] }
  0x35   :  { %v2718_v15 = vmax.f32 %v1508_v33, %v1626_v25  ;;  %v2720_v24 = vmax.f32 %v1512_v22, %v1628_v59  ;;  %v2724_v20 = vmax.f32 %v2722_v51, %v2723_v52  ;;  %v2726_v53 = vld [vmem:[#allocation3_spill] sm:$0xff]  ;;  %v2730_v25 = vld [vmem:[#allocation4_spill] sm:$0xff]  ;;  %v2752_v56 = vmax.f32 %v2750_v3, %v2751_v0 }
  0x36   :  { %v1799_v19 = vmax.f32 %v2714_v10, %v347_v17  ;;  %v1804_v37 = vmax.f32 %v2716_v14, %v348_v13  ;;  %v2728_v31 = vmax.f32 %v2726_v53, %v2727_v58  ;;  %v2735_v59 = vld [vmem:[#allocation15_spill] sm:$0xff]  ;;  %v2746_v17 = vld [vmem:[#allocation8_spill] sm:$0xff]  ;;  %v2747_v13 = vld [vmem:[#allocation18_spill] sm:$0xff]  ;;  %v401_v52 = vunpack.c.l.bf16 %v1206_v23 }
  0x37   :  { %v1809_v47 = vmax.f32 %v2718_v15, %v349_v55  ;;  %v1814_v30 = vmax.f32 %v2720_v24, %v350_v16  ;;  %v1822_v28 = vmax.f32 %v2724_v20, %v351_v54  ;;  %v2731_v55 = vld [vmem:[#allocation14_spill] sm:$0xff]  ;;  %v2734_v16 = vld [vmem:[#allocation5_spill] sm:$0xff]  ;;  %v1207_v54 = vld [vmem:[%s2586_s0 + $0x14] sm:$0x7]  ;;  %v2748_v38 = vmax.f32 %v2746_v17, %v2747_v13 }
  0x38   :  { %2715 = vst [vmem:[#allocation22_spill] sm:$0xff] %v1799_v19  ;;  %2717 = vst [vmem:[#allocation23_spill] sm:$0xff] %v1804_v37  ;;  %v1827_v33 = vmax.f32 %v2728_v31, %v352_v62  ;;  %v2732_v32 = vmax.f32 %v2730_v25, %v2731_v55  ;;  %v2736_v1 = vmax.f32 %v2734_v16, %v2735_v59  ;;  %v1209_v62 = vld [vmem:[%s2586_s0 + $0x20] sm:$0x7]  ;;  %v1211_v41 = vld [vmem:[%s2586_s0 + $0x2c] sm:$0x7]  ;;  %v402_v20 = vunpack.c.h.bf16 %v1206_v23 }
  0x39   :  { %2719 = vst [vmem:[#allocation24_spill] sm:$0xff] %v1809_v47  ;;  %2721 = vst [vmem:[#allocation25_spill] sm:$0xff] %v1814_v30  ;;  %v1861_v7 = vmax.f32 %v2748_v38, %v357_v35  ;;  %v1866_v57 = vmax.f32 %v2752_v56, %v358_v21  ;;  %v2755_v35 = vld [vmem:[#allocation20_spill] sm:$0xff]  ;;  %v2758_v10 = vld [vmem:[#allocation11_spill] sm:$0xff]  ;;  %v403_v58 = vunpack.c.l.bf16 %v1207_v54  ;;  %v404_v31 = vunpack.c.l.bf16 %v1208_v2 }
  0x3a   :  { %2725 = vst [vmem:[#allocation2_spill] sm:$0xff] %v1822_v28  ;;  %2729 = vst [vmem:[#allocation12_spill] sm:$0xff] %v1827_v33  ;;  %v1832_v22 = vmax.f32 %v2732_v32, %v353_v50  ;;  %v1837_v27 = vmax.f32 %v2736_v1, %v354_v46  ;;  %v2739_v50 = vld [vmem:[#allocation16_spill] sm:$0xff]  ;;  %v2743_v46 = vld [vmem:[#allocation17_spill] sm:$0xff]  ;;  %v2756_v29 = vmax.f32 %v2754_v34, %v2755_v35  ;;  %v405_v25 = vunpack.c.h.bf16 %v1208_v2 }
  0x3b   :  { %v2740_v4 = vmax.f32 %v2738_v26, %v2739_v50  ;;  %v2744_v12 = vmax.f32 %v2742_v61, %v2743_v46  ;;  %2749 = vst [vmem:[#allocation5_spill] sm:$0xff] %v1861_v7  ;;  %2753 = vst [vmem:[#allocation15_spill] sm:$0xff] %v1866_v57  ;;  %v2759_v21 = vld [vmem:[#allocation21_spill] sm:$0xff]  ;;  %v1216_v53 = vld [vmem:[%s2586_s0 + $0x60] sm:$0x77]  ;;  %v406_v55 = vunpack.c.l.bf16 %v1209_v62  ;;  %v409_v26 = vunpack.c.l.bf16 %v1211_v41 }
  0x3c   :  { %2733 = vst [vmem:[#allocation3_spill] sm:$0xff] %v1832_v22  ;;  %2737 = vst [vmem:[#allocation13_spill] sm:$0xff] %v1837_v27  ;;  %v1880_v9 = vmax.f32 %v2756_v29, %v359_v60  ;;  %v2760_v14 = vmax.f32 %v2758_v10, %v2759_v21  ;;  %v1213_v24 = vld [vmem:[%s2586_s0 + $0x38] sm:$0x7]  ;;  %v1215_v60 = vld [vmem:[%s2586_s0 + $0x5c] sm:$0x7]  ;;  %v417_v17 = vunpack.c.h.bf16 %v1216_v53 }
  0x3d   :  { %v1851_v8 = vmax.f32 %v2740_v4, %v355_v49  ;;  %v1856_v11 = vmax.f32 %v2744_v12, %v356_v45  ;;  %v1210_v49 = vld [vmem:[%s2586_s0 + $0x24] sm:$0x77]  ;;  %v1212_v45 = vld [vmem:[%s2586_s0 + $0x30] sm:$0x77]  ;;  %v1220_v16 = vld [vmem:[%s2586_s0 + $0x78] sm:$0x77]  ;;  %v412_v62 = vunpack.c.l.bf16 %v1213_v24  ;;  %v415_v46 = vunpack.c.l.bf16 %v1215_v60 }
  0x3e   :  { %2757 = vst [vmem:[#allocation6_spill] sm:$0xff] %v1880_v9  ;;  %v1885_v15 = vmax.f32 %v2760_v14, %v360_v6  ;;  %v1214_v51 = vld [vmem:[%s2586_s0 + $0x54] sm:$0x77]  ;;  %v1217_v6 = vld [vmem:[%s2586_s0 + $0x68] sm:$0x7]  ;;  %v407_v59 = vunpack.c.l.bf16 %v1210_v49  ;;  %v408_v1 = vunpack.c.h.bf16 %v1210_v49  ;;  %v410_v50 = vunpack.c.l.bf16 %v1212_v45 }
  0x3f   :  { %2741 = vst [vmem:[#allocation4_spill] sm:$0xff] %v1851_v8  ;;  %2745 = vst [vmem:[#allocation14_spill] sm:$0xff] %v1856_v11  ;;  %v1218_v23 = vld [vmem:[%s2586_s0 + $0x6c] sm:$0x77]  ;;  %v1219_v32 = vld [vmem:[%s2586_s0 + $0x74] sm:$0x7]  ;;  %v411_v2 = vunpack.c.h.bf16 %v1212_v45  ;;  %v413_v4 = vunpack.c.l.bf16 %v1214_v51  ;;  %v414_v61 = vunpack.c.h.bf16 %v1214_v51  ;;  %v416_v12 = vunpack.c.l.bf16 %v1216_v53 }
  0x40   :  { %2761 = vst [vmem:[#allocation16_spill] sm:$0xff] %v1885_v15  ;;  %v1221_v54 = vld [vmem:[%s2586_s0 + $0x80] sm:$0x7]  ;;  %v418_v13 = vunpack.c.l.bf16 %v1217_v6  ;;  %v419_v38 = vunpack.c.l.bf16 %v1218_v23  ;;  %v420_v3 = vunpack.c.h.bf16 %v1218_v23  ;;  %v421_v0 = vunpack.c.l.bf16 %v1219_v32  ;;  %v1236_v9 = vld [vmem:[%s2586_s0 + $0x78] sm:$0x66] }
  0x41   :  { %v422_v56 = vunpack.c.l.bf16 %v1220_v16  ;;  %v423_v34 = vunpack.c.h.bf16 %v1220_v16  ;;  %v424_v49 = vunpack.c.l.bf16 %v1221_v54  ;;  %v1914_v41 = vrot.slane %v401_v52, 1 }
  0x42   :  { %v1916_v35 = vrot.slane %v402_v20, 1  ;;  %v1918_v29 = vrot.slane %v403_v58, 1  ;;  %v1920_v45 = vrot.slane %v404_v31, 1  ;;  %v1922_v10 = vrot.slane %v405_v25, 1 }
  0x43   :  { %v1924_v21 = vrot.slane %v406_v55, 1  ;;  %v1926_v14 = vrot.slane %v407_v59, 1  ;;  %v1928_v24 = vrot.slane %v408_v1, 1  ;;  %v1930_v51 = vrot.slane %v409_v26, 1 }
  0x44   :  { %v1932_v60 = vrot.slane %v410_v50, 1  ;;  %v1934_v52 = vrot.slane %v411_v2, 1  ;;  %v1936_v20 = vrot.slane %v412_v62, 1  ;;  %v1938_v53 = vrot.slane %v413_v4, 1  ;;  %v1231_v2 = vld [vmem:[%s2586_s0 + $0x5c] sm:$0x6] }
  0x45   :  { %v1940_v6 = vrot.slane %v414_v61, 1  ;;  %v1942_v58 = vrot.slane %v415_v46, 1  ;;  %v1944_v31 = vrot.slane %v416_v12, 1  ;;  %v1946_v25 = vrot.slane %v417_v17, 1  ;;  %v1226_v12 = vld [vmem:[%s2586_s0 + $0x24] sm:$0x66] }
  0x46   :  { %2762 = vst [vmem:[#allocation7_spill] sm:$0xff] %v1934_v52  ;;  %2763 = vst [vmem:[#allocation17_spill] sm:$0xff] %v1936_v20  ;;  %v1948_v55 = vrot.slane %v418_v13, 1  ;;  %v1950_v23 = vrot.slane %v419_v38, 1  ;;  %v1952_v32 = vrot.slane %v420_v3, 1  ;;  %v1954_v16 = vrot.slane %v421_v0, 1 }
  0x47   :  { %2764 = vst [vmem:[#allocation8_spill] sm:$0xff] %v1938_v53  ;;  %2765 = vst [vmem:[#allocation18_spill] sm:$0xff] %v1940_v6  ;;  %v1956_v59 = vrot.slane %v422_v56, 1  ;;  %v1958_v1 = vrot.slane %v423_v34, 1  ;;  %v1960_v26 = vrot.slane %v424_v49, 1  ;;  %v544_v57 = vunpack.c.h.bf16 %v1226_v12 }
  0x48   :  { %2766 = vst [vmem:[#allocation9_spill] sm:$0xff] %v1942_v58  ;;  %2767 = vst [vmem:[#allocation19_spill] sm:$0xff] %v1944_v31  ;;  %v1222_v34 = vld [vmem:[%s2586_s0 + $0xc] sm:$0x66]  ;;  %v1223_v56 = vld [vmem:[%s2586_s0 + $0x14] sm:$0x6]  ;;  %v558_v33 = vunpack.c.l.bf16 %v1236_v9  ;;  %v559_v58 = vunpack.c.h.bf16 %v1236_v9 }
  0x49   :  { %2768 = vst [vmem:[#allocation10_spill] sm:$0xff] %v1946_v25  ;;  %2769 = vst [vmem:[#allocation20_spill] sm:$0xff] %v1948_v55  ;;  %v1224_v0 = vld [vmem:[%s2586_s0 + $0x18] sm:$0x66]  ;;  %v1225_v49 = vld [vmem:[%s2586_s0 + $0x20] sm:$0x6]  ;;  %v537_v4 = vunpack.c.l.bf16 %v1222_v34  ;;  %v538_v62 = vunpack.c.h.bf16 %v1222_v34  ;;  %v539_v54 = vunpack.c.l.bf16 %v1223_v56 }
  0x4a   :  { %2770 = vst [vmem:[#allocation11_spill] sm:$0xff] %v1950_v23  ;;  %2771 = vst [vmem:[#allocation21_spill] sm:$0xff] %v1952_v32  ;;  %v1227_v46 = vld [vmem:[%s2586_s0 + $0x2c] sm:$0x6]  ;;  %v1228_v13 = vld [vmem:[%s2586_s0 + $0x30] sm:$0x66]  ;;  %v540_v50 = vunpack.c.l.bf16 %v1224_v0  ;;  %v542_v15 = vunpack.c.l.bf16 %v1225_v49  ;;  %v551_v23 = vunpack.c.l.bf16 %v1231_v2 }
  0x4b   :  { %2772 = vst [vmem:[#allocation26_spill] sm:$0xff] %v1954_v16  ;;  %2773 = vst [vmem:[#allocation27_spill] sm:$0xff] %v1956_v59  ;;  %v1229_v17 = vld [vmem:[%s2586_s0 + $0x38] sm:$0x6]  ;;  %v1232_v38 = vld [vmem:[%s2586_s0 + $0x60] sm:$0x66]  ;;  %v543_v59 = vunpack.c.l.bf16 %v1226_v12  ;;  %v545_v16 = vunpack.c.l.bf16 %v1227_v46  ;;  %v546_v7 = vunpack.c.l.bf16 %v1228_v13  ;;  %v547_v56 = vunpack.c.h.bf16 %v1228_v13 }
  0x4c   :  { %2774 = vst [vmem:[#allocation28_spill] sm:$0xff] %v1958_v1  ;;  %2775 = vst [vmem:[#allocation29_spill] sm:$0xff] %v1960_v26  ;;  %v1230_v61 = vld [vmem:[%s2586_s0 + $0x54] sm:$0x66]  ;;  %v1233_v3 = vld [vmem:[%s2586_s0 + $0x68] sm:$0x6]  ;;  %v541_v26 = vunpack.c.h.bf16 %v1224_v0  ;;  %v548_v49 = vunpack.c.l.bf16 %v1229_v17  ;;  %v552_v8 = vunpack.c.l.bf16 %v1232_v38  ;;  %v553_v55 = vunpack.c.h.bf16 %v1232_v38 }
  0x4d   :  { %v1234_v34 = vld [vmem:[%s2586_s0 + $0x6c] sm:$0x66]  ;;  %v1235_v1 = vld [vmem:[%s2586_s0 + $0x74] sm:$0x6]  ;;  %v1237_v0 = vld [vmem:[%s2586_s0 + $0x80] sm:$0x6]  ;;  %v549_v32 = vunpack.c.l.bf16 %v1230_v61  ;;  %v550_v11 = vunpack.c.h.bf16 %v1230_v61  ;;  %v554_v27 = vunpack.c.l.bf16 %v1233_v3 }
  0x4e   :  { %v555_v25 = vunpack.c.l.bf16 %v1234_v34  ;;  %v556_v22 = vunpack.c.h.bf16 %v1234_v34  ;;  %v557_v31 = vunpack.c.l.bf16 %v1235_v1  ;;  %v560_v12 = vunpack.c.l.bf16 %v1237_v0 }
  0x4f   :  { %v585_v46 = vrot.slane %v537_v4, 2  ;;  %v586_v28 = vrot.slane %v538_v62, 2  ;;  %v587_v6 = vrot.slane %v539_v54, 2  ;;  %v588_v30 = vrot.slane %v540_v50, 2 }
  0x50   :  { %v589_v53 = vrot.slane %v541_v26, 2  ;;  %v590_v47 = vrot.slane %v542_v15, 2  ;;  %v591_v13 = vrot.slane %v543_v59, 2  ;;  %v592_v17 = vrot.slane %v544_v57, 2  ;;  %v2802_v59 = vld [vmem:[#allocation19_spill] sm:$0xff] }
  0x51   :  { %v593_v20 = vrot.slane %v545_v16, 2  ;;  %v594_v61 = vrot.slane %v546_v7, 2  ;;  %v595_v2 = vrot.slane %v547_v56, 2  ;;  %v596_v37 = vrot.slane %v548_v49, 2  ;;  %v2804_v49 = vld [vmem:[#allocation3_spill] sm:$0xff] }
  0x52   :  { %v597_v38 = vrot.slane %v549_v32, 2  ;;  %v598_v3 = vrot.slane %v550_v11, 2  ;;  %v599_v52 = vrot.slane %v551_v23, 2  ;;  %v600_v34 = vrot.slane %v552_v8, 2 }
  0x53   :  { %v601_v1 = vrot.slane %v553_v55, 2  ;;  %v602_v19 = vrot.slane %v554_v27, 2  ;;  %v603_v9 = vrot.slane %v555_v25, 2  ;;  %v604_v0 = vrot.slane %v556_v22, 2  ;;  %v2798_v25 = vld [vmem:[#allocation2_spill] sm:$0xff]  ;;  %v2799_v55 = vld [vmem:[#allocation9_spill] sm:$0xff] }
  0x54   :  { %v605_v4 = vrot.slane %v557_v31, 2  ;;  %v606_v62 = vrot.slane %v558_v33, 2  ;;  %v607_v54 = vrot.slane %v559_v58, 2  ;;  %v608_v50 = vrot.slane %v560_v12, 2  ;;  %v2796_v58 = vld [vmem:[#allocation18_spill] sm:$0xff] }
  0x55   :  { %v2776_v15 = vmax.f32 %v1749_v39, %v1914_v41  ;;  %v2777_v7 = vmax.f32 %v1754_v40, %v1916_v35  ;;  %v2778_v8 = vmax.f32 %v1759_v5, %v1918_v29  ;;  %v2779_v33 = vmax.f32 %v1764_v44, %v1920_v45  ;;  %v2786_v29 = vld [vmem:[#allocation22_spill] sm:$0xff]  ;;  %v2787_v45 = vld [vmem:[#allocation7_spill] sm:$0xff]  ;;  %v1238_v31 = vld [vmem:[%s2586_s0 + $0x18] sm:$0x33] }
  0x56   :  { %v2780_v39 = vmax.f32 %v1769_v63, %v1922_v10  ;;  %v2781_v40 = vmax.f32 %v1774_v36, %v1924_v21  ;;  %v2782_v5 = vmax.f32 %v1779_v42, %v1926_v14  ;;  %v2783_v44 = vmax.f32 %v1784_v43, %v1928_v24  ;;  %v2789_v21 = vld [vmem:[#allocation23_spill] sm:$0xff]  ;;  %v2790_v14 = vld [vmem:[#allocation17_spill] sm:$0xff]  ;;  %v2805_v12 = vld [vmem:[#allocation10_spill] sm:$0xff] }
  0x57   :  { %v2061_v57 = vmax.f32 %v2776_v15, %v585_v46  ;;  %v2066_v32 = vmax.f32 %v2777_v7, %v586_v28  ;;  %v2071_v27 = vmax.f32 %v2778_v8, %v587_v6  ;;  %v2076_v22 = vmax.f32 %v2779_v33, %v588_v30  ;;  %v2793_v6 = vld [vmem:[#allocation8_spill] sm:$0xff]  ;;  %v2813_v33 = vld [vmem:[#allocation14_spill] sm:$0xff] }
  0x58   :  { %v2081_v11 = vmax.f32 %v2780_v39, %v589_v53  ;;  %v2086_v28 = vmax.f32 %v2781_v40, %v590_v47  ;;  %v2091_v41 = vmax.f32 %v2782_v5, %v591_v13  ;;  %v2096_v30 = vmax.f32 %v2783_v44, %v592_v17  ;;  %v2792_v53 = vld [vmem:[#allocation24_spill] sm:$0xff]  ;;  %v2807_v17 = vld [vmem:[#allocation13_spill] sm:$0xff]  ;;  %v2817_v44 = vld [vmem:[#allocation26_spill] sm:$0xff] }
  0x59   :  { %v2784_v63 = vmax.f32 %v1789_v18, %v1930_v51  ;;  %v2785_v36 = vmax.f32 %v1794_v48, %v1932_v60  ;;  %v2788_v42 = vmax.f32 %v2786_v29, %v2787_v45  ;;  %v2791_v43 = vmax.f32 %v2789_v21, %v2790_v14  ;;  %v2810_v15 = vld [vmem:[#allocation4_spill] sm:$0xff]  ;;  %v2816_v5 = vld [vmem:[#allocation5_spill] sm:$0xff]  ;;  %v2819_v29 = vld [vmem:[#allocation15_spill] sm:$0xff] }
  0x5a   :  { %v2794_v18 = vmax.f32 %v2792_v53, %v2793_v6  ;;  %v2800_v23 = vmax.f32 %v2798_v25, %v2799_v55  ;;  %v2806_v46 = vmax.f32 %v2804_v49, %v2805_v12  ;;  %v2820_v45 = vld [vmem:[#allocation27_spill] sm:$0xff]  ;;  %v1243_v14 = vld [vmem:[%s2586_s0 + $0x38] sm:$0x3]  ;;  %v1246_v25 = vld [vmem:[%s2586_s0 + $0x60] sm:$0x33]  ;;  %v674_v55 = vunpack.c.l.bf16 %v1238_v31 }
  0x5b   :  { %v2101_v35 = vmax.f32 %v2784_v63, %v593_v20  ;;  %v2106_v47 = vmax.f32 %v2785_v36, %v594_v61  ;;  %v2111_v10 = vmax.f32 %v2788_v42, %v595_v2  ;;  %v2116_v24 = vmax.f32 %v2791_v43, %v596_v37  ;;  %v2795_v20 = vld [vmem:[#allocation25_spill] sm:$0xff]  ;;  %v2801_v37 = vld [vmem:[#allocation12_spill] sm:$0xff]  ;;  %v2822_v43 = vld [vmem:[#allocation6_spill] sm:$0xff] }
  0x5c   :  { %v2121_v51 = vmax.f32 %v2794_v18, %v597_v38  ;;  %v2797_v48 = vmax.f32 %v2795_v20, %v2796_v58  ;;  %v2134_v16 = vmax.f32 %v2800_v23, %v599_v52  ;;  %v2803_v26 = vmax.f32 %v2801_v37, %v2802_v59  ;;  %v2808_v61 = vld [vmem:[#allocation20_spill] sm:$0xff]  ;;  %v1239_v52 = vld [vmem:[%s2586_s0 + $0x20] sm:$0x3] }
  0x5d   :  { %v2144_v13 = vmax.f32 %v2806_v46, %v601_v1  ;;  %v2809_v2 = vmax.f32 %v2807_v17, %v2808_v61  ;;  %v2811_v1 = vld [vmem:[#allocation11_spill] sm:$0xff]  ;;  %v2818_v63 = vmax.f32 %v2816_v5, %v2817_v44  ;;  %v2821_v42 = vmax.f32 %v2819_v29, %v2820_v45  ;;  %v2825_v18 = vld [vmem:[#allocation16_spill] sm:$0xff]  ;;  %v1251_v46 = vld [vmem:[%s2586_s0 + $0x80] sm:$0x3] }
  0x5e   :  { %v2126_v60 = vmax.f32 %v2797_v48, %v598_v3  ;;  %v2139_v56 = vmax.f32 %v2803_v26, %v600_v34  ;;  %v1240_v3 = vld [vmem:[%s2586_s0 + $0x24] sm:$0x33]  ;;  %v1241_v34 = vld [vmem:[%s2586_s0 + $0x2c] sm:$0x3]  ;;  %v2812_v7 = vmax.f32 %v2810_v15, %v2811_v1  ;;  %v675_v23 = vunpack.c.h.bf16 %v1238_v31  ;;  %v1250_v31 = vld [vmem:[%s2586_s0 + $0x78] sm:$0x33] }
  0x5f   :  { %v2149_v38 = vmax.f32 %v2809_v2, %v602_v19  ;;  %v2814_v19 = vld [vmem:[#allocation21_spill] sm:$0xff]  ;;  %v2173_v36 = vmax.f32 %v2818_v63, %v605_v4  ;;  %v2178_v21 = vmax.f32 %v2821_v42, %v606_v62  ;;  %v2823_v4 = vld [vmem:[#allocation28_spill] sm:$0xff]  ;;  %v1245_v48 = vld [vmem:[%s2586_s0 + $0x44] sm:$0x3]  ;;  %v676_v59 = vunpack.c.l.bf16 %v1239_v52 }
  0x60   :  { %v2163_v8 = vmax.f32 %v2812_v7, %v603_v9  ;;  %v2815_v39 = vmax.f32 %v2813_v33, %v2814_v19  ;;  %v1242_v9 = vld [vmem:[%s2586_s0 + $0x30] sm:$0x33]  ;;  %v2824_v53 = vmax.f32 %v2822_v43, %v2823_v4  ;;  %v2826_v62 = vld [vmem:[#allocation29_spill] sm:$0xff]  ;;  %v677_v26 = vunpack.c.l.bf16 %v1240_v3  ;;  %v1252_v17 = vld [vmem:[%s2586_s0 + $0x84] sm:$0x33] }
  0x61   :  { %v2827_v20 = vmax.f32 %v2825_v18, %v2826_v62  ;;  %v1248_v37 = vld [vmem:[%s2586_s0 + $0x6c] sm:$0x33]  ;;  %v678_v49 = vunpack.c.h.bf16 %v1240_v3  ;;  %v679_v12 = vunpack.c.l.bf16 %v1241_v34  ;;  %v680_v61 = vunpack.c.l.bf16 %v1242_v9 }
  0x62   :  { %v2168_v40 = vmax.f32 %v2815_v39, %v604_v0  ;;  %v1244_v0 = vld [vmem:[%s2586_s0 + $0x3c] sm:$0x33]  ;;  %v2192_v6 = vmax.f32 %v2824_v53, %v607_v54  ;;  %v1247_v54 = vld [vmem:[%s2586_s0 + $0x68] sm:$0x3]  ;;  %v681_v2 = vunpack.c.h.bf16 %v1242_v9  ;;  %v682_v15 = vunpack.c.l.bf16 %v1243_v14  ;;  %v1253_v52 = vld [vmem:[%s2586_s0 + $0x8c] sm:$0x3] }
  0x63   :  { %v2197_v58 = vmax.f32 %v2827_v20, %v608_v50  ;;  %v1249_v50 = vld [vmem:[%s2586_s0 + $0x74] sm:$0x3]  ;;  %v683_v1 = vunpack.c.l.bf16 %v1244_v0  ;;  %v684_v3 = vunpack.c.h.bf16 %v1244_v0  ;;  %v685_v34 = vunpack.c.l.bf16 %v1245_v48 }
  0x64   :  { %v686_v7 = vunpack.c.l.bf16 %v1246_v25  ;;  %v687_v33 = vunpack.c.h.bf16 %v1246_v25  ;;  %v688_v19 = vunpack.c.l.bf16 %v1247_v54  ;;  %v689_v39 = vunpack.c.l.bf16 %v1248_v37  ;;  %v1258_v25 = vld [vmem:[%s2586_s0 + $0x30] sm:$0x77] }
  0x65   :  { %v690_v5 = vunpack.c.h.bf16 %v1248_v37  ;;  %v691_v44 = vunpack.c.l.bf16 %v1249_v50  ;;  %v692_v63 = vunpack.c.l.bf16 %v1250_v31  ;;  %v693_v29 = vunpack.c.h.bf16 %v1250_v31  ;;  %v1263_v50 = vld [vmem:[%s2586_s0 + $0x68] sm:$0x7]  ;;  %v1266_v31 = vld [vmem:[%s2586_s0 + $0x78] sm:$0x77] }
  0x66   :  { %v694_v45 = vunpack.c.l.bf16 %v1251_v46  ;;  %v695_v42 = vunpack.c.l.bf16 %v1252_v17  ;;  %v696_v43 = vunpack.c.h.bf16 %v1252_v17  ;;  %v697_v9 = vunpack.c.l.bf16 %v1253_v52  ;;  %v1267_v46 = vld [vmem:[%s2586_s0 + $0x80] sm:$0x7]  ;;  %v1268_v17 = vld [vmem:[%s2586_s0 + $0x84] sm:$0x77]  ;;  %v1269_v52 = vld [vmem:[%s2586_s0 + $0x8c] sm:$0x7] }
  0x67   :  { %v2227_v14 = vmax.f32 %v2061_v57, %v674_v55  ;;  %v2230_v4 = vmax.f32 %v2066_v32, %v675_v23  ;;  %v2233_v0 = vmax.f32 %v2071_v27, %v676_v59  ;;  %v2236_v53 = vmax.f32 %v2076_v22, %v677_v26  ;;  %v1259_v55 = vld [vmem:[%s2586_s0 + $0x38] sm:$0x7]  ;;  %v1262_v23 = vld [vmem:[%s2586_s0 + $0x60] sm:$0x77] }
  0x68   :  { %v2239_v18 = vmax.f32 %v2081_v11, %v678_v49  ;;  %v2242_v62 = vmax.f32 %v2086_v28, %v679_v12  ;;  %v2245_v20 = vmax.f32 %v2091_v41, %v680_v61  ;;  %v2248_v57 = vmax.f32 %v2096_v30, %v681_v2  ;;  %v1254_v30 = vld [vmem:[%s2586_s0 + $0x18] sm:$0x77] }
  0x69   :  { %v2251_v32 = vmax.f32 %v2101_v35, %v682_v15  ;;  %v2254_v27 = vmax.f32 %v2106_v47, %v683_v1  ;;  %v2257_v22 = vmax.f32 %v2111_v10, %v684_v3  ;;  %v2260_v11 = vmax.f32 %v2116_v24, %v685_v34 }
  0x6a   :  { %v2263_v28 = vmax.f32 %v2121_v51, %v686_v7  ;;  %v2266_v41 = vmax.f32 %v2126_v60, %v687_v33  ;;  %v2272_v35 = vmax.f32 %v2134_v16, %v688_v19  ;;  %v2275_v47 = vmax.f32 %v2139_v56, %v689_v39  ;;  %v1255_v51 = vld [vmem:[%s2586_s0 + $0x20] sm:$0x7]  ;;  %v1256_v60 = vld [vmem:[%s2586_s0 + $0x24] sm:$0x77]  ;;  %v1257_v16 = vld [vmem:[%s2586_s0 + $0x2c] sm:$0x7] }
  0x6b   :  { %2828 = vst [vmem:[#allocation22_spill] sm:$0xff] %v2257_v22  ;;  %2829 = vst [vmem:[#allocation7_spill] sm:$0xff] %v2260_v11  ;;  %v2278_v10 = vmax.f32 %v2144_v13, %v690_v5  ;;  %v2281_v24 = vmax.f32 %v2149_v38, %v691_v44  ;;  %v2293_v56 = vmax.f32 %v2163_v8, %v692_v63  ;;  %v1260_v8 = vld [vmem:[%s2586_s0 + $0x3c] sm:$0x77]  ;;  %v738_v54 = vunpack.c.l.bf16 %v1254_v30 }
  0x6c   :  { %2830 = vst [vmem:[#allocation23_spill] sm:$0xff] %v2263_v28  ;;  %2831 = vst [vmem:[#allocation17_spill] sm:$0xff] %v2266_v41  ;;  %v2296_v13 = vmax.f32 %v2168_v40, %v693_v29  ;;  %v2299_v38 = vmax.f32 %v2173_v36, %v694_v45  ;;  %v2302_v48 = vmax.f32 %v2178_v21, %v695_v42  ;;  %v1261_v21 = vld [vmem:[%s2586_s0 + $0x44] sm:$0x7]  ;;  %v739_v37 = vunpack.c.h.bf16 %v1254_v30 }
  0x6d   :  { %2832 = vst [vmem:[#allocation24_spill] sm:$0xff] %v2272_v35  ;;  %2833 = vst [vmem:[#allocation8_spill] sm:$0xff] %v2275_v47  ;;  %v2314_v40 = vmax.f32 %v2192_v6, %v696_v43  ;;  %v2317_v36 = vmax.f32 %v2197_v58, %v697_v9  ;;  %v1264_v6 = vld [vmem:[%s2586_s0 + $0x6c] sm:$0x77]  ;;  %v1265_v58 = vld [vmem:[%s2586_s0 + $0x74] sm:$0x7]  ;;  %v740_v59 = vunpack.c.l.bf16 %v1255_v51  ;;  %v741_v26 = vunpack.c.l.bf16 %v1256_v60 }
  0x6e   :  { %2834 = vst [vmem:[#allocation25_spill] sm:$0xff] %v2278_v10  ;;  %2835 = vst [vmem:[#allocation18_spill] sm:$0xff] %v2281_v24  ;;  %v742_v49 = vunpack.c.h.bf16 %v1256_v60  ;;  %v743_v12 = vunpack.c.l.bf16 %v1257_v16  ;;  %v744_v61 = vunpack.c.l.bf16 %v1258_v25  ;;  %v745_v2 = vunpack.c.h.bf16 %v1258_v25 }
  0x6f   :  { %2836 = vst [vmem:[#allocation2_spill] sm:$0xff] %v2293_v56  ;;  %2837 = vst [vmem:[#allocation9_spill] sm:$0xff] %v2296_v13  ;;  %v746_v15 = vunpack.c.l.bf16 %v1259_v55  ;;  %v747_v1 = vunpack.c.l.bf16 %v1260_v8  ;;  %v748_v3 = vunpack.c.h.bf16 %v1260_v8  ;;  %v749_v34 = vunpack.c.l.bf16 %v1261_v21 }
  0x70   :  { %2838 = vst [vmem:[#allocation12_spill] sm:$0xff] %v2299_v38  ;;  %2839 = vst [vmem:[#allocation19_spill] sm:$0xff] %v2302_v48  ;;  %v750_v7 = vunpack.c.l.bf16 %v1262_v23  ;;  %v751_v33 = vunpack.c.h.bf16 %v1262_v23  ;;  %v752_v19 = vunpack.c.l.bf16 %v1263_v50  ;;  %v753_v39 = vunpack.c.l.bf16 %v1264_v6 }
  0x71   :  { %2840 = vst [vmem:[#allocation3_spill] sm:$0xff] %v2314_v40  ;;  %2841 = vst [vmem:[#allocation10_spill] sm:$0xff] %v2317_v36  ;;  %v754_v5 = vunpack.c.h.bf16 %v1264_v6  ;;  %v755_v44 = vunpack.c.l.bf16 %v1265_v58  ;;  %v756_v63 = vunpack.c.l.bf16 %v1266_v31  ;;  %v757_v29 = vunpack.c.h.bf16 %v1266_v31  ;;  %v1284_v40 = vld [vmem:[%s2586_s0 + $0x84] sm:$0x66] }
  0x72   :  { %v758_v45 = vunpack.c.l.bf16 %v1267_v46  ;;  %v759_v42 = vunpack.c.l.bf16 %v1268_v17  ;;  %v760_v43 = vunpack.c.h.bf16 %v1268_v17  ;;  %v761_v9 = vunpack.c.l.bf16 %v1269_v52 }
  0x73   :  { %v2346_v30 = vrot.slane %v738_v54, 1  ;;  %v2348_v51 = vrot.slane %v739_v37, 1  ;;  %v2350_v60 = vrot.slane %v740_v59, 1  ;;  %v2352_v16 = vrot.slane %v741_v26, 1 }
  0x74   :  { %v2354_v25 = vrot.slane %v742_v49, 1  ;;  %v2356_v55 = vrot.slane %v743_v12, 1  ;;  %v2358_v8 = vrot.slane %v744_v61, 1  ;;  %v2360_v21 = vrot.slane %v745_v2, 1 }
  0x75   :  { %v2362_v23 = vrot.slane %v746_v15, 1  ;;  %v2364_v50 = vrot.slane %v747_v1, 1  ;;  %v2366_v54 = vrot.slane %v748_v3, 1  ;;  %v2368_v37 = vrot.slane %v749_v34, 1  ;;  %v1279_v3 = vld [vmem:[%s2586_s0 + $0x68] sm:$0x6] }
  0x76   :  { %v2370_v6 = vrot.slane %v750_v7, 1  ;;  %v2372_v58 = vrot.slane %v751_v33, 1  ;;  %v2374_v59 = vrot.slane %v752_v19, 1  ;;  %v2376_v26 = vrot.slane %v753_v39, 1  ;;  %v1274_v39 = vld [vmem:[%s2586_s0 + $0x30] sm:$0x66] }
  0x77   :  { %2842 = vst [vmem:[#allocation13_spill] sm:$0xff] %v2366_v54  ;;  %2843 = vst [vmem:[#allocation20_spill] sm:$0xff] %v2368_v37  ;;  %v2378_v49 = vrot.slane %v754_v5, 1  ;;  %v2380_v12 = vrot.slane %v755_v44, 1  ;;  %v2382_v31 = vrot.slane %v756_v63, 1  ;;  %v2384_v46 = vrot.slane %v757_v29, 1 }
  0x78   :  { %2844 = vst [vmem:[#allocation4_spill] sm:$0xff] %v2370_v6  ;;  %2845 = vst [vmem:[#allocation11_spill] sm:$0xff] %v2372_v58  ;;  %v2386_v17 = vrot.slane %v758_v45, 1  ;;  %v2388_v61 = vrot.slane %v759_v42, 1  ;;  %v2390_v2 = vrot.slane %v760_v43, 1  ;;  %v2392_v15 = vrot.slane %v761_v9, 1 }
  0x79   :  { %2846 = vst [vmem:[#allocation14_spill] sm:$0xff] %v2374_v59  ;;  %2847 = vst [vmem:[#allocation21_spill] sm:$0xff] %v2376_v26  ;;  %v1270_v43 = vld [vmem:[%s2586_s0 + $0x18] sm:$0x66]  ;;  %v1271_v42 = vld [vmem:[%s2586_s0 + $0x20] sm:$0x6]  ;;  %v881_v48 = vunpack.c.h.bf16 %v1274_v39  ;;  %v895_v47 = vunpack.c.l.bf16 %v1284_v40  ;;  %v896_v59 = vunpack.c.h.bf16 %v1284_v40 }
  0x7a   :  { %2848 = vst [vmem:[#allocation5_spill] sm:$0xff] %v2378_v49  ;;  %2849 = vst [vmem:[#allocation26_spill] sm:$0xff] %v2380_v12  ;;  %v1272_v45 = vld [vmem:[%s2586_s0 + $0x24] sm:$0x66]  ;;  %v1273_v9 = vld [vmem:[%s2586_s0 + $0x2c] sm:$0x6]  ;;  %v874_v7 = vunpack.c.l.bf16 %v1270_v43  ;;  %v875_v34 = vunpack.c.h.bf16 %v1270_v43  ;;  %v876_v52 = vunpack.c.l.bf16 %v1271_v42 }
  0x7b   :  { %2850 = vst [vmem:[#allocation15_spill] sm:$0xff] %v2382_v31  ;;  %2851 = vst [vmem:[#allocation27_spill] sm:$0xff] %v2384_v46  ;;  %v1275_v19 = vld [vmem:[%s2586_s0 + $0x38] sm:$0x6]  ;;  %v1276_v44 = vld [vmem:[%s2586_s0 + $0x3c] sm:$0x66]  ;;  %v877_v1 = vunpack.c.l.bf16 %v1272_v45  ;;  %v879_v36 = vunpack.c.l.bf16 %v1273_v9  ;;  %v888_v31 = vunpack.c.l.bf16 %v1279_v3 }
  0x7c   :  { %2852 = vst [vmem:[#allocation6_spill] sm:$0xff] %v2386_v17  ;;  %2853 = vst [vmem:[#allocation28_spill] sm:$0xff] %v2388_v61  ;;  %v1277_v5 = vld [vmem:[%s2586_s0 + $0x44] sm:$0x6]  ;;  %v1280_v63 = vld [vmem:[%s2586_s0 + $0x6c] sm:$0x66]  ;;  %v880_v61 = vunpack.c.l.bf16 %v1274_v39  ;;  %v882_v17 = vunpack.c.l.bf16 %v1275_v19  ;;  %v883_v38 = vunpack.c.l.bf16 %v1276_v44  ;;  %v884_v42 = vunpack.c.h.bf16 %v1276_v44 }
  0x7d   :  { %2854 = vst [vmem:[#allocation16_spill] sm:$0xff] %v2390_v2  ;;  %2855 = vst [vmem:[#allocation29_spill] sm:$0xff] %v2392_v15  ;;  %v1278_v33 = vld [vmem:[%s2586_s0 + $0x60] sm:$0x66]  ;;  %v1281_v29 = vld [vmem:[%s2586_s0 + $0x74] sm:$0x6]  ;;  %v878_v15 = vunpack.c.h.bf16 %v1272_v45  ;;  %v885_v9 = vunpack.c.l.bf16 %v1277_v5  ;;  %v889_v56 = vunpack.c.l.bf16 %v1280_v63  ;;  %v890_v12 = vunpack.c.h.bf16 %v1280_v63 }
  0x7e   :  { %v1282_v43 = vld [vmem:[%s2586_s0 + $0x78] sm:$0x66]  ;;  %v1283_v2 = vld [vmem:[%s2586_s0 + $0x80] sm:$0x6]  ;;  %v1285_v45 = vld [vmem:[%s2586_s0 + $0x8c] sm:$0x6]  ;;  %v886_v46 = vunpack.c.l.bf16 %v1278_v33  ;;  %v887_v13 = vunpack.c.h.bf16 %v1278_v33  ;;  %v891_v24 = vunpack.c.l.bf16 %v1281_v29 }
  0x7f   :  { %v892_v49 = vunpack.c.l.bf16 %v1282_v43  ;;  %v893_v10 = vunpack.c.h.bf16 %v1282_v43  ;;  %v894_v26 = vunpack.c.l.bf16 %v1283_v2  ;;  %v897_v39 = vunpack.c.l.bf16 %v1285_v45 }
  0x80   :  { %v922_v19 = vrot.slane %v874_v7, 2  ;;  %v923_v35 = vrot.slane %v875_v34, 2  ;;  %v924_v58 = vrot.slane %v876_v52, 2  ;;  %v925_v41 = vrot.slane %v877_v1, 2 }
  0x81   :  { %v926_v6 = vrot.slane %v878_v15, 2  ;;  %v927_v28 = vrot.slane %v879_v36, 2  ;;  %v928_v44 = vrot.slane %v880_v61, 2  ;;  %v929_v5 = vrot.slane %v881_v48, 2  ;;  %v2882_v61 = vld [vmem:[#allocation21_spill] sm:$0xff] }
  0x82   :  { %v930_v37 = vrot.slane %v882_v17, 2  ;;  %v931_v33 = vrot.slane %v883_v38, 2  ;;  %v932_v3 = vrot.slane %v884_v42, 2  ;;  %v933_v11 = vrot.slane %v885_v9, 2  ;;  %v2884_v9 = vld [vmem:[#allocation25_spill] sm:$0xff] }
  0x83   :  { %v934_v63 = vrot.slane %v886_v46, 2  ;;  %v935_v29 = vrot.slane %v887_v13, 2  ;;  %v936_v54 = vrot.slane %v888_v31, 2  ;;  %v937_v43 = vrot.slane %v889_v56, 2  ;;  %v2879_v31 = vld [vmem:[#allocation14_spill] sm:$0xff]  ;;  %v2881_v46 = vld [vmem:[#allocation8_spill] sm:$0xff] }
  0x84   :  { %v938_v2 = vrot.slane %v890_v12, 2  ;;  %v939_v22 = vrot.slane %v891_v24, 2  ;;  %v940_v40 = vrot.slane %v892_v49, 2  ;;  %v941_v45 = vrot.slane %v893_v10, 2  ;;  %v2875_v49 = vld [vmem:[#allocation17_spill] sm:$0xff]  ;;  %v2876_v12 = vld [vmem:[#allocation11_spill] sm:$0xff] }
  0x85   :  { %v942_v7 = vrot.slane %v894_v26, 2  ;;  %v943_v34 = vrot.slane %v895_v47, 2  ;;  %v944_v52 = vrot.slane %v896_v59, 2  ;;  %v945_v1 = vrot.slane %v897_v39, 2  ;;  %v2873_v26 = vld [vmem:[#allocation4_spill] sm:$0xff]  ;;  %v2885_v39 = vld [vmem:[#allocation5_spill] sm:$0xff] }
  0x86   :  { %v2856_v36 = vmax.f32 %v2227_v14, %v2346_v30  ;;  %v2857_v38 = vmax.f32 %v2230_v4, %v2348_v51  ;;  %v2858_v13 = vmax.f32 %v2233_v0, %v2350_v60  ;;  %v2859_v24 = vmax.f32 %v2236_v53, %v2352_v16  ;;  %v2866_v16 = vld [vmem:[#allocation22_spill] sm:$0xff] }
  0x87   :  { %v2860_v47 = vmax.f32 %v2239_v18, %v2354_v25  ;;  %v2861_v14 = vmax.f32 %v2242_v62, %v2356_v55  ;;  %v2862_v4 = vmax.f32 %v2245_v20, %v2358_v8  ;;  %v2863_v0 = vmax.f32 %v2248_v57, %v2360_v21  ;;  %v2867_v25 = vld [vmem:[#allocation13_spill] sm:$0xff]  ;;  %v2869_v55 = vld [vmem:[#allocation7_spill] sm:$0xff] }
  0x88   :  { %v970_v48 = vmax.f32 %v2856_v36, %v922_v19  ;;  %v971_v17 = vmax.f32 %v2857_v38, %v923_v35  ;;  %v972_v56 = vmax.f32 %v2858_v13, %v924_v58  ;;  %v973_v10 = vmax.f32 %v2859_v24, %v925_v41  ;;  %v2872_v58 = vld [vmem:[#allocation23_spill] sm:$0xff]  ;;  %v2893_v13 = vld [vmem:[#allocation9_spill] sm:$0xff] }
  0x89   :  { %v974_v59 = vmax.f32 %v2860_v47, %v926_v6  ;;  %v975_v30 = vmax.f32 %v2861_v14, %v927_v28  ;;  %v976_v35 = vmax.f32 %v2862_v4, %v928_v44  ;;  %v977_v51 = vmax.f32 %v2863_v0, %v929_v5  ;;  %v2870_v6 = vld [vmem:[#allocation20_spill] sm:$0xff]  ;;  %v2887_v44 = vld [vmem:[#allocation18_spill] sm:$0xff]  ;;  %v2891_v36 = vld [vmem:[#allocation15_spill] sm:$0xff] }
  0x8a   :  { %v2864_v53 = vmax.f32 %v2251_v32, %v2362_v23  ;;  %v2865_v18 = vmax.f32 %v2254_v27, %v2364_v50  ;;  %v2868_v62 = vmax.f32 %v2866_v16, %v2867_v25  ;;  %v2871_v20 = vmax.f32 %v2869_v55, %v2870_v6  ;;  %v2888_v5 = vld [vmem:[#allocation26_spill] sm:$0xff]  ;;  %v2894_v24 = vld [vmem:[#allocation27_spill] sm:$0xff]  ;;  %v2896_v4 = vld [vmem:[#allocation12_spill] sm:$0xff] }
  0x8b   :  { %v2874_v57 = vmax.f32 %v2872_v58, %v2873_v26  ;;  %v2877_v32 = vmax.f32 %v2875_v49, %v2876_v12  ;;  %v2883_v15 = vmax.f32 %v2881_v46, %v2882_v61  ;;  %v2886_v19 = vmax.f32 %v2884_v9, %v2885_v39  ;;  %v2897_v0 = vld [vmem:[#allocation6_spill] sm:$0xff]  ;;  %v2900_v16 = vld [vmem:[#allocation28_spill] sm:$0xff]  ;;  %v2906_v26 = vld [vmem:[#allocation29_spill] sm:$0xff] }
  0x8c   :  { %v978_v41 = vmax.f32 %v2864_v53, %v930_v37  ;;  %v979_v60 = vmax.f32 %v2865_v18, %v931_v33  ;;  %v980_v28 = vmax.f32 %v2868_v62, %v932_v3  ;;  %v981_v8 = vmax.f32 %v2871_v20, %v933_v11  ;;  %v2878_v37 = vld [vmem:[#allocation24_spill] sm:$0xff]  ;;  %v2899_v18 = vld [vmem:[#allocation19_spill] sm:$0xff] }
  0x8d   :  { %v982_v21 = vmax.f32 %v2874_v57, %v934_v63  ;;  %v983_v23 = vmax.f32 %v2877_v32, %v935_v29  ;;  %v2880_v27 = vmax.f32 %v2878_v37, %v2879_v31  ;;  %v985_v42 = vmax.f32 %v2883_v15, %v937_v43  ;;  %v2890_v63 = vld [vmem:[#allocation2_spill] sm:$0xff]  ;;  %v2902_v62 = vld [vmem:[#allocation3_spill] sm:$0xff]  ;;  %v2903_v55 = vld [vmem:[#allocation16_spill] sm:$0xff] }
  0x8e   :  { %v986_v11 = vmax.f32 %v2886_v19, %v938_v2  ;;  %v2889_v33 = vmax.f32 %v2887_v44, %v2888_v5  ;;  %v2892_v38 = vmax.f32 %v2890_v63, %v2891_v36  ;;  %v2895_v47 = vmax.f32 %v2893_v13, %v2894_v24 }
  0x8f   :  { %v984_v50 = vmax.f32 %v2880_v27, %v936_v54  ;;  %v1046_v14 = vlaneseq  ;;  %v2898_v43 = vmax.f32 %v2896_v4, %v2897_v0  ;;  %v2901_v2 = vmax.f32 %v2899_v18, %v2900_v16 }
  0x90   :  { %v987_v3 = vmax.f32 %v2889_v33, %v939_v22  ;;  %v988_v29 = vmax.f32 %v2892_v38, %v940_v40  ;;  %v989_v54 = vmax.f32 %v2895_v47, %v941_v45  ;;  %v2904_v22 = vmax.f32 %v2902_v62, %v2903_v55  ;;  %v2905_v40 = vld [vmem:[#allocation10_spill] sm:$0xff] }
  0x91   :  { %v990_v53 = vmax.f32 %v2898_v43, %v942_v7  ;;  %v991_v25 = vmax.f32 %v2901_v2, %v943_v34  ;;  %v1295_v20 = vmov 1983009808   ;;  %v2907_v57 = vmax.f32 %v2905_v40, %v2906_v26 }
  0x92   :  { %v992_v6 = vmax.f32 %v2904_v22, %v944_v52  ;;  %v1044_v58 = vunpack.c.l.s4 %v1295_v20  ;;  %v996_v45 = vpack.c.bf16 %v972_v56, %v972_v56  ;;  %v999_v12 = vpack.c.bf16 %v975_v30, %v975_v30 }
  0x93   :  { %v993_v49 = vmax.f32 %v2907_v57, %v945_v1  ;;  %v1047_v32 = vshrl.u32 %v1046_v14, 7  ;;  %v1002_v37 = vpack.c.bf16 %v978_v41, %v978_v41  ;;  %v1286_v31 = vpack.c.bf16 %v971_v17, %v970_v48 }
  0x94   :  { %v1045_v7 = vunpack.c.0.s8 %v1044_v58  ;;  %v1287_v27 = vpack.c.bf16 %v974_v59, %v973_v10  ;;  %v1005_v46 = vpack.c.bf16 %v981_v8, %v981_v8  ;;  %v1008_v61 = vpack.c.bf16 %v984_v50, %v984_v50 }
  0x95   :  { %v1288_v34 = vpack.c.bf16 %v977_v51, %v976_v35  ;;  %v1289_v15 = vpack.c.bf16 %v980_v28, %v979_v60  ;;  %v1011_v9 = vpack.c.bf16 %v987_v3, %v987_v3  ;;  %v1014_v39 = vpack.c.bf16 %v990_v53, %v990_v53 }
  0x96   :  { %v1048_v52 = vsub.s32 %v1045_v7, %v1047_v32  ;;  %v1290_v19 = vpack.c.bf16 %v983_v23, %v982_v21  ;;  %v1017_v44 = vpack.c.bf16 %v993_v49, %v993_v49  ;;  %v1291_v5 = vpack.c.bf16 %v986_v11, %v985_v42 }
  0x97   :  { %v1292_v33 = vpack.c.bf16 %v989_v54, %v988_v29  ;;  %v1293_v63 = vpack.c.bf16 %v992_v6, %v991_v25 }
  0x98   :  { %v1049_v1 = vrot.slane %v1286_v31, %v1048_v52  ;;  %v1056_v56 = vrot.slane %v996_v45, %v1048_v52  ;;  %v1065_v30 = vrot.slane %v1287_v27, %v1048_v52  ;;  %v1072_v36 = vrot.slane %v999_v12, %v1048_v52 }
  0x99   :  { %v1081_v41 = vrot.slane %v1288_v34, %v1048_v52  ;;  %v1088_v48 = vrot.slane %v1002_v37, %v1048_v52  ;;  %v1097_v17 = vrot.slane %v1289_v15, %v1048_v52  ;;  %v1104_v10 = vrot.slane %v1005_v46, %v1048_v52 }
  0x9a   :  { %v1057_v59 = vcombine.low %v1049_v1, %v1056_v56  ;;  %v1073_v8 = vcombine.low %v1065_v30, %v1072_v36  ;;  %v1113_v35 = vrot.slane %v1290_v19, %v1048_v52  ;;  %v1120_v51 = vrot.slane %v1008_v61, %v1048_v52 }
  0x9b   :  { %v1089_v60 = vcombine.low %v1081_v41, %v1088_v48  ;;  %v1105_v28 = vcombine.low %v1097_v17, %v1104_v10  ;;  %v1129_v50 = vrot.slane %v1291_v5, %v1048_v52  ;;  %v1136_v21 = vrot.slane %v1011_v9, %v1048_v52 }
  0x9c   :  { %v1121_v23 = vcombine.low %v1113_v35, %v1120_v51  ;;  %v1145_v42 = vrot.slane %v1292_v33, %v1048_v52  ;;  %v1152_v11 = vrot.slane %v1014_v39, %v1048_v52  ;;  %v1161_v3 = vrot.slane %v1293_v63, %v1048_v52  ;;  %1178 = vst [vmem:[%s2587_s1] sm:$0x3f] %v1057_v59 }
  0x9d   :  { %1179 = vst [vmem:[%s2587_s1 + $0x6] sm:$0x3f] %v1073_v8  ;;  %v1137_v38 = vcombine.low %v1129_v50, %v1136_v21  ;;  %v1168_v29 = vrot.slane %v1017_v44, %v1048_v52  ;;  %1180 = vst [vmem:[%s2587_s1 + $0xc] sm:$0x3f] %v1089_v60 }
  0x9e   :  { %1181 = vst [vmem:[%s2587_s1 + $0x12] sm:$0x3f] %v1105_v28  ;;  %v1153_v13 = vcombine.low %v1145_v42, %v1152_v11  ;;  %1182 = vst [vmem:[%s2587_s1 + $0x18] sm:$0x3f] %v1121_v23 }
  0x9f   :  { %v1169_v24 = vcombine.low %v1161_v3, %v1168_v29  ;;  %1183 = vst [vmem:[%s2587_s1 + $0x1e] sm:$0x3f] %v1137_v38 }
  0xa0   :  { %1184 = vst [vmem:[%s2587_s1 + $0x24] sm:$0x3f] %v1153_v13 }
  0xa1   :  { %1185 = vst [vmem:[%s2587_s1 + $0x2a] sm:$0x3f] %v1169_v24 }

// kernel: inception_net_forward.29
= control target key start
LH: loop header
LB: loop body
LE: loop exit
PB: predicated region body
PF: predicated region fallthrough
CT: control target
= control target key end

     0   :  { %v817_v0 = vmov 0.0   ;;  %vm818_vm0 = vmmov 0   ;;  %v160_v14 = vlaneseq  ;;  %vm408_vm1 = vcmask 1041409   ;;  %s1065_s1 = inlined_call_operand.vmem [shape: bf16[384,128], index: 1, kind: input, shape index: {}]   ;;  %s1066_s0 = inlined_call_operand.vmem [shape: bf16[8,2,2,384], index: 0, kind: input, shape index: {}]   ;;  %s1067_s2 = inlined_call_operand.vmem [shape: f32[1,128], index: 2, kind: input, shape index: {}]   ;;  %s1068_s3 = inlined_call_operand.vmem [shape: f32[8,128], index: 3, kind: output, shape index: {}]  }
   0x1   :  { %771 = vmatprep.subr.bf16.mxu1 %v817_v0  ;;  %v793_v1 = vld [vmem:[%s1065_s1 + $0x78] sm:$0xff]   ;;  %787 = vmatprep.mubr.msk.bf16.mxu1 %vm818_vm0, %v817_v0  ;;  %v796_v4 = vld [vmem:[%s1065_s1 + $0x70] sm:$0xff]   ;;  %v799_v7 = vld [vmem:[%s1065_s1 + $0x68] sm:$0xff]   ;;  %vm411_vm2 = vcmask 1042434   ;;  %vm414_vm3 = vcmask 1043459   ;;  %vm417_vm4 = vcmask 1044484  }
   0x2   :  { %v794_v2 = vld [vmem:[%s1065_s1 + $0xb8] sm:$0xff]   ;;  %740 = vmatprep.subr.bf16.mxu0 %v793_v1  ;;  %v797_v5 = vld [vmem:[%s1065_s1 + $0xb0] sm:$0xff]   ;;  %v800_v8 = vld [vmem:[%s1065_s1 + $0xa8] sm:$0xff]   ;;  %v161_v18 = vshrl.u32 %v160_v14, 7  ;;  %vm420_vm5 = vcmask 1045509   ;;  %vm423_vm6 = vcmask 1046534  }
   0x3   :  { %v795_v3 = vld [vmem:[%s1065_s1 + $0x38] sm:$0xff]   ;;  %772 = vmatpush3.bf16.msra.mxu1 %v794_v2  ;;  %v798_v6 = vld [vmem:[%s1065_s1 + $0x30] sm:$0xff]   ;;  %v801_v9 = vld [vmem:[%s1065_s1 + $0x28] sm:$0xff]   ;;  %vm426_vm7 = vcmask 1047559  }
   0x4   :  { %741 = vmatpush3.bf16.msra.mxu0 %v795_v3  ;;  %773 = vmatprep.subr.bf16.mxu1 %v817_v0  ;;  %v802_v10 = vld [vmem:[%s1065_s1 + $0x60] sm:$0xff]   ;;  %v805_v13 = vld [vmem:[%s1065_s1 + $0x58] sm:$0xff]   ;;  %v808_v17 = vld [vmem:[%s1065_s1 + $0x50] sm:$0xff]   ;;  %v906_v23 = vsub.s32 2, %v161_v18  ;;  %v911_v25 = vsub.s32 4, %v161_v18  ;;  %v916_v27 = vsub.s32 0, %v161_v18 }
   0x5   :  { %742 = vmatprep.subr.bf16.mxu0 %v796_v4  ;;  %v803_v11 = vld [vmem:[%s1065_s1 + $0xa0] sm:$0xff]   ;;  %v806_v15 = vld [vmem:[%s1065_s1 + $0x98] sm:$0xff]   ;;  %v809_v19 = vld [vmem:[%s1065_s1 + $0x90] sm:$0xff]  }
   0x6   :  { %v804_v12 = vld [vmem:[%s1065_s1 + $0x20] sm:$0xff]   ;;  %v807_v16 = vld [vmem:[%s1065_s1 + $0x18] sm:$0xff]   ;;  %v810_v20 = vld [vmem:[%s1065_s1 + $0x10] sm:$0xff]  }
   0x7   :  { %774 = vmatpush3.bf16.msra.mxu1 %v797_v5  ;;  %v811_v21 = vld [vmem:[%s1065_s1 + $0x48] sm:$0xff]   ;;  %v814_v26 = vld [vmem:[%s1065_s1 + $0x40] sm:$0xff]   ;;  %v18_v32 = vld [vmem:[%s1066_s0 + $0x12] sm:$0x7] }
   0x8   :  { %743 = vmatpush3.bf16.msra.mxu0 %v798_v6  ;;  %775 = vmatprep.subr.bf16.mxu1 %v817_v0  ;;  %v812_v22 = vld [vmem:[%s1065_s1 + $0x88] sm:$0xff]   ;;  %v15_v28 = vld [vmem:[%s1066_s0] sm:$0x7]  ;;  %v19_v33 = vld [vmem:[%s1066_s0 + $0x18] sm:$0x7]  ;;  %v26_v41 = vunpack.c.l.bf16 %v18_v32 }
   0x9   :  { %744 = vmatprep.subr.bf16.mxu0 %v799_v7  ;;  %v813_v24 = vld [vmem:[%s1065_s1 + $0x8] sm:$0xff]   ;;  %v815_v31 = vld [vmem:[%s1065_s1 + $0x80] sm:$0xff]   ;;  %v23_v35 = vunpack.c.l.bf16 %v15_v28  ;;  %v27_v42 = vunpack.c.l.bf16 %v19_v33  ;;  %v702_v55 = vld [vmem:[%s1066_s0 + $0x15] sm:$0x7] }
   0xa   :  { %v16_v29 = vld [vmem:[%s1066_s0 + $0x6] sm:$0x7]  ;;  %v17_v30 = vld [vmem:[%s1066_s0 + $0xc] sm:$0x7]  ;;  %v20_v34 = vld [vmem:[%s1066_s0 + $0x1e] sm:$0x7] }
   0xb   :  { %776 = vmatpush3.bf16.msra.mxu1 %v800_v8  ;;  %v24_v36 = vunpack.c.l.bf16 %v16_v29  ;;  %v25_v37 = vunpack.c.l.bf16 %v17_v30  ;;  %v816_v38 = vld [vmem:[%s1065_s1] sm:$0xff]   ;;  %v22_v40 = vld [vmem:[%s1066_s0 + $0x2a] sm:$0x7]  ;;  %v28_v43 = vunpack.c.l.bf16 %v20_v34  ;;  %v691_v47 = vrot.slane %v23_v35, 9  ;;  %v701_v50 = vld [vmem:[%s1066_s0 + $0xf] sm:$0x7] }
   0xc   :  { %745 = vmatpush3.bf16.msra.mxu0 %v801_v9  ;;  %777 = vmatprep.subr.bf16.mxu1 %v817_v0  ;;  %v21_v39 = vld [vmem:[%s1066_s0 + $0x24] sm:$0x7]  ;;  %v30_v46 = vunpack.c.l.bf16 %v22_v40  ;;  %v700_v49 = vld [vmem:[%s1066_s0 + $0x9] sm:$0x7]  ;;  %v694_v52 = vrot.slane %v26_v41, 9  ;;  %v695_v53 = vrot.slane %v27_v42, 9  ;;  %v90_v8 = vunpack.c.l.bf16 %v701_v50 }
   0xd   :  { %746 = vmatprep.subr.bf16.mxu0 %v802_v10  ;;  %v699_v44 = vld [vmem:[%s1066_s0 + $0x3] sm:$0x7]  ;;  %v29_v45 = vunpack.c.l.bf16 %v21_v39  ;;  %v692_v48 = vrot.slane %v24_v36, 9  ;;  %v693_v51 = vrot.slane %v25_v37, 9  ;;  %v696_v54 = vrot.slane %v28_v43, 9 }
   0xe   :  { %v698_v57 = vrot.slane %v30_v46, 9  ;;  %v71_v58 = vadd.f32 %v691_v47, %v23_v35  ;;  %v703_v60 = vld [vmem:[%s1066_s0 + $0x1b] sm:$0x7]  ;;  %v704_v61 = vld [vmem:[%s1066_s0 + $0x21] sm:$0x7]  ;;  %v74_v63 = vadd.f32 %v694_v52, %v26_v41  ;;  %v88_v6 = vunpack.c.l.bf16 %v699_v44 }
   0xf   :  { %778 = vmatpush3.bf16.msra.mxu1 %v803_v11  ;;  %v697_v56 = vrot.slane %v29_v45, 9  ;;  %v72_v59 = vadd.f32 %v692_v48, %v24_v36  ;;  %v73_v62 = vadd.f32 %v693_v51, %v25_v37  ;;  %v76_v1 = vadd.f32 %v696_v54, %v28_v43  ;;  %v705_v2 = vld [vmem:[%s1066_s0 + $0x27] sm:$0x7]  ;;  %v706_v3 = vld [vmem:[%s1066_s0 + $0x2d] sm:$0x7] }
  0x10   :  { %747 = vmatpush3.bf16.msra.mxu0 %v804_v12  ;;  %779 = vmatprep.subr.bf16.mxu1 %v817_v0  ;;  %v78_v5 = vadd.f32 %v698_v57, %v30_v46  ;;  %v89_v7 = vunpack.c.l.bf16 %v700_v49  ;;  %v91_v9 = vunpack.c.l.bf16 %v702_v55  ;;  %v92_v10 = vunpack.c.l.bf16 %v703_v60 }
  0x11   :  { %748 = vmatprep.subr.bf16.mxu0 %v805_v13  ;;  %v77_v4 = vadd.f32 %v697_v56, %v29_v45  ;;  %v93_v11 = vunpack.c.l.bf16 %v704_v61  ;;  %v94_v12 = vunpack.c.l.bf16 %v705_v2  ;;  %v95_v13 = vunpack.c.l.bf16 %v706_v3 }
  0x12   :  { %v96_v14 = vadd.f32 %v88_v6, %v71_v58  ;;  %v710_v28 = vrot.slane %v91_v9, 9  ;;  %v711_v29 = vrot.slane %v92_v10, 9 }
  0x13   :  { %780 = vmatpush3.bf16.msra.mxu1 %v806_v15  ;;  %v97_v15 = vadd.f32 %v89_v7, %v72_v59  ;;  %v712_v30 = vrot.slane %v93_v11, 9  ;;  %v714_v32 = vrot.slane %v95_v13, 9 }
  0x14   :  { %749 = vmatpush3.bf16.msra.mxu0 %v807_v16  ;;  %781 = vmatprep.subr.bf16.mxu1 %v817_v0  ;;  %v98_v16 = vadd.f32 %v90_v8, %v73_v62 }
  0x15   :  { %750 = vmatprep.subr.bf16.mxu0 %v808_v17  ;;  %v99_v17 = vadd.f32 %v91_v9, %v74_v63 }
  0x17   :  { %782 = vmatpush3.bf16.msra.mxu1 %v809_v19  ;;  %v101_v19 = vadd.f32 %v93_v11, %v76_v1  ;;  %v139_v36 = vadd.f32 %v710_v28, %v99_v17 }
  0x18   :  { %751 = vmatpush3.bf16.msra.mxu0 %v810_v20  ;;  %783 = vmatprep.subr.bf16.mxu1 %v817_v0  ;;  %v102_v20 = vadd.f32 %v94_v12, %v77_v4 }
  0x19   :  { %752 = vmatprep.subr.bf16.mxu0 %v811_v21  ;;  %v103_v21 = vadd.f32 %v95_v13, %v78_v5  ;;  %v980_v44 = vmul.f32 0.25, %v139_v36 }
  0x1b   :  { %784 = vmatpush3.bf16.msra.mxu1 %v812_v22  ;;  %v707_v22 = vrot.slane %v88_v6, 9  ;;  %v143_v40 = vadd.f32 %v714_v32, %v103_v21  ;;  %v203_v52 = vrot.slane %v980_v44, %v906_v23 }
  0x1c   :  { %753 = vmatpush3.bf16.msra.mxu0 %v813_v24  ;;  %785 = vmatprep.subr.bf16.mxu1 %v817_v0  ;;  %v75_v0 = vadd.f32 %v695_v53, %v27_v42  ;;  %v708_v24 = vrot.slane %v89_v7, 9 }
  0x1d   :  { %754 = vmatprep.subr.bf16.mxu0 %v814_v26  ;;  %v709_v26 = vrot.slane %v90_v8, 9  ;;  %v136_v33 = vadd.f32 %v707_v22, %v96_v14  ;;  %v988_v48 = vmul.f32 0.25, %v143_v40  ;;  %v290_v60 = vpack.c.bf16 %v203_v52, %v203_v52 }
  0x1e   :  { %v100_v18 = vadd.f32 %v92_v10, %v75_v0  ;;  %v137_v34 = vadd.f32 %v708_v24, %v97_v15 }
  0x1f   :  { %786 = vmatpush3.bf16.msra.mxu1 %v815_v31  ;;  %v713_v31 = vrot.slane %v94_v12, 9  ;;  %v138_v35 = vadd.f32 %v709_v26, %v98_v16  ;;  %v974_v41 = vmul.f32 0.25, %v136_v33  ;;  %v251_v56 = vrot.slane %v988_v48, %v906_v23 }
  0x20   :  { %755 = vmatpush3.bf16.msra.mxu0 %v816_v38  ;;  %v140_v37 = vadd.f32 %v711_v29, %v100_v18  ;;  %v141_v38 = vadd.f32 %v712_v30, %v101_v19  ;;  %v976_v42 = vmul.f32 0.25, %v137_v34  ;;  %v393_v4 = vunpack.c.l.b16 %v290_v60 }
  0x21   :  { %v142_v39 = vadd.f32 %v713_v31, %v102_v20  ;;  %v978_v43 = vmul.f32 0.25, %v138_v35  ;;  %v167_v49 = vrot.slane %v974_v41, %v906_v23  ;;  %v302_v0 = vpack.c.bf16 %v251_v56, %v251_v56 }
  0x22   :  { %v982_v45 = vmul.f32 0.25, %v140_v37  ;;  %v984_v46 = vmul.f32 0.25, %v141_v38  ;;  %v179_v50 = vrot.slane %v976_v42, %v906_v23  ;;  %v432_v11 = vrot.slane %v393_v4, 5 }
  0x23   :  { %v986_v47 = vmul.f32 0.25, %v142_v39  ;;  %v191_v51 = vrot.slane %v978_v43, %v906_v23  ;;  %v281_v57 = vpack.c.bf16 %v167_v49, %v167_v49  ;;  %v405_v8 = vunpack.c.l.b16 %v302_v0 }
  0x24   :  { %v215_v53 = vrot.slane %v982_v45, %v906_v23  ;;  %v227_v54 = vrot.slane %v984_v46, %v906_v23  ;;  %v284_v58 = vpack.c.bf16 %v179_v50, %v179_v50  ;;  %v183_v17 = vrot.slane %v976_v42, %v911_v25 }
  0x25   :  { %v239_v55 = vrot.slane %v986_v47, %v906_v23  ;;  %v287_v59 = vpack.c.bf16 %v191_v51, %v191_v51  ;;  %v384_v1 = vunpack.c.l.b16 %v281_v57  ;;  %v171_v23 = vrot.slane %v974_v41, %v911_v25 }
  0x26   :  { %v293_v61 = vpack.c.bf16 %v215_v53, %v215_v53  ;;  %v296_v62 = vpack.c.bf16 %v227_v54, %v227_v54  ;;  %v387_v2 = vunpack.c.l.b16 %v284_v58  ;;  %v440_v16 = vrot.slane %v405_v8, 1 }
  0x27   :  { %v299_v63 = vpack.c.bf16 %v239_v55, %v239_v55  ;;  %v390_v3 = vunpack.c.l.b16 %v287_v59  ;;  %v195_v19 = vrot.slane %v978_v43, %v911_v25  ;;  %v207_v20 = vrot.slane %v980_v44, %v911_v25 }
  0x28   :  { %v396_v5 = vunpack.c.l.b16 %v293_v61  ;;  %v399_v6 = vunpack.c.l.b16 %v296_v62  ;;  %v428_v9 = vrot.slane %v387_v2, 7  ;;  %v219_v21 = vrot.slane %v982_v45, %v911_v25 }
  0x29   :  { %v402_v7 = vunpack.c.l.b16 %v299_v63  ;;  %v430_v10 = vrot.slane %v390_v3, 6  ;;  %v231_v24 = vrot.slane %v984_v46, %v911_v25  ;;  %v243_v26 = vrot.slane %v986_v47, %v911_v25 }
  0x2a   :  { %v434_v12 = vrot.slane %v396_v5, 4  ;;  %v436_v13 = vrot.slane %v399_v6, 3  ;;  %v429_v14 = vsel %vm408_vm1, %v428_v9, %v384_v1  ;;  %v255_v28 = vrot.slane %v988_v48, %v911_v25 }
  0x2b   :  { %v438_v15 = vrot.slane %v402_v7, 2  ;;  %v431_v18 = vsel %vm411_vm2, %v430_v10, %v429_v14  ;;  %v282_v30 = vpack.c.bf16 %v171_v23, %v171_v23  ;;  %v285_v31 = vpack.c.bf16 %v183_v17, %v183_v17 }
  0x2c   :  { %v433_v22 = vsel %vm414_vm3, %v432_v11, %v431_v18  ;;  %v288_v32 = vpack.c.bf16 %v195_v19, %v195_v19  ;;  %v291_v34 = vpack.c.bf16 %v207_v20, %v207_v20  ;;  %v294_v35 = vpack.c.bf16 %v219_v21, %v219_v21 }
  0x2d   :  { %v435_v29 = vsel %vm417_vm4, %v434_v12, %v433_v22  ;;  %v297_v36 = vpack.c.bf16 %v231_v24, %v231_v24  ;;  %v300_v38 = vpack.c.bf16 %v243_v26, %v243_v26  ;;  %v303_v39 = vpack.c.bf16 %v255_v28, %v255_v28 }
  0x2e   :  { %v437_v33 = vsel %vm420_vm5, %v436_v13, %v435_v29  ;;  %v385_v40 = vunpack.c.l.b16 %v282_v30  ;;  %v388_v50 = vunpack.c.l.b16 %v285_v31  ;;  %v391_v51 = vunpack.c.l.b16 %v288_v32 }
  0x2f   :  { %v439_v37 = vsel %vm423_vm6, %v438_v15, %v437_v33  ;;  %v394_v25 = vunpack.c.l.b16 %v291_v34  ;;  %v397_v53 = vunpack.c.l.b16 %v294_v35  ;;  %v400_v54 = vunpack.c.l.b16 %v297_v36 }
  0x30   :  { %v441_v49 = vsel %vm426_vm7, %v440_v16, %v439_v37  ;;  %v403_v55 = vunpack.c.l.b16 %v300_v38  ;;  %v406_v56 = vunpack.c.l.b16 %v303_v39  ;;  %v442_v57 = vrot.slane %v388_v50, 7 }
  0x31   :  { %v457_v52 = vpack.c.b16 %v441_v49, %v441_v49  ;;  %v444_v58 = vrot.slane %v391_v51, 6  ;;  %v446_v59 = vrot.slane %v394_v25, 5  ;;  %v448_v60 = vrot.slane %v397_v53, 4 }
  0x32   :  { %v450_v61 = vrot.slane %v400_v54, 3  ;;  %v452_v62 = vrot.slane %v403_v55, 2  ;;  %v163_v63 = vrot.slane %v974_v41, %v916_v27  ;;  %v443_v0 = vsel %vm408_vm1, %v442_v57, %v385_v40 }
  0x33   :  { %638 = vmatprep.mubr.bf16.mxu0 %v457_v52  ;;  %v454_v1 = vrot.slane %v406_v56, 1  ;;  %v175_v2 = vrot.slane %v976_v42, %v916_v27  ;;  %v187_v3 = vrot.slane %v978_v43, %v916_v27  ;;  %v445_v4 = vsel %vm411_vm2, %v444_v58, %v443_v0  ;;  %v715_v52 = vld [vmem:[%s1067_s2] ss:$0 sm:$0xff] }
  0x34   :  { %v199_v5 = vrot.slane %v980_v44, %v916_v27  ;;  %v211_v6 = vrot.slane %v982_v45, %v916_v27  ;;  %v223_v41 = vrot.slane %v984_v46, %v916_v27  ;;  %v447_v7 = vsel %vm414_vm3, %v446_v59, %v445_v4 }
  0x35   :  { %v235_v8 = vrot.slane %v986_v47, %v916_v27  ;;  %v247_v42 = vrot.slane %v988_v48, %v916_v27  ;;  %v280_v43 = vpack.c.bf16 %v163_v63, %v163_v63  ;;  %v449_v9 = vsel %vm417_vm4, %v448_v60, %v447_v7 }
  0x36   :  { %v283_v23 = vpack.c.bf16 %v175_v2, %v175_v2  ;;  %v286_v10 = vpack.c.bf16 %v187_v3, %v187_v3  ;;  %v289_v44 = vpack.c.bf16 %v199_v5, %v199_v5  ;;  %v451_v11 = vsel %vm420_vm5, %v450_v61, %v449_v9 }
  0x37   :  { %v292_v45 = vpack.c.bf16 %v211_v6, %v211_v6  ;;  %v295_v12 = vpack.c.bf16 %v223_v41, %v223_v41  ;;  %v298_v13 = vpack.c.bf16 %v235_v8, %v235_v8  ;;  %v453_v46 = vsel %vm423_vm6, %v452_v62, %v451_v11 }
  0x38   :  { %v301_v14 = vpack.c.bf16 %v247_v42, %v247_v42  ;;  %v383_v15 = vunpack.c.l.b16 %v280_v43  ;;  %v386_v16 = vunpack.c.l.b16 %v283_v23  ;;  %v455_v47 = vsel %vm426_vm7, %v454_v1, %v453_v46 }
  0x39   :  { %v389_v17 = vunpack.c.l.b16 %v286_v10  ;;  %v392_v27 = vunpack.c.l.b16 %v289_v44  ;;  %v395_v48 = vunpack.c.l.b16 %v292_v45  ;;  %v458_v18 = vpack.c.b16 %v455_v47, %v455_v47 }
  0x3a   :  { %v398_v19 = vunpack.c.l.b16 %v295_v12  ;;  %v401_v20 = vunpack.c.l.b16 %v298_v13  ;;  %v404_v21 = vunpack.c.l.b16 %v301_v14  ;;  %v407_v22 = vrot.slane %v386_v16, 7 }
  0x3b   :  { %v410_v24 = vrot.slane %v389_v17, 6  ;;  %v413_v26 = vrot.slane %v392_v27, 5  ;;  %788 = vmatmul.mubr.bf16.vlgmr.msra.gmra.mxu1 %v458_v18  ;;  %v416_v28 = vrot.slane %v395_v48, 4 }
  0x3c   :  { %v409_v29 = vsel %vm408_vm1, %v407_v22, %v383_v15  ;;  %v419_v30 = vrot.slane %v398_v19, 3  ;;  %v422_v32 = vrot.slane %v401_v20, 2  ;;  %v425_v34 = vrot.slane %v404_v21, 1 }
  0x3d   :  { %v412_v31 = vsel %vm411_vm2, %v410_v24, %v409_v29 }
  0x3e   :  { %v415_v33 = vsel %vm414_vm3, %v413_v26, %v412_v31 }
  0x3f   :  { %v418_v35 = vsel %vm417_vm4, %v416_v28, %v415_v33 }
  0x40   :  { %v421_v36 = vsel %vm420_vm5, %v419_v30, %v418_v35 }
  0x41   :  { %v424_v37 = vsel %vm423_vm6, %v422_v32, %v421_v36 }
  0x42   :  { %v427_v38 = vsel %vm426_vm7, %v425_v34, %v424_v37 }
  0x43   :  { %v456_v39 = vpack.c.b16 %v427_v38, %v427_v38 }
  0x45   :  { %639 = vmatmul.mubr.bf16.vlgmr.msra.gmra.mxu0 %v456_v39 }
  0xfb   :  { %v680_v40 = vpop.f32.mrf.mxu1 }
  0xfd   :  { %v789_v49 = vpop.f32.mrf.mxu1 }
  0xff   :  { %v683_v50 = vpop.f32.mrf.mxu1 }
 0x101   :  { %v790_v51 = vpop.f32.mrf.mxu1 }
 0x105   :  { %v756_v25 = vpop.f32.mrf.mxu0 }
 0x107   :  { %v757_v53 = vpop.f32.mrf.mxu0 }
 0x108   :  { %v758_v54 = vadd.f32 %v757_v53, %v756_v25 }
 0x109   :  { %v759_v55 = vpop.f32.mrf.mxu0 }
 0x10a   :  { %v641_v56 = vadd.f32 %v758_v54, %v715_v52 }
 0x10b   :  { %v760_v57 = vpop.f32.mrf.mxu0 }
 0x10c   :  { %v681_v58 = vadd.f32 %v680_v40, %v641_v56 }
 0x10e   :  { %686 = vst [vmem:[%s1068_s3] sm:$0xff] %v681_v58 }

</bundles_post_ra>
